<compile_context>
chip_gen: v7x
topology: tpu7x:2x2x1
jax: 0.10.0
libtpu: 0.0.40
codegen_flags: <defaults>
</compile_context>

<pallas_src>
import functools
import math

import jax
import jax.numpy as jnp
import numpy as np
from jax.experimental import pallas as pl
from jax.experimental.pallas import tpu as pltpu


# ----------------------------------------------------------------------------
# In-kernel helpers
# ----------------------------------------------------------------------------
def _conv3x3_im2col(pad_ref, im_ref, w_ref, b_ref, H, W, Cin):
    """3x3 'same' conv as ONE K=9*Cin MXU matmul via im2col staging in VMEM.

    pad_ref: (H+2, W+2, >=Cin) zero-haloed input (only lanes [0, Cin) are read).
    im_ref:  (>=H*W, >=9*Cin) staging scratch.
    w_ref:   (9*Cin, Cout) im2col weights, b_ref: (1, Cout).
    Returns (H*W, Cout) f32 (row = y*W + x).
    """
    HW = H * W
    k = 0
    for dy in range(3):
        for dx in range(3):
            patch = pad_ref[pl.ds(dy, H), pl.ds(dx, W), pl.ds(0, Cin)].reshape(HW, Cin)
            im_ref[pl.ds(0, HW), pl.ds(k * Cin, Cin)] = patch
            k += 1
    patches = im_ref[pl.ds(0, HW), pl.ds(0, 9 * Cin)]
    return jnp.dot(patches, w_ref[...], preferred_element_type=jnp.float32) + b_ref[...]


def _conv_block_and_wpool(pad_ref, im_ref, pf_ref, wa_ref, ba_ref, wb_ref, bb_ref,
                          H, W, Cin, C, leaky_first):
    """conv3x3 -> act -> conv3x3 -> ReLU -> maxpool along W (the H-pool is done by the caller).

    Returns wp of shape (H * W//2, C) with flat row = y * (W//2) + j.
    """
    HW = H * W
    a = _conv3x3_im2col(pad_ref, im_ref, wa_ref, ba_ref, H, W, Cin)
    if leaky_first:
        h = jnp.where(a > 0, a, 0.01 * a)          # LeakyReLU(0.01) (torch default slope)
    else:
        h = jnp.maximum(a, 0.0)                    # ReLU
    # conv B reads from the same padded scratch; the halo stays zero (only interior written).
    pad_ref[pl.ds(1, H), pl.ds(1, W), :] = h.reshape(H, W, C)
    b = _conv3x3_im2col(pad_ref, im_ref, wb_ref, bb_ref, H, W, C)
    h2 = jnp.maximum(b, 0.0)
    # maxpool along W: flat rows are y*W + x, so (even x, odd x) are stride-2 row pairs.
    pf_ref[pl.ds(0, HW), :] = h2
    wp = jnp.maximum(pf_ref[pl.ds(0, HW // 2, 2), :],
                     pf_ref[pl.ds(1, HW // 2, 2), :])
    return wp


def _hpool(pw_ref, wp, H, W2, C):
    """maxpool along H of a W-pooled (H*W2, C) map -> (H//2, W2, C)."""
    H2 = H // 2
    pw_ref[pl.ds(0, H), pl.ds(0, W2), :] = wp.reshape(H, W2, C)
    return jnp.maximum(pw_ref[pl.ds(0, H2, 2), pl.ds(0, W2), :],
                       pw_ref[pl.ds(1, H2, 2), pl.ds(0, W2), :])


# ----------------------------------------------------------------------------
# Fully fused kernel: 3 conv stages + dense head, one batch element per grid step
# ----------------------------------------------------------------------------
def _rmm_fused_kernel(x_ref, w1_ref, b1_ref, w2_ref, b2_ref, w3_ref, b3_ref,
                      w4_ref, b4_ref, w5_ref, b5_ref, w6_ref, b6_ref,
                      wd_ref, bd_ref, wo_ref, bo_ref, o_ref,
                      pad1, pad2, pad3, im, pf, pw, *, H, W, Cin, C):
    H2, W2 = H // 2, W // 2
    H4, W4 = H // 4, W // 4
    H8, W8 = H // 8, W // 8

    # Fresh zero halos every grid step -> each step is self-contained, so the batch grid axis
    # can be "parallel" (v7x megacore) without cross-iteration scratch dependencies.
    pad1[...] = jnp.zeros_like(pad1)
    pad2[...] = jnp.zeros_like(pad2)
    pad3[...] = jnp.zeros_like(pad3)

    # ---- stage 1: conv -> ReLU -> conv -> ReLU -> maxpool2x2 ----
    pad1[pl.ds(1, H), pl.ds(1, W), pl.ds(0, Cin)] = x_ref[0]
    wp1 = _conv_block_and_wpool(pad1, im, pf, w1_ref, b1_ref, w2_ref, b2_ref,
                                H, W, Cin, C, leaky_first=False)
    p1 = _hpool(pw, wp1, H, W2, C)                      # (H2, W2, C)

    # ---- stage 2: conv -> LeakyReLU -> conv -> ReLU -> maxpool2x2 ----
    pad2[pl.ds(1, H2), pl.ds(1, W2), :] = p1
    wp2 = _conv_block_and_wpool(pad2, im, pf, w3_ref, b3_ref, w4_ref, b4_ref,
                                H2, W2, C, C, leaky_first=True)
    p2 = _hpool(pw, wp2, H2, W4, C)                     # (H4, W4, C)

    # ---- stage 3: conv -> LeakyReLU -> conv -> ReLU -> maxpool2x2 (H-pool fused into dense) ----
    pad3[pl.ds(1, H4), pl.ds(1, W4), :] = p2
    wp3 = _conv_block_and_wpool(pad3, im, pf, w5_ref, b5_ref, w6_ref, b6_ref,
                                H4, W4, C, C, leaky_first=True)
    # wp3: (H4 * W8, C), flat row = y * W8 + j

    # ---- dense head: Linear(F+3 -> hidden) -> Linear(hidden -> H*W) ----
    # Boundary features [10, 10, 1] are pre-folded into bd (dropout is identity in eval mode).
    # TODO(synk): nn.Dropout(p=0.5) training-mode mask not implemented (eval-mode identity).
    hd = bd_ref[...]                                    # (1, hidden) f32 accumulator
    for yp in range(H8):
        for j in range(W8):
            r_out = yp * W8 + j
            ra = (2 * yp) * W8 + j
            rb = (2 * yp + 1) * W8 + j
            row = jnp.maximum(wp3[ra:ra + 1, :], wp3[rb:rb + 1, :])   # 2x2-pooled (1, C)
            hd = hd + jnp.dot(row.astype(jnp.bfloat16),
                              wd_ref[pl.ds(r_out * C, C), :],
                              preferred_element_type=jnp.float32)
    out = jnp.dot(hd.astype(jnp.bfloat16), wo_ref[...],
                  preferred_element_type=jnp.float32) + bo_ref[...]
    o_ref[0] = out.astype(o_ref.dtype)                  # lane-dense (1, H*W) store


# ----------------------------------------------------------------------------
# Wrapper
# ----------------------------------------------------------------------------
def rmm_nn_4_forward(x_nchw, pp):
    B, Cin, H, W = x_nchw.shape
    assert H % 8 == 0 and W % 8 == 0
    C = 16
    hidden = pp["wd"].shape[1]
    n_out = pp["wo"].shape[1]
    x = jnp.transpose(x_nchw, (0, 2, 3, 1)).astype(jnp.float32)     # NCHW -> NHWC (tiny, one-off)

    kernel = functools.partial(_rmm_fused_kernel, H=H, W=W, Cin=Cin, C=C)
    cm = lambda b: (0, 0)                                           # constant-index (resident) weights

    out3 = pl.pallas_call(
        kernel,
        out_shape=jax.ShapeDtypeStruct((B, 1, n_out), jnp.float32),
        grid=(B,),
        in_specs=[
            pl.BlockSpec((1, H, W, Cin), lambda b: (b, 0, 0, 0)),
            pl.BlockSpec((9 * Cin, C), cm), pl.BlockSpec((1, C), cm),
            pl.BlockSpec((9 * C, C), cm),   pl.BlockSpec((1, C), cm),
            pl.BlockSpec((9 * C, C), cm),   pl.BlockSpec((1, C), cm),
            pl.BlockSpec((9 * C, C), cm),   pl.BlockSpec((1, C), cm),
            pl.BlockSpec((9 * C, C), cm),   pl.BlockSpec((1, C), cm),
            pl.BlockSpec((9 * C, C), cm),   pl.BlockSpec((1, C), cm),
            pl.BlockSpec(((H // 8) * (W // 8) * C, hidden), cm),     # wd (permuted, bf16)
            pl.BlockSpec((1, hidden), cm),                           # bd (+ boundary fold, f32)
            pl.BlockSpec((hidden, n_out), cm),                       # wo (bf16)
            pl.BlockSpec((1, n_out), cm),                            # bo (f32)
        ],
        out_specs=pl.BlockSpec((1, 1, n_out), lambda b: (b, 0, 0)),
        scratch_shapes=[
            pltpu.VMEM((H + 2, W + 2, C), jnp.float32),              # stage-1 padded activations
            pltpu.VMEM((H // 2 + 2, W // 2 + 2, C), jnp.float32),    # stage-2 padded activations
            pltpu.VMEM((H // 4 + 2, W // 4 + 2, C), jnp.float32),    # stage-3 padded activations
            pltpu.VMEM((H * W, 9 * C), jnp.float32),                 # im2col staging (reused)
            pltpu.VMEM((H * W, C), jnp.float32),                     # W-pooling staging (reused)
            pltpu.VMEM((H, W // 2, C), jnp.float32),                 # H-pooling staging (reused)
        ],
        compiler_params=pltpu.CompilerParams(dimension_semantics=("parallel",)),
    )(x, pp["w1"], pp["b1"], pp["w2"], pp["b2"], pp["w3"], pp["b3"],
      pp["w4"], pp["b4"], pp["w5"], pp["b5"], pp["w6"], pp["b6"],
      pp["wd"], pp["bd"], pp["wo"], pp["bo"])
    return out3.reshape(B, n_out)


# ----------------------------------------------------------------------------
# One-time parameter preparation (im2col reshape, dense-row permutation, bias fold, bf16 cast)
# ----------------------------------------------------------------------------
def prepare_params(p, Hin, Win):
    C = 16
    H8, W8 = Hin // 8, Win // 8
    nf = C * H8 * W8
    pp = {}
    for i in range(1, 7):
        w = p[f"w{i}"]                                   # (3, 3, Cin_i, 16), HWIO
        pp[f"w{i}"] = w.reshape(-1, w.shape[-1])          # (9*Cin_i, 16): rows ordered (dy, dx, cin)
        pp[f"b{i}"] = p[f"b{i}"]
    wd = p["wd"]                                          # (nf + 3, hidden), torch NCHW feature order
    boundaries = jnp.array([[10.0, 10.0, 1.0]], jnp.float32)   # LeftBC, RightBC, DeltaT
    bd_eff = p["bd"] + boundaries @ wd[nf:nf + 3, :]      # fold constant boundary features into bias
    # Permute conv-feature rows from torch (c, y, x) flatten order to the kernel's (y, x, c) order.
    perm = np.array([c * (H8 * W8) + r for r in range(H8 * W8) for c in range(C)], np.int32)
    pp["wd"] = wd[:nf][perm].astype(jnp.bfloat16)
    pp["bd"] = bd_eff.astype(jnp.float32)
    pp["wo"] = p["wo"].astype(jnp.bfloat16)
    pp["bo"] = p["bo"]
    return pp


# ----------------------------------------------------------------------------
# Deterministic synthetic parameter init (torch-default-like uniform fan-in scaling)
# ----------------------------------------------------------------------------
def init_params(key, channels, Hin, Win):
    Cout = 16
    keys = jax.random.split(key, 16)

    def u(k, shape, fan_in):
        b = 1.0 / math.sqrt(fan_in)
        return jax.random.uniform(k, shape, jnp.float32, -b, b)

    p = {}
    p["w1"] = u(keys[0], (3, 3, channels, Cout), channels * 9)
    p["b1"] = u(keys[1], (1, Cout), channels * 9)
    for i, n in enumerate(["2", "3", "4", "5", "6"]):
        p["w" + n] = u(keys[2 + 2 * i], (3, 3, Cout, Cout), Cout * 9)
        p["b" + n] = u(keys[3 + 2 * i], (1, Cout), Cout * 9)
    F = Cout * (Hin // 8) * (Win // 8) + 3
    p["wd"] = u(keys[12], (F, 2000), F)
    p["bd"] = u(keys[13], (1, 2000), F)
    p["wo"] = u(keys[14], (2000, Hin * Win), 2000)
    p["bo"] = u(keys[15], (1, Hin * Win), 2000)
    return p


# ----------------------------------------------------------------------------
# Pure-JAX reference (f32, faithful to the torch module) for numerical check
# ----------------------------------------------------------------------------
def ref_forward(x_nchw, p):
    dn = ("NHWC", "HWIO", "NHWC")

    def conv(h, w, b):
        y = jax.lax.conv_general_dilated(h, w, (1, 1), ((1, 1), (1, 1)),
                                         dimension_numbers=dn)
        return y + b.reshape(1, 1, 1, -1)

    def pool(h):
        return jax.lax.reduce_window(h, -jnp.inf, jax.lax.max,
                                     (1, 2, 2, 1), (1, 2, 2, 1), "VALID")

    def leaky(h):
        return jnp.where(h > 0, h, 0.01 * h)

    B = x_nchw.shape[0]
    x = jnp.transpose(x_nchw, (0, 2, 3, 1)).astype(jnp.float32)
    h = jnp.maximum(conv(x, p["w1"], p["b1"]), 0.0)
    h = jnp.maximum(conv(h, p["w2"], p["b2"]), 0.0)
    h = pool(h)
    h = leaky(conv(h, p["w3"], p["b3"]))
    h = jnp.maximum(conv(h, p["w4"], p["b4"]), 0.0)
    h = pool(h)
    h = leaky(conv(h, p["w5"], p["b5"]))
    h = jnp.maximum(conv(h, p["w6"], p["b6"]), 0.0)
    h = pool(h)
    feat = jnp.transpose(h, (0, 3, 1, 2)).reshape(B, -1)
    feat = jnp.concatenate(
        [feat, jnp.broadcast_to(jnp.array([10.0, 10.0, 1.0], jnp.float32), (B, 3))], axis=1)
    hd = feat @ p["wd"] + p["bd"]
    return hd @ p["wo"] + p["bo"]


if __name__ == "__main__":
    # Small shapes consistent with the module: grid_size=[16, 16], channels=2, batch=2.
    B, C, Hin, Win = 2, 2, 16, 16
    key = jax.random.PRNGKey(0)
    kx, kp = jax.random.split(key)
    x = jax.random.normal(kx, (B, C, Hin, Win), jnp.float32)   # PyTorch-style NCHW input
    params = init_params(kp, C, Hin, Win)
    prepped = prepare_params(params, Hin, Win)

    fwd = jax.jit(rmm_nn_4_forward)
    out = jax.block_until_ready(fwd(x, prepped))
    ref = jax.block_until_ready(ref_forward(x, params))

    assert out.shape == (B, Hin * Win)
    np.testing.assert_allclose(np.asarray(out), np.asarray(ref), rtol=2e-2, atol=2e-2)
    print("KERNEL_OK")
</pallas_src>

<mosaic_0001>
module attributes {stable_mosaic.version = 11 : i64} {
  func.func @_rmm_fused_kernel(%arg0: i32, %arg1: memref<1x16x16x2xf32, #tpu.memory_space<vmem>>, %arg2: memref<18x16xf32, #tpu.memory_space<vmem>>, %arg3: memref<1x16xf32, #tpu.memory_space<vmem>>, %arg4: memref<144x16xf32, #tpu.memory_space<vmem>>, %arg5: memref<1x16xf32, #tpu.memory_space<vmem>>, %arg6: memref<144x16xf32, #tpu.memory_space<vmem>>, %arg7: memref<1x16xf32, #tpu.memory_space<vmem>>, %arg8: memref<144x16xf32, #tpu.memory_space<vmem>>, %arg9: memref<1x16xf32, #tpu.memory_space<vmem>>, %arg10: memref<144x16xf32, #tpu.memory_space<vmem>>, %arg11: memref<1x16xf32, #tpu.memory_space<vmem>>, %arg12: memref<144x16xf32, #tpu.memory_space<vmem>>, %arg13: memref<1x16xf32, #tpu.memory_space<vmem>>, %arg14: memref<64x2000xbf16, #tpu.memory_space<vmem>>, %arg15: memref<1x2000xf32, #tpu.memory_space<vmem>>, %arg16: memref<2000x256xbf16, #tpu.memory_space<vmem>>, %arg17: memref<1x256xf32, #tpu.memory_space<vmem>>, %arg18: memref<1x1x256xf32, #tpu.memory_space<vmem>>, %arg19: memref<18x18x16xf32, #tpu.memory_space<vmem>>, %arg20: memref<10x10x16xf32, #tpu.memory_space<vmem>>, %arg21: memref<6x6x16xf32, #tpu.memory_space<vmem>>, %arg22: memref<256x144xf32, #tpu.memory_space<vmem>>, %arg23: memref<256x16xf32, #tpu.memory_space<vmem>>, %arg24: memref<16x8x16xf32, #tpu.memory_space<vmem>>) attributes {dimension_semantics = [#tpu.dimension_semantics<parallel>], iteration_bounds = array<i64: 2>, scalar_prefetch = 0 : i64, scratch_operands = 6 : i64, tpu.core_type = #tpu.core_type<tc>, window_params = [{transform_indices = @transform_0, window_bounds = array<i64: 1, 16, 16, 2>}, {pipeline_mode = #tpu.pipeline_mode<synchronous>, transform_indices = @transform_1, window_bounds = array<i64: 18, 16>}, {pipeline_mode = #tpu.pipeline_mode<synchronous>, transform_indices = @transform_2, window_bounds = array<i64: 1, 16>}, {pipeline_mode = #tpu.pipeline_mode<synchronous>, transform_indices = @transform_3, window_bounds = array<i64: 144, 16>}, {pipeline_mode = #tpu.pipeline_mode<synchronous>, transform_indices = @transform_4, window_bounds = array<i64: 1, 16>}, {pipeline_mode = #tpu.pipeline_mode<synchronous>, transform_indices = @transform_5, window_bounds = array<i64: 144, 16>}, {pipeline_mode = #tpu.pipeline_mode<synchronous>, transform_indices = @transform_6, window_bounds = array<i64: 1, 16>}, {pipeline_mode = #tpu.pipeline_mode<synchronous>, transform_indices = @transform_7, window_bounds = array<i64: 144, 16>}, {pipeline_mode = #tpu.pipeline_mode<synchronous>, transform_indices = @transform_8, window_bounds = array<i64: 1, 16>}, {pipeline_mode = #tpu.pipeline_mode<synchronous>, transform_indices = @transform_9, window_bounds = array<i64: 144, 16>}, {pipeline_mode = #tpu.pipeline_mode<synchronous>, transform_indices = @transform_10, window_bounds = array<i64: 1, 16>}, {pipeline_mode = #tpu.pipeline_mode<synchronous>, transform_indices = @transform_11, window_bounds = array<i64: 144, 16>}, {pipeline_mode = #tpu.pipeline_mode<synchronous>, transform_indices = @transform_12, window_bounds = array<i64: 1, 16>}, {pipeline_mode = #tpu.pipeline_mode<synchronous>, transform_indices = @transform_13, window_bounds = array<i64: 64, 2000>}, {pipeline_mode = #tpu.pipeline_mode<synchronous>, transform_indices = @transform_14, window_bounds = array<i64: 1, 2000>}, {pipeline_mode = #tpu.pipeline_mode<synchronous>, transform_indices = @transform_15, window_bounds = array<i64: 2000, 256>}, {pipeline_mode = #tpu.pipeline_mode<synchronous>, transform_indices = @transform_16, window_bounds = array<i64: 1, 256>}, {transform_indices = @transform_17, window_bounds = array<i64: 1, 1, 256>}]} {
    %cst = arith.constant 0.000000e+00 : f32
    %0 = vector.broadcast %cst : f32 to vector<18x18x16xf32>
    %c0 = arith.constant 0 : index
    %c0_0 = arith.constant 0 : index
    %c0_1 = arith.constant 0 : index
    %1 = vector.load %arg19[%c0, %c0_0, %c0_1] : memref<18x18x16xf32, #tpu.memory_space<vmem>>, vector<18x18x16xf32>
    tpu.vector_store %arg19[%c0, %c0_0, %c0_1], %0 {strides = array<i32>} : memref<18x18x16xf32, #tpu.memory_space<vmem>>, vector<18x18x16xf32>,
    %cst_2 = arith.constant 0.000000e+00 : f32
    %2 = vector.broadcast %cst_2 : f32 to vector<10x10x16xf32>
    %c0_3 = arith.constant 0 : index
    %c0_4 = arith.constant 0 : index
    %c0_5 = arith.constant 0 : index
    %3 = vector.load %arg20[%c0_3, %c0_4, %c0_5] : memref<10x10x16xf32, #tpu.memory_space<vmem>>, vector<10x10x16xf32>
    tpu.vector_store %arg20[%c0_3, %c0_4, %c0_5], %2 {strides = array<i32>} : memref<10x10x16xf32, #tpu.memory_space<vmem>>, vector<10x10x16xf32>,
    %cst_6 = arith.constant 0.000000e+00 : f32
    %4 = vector.broadcast %cst_6 : f32 to vector<6x6x16xf32>
    %c0_7 = arith.constant 0 : index
    %c0_8 = arith.constant 0 : index
    %c0_9 = arith.constant 0 : index
    %5 = vector.load %arg21[%c0_7, %c0_8, %c0_9] : memref<6x6x16xf32, #tpu.memory_space<vmem>>, vector<6x6x16xf32>
    tpu.vector_store %arg21[%c0_7, %c0_8, %c0_9], %4 {strides = array<i32>} : memref<6x6x16xf32, #tpu.memory_space<vmem>>, vector<6x6x16xf32>,
    %c0_10 = arith.constant 0 : index
    %c0_11 = arith.constant 0 : index
    %c0_12 = arith.constant 0 : index
    %c0_13 = arith.constant 0 : index
    %6 = vector.load %arg1[%c0_10, %c0_11, %c0_12, %c0_13] : memref<1x16x16x2xf32, #tpu.memory_space<vmem>>, vector<1x16x16x2xf32>
    %7 = vector.shape_cast %6 : vector<1x16x16x2xf32> to vector<16x16x2xf32>
    %c1 = arith.constant 1 : index
    %c1_14 = arith.constant 1 : index
    %c0_15 = arith.constant 0 : index
    %8 = vector.load %arg19[%c1, %c1_14, %c0_15] : memref<18x18x16xf32, #tpu.memory_space<vmem>>, vector<16x16x2xf32>
    tpu.vector_store %arg19[%c1, %c1_14, %c0_15], %7 {strides = array<i32>} : memref<18x18x16xf32, #tpu.memory_space<vmem>>, vector<16x16x2xf32>,
    %c0_16 = arith.constant 0 : index
    %c0_17 = arith.constant 0 : index
    %c0_18 = arith.constant 0 : index
    %9 = vector.load %arg19[%c0_16, %c0_17, %c0_18] : memref<18x18x16xf32, #tpu.memory_space<vmem>>, vector<16x16x2xf32>
    %10 = vector.shape_cast %9 : vector<16x16x2xf32> to vector<256x2xf32>
    %c0_19 = arith.constant 0 : index
    %c0_20 = arith.constant 0 : index
    %11 = vector.load %arg22[%c0_19, %c0_20] : memref<256x144xf32, #tpu.memory_space<vmem>>, vector<256x2xf32>
    tpu.vector_store %arg22[%c0_19, %c0_20], %10 {strides = array<i32>} : memref<256x144xf32, #tpu.memory_space<vmem>>, vector<256x2xf32>,
    %c0_21 = arith.constant 0 : index
    %c1_22 = arith.constant 1 : index
    %c0_23 = arith.constant 0 : index
    %12 = vector.load %arg19[%c0_21, %c1_22, %c0_23] : memref<18x18x16xf32, #tpu.memory_space<vmem>>, vector<16x16x2xf32>
    %13 = vector.shape_cast %12 : vector<16x16x2xf32> to vector<256x2xf32>
    %c0_24 = arith.constant 0 : index
    %c2 = arith.constant 2 : index
    %14 = vector.load %arg22[%c0_24, %c2] : memref<256x144xf32, #tpu.memory_space<vmem>>, vector<256x2xf32>
    tpu.vector_store %arg22[%c0_24, %c2], %13 {strides = array<i32>} : memref<256x144xf32, #tpu.memory_space<vmem>>, vector<256x2xf32>,
    %c0_25 = arith.constant 0 : index
    %c2_26 = arith.constant 2 : index
    %c0_27 = arith.constant 0 : index
    %15 = vector.load %arg19[%c0_25, %c2_26, %c0_27] : memref<18x18x16xf32, #tpu.memory_space<vmem>>, vector<16x16x2xf32>
    %16 = vector.shape_cast %15 : vector<16x16x2xf32> to vector<256x2xf32>
    %c0_28 = arith.constant 0 : index
    %c4 = arith.constant 4 : index
    %17 = vector.load %arg22[%c0_28, %c4] : memref<256x144xf32, #tpu.memory_space<vmem>>, vector<256x2xf32>
    tpu.vector_store %arg22[%c0_28, %c4], %16 {strides = array<i32>} : memref<256x144xf32, #tpu.memory_space<vmem>>, vector<256x2xf32>,
    %c1_29 = arith.constant 1 : index
    %c0_30 = arith.constant 0 : index
    %c0_31 = arith.constant 0 : index
    %18 = vector.load %arg19[%c1_29, %c0_30, %c0_31] : memref<18x18x16xf32, #tpu.memory_space<vmem>>, vector<16x16x2xf32>
    %19 = vector.shape_cast %18 : vector<16x16x2xf32> to vector<256x2xf32>
    %c0_32 = arith.constant 0 : index
    %c6 = arith.constant 6 : index
    %20 = vector.load %arg22[%c0_32, %c6] : memref<256x144xf32, #tpu.memory_space<vmem>>, vector<256x2xf32>
    tpu.vector_store %arg22[%c0_32, %c6], %19 {strides = array<i32>} : memref<256x144xf32, #tpu.memory_space<vmem>>, vector<256x2xf32>,
    %c1_33 = arith.constant 1 : index
    %c1_34 = arith.constant 1 : index
    %c0_35 = arith.constant 0 : index
    %21 = vector.load %arg19[%c1_33, %c1_34, %c0_35] : memref<18x18x16xf32, #tpu.memory_space<vmem>>, vector<16x16x2xf32>
    %22 = vector.shape_cast %21 : vector<16x16x2xf32> to vector<256x2xf32>
    %c0_36 = arith.constant 0 : index
    %c8 = arith.constant 8 : index
    %23 = vector.load %arg22[%c0_36, %c8] : memref<256x144xf32, #tpu.memory_space<vmem>>, vector<256x2xf32>
    tpu.vector_store %arg22[%c0_36, %c8], %22 {strides = array<i32>} : memref<256x144xf32, #tpu.memory_space<vmem>>, vector<256x2xf32>,
    %c1_37 = arith.constant 1 : index
    %c2_38 = arith.constant 2 : index
    %c0_39 = arith.constant 0 : index
    %24 = vector.load %arg19[%c1_37, %c2_38, %c0_39] : memref<18x18x16xf32, #tpu.memory_space<vmem>>, vector<16x16x2xf32>
    %25 = vector.shape_cast %24 : vector<16x16x2xf32> to vector<256x2xf32>
    %c0_40 = arith.constant 0 : index
    %c10 = arith.constant 10 : index
    %26 = vector.load %arg22[%c0_40, %c10] : memref<256x144xf32, #tpu.memory_space<vmem>>, vector<256x2xf32>
    tpu.vector_store %arg22[%c0_40, %c10], %25 {strides = array<i32>} : memref<256x144xf32, #tpu.memory_space<vmem>>, vector<256x2xf32>,
    %c2_41 = arith.constant 2 : index
    %c0_42 = arith.constant 0 : index
    %c0_43 = arith.constant 0 : index
    %27 = vector.load %arg19[%c2_41, %c0_42, %c0_43] : memref<18x18x16xf32, #tpu.memory_space<vmem>>, vector<16x16x2xf32>
    %28 = vector.shape_cast %27 : vector<16x16x2xf32> to vector<256x2xf32>
    %c0_44 = arith.constant 0 : index
    %c12 = arith.constant 12 : index
    %29 = vector.load %arg22[%c0_44, %c12] : memref<256x144xf32, #tpu.memory_space<vmem>>, vector<256x2xf32>
    tpu.vector_store %arg22[%c0_44, %c12], %28 {strides = array<i32>} : memref<256x144xf32, #tpu.memory_space<vmem>>, vector<256x2xf32>,
    %c2_45 = arith.constant 2 : index
    %c1_46 = arith.constant 1 : index
    %c0_47 = arith.constant 0 : index
    %30 = vector.load %arg19[%c2_45, %c1_46, %c0_47] : memref<18x18x16xf32, #tpu.memory_space<vmem>>, vector<16x16x2xf32>
    %31 = vector.shape_cast %30 : vector<16x16x2xf32> to vector<256x2xf32>
    %c0_48 = arith.constant 0 : index
    %c14 = arith.constant 14 : index
    %32 = vector.load %arg22[%c0_48, %c14] : memref<256x144xf32, #tpu.memory_space<vmem>>, vector<256x2xf32>
    tpu.vector_store %arg22[%c0_48, %c14], %31 {strides = array<i32>} : memref<256x144xf32, #tpu.memory_space<vmem>>, vector<256x2xf32>,
    %c2_49 = arith.constant 2 : index
    %c2_50 = arith.constant 2 : index
    %c0_51 = arith.constant 0 : index
    %33 = vector.load %arg19[%c2_49, %c2_50, %c0_51] : memref<18x18x16xf32, #tpu.memory_space<vmem>>, vector<16x16x2xf32>
    %34 = vector.shape_cast %33 : vector<16x16x2xf32> to vector<256x2xf32>
    %c0_52 = arith.constant 0 : index
    %c16 = arith.constant 16 : index
    %35 = vector.load %arg22[%c0_52, %c16] : memref<256x144xf32, #tpu.memory_space<vmem>>, vector<256x2xf32>
    tpu.vector_store %arg22[%c0_52, %c16], %34 {strides = array<i32>} : memref<256x144xf32, #tpu.memory_space<vmem>>, vector<256x2xf32>,
    %c0_53 = arith.constant 0 : index
    %c0_54 = arith.constant 0 : index
    %36 = vector.load %arg22[%c0_53, %c0_54] : memref<256x144xf32, #tpu.memory_space<vmem>>, vector<256x18xf32>
    %c0_55 = arith.constant 0 : index
    %c0_56 = arith.constant 0 : index
    %37 = vector.load %arg2[%c0_55, %c0_56] : memref<18x16xf32, #tpu.memory_space<vmem>>, vector<18x16xf32>
    %cst_57 = arith.constant dense<0.000000e+00> : vector<256x16xf32>
    %38 = tpu.matmul %36, %37, %cst_57 {dimension_numbers = #tpu.dot_dimension_numbers<[1], [0], [0], [1], [0, 0, 1, 1], [], []>} : vector<256x18xf32>, vector<18x16xf32>, vector<256x16xf32> -> vector<256x16xf32>
    %c0_58 = arith.constant 0 : index
    %c0_59 = arith.constant 0 : index
    %39 = vector.load %arg3[%c0_58, %c0_59] : memref<1x16xf32, #tpu.memory_space<vmem>>, vector<1x16xf32>
    %40 = vector.broadcast %39 : vector<1x16xf32> to vector<256x16xf32>
    %41 = arith.addf %38, %40 : vector<256x16xf32>
    %cst_60 = arith.constant 0.000000e+00 : f32
    %42 = vector.broadcast %cst_60 : f32 to vector<256x16xf32>
    %43 = arith.maximumf %41, %42 : vector<256x16xf32>
    %44 = vector.shape_cast %43 : vector<256x16xf32> to vector<16x16x16xf32>
    %c1_61 = arith.constant 1 : index
    %c1_62 = arith.constant 1 : index
    %c0_63 = arith.constant 0 : index
    %45 = vector.load %arg19[%c1_61, %c1_62, %c0_63] : memref<18x18x16xf32, #tpu.memory_space<vmem>>, vector<16x16x16xf32>
    tpu.vector_store %arg19[%c1_61, %c1_62, %c0_63], %44 {strides = array<i32>} : memref<18x18x16xf32, #tpu.memory_space<vmem>>, vector<16x16x16xf32>,
    %c0_64 = arith.constant 0 : index
    %c0_65 = arith.constant 0 : index
    %c0_66 = arith.constant 0 : index
    %46 = vector.load %arg19[%c0_64, %c0_65, %c0_66] : memref<18x18x16xf32, #tpu.memory_space<vmem>>, vector<16x16x16xf32>
    %47 = vector.shape_cast %46 : vector<16x16x16xf32> to vector<256x16xf32>
    %c0_67 = arith.constant 0 : index
    %c0_68 = arith.constant 0 : index
    %48 = vector.load %arg22[%c0_67, %c0_68] : memref<256x144xf32, #tpu.memory_space<vmem>>, vector<256x16xf32>
    tpu.vector_store %arg22[%c0_67, %c0_68], %47 {strides = array<i32>} : memref<256x144xf32, #tpu.memory_space<vmem>>, vector<256x16xf32>,
    %c0_69 = arith.constant 0 : index
    %c1_70 = arith.constant 1 : index
    %c0_71 = arith.constant 0 : index
    %49 = vector.load %arg19[%c0_69, %c1_70, %c0_71] : memref<18x18x16xf32, #tpu.memory_space<vmem>>, vector<16x16x16xf32>
    %50 = vector.shape_cast %49 : vector<16x16x16xf32> to vector<256x16xf32>
    %c0_72 = arith.constant 0 : index
    %c16_73 = arith.constant 16 : index
    %51 = vector.load %arg22[%c0_72, %c16_73] : memref<256x144xf32, #tpu.memory_space<vmem>>, vector<256x16xf32>
    tpu.vector_store %arg22[%c0_72, %c16_73], %50 {strides = array<i32>} : memref<256x144xf32, #tpu.memory_space<vmem>>, vector<256x16xf32>,
    %c0_74 = arith.constant 0 : index
    %c2_75 = arith.constant 2 : index
    %c0_76 = arith.constant 0 : index
    %52 = vector.load %arg19[%c0_74, %c2_75, %c0_76] : memref<18x18x16xf32, #tpu.memory_space<vmem>>, vector<16x16x16xf32>
    %53 = vector.shape_cast %52 : vector<16x16x16xf32> to vector<256x16xf32>
    %c0_77 = arith.constant 0 : index
    %c32 = arith.constant 32 : index
    %54 = vector.load %arg22[%c0_77, %c32] : memref<256x144xf32, #tpu.memory_space<vmem>>, vector<256x16xf32>
    tpu.vector_store %arg22[%c0_77, %c32], %53 {strides = array<i32>} : memref<256x144xf32, #tpu.memory_space<vmem>>, vector<256x16xf32>,
    %c1_78 = arith.constant 1 : index
    %c0_79 = arith.constant 0 : index
    %c0_80 = arith.constant 0 : index
    %55 = vector.load %arg19[%c1_78, %c0_79, %c0_80] : memref<18x18x16xf32, #tpu.memory_space<vmem>>, vector<16x16x16xf32>
    %56 = vector.shape_cast %55 : vector<16x16x16xf32> to vector<256x16xf32>
    %c0_81 = arith.constant 0 : index
    %c48 = arith.constant 48 : index
    %57 = vector.load %arg22[%c0_81, %c48] : memref<256x144xf32, #tpu.memory_space<vmem>>, vector<256x16xf32>
    tpu.vector_store %arg22[%c0_81, %c48], %56 {strides = array<i32>} : memref<256x144xf32, #tpu.memory_space<vmem>>, vector<256x16xf32>,
    %c1_82 = arith.constant 1 : index
    %c1_83 = arith.constant 1 : index
    %c0_84 = arith.constant 0 : index
    %58 = vector.load %arg19[%c1_82, %c1_83, %c0_84] : memref<18x18x16xf32, #tpu.memory_space<vmem>>, vector<16x16x16xf32>
    %59 = vector.shape_cast %58 : vector<16x16x16xf32> to vector<256x16xf32>
    %c0_85 = arith.constant 0 : index
    %c64 = arith.constant 64 : index
    %60 = vector.load %arg22[%c0_85, %c64] : memref<256x144xf32, #tpu.memory_space<vmem>>, vector<256x16xf32>
    tpu.vector_store %arg22[%c0_85, %c64], %59 {strides = array<i32>} : memref<256x144xf32, #tpu.memory_space<vmem>>, vector<256x16xf32>,
    %c1_86 = arith.constant 1 : index
    %c2_87 = arith.constant 2 : index
    %c0_88 = arith.constant 0 : index
    %61 = vector.load %arg19[%c1_86, %c2_87, %c0_88] : memref<18x18x16xf32, #tpu.memory_space<vmem>>, vector<16x16x16xf32>
    %62 = vector.shape_cast %61 : vector<16x16x16xf32> to vector<256x16xf32>
    %c0_89 = arith.constant 0 : index
    %c80 = arith.constant 80 : index
    %63 = vector.load %arg22[%c0_89, %c80] : memref<256x144xf32, #tpu.memory_space<vmem>>, vector<256x16xf32>
    tpu.vector_store %arg22[%c0_89, %c80], %62 {strides = array<i32>} : memref<256x144xf32, #tpu.memory_space<vmem>>, vector<256x16xf32>,
    %c2_90 = arith.constant 2 : index
    %c0_91 = arith.constant 0 : index
    %c0_92 = arith.constant 0 : index
    %64 = vector.load %arg19[%c2_90, %c0_91, %c0_92] : memref<18x18x16xf32, #tpu.memory_space<vmem>>, vector<16x16x16xf32>
    %65 = vector.shape_cast %64 : vector<16x16x16xf32> to vector<256x16xf32>
    %c0_93 = arith.constant 0 : index
    %c96 = arith.constant 96 : index
    %66 = vector.load %arg22[%c0_93, %c96] : memref<256x144xf32, #tpu.memory_space<vmem>>, vector<256x16xf32>
    tpu.vector_store %arg22[%c0_93, %c96], %65 {strides = array<i32>} : memref<256x144xf32, #tpu.memory_space<vmem>>, vector<256x16xf32>,
    %c2_94 = arith.constant 2 : index
    %c1_95 = arith.constant 1 : index
    %c0_96 = arith.constant 0 : index
    %67 = vector.load %arg19[%c2_94, %c1_95, %c0_96] : memref<18x18x16xf32, #tpu.memory_space<vmem>>, vector<16x16x16xf32>
    %68 = vector.shape_cast %67 : vector<16x16x16xf32> to vector<256x16xf32>
    %c0_97 = arith.constant 0 : index
    %c112 = arith.constant 112 : index
    %69 = vector.load %arg22[%c0_97, %c112] : memref<256x144xf32, #tpu.memory_space<vmem>>, vector<256x16xf32>
    tpu.vector_store %arg22[%c0_97, %c112], %68 {strides = array<i32>} : memref<256x144xf32, #tpu.memory_space<vmem>>, vector<256x16xf32>,
    %c2_98 = arith.constant 2 : index
    %c2_99 = arith.constant 2 : index
    %c0_100 = arith.constant 0 : index
    %70 = vector.load %arg19[%c2_98, %c2_99, %c0_100] : memref<18x18x16xf32, #tpu.memory_space<vmem>>, vector<16x16x16xf32>
    %71 = vector.shape_cast %70 : vector<16x16x16xf32> to vector<256x16xf32>
    %c0_101 = arith.constant 0 : index
    %c128 = arith.constant 128 : index
    %72 = vector.load %arg22[%c0_101, %c128] : memref<256x144xf32, #tpu.memory_space<vmem>>, vector<256x16xf32>
    tpu.vector_store %arg22[%c0_101, %c128], %71 {strides = array<i32>} : memref<256x144xf32, #tpu.memory_space<vmem>>, vector<256x16xf32>,
    %c0_102 = arith.constant 0 : index
    %c0_103 = arith.constant 0 : index
    %73 = vector.load %arg22[%c0_102, %c0_103] : memref<256x144xf32, #tpu.memory_space<vmem>>, vector<256x144xf32>
    %c0_104 = arith.constant 0 : index
    %c0_105 = arith.constant 0 : index
    %74 = vector.load %arg4[%c0_104, %c0_105] : memref<144x16xf32, #tpu.memory_space<vmem>>, vector<144x16xf32>
    %cst_106 = arith.constant dense<0.000000e+00> : vector<256x16xf32>
    %75 = tpu.matmul %73, %74, %cst_106 {dimension_numbers = #tpu.dot_dimension_numbers<[1], [0], [0], [1], [0, 0, 1, 1], [], []>} : vector<256x144xf32>, vector<144x16xf32>, vector<256x16xf32> -> vector<256x16xf32>
    %c0_107 = arith.constant 0 : index
    %c0_108 = arith.constant 0 : index
    %76 = vector.load %arg5[%c0_107, %c0_108] : memref<1x16xf32, #tpu.memory_space<vmem>>, vector<1x16xf32>
    %77 = vector.broadcast %76 : vector<1x16xf32> to vector<256x16xf32>
    %78 = arith.addf %75, %77 : vector<256x16xf32>
    %cst_109 = arith.constant 0.000000e+00 : f32
    %79 = vector.broadcast %cst_109 : f32 to vector<256x16xf32>
    %80 = arith.maximumf %78, %79 : vector<256x16xf32>
    %c0_110 = arith.constant 0 : index
    %c0_111 = arith.constant 0 : index
    %81 = vector.load %arg23[%c0_110, %c0_111] : memref<256x16xf32, #tpu.memory_space<vmem>>, vector<256x16xf32>
    tpu.vector_store %arg23[%c0_110, %c0_111], %80 {strides = array<i32>} : memref<256x16xf32, #tpu.memory_space<vmem>>, vector<256x16xf32>,
    %c0_112 = arith.constant 0 : index
    %c0_113 = arith.constant 0 : index
    %82 = tpu.strided_load %arg23[%c0_112, %c0_113] {strides = array<i32: 2, 1>} : memref<256x16xf32, #tpu.memory_space<vmem>>, vector<128x16xf32>
    %c1_114 = arith.constant 1 : index
    %c0_115 = arith.constant 0 : index
    %83 = tpu.strided_load %arg23[%c1_114, %c0_115] {strides = array<i32: 2, 1>} : memref<256x16xf32, #tpu.memory_space<vmem>>, vector<128x16xf32>
    %84 = arith.maximumf %82, %83 : vector<128x16xf32>
    %85 = vector.shape_cast %84 : vector<128x16xf32> to vector<16x8x16xf32>
    %c0_116 = arith.constant 0 : index
    %c0_117 = arith.constant 0 : index
    %c0_118 = arith.constant 0 : index
    %86 = vector.load %arg24[%c0_116, %c0_117, %c0_118] : memref<16x8x16xf32, #tpu.memory_space<vmem>>, vector<16x8x16xf32>
    tpu.vector_store %arg24[%c0_116, %c0_117, %c0_118], %85 {strides = array<i32>} : memref<16x8x16xf32, #tpu.memory_space<vmem>>, vector<16x8x16xf32>,
    %c0_119 = arith.constant 0 : index
    %c0_120 = arith.constant 0 : index
    %c0_121 = arith.constant 0 : index
    %87 = tpu.strided_load %arg24[%c0_119, %c0_120, %c0_121] {strides = array<i32: 2, 1, 1>} : memref<16x8x16xf32, #tpu.memory_space<vmem>>, vector<8x8x16xf32>
    %c1_122 = arith.constant 1 : index
    %c0_123 = arith.constant 0 : index
    %c0_124 = arith.constant 0 : index
    %88 = tpu.strided_load %arg24[%c1_122, %c0_123, %c0_124] {strides = array<i32: 2, 1, 1>} : memref<16x8x16xf32, #tpu.memory_space<vmem>>, vector<8x8x16xf32>
    %89 = arith.maximumf %87, %88 : vector<8x8x16xf32>
    %c1_125 = arith.constant 1 : index
    %c1_126 = arith.constant 1 : index
    %c0_127 = arith.constant 0 : index
    %90 = vector.load %arg20[%c1_125, %c1_126, %c0_127] : memref<10x10x16xf32, #tpu.memory_space<vmem>>, vector<8x8x16xf32>
    tpu.vector_store %arg20[%c1_125, %c1_126, %c0_127], %89 {strides = array<i32>} : memref<10x10x16xf32, #tpu.memory_space<vmem>>, vector<8x8x16xf32>,
    %c0_128 = arith.constant 0 : index
    %c0_129 = arith.constant 0 : index
    %c0_130 = arith.constant 0 : index
    %91 = vector.load %arg20[%c0_128, %c0_129, %c0_130] : memref<10x10x16xf32, #tpu.memory_space<vmem>>, vector<8x8x16xf32>
    %92 = vector.shape_cast %91 : vector<8x8x16xf32> to vector<64x16xf32>
    %c0_131 = arith.constant 0 : index
    %c0_132 = arith.constant 0 : index
    %93 = vector.load %arg22[%c0_131, %c0_132] : memref<256x144xf32, #tpu.memory_space<vmem>>, vector<64x16xf32>
    tpu.vector_store %arg22[%c0_131, %c0_132], %92 {strides = array<i32>} : memref<256x144xf32, #tpu.memory_space<vmem>>, vector<64x16xf32>,
    %c0_133 = arith.constant 0 : index
    %c1_134 = arith.constant 1 : index
    %c0_135 = arith.constant 0 : index
    %94 = vector.load %arg20[%c0_133, %c1_134, %c0_135] : memref<10x10x16xf32, #tpu.memory_space<vmem>>, vector<8x8x16xf32>
    %95 = vector.shape_cast %94 : vector<8x8x16xf32> to vector<64x16xf32>
    %c0_136 = arith.constant 0 : index
    %c16_137 = arith.constant 16 : index
    %96 = vector.load %arg22[%c0_136, %c16_137] : memref<256x144xf32, #tpu.memory_space<vmem>>, vector<64x16xf32>
    tpu.vector_store %arg22[%c0_136, %c16_137], %95 {strides = array<i32>} : memref<256x144xf32, #tpu.memory_space<vmem>>, vector<64x16xf32>,
    %c0_138 = arith.constant 0 : index
    %c2_139 = arith.constant 2 : index
    %c0_140 = arith.constant 0 : index
    %97 = vector.load %arg20[%c0_138, %c2_139, %c0_140] : memref<10x10x16xf32, #tpu.memory_space<vmem>>, vector<8x8x16xf32>
    %98 = vector.shape_cast %97 : vector<8x8x16xf32> to vector<64x16xf32>
    %c0_141 = arith.constant 0 : index
    %c32_142 = arith.constant 32 : index
    %99 = vector.load %arg22[%c0_141, %c32_142] : memref<256x144xf32, #tpu.memory_space<vmem>>, vector<64x16xf32>
    tpu.vector_store %arg22[%c0_141, %c32_142], %98 {strides = array<i32>} : memref<256x144xf32, #tpu.memory_space<vmem>>, vector<64x16xf32>,
    %c1_143 = arith.constant 1 : index
    %c0_144 = arith.constant 0 : index
    %c0_145 = arith.constant 0 : index
    %100 = vector.load %arg20[%c1_143, %c0_144, %c0_145] : memref<10x10x16xf32, #tpu.memory_space<vmem>>, vector<8x8x16xf32>
    %101 = vector.shape_cast %100 : vector<8x8x16xf32> to vector<64x16xf32>
    %c0_146 = arith.constant 0 : index
    %c48_147 = arith.constant 48 : index
    %102 = vector.load %arg22[%c0_146, %c48_147] : memref<256x144xf32, #tpu.memory_space<vmem>>, vector<64x16xf32>
    tpu.vector_store %arg22[%c0_146, %c48_147], %101 {strides = array<i32>} : memref<256x144xf32, #tpu.memory_space<vmem>>, vector<64x16xf32>,
    %c1_148 = arith.constant 1 : index
    %c1_149 = arith.constant 1 : index
    %c0_150 = arith.constant 0 : index
    %103 = vector.load %arg20[%c1_148, %c1_149, %c0_150] : memref<10x10x16xf32, #tpu.memory_space<vmem>>, vector<8x8x16xf32>
    %104 = vector.shape_cast %103 : vector<8x8x16xf32> to vector<64x16xf32>
    %c0_151 = arith.constant 0 : index
    %c64_152 = arith.constant 64 : index
    %105 = vector.load %arg22[%c0_151, %c64_152] : memref<256x144xf32, #tpu.memory_space<vmem>>, vector<64x16xf32>
    tpu.vector_store %arg22[%c0_151, %c64_152], %104 {strides = array<i32>} : memref<256x144xf32, #tpu.memory_space<vmem>>, vector<64x16xf32>,
    %c1_153 = arith.constant 1 : index
    %c2_154 = arith.constant 2 : index
    %c0_155 = arith.constant 0 : index
    %106 = vector.load %arg20[%c1_153, %c2_154, %c0_155] : memref<10x10x16xf32, #tpu.memory_space<vmem>>, vector<8x8x16xf32>
    %107 = vector.shape_cast %106 : vector<8x8x16xf32> to vector<64x16xf32>
    %c0_156 = arith.constant 0 : index
    %c80_157 = arith.constant 80 : index
    %108 = vector.load %arg22[%c0_156, %c80_157] : memref<256x144xf32, #tpu.memory_space<vmem>>, vector<64x16xf32>
    tpu.vector_store %arg22[%c0_156, %c80_157], %107 {strides = array<i32>} : memref<256x144xf32, #tpu.memory_space<vmem>>, vector<64x16xf32>,
    %c2_158 = arith.constant 2 : index
    %c0_159 = arith.constant 0 : index
    %c0_160 = arith.constant 0 : index
    %109 = vector.load %arg20[%c2_158, %c0_159, %c0_160] : memref<10x10x16xf32, #tpu.memory_space<vmem>>, vector<8x8x16xf32>
    %110 = vector.shape_cast %109 : vector<8x8x16xf32> to vector<64x16xf32>
    %c0_161 = arith.constant 0 : index
    %c96_162 = arith.constant 96 : index
    %111 = vector.load %arg22[%c0_161, %c96_162] : memref<256x144xf32, #tpu.memory_space<vmem>>, vector<64x16xf32>
    tpu.vector_store %arg22[%c0_161, %c96_162], %110 {strides = array<i32>} : memref<256x144xf32, #tpu.memory_space<vmem>>, vector<64x16xf32>,
    %c2_163 = arith.constant 2 : index
    %c1_164 = arith.constant 1 : index
    %c0_165 = arith.constant 0 : index
    %112 = vector.load %arg20[%c2_163, %c1_164, %c0_165] : memref<10x10x16xf32, #tpu.memory_space<vmem>>, vector<8x8x16xf32>
    %113 = vector.shape_cast %112 : vector<8x8x16xf32> to vector<64x16xf32>
    %c0_166 = arith.constant 0 : index
    %c112_167 = arith.constant 112 : index
    %114 = vector.load %arg22[%c0_166, %c112_167] : memref<256x144xf32, #tpu.memory_space<vmem>>, vector<64x16xf32>
    tpu.vector_store %arg22[%c0_166, %c112_167], %113 {strides = array<i32>} : memref<256x144xf32, #tpu.memory_space<vmem>>, vector<64x16xf32>,
    %c2_168 = arith.constant 2 : index
    %c2_169 = arith.constant 2 : index
    %c0_170 = arith.constant 0 : index
    %115 = vector.load %arg20[%c2_168, %c2_169, %c0_170] : memref<10x10x16xf32, #tpu.memory_space<vmem>>, vector<8x8x16xf32>
    %116 = vector.shape_cast %115 : vector<8x8x16xf32> to vector<64x16xf32>
    %c0_171 = arith.constant 0 : index
    %c128_172 = arith.constant 128 : index
    %117 = vector.load %arg22[%c0_171, %c128_172] : memref<256x144xf32, #tpu.memory_space<vmem>>, vector<64x16xf32>
    tpu.vector_store %arg22[%c0_171, %c128_172], %116 {strides = array<i32>} : memref<256x144xf32, #tpu.memory_space<vmem>>, vector<64x16xf32>,
    %c0_173 = arith.constant 0 : index
    %c0_174 = arith.constant 0 : index
    %118 = vector.load %arg22[%c0_173, %c0_174] : memref<256x144xf32, #tpu.memory_space<vmem>>, vector<64x144xf32>
    %c0_175 = arith.constant 0 : index
    %c0_176 = arith.constant 0 : index
    %119 = vector.load %arg6[%c0_175, %c0_176] : memref<144x16xf32, #tpu.memory_space<vmem>>, vector<144x16xf32>
    %cst_177 = arith.constant dense<0.000000e+00> : vector<64x16xf32>
    %120 = tpu.matmul %118, %119, %cst_177 {dimension_numbers = #tpu.dot_dimension_numbers<[1], [0], [0], [1], [0, 0, 1, 1], [], []>} : vector<64x144xf32>, vector<144x16xf32>, vector<64x16xf32> -> vector<64x16xf32>
    %c0_178 = arith.constant 0 : index
    %c0_179 = arith.constant 0 : index
    %121 = vector.load %arg7[%c0_178, %c0_179] : memref<1x16xf32, #tpu.memory_space<vmem>>, vector<1x16xf32>
    %122 = vector.broadcast %121 : vector<1x16xf32> to vector<64x16xf32>
    %123 = arith.addf %120, %122 : vector<64x16xf32>
    %cst_180 = arith.constant 0.000000e+00 : f32
    %124 = vector.broadcast %cst_180 : f32 to vector<64x16xf32>
    %125 = arith.cmpf ogt, %123, %124 : vector<64x16xf32>
    %cst_181 = arith.constant 0.00999999977 : f32
    %126 = vector.broadcast %cst_181 : f32 to vector<64x16xf32>
    %127 = arith.mulf %126, %123 : vector<64x16xf32>
    %128 = arith.select %125, %123, %127 : vector<64x16xi1>, vector<64x16xf32>
    %129 = vector.shape_cast %128 : vector<64x16xf32> to vector<8x8x16xf32>
    %c1_182 = arith.constant 1 : index
    %c1_183 = arith.constant 1 : index
    %c0_184 = arith.constant 0 : index
    %130 = vector.load %arg20[%c1_182, %c1_183, %c0_184] : memref<10x10x16xf32, #tpu.memory_space<vmem>>, vector<8x8x16xf32>
    tpu.vector_store %arg20[%c1_182, %c1_183, %c0_184], %129 {strides = array<i32>} : memref<10x10x16xf32, #tpu.memory_space<vmem>>, vector<8x8x16xf32>,
    %c0_185 = arith.constant 0 : index
    %c0_186 = arith.constant 0 : index
    %c0_187 = arith.constant 0 : index
    %131 = vector.load %arg20[%c0_185, %c0_186, %c0_187] : memref<10x10x16xf32, #tpu.memory_space<vmem>>, vector<8x8x16xf32>
    %132 = vector.shape_cast %131 : vector<8x8x16xf32> to vector<64x16xf32>
    %c0_188 = arith.constant 0 : index
    %c0_189 = arith.constant 0 : index
    %133 = vector.load %arg22[%c0_188, %c0_189] : memref<256x144xf32, #tpu.memory_space<vmem>>, vector<64x16xf32>
    tpu.vector_store %arg22[%c0_188, %c0_189], %132 {strides = array<i32>} : memref<256x144xf32, #tpu.memory_space<vmem>>, vector<64x16xf32>,
    %c0_190 = arith.constant 0 : index
    %c1_191 = arith.constant 1 : index
    %c0_192 = arith.constant 0 : index
    %134 = vector.load %arg20[%c0_190, %c1_191, %c0_192] : memref<10x10x16xf32, #tpu.memory_space<vmem>>, vector<8x8x16xf32>
    %135 = vector.shape_cast %134 : vector<8x8x16xf32> to vector<64x16xf32>
    %c0_193 = arith.constant 0 : index
    %c16_194 = arith.constant 16 : index
    %136 = vector.load %arg22[%c0_193, %c16_194] : memref<256x144xf32, #tpu.memory_space<vmem>>, vector<64x16xf32>
    tpu.vector_store %arg22[%c0_193, %c16_194], %135 {strides = array<i32>} : memref<256x144xf32, #tpu.memory_space<vmem>>, vector<64x16xf32>,
    %c0_195 = arith.constant 0 : index
    %c2_196 = arith.constant 2 : index
    %c0_197 = arith.constant 0 : index
    %137 = vector.load %arg20[%c0_195, %c2_196, %c0_197] : memref<10x10x16xf32, #tpu.memory_space<vmem>>, vector<8x8x16xf32>
    %138 = vector.shape_cast %137 : vector<8x8x16xf32> to vector<64x16xf32>
    %c0_198 = arith.constant 0 : index
    %c32_199 = arith.constant 32 : index
    %139 = vector.load %arg22[%c0_198, %c32_199] : memref<256x144xf32, #tpu.memory_space<vmem>>, vector<64x16xf32>
    tpu.vector_store %arg22[%c0_198, %c32_199], %138 {strides = array<i32>} : memref<256x144xf32, #tpu.memory_space<vmem>>, vector<64x16xf32>,
    %c1_200 = arith.constant 1 : index
    %c0_201 = arith.constant 0 : index
    %c0_202 = arith.constant 0 : index
    %140 = vector.load %arg20[%c1_200, %c0_201, %c0_202] : memref<10x10x16xf32, #tpu.memory_space<vmem>>, vector<8x8x16xf32>
    %141 = vector.shape_cast %140 : vector<8x8x16xf32> to vector<64x16xf32>
    %c0_203 = arith.constant 0 : index
    %c48_204 = arith.constant 48 : index
    %142 = vector.load %arg22[%c0_203, %c48_204] : memref<256x144xf32, #tpu.memory_space<vmem>>, vector<64x16xf32>
    tpu.vector_store %arg22[%c0_203, %c48_204], %141 {strides = array<i32>} : memref<256x144xf32, #tpu.memory_space<vmem>>, vector<64x16xf32>,
    %c1_205 = arith.constant 1 : index
    %c1_206 = arith.constant 1 : index
    %c0_207 = arith.constant 0 : index
    %143 = vector.load %arg20[%c1_205, %c1_206, %c0_207] : memref<10x10x16xf32, #tpu.memory_space<vmem>>, vector<8x8x16xf32>
    %144 = vector.shape_cast %143 : vector<8x8x16xf32> to vector<64x16xf32>
    %c0_208 = arith.constant 0 : index
    %c64_209 = arith.constant 64 : index
    %145 = vector.load %arg22[%c0_208, %c64_209] : memref<256x144xf32, #tpu.memory_space<vmem>>, vector<64x16xf32>
    tpu.vector_store %arg22[%c0_208, %c64_209], %144 {strides = array<i32>} : memref<256x144xf32, #tpu.memory_space<vmem>>, vector<64x16xf32>,
    %c1_210 = arith.constant 1 : index
    %c2_211 = arith.constant 2 : index
    %c0_212 = arith.constant 0 : index
    %146 = vector.load %arg20[%c1_210, %c2_211, %c0_212] : memref<10x10x16xf32, #tpu.memory_space<vmem>>, vector<8x8x16xf32>
    %147 = vector.shape_cast %146 : vector<8x8x16xf32> to vector<64x16xf32>
    %c0_213 = arith.constant 0 : index
    %c80_214 = arith.constant 80 : index
    %148 = vector.load %arg22[%c0_213, %c80_214] : memref<256x144xf32, #tpu.memory_space<vmem>>, vector<64x16xf32>
    tpu.vector_store %arg22[%c0_213, %c80_214], %147 {strides = array<i32>} : memref<256x144xf32, #tpu.memory_space<vmem>>, vector<64x16xf32>,
    %c2_215 = arith.constant 2 : index
    %c0_216 = arith.constant 0 : index
    %c0_217 = arith.constant 0 : index
    %149 = vector.load %arg20[%c2_215, %c0_216, %c0_217] : memref<10x10x16xf32, #tpu.memory_space<vmem>>, vector<8x8x16xf32>
    %150 = vector.shape_cast %149 : vector<8x8x16xf32> to vector<64x16xf32>
    %c0_218 = arith.constant 0 : index
    %c96_219 = arith.constant 96 : index
    %151 = vector.load %arg22[%c0_218, %c96_219] : memref<256x144xf32, #tpu.memory_space<vmem>>, vector<64x16xf32>
    tpu.vector_store %arg22[%c0_218, %c96_219], %150 {strides = array<i32>} : memref<256x144xf32, #tpu.memory_space<vmem>>, vector<64x16xf32>,
    %c2_220 = arith.constant 2 : index
    %c1_221 = arith.constant 1 : index
    %c0_222 = arith.constant 0 : index
    %152 = vector.load %arg20[%c2_220, %c1_221, %c0_222] : memref<10x10x16xf32, #tpu.memory_space<vmem>>, vector<8x8x16xf32>
    %153 = vector.shape_cast %152 : vector<8x8x16xf32> to vector<64x16xf32>
    %c0_223 = arith.constant 0 : index
    %c112_224 = arith.constant 112 : index
    %154 = vector.load %arg22[%c0_223, %c112_224] : memref<256x144xf32, #tpu.memory_space<vmem>>, vector<64x16xf32>
    tpu.vector_store %arg22[%c0_223, %c112_224], %153 {strides = array<i32>} : memref<256x144xf32, #tpu.memory_space<vmem>>, vector<64x16xf32>,
    %c2_225 = arith.constant 2 : index
    %c2_226 = arith.constant 2 : index
    %c0_227 = arith.constant 0 : index
    %155 = vector.load %arg20[%c2_225, %c2_226, %c0_227] : memref<10x10x16xf32, #tpu.memory_space<vmem>>, vector<8x8x16xf32>
    %156 = vector.shape_cast %155 : vector<8x8x16xf32> to vector<64x16xf32>
    %c0_228 = arith.constant 0 : index
    %c128_229 = arith.constant 128 : index
    %157 = vector.load %arg22[%c0_228, %c128_229] : memref<256x144xf32, #tpu.memory_space<vmem>>, vector<64x16xf32>
    tpu.vector_store %arg22[%c0_228, %c128_229], %156 {strides = array<i32>} : memref<256x144xf32, #tpu.memory_space<vmem>>, vector<64x16xf32>,
    %c0_230 = arith.constant 0 : index
    %c0_231 = arith.constant 0 : index
    %158 = vector.load %arg22[%c0_230, %c0_231] : memref<256x144xf32, #tpu.memory_space<vmem>>, vector<64x144xf32>
    %c0_232 = arith.constant 0 : index
    %c0_233 = arith.constant 0 : index
    %159 = vector.load %arg8[%c0_232, %c0_233] : memref<144x16xf32, #tpu.memory_space<vmem>>, vector<144x16xf32>
    %cst_234 = arith.constant dense<0.000000e+00> : vector<64x16xf32>
    %160 = tpu.matmul %158, %159, %cst_234 {dimension_numbers = #tpu.dot_dimension_numbers<[1], [0], [0], [1], [0, 0, 1, 1], [], []>} : vector<64x144xf32>, vector<144x16xf32>, vector<64x16xf32> -> vector<64x16xf32>
    %c0_235 = arith.constant 0 : index
    %c0_236 = arith.constant 0 : index
    %161 = vector.load %arg9[%c0_235, %c0_236] : memref<1x16xf32, #tpu.memory_space<vmem>>, vector<1x16xf32>
    %162 = vector.broadcast %161 : vector<1x16xf32> to vector<64x16xf32>
    %163 = arith.addf %160, %162 : vector<64x16xf32>
    %cst_237 = arith.constant 0.000000e+00 : f32
    %164 = vector.broadcast %cst_237 : f32 to vector<64x16xf32>
    %165 = arith.maximumf %163, %164 : vector<64x16xf32>
    %c0_238 = arith.constant 0 : index
    %c0_239 = arith.constant 0 : index
    %166 = vector.load %arg23[%c0_238, %c0_239] : memref<256x16xf32, #tpu.memory_space<vmem>>, vector<64x16xf32>
    tpu.vector_store %arg23[%c0_238, %c0_239], %165 {strides = array<i32>} : memref<256x16xf32, #tpu.memory_space<vmem>>, vector<64x16xf32>,
    %c0_240 = arith.constant 0 : index
    %c0_241 = arith.constant 0 : index
    %167 = tpu.strided_load %arg23[%c0_240, %c0_241] {strides = array<i32: 2, 1>} : memref<256x16xf32, #tpu.memory_space<vmem>>, vector<32x16xf32>
    %c1_242 = arith.constant 1 : index
    %c0_243 = arith.constant 0 : index
    %168 = tpu.strided_load %arg23[%c1_242, %c0_243] {strides = array<i32: 2, 1>} : memref<256x16xf32, #tpu.memory_space<vmem>>, vector<32x16xf32>
    %169 = arith.maximumf %167, %168 : vector<32x16xf32>
    %170 = vector.shape_cast %169 : vector<32x16xf32> to vector<8x4x16xf32>
    %c0_244 = arith.constant 0 : index
    %c0_245 = arith.constant 0 : index
    %c0_246 = arith.constant 0 : index
    %171 = vector.load %arg24[%c0_244, %c0_245, %c0_246] : memref<16x8x16xf32, #tpu.memory_space<vmem>>, vector<8x4x16xf32>
    tpu.vector_store %arg24[%c0_244, %c0_245, %c0_246], %170 {strides = array<i32>} : memref<16x8x16xf32, #tpu.memory_space<vmem>>, vector<8x4x16xf32>,
    %c0_247 = arith.constant 0 : index
    %c0_248 = arith.constant 0 : index
    %c0_249 = arith.constant 0 : index
    %172 = tpu.strided_load %arg24[%c0_247, %c0_248, %c0_249] {strides = array<i32: 2, 1, 1>} : memref<16x8x16xf32, #tpu.memory_space<vmem>>, vector<4x4x16xf32>
    %c1_250 = arith.constant 1 : index
    %c0_251 = arith.constant 0 : index
    %c0_252 = arith.constant 0 : index
    %173 = tpu.strided_load %arg24[%c1_250, %c0_251, %c0_252] {strides = array<i32: 2, 1, 1>} : memref<16x8x16xf32, #tpu.memory_space<vmem>>, vector<4x4x16xf32>
    %174 = arith.maximumf %172, %173 : vector<4x4x16xf32>
    %c1_253 = arith.constant 1 : index
    %c1_254 = arith.constant 1 : index
    %c0_255 = arith.constant 0 : index
    %175 = vector.load %arg21[%c1_253, %c1_254, %c0_255] : memref<6x6x16xf32, #tpu.memory_space<vmem>>, vector<4x4x16xf32>
    tpu.vector_store %arg21[%c1_253, %c1_254, %c0_255], %174 {strides = array<i32>} : memref<6x6x16xf32, #tpu.memory_space<vmem>>, vector<4x4x16xf32>,
    %c0_256 = arith.constant 0 : index
    %c0_257 = arith.constant 0 : index
    %c0_258 = arith.constant 0 : index
    %176 = vector.load %arg21[%c0_256, %c0_257, %c0_258] : memref<6x6x16xf32, #tpu.memory_space<vmem>>, vector<4x4x16xf32>
    %177 = vector.shape_cast %176 : vector<4x4x16xf32> to vector<16x16xf32>
    %c0_259 = arith.constant 0 : index
    %c0_260 = arith.constant 0 : index
    %178 = vector.load %arg22[%c0_259, %c0_260] : memref<256x144xf32, #tpu.memory_space<vmem>>, vector<16x16xf32>
    tpu.vector_store %arg22[%c0_259, %c0_260], %177 {strides = array<i32>} : memref<256x144xf32, #tpu.memory_space<vmem>>, vector<16x16xf32>,
    %c0_261 = arith.constant 0 : index
    %c1_262 = arith.constant 1 : index
    %c0_263 = arith.constant 0 : index
    %179 = vector.load %arg21[%c0_261, %c1_262, %c0_263] : memref<6x6x16xf32, #tpu.memory_space<vmem>>, vector<4x4x16xf32>
    %180 = vector.shape_cast %179 : vector<4x4x16xf32> to vector<16x16xf32>
    %c0_264 = arith.constant 0 : index
    %c16_265 = arith.constant 16 : index
    %181 = vector.load %arg22[%c0_264, %c16_265] : memref<256x144xf32, #tpu.memory_space<vmem>>, vector<16x16xf32>
    tpu.vector_store %arg22[%c0_264, %c16_265], %180 {strides = array<i32>} : memref<256x144xf32, #tpu.memory_space<vmem>>, vector<16x16xf32>,
    %c0_266 = arith.constant 0 : index
    %c2_267 = arith.constant 2 : index
    %c0_268 = arith.constant 0 : index
    %182 = vector.load %arg21[%c0_266, %c2_267, %c0_268] : memref<6x6x16xf32, #tpu.memory_space<vmem>>, vector<4x4x16xf32>
    %183 = vector.shape_cast %182 : vector<4x4x16xf32> to vector<16x16xf32>
    %c0_269 = arith.constant 0 : index
    %c32_270 = arith.constant 32 : index
    %184 = vector.load %arg22[%c0_269, %c32_270] : memref<256x144xf32, #tpu.memory_space<vmem>>, vector<16x16xf32>
    tpu.vector_store %arg22[%c0_269, %c32_270], %183 {strides = array<i32>} : memref<256x144xf32, #tpu.memory_space<vmem>>, vector<16x16xf32>,
    %c1_271 = arith.constant 1 : index
    %c0_272 = arith.constant 0 : index
    %c0_273 = arith.constant 0 : index
    %185 = vector.load %arg21[%c1_271, %c0_272, %c0_273] : memref<6x6x16xf32, #tpu.memory_space<vmem>>, vector<4x4x16xf32>
    %186 = vector.shape_cast %185 : vector<4x4x16xf32> to vector<16x16xf32>
    %c0_274 = arith.constant 0 : index
    %c48_275 = arith.constant 48 : index
    %187 = vector.load %arg22[%c0_274, %c48_275] : memref<256x144xf32, #tpu.memory_space<vmem>>, vector<16x16xf32>
    tpu.vector_store %arg22[%c0_274, %c48_275], %186 {strides = array<i32>} : memref<256x144xf32, #tpu.memory_space<vmem>>, vector<16x16xf32>,
    %c1_276 = arith.constant 1 : index
    %c1_277 = arith.constant 1 : index
    %c0_278 = arith.constant 0 : index
    %188 = vector.load %arg21[%c1_276, %c1_277, %c0_278] : memref<6x6x16xf32, #tpu.memory_space<vmem>>, vector<4x4x16xf32>
    %189 = vector.shape_cast %188 : vector<4x4x16xf32> to vector<16x16xf32>
    %c0_279 = arith.constant 0 : index
    %c64_280 = arith.constant 64 : index
    %190 = vector.load %arg22[%c0_279, %c64_280] : memref<256x144xf32, #tpu.memory_space<vmem>>, vector<16x16xf32>
    tpu.vector_store %arg22[%c0_279, %c64_280], %189 {strides = array<i32>} : memref<256x144xf32, #tpu.memory_space<vmem>>, vector<16x16xf32>,
    %c1_281 = arith.constant 1 : index
    %c2_282 = arith.constant 2 : index
    %c0_283 = arith.constant 0 : index
    %191 = vector.load %arg21[%c1_281, %c2_282, %c0_283] : memref<6x6x16xf32, #tpu.memory_space<vmem>>, vector<4x4x16xf32>
    %192 = vector.shape_cast %191 : vector<4x4x16xf32> to vector<16x16xf32>
    %c0_284 = arith.constant 0 : index
    %c80_285 = arith.constant 80 : index
    %193 = vector.load %arg22[%c0_284, %c80_285] : memref<256x144xf32, #tpu.memory_space<vmem>>, vector<16x16xf32>
    tpu.vector_store %arg22[%c0_284, %c80_285], %192 {strides = array<i32>} : memref<256x144xf32, #tpu.memory_space<vmem>>, vector<16x16xf32>,
    %c2_286 = arith.constant 2 : index
    %c0_287 = arith.constant 0 : index
    %c0_288 = arith.constant 0 : index
    %194 = vector.load %arg21[%c2_286, %c0_287, %c0_288] : memref<6x6x16xf32, #tpu.memory_space<vmem>>, vector<4x4x16xf32>
    %195 = vector.shape_cast %194 : vector<4x4x16xf32> to vector<16x16xf32>
    %c0_289 = arith.constant 0 : index
    %c96_290 = arith.constant 96 : index
    %196 = vector.load %arg22[%c0_289, %c96_290] : memref<256x144xf32, #tpu.memory_space<vmem>>, vector<16x16xf32>
    tpu.vector_store %arg22[%c0_289, %c96_290], %195 {strides = array<i32>} : memref<256x144xf32, #tpu.memory_space<vmem>>, vector<16x16xf32>,
    %c2_291 = arith.constant 2 : index
    %c1_292 = arith.constant 1 : index
    %c0_293 = arith.constant 0 : index
    %197 = vector.load %arg21[%c2_291, %c1_292, %c0_293] : memref<6x6x16xf32, #tpu.memory_space<vmem>>, vector<4x4x16xf32>
    %198 = vector.shape_cast %197 : vector<4x4x16xf32> to vector<16x16xf32>
    %c0_294 = arith.constant 0 : index
    %c112_295 = arith.constant 112 : index
    %199 = vector.load %arg22[%c0_294, %c112_295] : memref<256x144xf32, #tpu.memory_space<vmem>>, vector<16x16xf32>
    tpu.vector_store %arg22[%c0_294, %c112_295], %198 {strides = array<i32>} : memref<256x144xf32, #tpu.memory_space<vmem>>, vector<16x16xf32>,
    %c2_296 = arith.constant 2 : index
    %c2_297 = arith.constant 2 : index
    %c0_298 = arith.constant 0 : index
    %200 = vector.load %arg21[%c2_296, %c2_297, %c0_298] : memref<6x6x16xf32, #tpu.memory_space<vmem>>, vector<4x4x16xf32>
    %201 = vector.shape_cast %200 : vector<4x4x16xf32> to vector<16x16xf32>
    %c0_299 = arith.constant 0 : index
    %c128_300 = arith.constant 128 : index
    %202 = vector.load %arg22[%c0_299, %c128_300] : memref<256x144xf32, #tpu.memory_space<vmem>>, vector<16x16xf32>
    tpu.vector_store %arg22[%c0_299, %c128_300], %201 {strides = array<i32>} : memref<256x144xf32, #tpu.memory_space<vmem>>, vector<16x16xf32>,
    %c0_301 = arith.constant 0 : index
    %c0_302 = arith.constant 0 : index
    %203 = vector.load %arg22[%c0_301, %c0_302] : memref<256x144xf32, #tpu.memory_space<vmem>>, vector<16x144xf32>
    %c0_303 = arith.constant 0 : index
    %c0_304 = arith.constant 0 : index
    %204 = vector.load %arg10[%c0_303, %c0_304] : memref<144x16xf32, #tpu.memory_space<vmem>>, vector<144x16xf32>
    %cst_305 = arith.constant dense<0.000000e+00> : vector<16x16xf32>
    %205 = tpu.matmul %203, %204, %cst_305 {dimension_numbers = #tpu.dot_dimension_numbers<[1], [0], [0], [1], [0, 0, 1, 1], [], []>} : vector<16x144xf32>, vector<144x16xf32>, vector<16x16xf32> -> vector<16x16xf32>
    %c0_306 = arith.constant 0 : index
    %c0_307 = arith.constant 0 : index
    %206 = vector.load %arg11[%c0_306, %c0_307] : memref<1x16xf32, #tpu.memory_space<vmem>>, vector<1x16xf32>
    %207 = vector.broadcast %206 : vector<1x16xf32> to vector<16x16xf32>
    %208 = arith.addf %205, %207 : vector<16x16xf32>
    %cst_308 = arith.constant 0.000000e+00 : f32
    %209 = vector.broadcast %cst_308 : f32 to vector<16x16xf32>
    %210 = arith.cmpf ogt, %208, %209 : vector<16x16xf32>
    %cst_309 = arith.constant 0.00999999977 : f32
    %211 = vector.broadcast %cst_309 : f32 to vector<16x16xf32>
    %212 = arith.mulf %211, %208 : vector<16x16xf32>
    %213 = arith.select %210, %208, %212 : vector<16x16xi1>, vector<16x16xf32>
    %214 = vector.shape_cast %213 : vector<16x16xf32> to vector<4x4x16xf32>
    %c1_310 = arith.constant 1 : index
    %c1_311 = arith.constant 1 : index
    %c0_312 = arith.constant 0 : index
    %215 = vector.load %arg21[%c1_310, %c1_311, %c0_312] : memref<6x6x16xf32, #tpu.memory_space<vmem>>, vector<4x4x16xf32>
    tpu.vector_store %arg21[%c1_310, %c1_311, %c0_312], %214 {strides = array<i32>} : memref<6x6x16xf32, #tpu.memory_space<vmem>>, vector<4x4x16xf32>,
    %c0_313 = arith.constant 0 : index
    %c0_314 = arith.constant 0 : index
    %c0_315 = arith.constant 0 : index
    %216 = vector.load %arg21[%c0_313, %c0_314, %c0_315] : memref<6x6x16xf32, #tpu.memory_space<vmem>>, vector<4x4x16xf32>
    %217 = vector.shape_cast %216 : vector<4x4x16xf32> to vector<16x16xf32>
    %c0_316 = arith.constant 0 : index
    %c0_317 = arith.constant 0 : index
    %218 = vector.load %arg22[%c0_316, %c0_317] : memref<256x144xf32, #tpu.memory_space<vmem>>, vector<16x16xf32>
    tpu.vector_store %arg22[%c0_316, %c0_317], %217 {strides = array<i32>} : memref<256x144xf32, #tpu.memory_space<vmem>>, vector<16x16xf32>,
    %c0_318 = arith.constant 0 : index
    %c1_319 = arith.constant 1 : index
    %c0_320 = arith.constant 0 : index
    %219 = vector.load %arg21[%c0_318, %c1_319, %c0_320] : memref<6x6x16xf32, #tpu.memory_space<vmem>>, vector<4x4x16xf32>
    %220 = vector.shape_cast %219 : vector<4x4x16xf32> to vector<16x16xf32>
    %c0_321 = arith.constant 0 : index
    %c16_322 = arith.constant 16 : index
    %221 = vector.load %arg22[%c0_321, %c16_322] : memref<256x144xf32, #tpu.memory_space<vmem>>, vector<16x16xf32>
    tpu.vector_store %arg22[%c0_321, %c16_322], %220 {strides = array<i32>} : memref<256x144xf32, #tpu.memory_space<vmem>>, vector<16x16xf32>,
    %c0_323 = arith.constant 0 : index
    %c2_324 = arith.constant 2 : index
    %c0_325 = arith.constant 0 : index
    %222 = vector.load %arg21[%c0_323, %c2_324, %c0_325] : memref<6x6x16xf32, #tpu.memory_space<vmem>>, vector<4x4x16xf32>
    %223 = vector.shape_cast %222 : vector<4x4x16xf32> to vector<16x16xf32>
    %c0_326 = arith.constant 0 : index
    %c32_327 = arith.constant 32 : index
    %224 = vector.load %arg22[%c0_326, %c32_327] : memref<256x144xf32, #tpu.memory_space<vmem>>, vector<16x16xf32>
    tpu.vector_store %arg22[%c0_326, %c32_327], %223 {strides = array<i32>} : memref<256x144xf32, #tpu.memory_space<vmem>>, vector<16x16xf32>,
    %c1_328 = arith.constant 1 : index
    %c0_329 = arith.constant 0 : index
    %c0_330 = arith.constant 0 : index
    %225 = vector.load %arg21[%c1_328, %c0_329, %c0_330] : memref<6x6x16xf32, #tpu.memory_space<vmem>>, vector<4x4x16xf32>
    %226 = vector.shape_cast %225 : vector<4x4x16xf32> to vector<16x16xf32>
    %c0_331 = arith.constant 0 : index
    %c48_332 = arith.constant 48 : index
    %227 = vector.load %arg22[%c0_331, %c48_332] : memref<256x144xf32, #tpu.memory_space<vmem>>, vector<16x16xf32>
    tpu.vector_store %arg22[%c0_331, %c48_332], %226 {strides = array<i32>} : memref<256x144xf32, #tpu.memory_space<vmem>>, vector<16x16xf32>,
    %c1_333 = arith.constant 1 : index
    %c1_334 = arith.constant 1 : index
    %c0_335 = arith.constant 0 : index
    %228 = vector.load %arg21[%c1_333, %c1_334, %c0_335] : memref<6x6x16xf32, #tpu.memory_space<vmem>>, vector<4x4x16xf32>
    %229 = vector.shape_cast %228 : vector<4x4x16xf32> to vector<16x16xf32>
    %c0_336 = arith.constant 0 : index
    %c64_337 = arith.constant 64 : index
    %230 = vector.load %arg22[%c0_336, %c64_337] : memref<256x144xf32, #tpu.memory_space<vmem>>, vector<16x16xf32>
    tpu.vector_store %arg22[%c0_336, %c64_337], %229 {strides = array<i32>} : memref<256x144xf32, #tpu.memory_space<vmem>>, vector<16x16xf32>,
    %c1_338 = arith.constant 1 : index
    %c2_339 = arith.constant 2 : index
    %c0_340 = arith.constant 0 : index
    %231 = vector.load %arg21[%c1_338, %c2_339, %c0_340] : memref<6x6x16xf32, #tpu.memory_space<vmem>>, vector<4x4x16xf32>
    %232 = vector.shape_cast %231 : vector<4x4x16xf32> to vector<16x16xf32>
    %c0_341 = arith.constant 0 : index
    %c80_342 = arith.constant 80 : index
    %233 = vector.load %arg22[%c0_341, %c80_342] : memref<256x144xf32, #tpu.memory_space<vmem>>, vector<16x16xf32>
    tpu.vector_store %arg22[%c0_341, %c80_342], %232 {strides = array<i32>} : memref<256x144xf32, #tpu.memory_space<vmem>>, vector<16x16xf32>,
    %c2_343 = arith.constant 2 : index
    %c0_344 = arith.constant 0 : index
    %c0_345 = arith.constant 0 : index
    %234 = vector.load %arg21[%c2_343, %c0_344, %c0_345] : memref<6x6x16xf32, #tpu.memory_space<vmem>>, vector<4x4x16xf32>
    %235 = vector.shape_cast %234 : vector<4x4x16xf32> to vector<16x16xf32>
    %c0_346 = arith.constant 0 : index
    %c96_347 = arith.constant 96 : index
    %236 = vector.load %arg22[%c0_346, %c96_347] : memref<256x144xf32, #tpu.memory_space<vmem>>, vector<16x16xf32>
    tpu.vector_store %arg22[%c0_346, %c96_347], %235 {strides = array<i32>} : memref<256x144xf32, #tpu.memory_space<vmem>>, vector<16x16xf32>,
    %c2_348 = arith.constant 2 : index
    %c1_349 = arith.constant 1 : index
    %c0_350 = arith.constant 0 : index
    %237 = vector.load %arg21[%c2_348, %c1_349, %c0_350] : memref<6x6x16xf32, #tpu.memory_space<vmem>>, vector<4x4x16xf32>
    %238 = vector.shape_cast %237 : vector<4x4x16xf32> to vector<16x16xf32>
    %c0_351 = arith.constant 0 : index
    %c112_352 = arith.constant 112 : index
    %239 = vector.load %arg22[%c0_351, %c112_352] : memref<256x144xf32, #tpu.memory_space<vmem>>, vector<16x16xf32>
    tpu.vector_store %arg22[%c0_351, %c112_352], %238 {strides = array<i32>} : memref<256x144xf32, #tpu.memory_space<vmem>>, vector<16x16xf32>,
    %c2_353 = arith.constant 2 : index
    %c2_354 = arith.constant 2 : index
    %c0_355 = arith.constant 0 : index
    %240 = vector.load %arg21[%c2_353, %c2_354, %c0_355] : memref<6x6x16xf32, #tpu.memory_space<vmem>>, vector<4x4x16xf32>
    %241 = vector.shape_cast %240 : vector<4x4x16xf32> to vector<16x16xf32>
    %c0_356 = arith.constant 0 : index
    %c128_357 = arith.constant 128 : index
    %242 = vector.load %arg22[%c0_356, %c128_357] : memref<256x144xf32, #tpu.memory_space<vmem>>, vector<16x16xf32>
    tpu.vector_store %arg22[%c0_356, %c128_357], %241 {strides = array<i32>} : memref<256x144xf32, #tpu.memory_space<vmem>>, vector<16x16xf32>,
    %c0_358 = arith.constant 0 : index
    %c0_359 = arith.constant 0 : index
    %243 = vector.load %arg22[%c0_358, %c0_359] : memref<256x144xf32, #tpu.memory_space<vmem>>, vector<16x144xf32>
    %c0_360 = arith.constant 0 : index
    %c0_361 = arith.constant 0 : index
    %244 = vector.load %arg12[%c0_360, %c0_361] : memref<144x16xf32, #tpu.memory_space<vmem>>, vector<144x16xf32>
    %cst_362 = arith.constant dense<0.000000e+00> : vector<16x16xf32>
    %245 = tpu.matmul %243, %244, %cst_362 {dimension_numbers = #tpu.dot_dimension_numbers<[1], [0], [0], [1], [0, 0, 1, 1], [], []>} : vector<16x144xf32>, vector<144x16xf32>, vector<16x16xf32> -> vector<16x16xf32>
    %c0_363 = arith.constant 0 : index
    %c0_364 = arith.constant 0 : index
    %246 = vector.load %arg13[%c0_363, %c0_364] : memref<1x16xf32, #tpu.memory_space<vmem>>, vector<1x16xf32>
    %247 = vector.broadcast %246 : vector<1x16xf32> to vector<16x16xf32>
    %248 = arith.addf %245, %247 : vector<16x16xf32>
    %cst_365 = arith.constant 0.000000e+00 : f32
    %249 = vector.broadcast %cst_365 : f32 to vector<16x16xf32>
    %250 = arith.maximumf %248, %249 : vector<16x16xf32>
    %c0_366 = arith.constant 0 : index
    %c0_367 = arith.constant 0 : index
    %251 = vector.load %arg23[%c0_366, %c0_367] : memref<256x16xf32, #tpu.memory_space<vmem>>, vector<16x16xf32>
    tpu.vector_store %arg23[%c0_366, %c0_367], %250 {strides = array<i32>} : memref<256x16xf32, #tpu.memory_space<vmem>>, vector<16x16xf32>,
    %c0_368 = arith.constant 0 : index
    %c0_369 = arith.constant 0 : index
    %252 = tpu.strided_load %arg23[%c0_368, %c0_369] {strides = array<i32: 2, 1>} : memref<256x16xf32, #tpu.memory_space<vmem>>, vector<8x16xf32>
    %c1_370 = arith.constant 1 : index
    %c0_371 = arith.constant 0 : index
    %253 = tpu.strided_load %arg23[%c1_370, %c0_371] {strides = array<i32: 2, 1>} : memref<256x16xf32, #tpu.memory_space<vmem>>, vector<8x16xf32>
    %254 = arith.maximumf %252, %253 : vector<8x16xf32>
    %c0_372 = arith.constant 0 : index
    %c0_373 = arith.constant 0 : index
    %255 = vector.load %arg15[%c0_372, %c0_373] : memref<1x2000xf32, #tpu.memory_space<vmem>>, vector<1x2000xf32>
    %256 = vector.extract_strided_slice %254 {offsets = [0, 0], sizes = [1, 16], strides = [1, 1]} : vector<8x16xf32> to vector<1x16xf32>
    %257 = vector.extract_strided_slice %254 {offsets = [2, 0], sizes = [1, 16], strides = [1, 1]} : vector<8x16xf32> to vector<1x16xf32>
    %258 = arith.maximumf %256, %257 : vector<1x16xf32>
    %259 = arith.truncf %258 : vector<1x16xf32> to vector<1x16xbf16>
    %c0_374 = arith.constant 0 : index
    %c0_375 = arith.constant 0 : index
    %260 = vector.load %arg14[%c0_374, %c0_375] : memref<64x2000xbf16, #tpu.memory_space<vmem>>, vector<16x2000xbf16>
    %cst_376 = arith.constant dense<0.000000e+00> : vector<1x2000xf32>
    %261 = tpu.matmul %259, %260, %cst_376 {dimension_numbers = #tpu.dot_dimension_numbers<[1], [0], [0], [1], [0, 0, 1, 1], [], []>} : vector<1x16xbf16>, vector<16x2000xbf16>, vector<1x2000xf32> -> vector<1x2000xf32>
    %262 = arith.addf %255, %261 : vector<1x2000xf32>
    %263 = vector.extract_strided_slice %254 {offsets = [1, 0], sizes = [1, 16], strides = [1, 1]} : vector<8x16xf32> to vector<1x16xf32>
    %264 = vector.extract_strided_slice %254 {offsets = [3, 0], sizes = [1, 16], strides = [1, 1]} : vector<8x16xf32> to vector<1x16xf32>
    %265 = arith.maximumf %263, %264 : vector<1x16xf32>
    %266 = arith.truncf %265 : vector<1x16xf32> to vector<1x16xbf16>
    %c16_377 = arith.constant 16 : index
    %c0_378 = arith.constant 0 : index
    %267 = vector.load %arg14[%c16_377, %c0_378] : memref<64x2000xbf16, #tpu.memory_space<vmem>>, vector<16x2000xbf16>
    %cst_379 = arith.constant dense<0.000000e+00> : vector<1x2000xf32>
    %268 = tpu.matmul %266, %267, %cst_379 {dimension_numbers = #tpu.dot_dimension_numbers<[1], [0], [0], [1], [0, 0, 1, 1], [], []>} : vector<1x16xbf16>, vector<16x2000xbf16>, vector<1x2000xf32> -> vector<1x2000xf32>
    %269 = arith.addf %262, %268 : vector<1x2000xf32>
    %270 = vector.extract_strided_slice %254 {offsets = [4, 0], sizes = [1, 16], strides = [1, 1]} : vector<8x16xf32> to vector<1x16xf32>
    %271 = vector.extract_strided_slice %254 {offsets = [6, 0], sizes = [1, 16], strides = [1, 1]} : vector<8x16xf32> to vector<1x16xf32>
    %272 = arith.maximumf %270, %271 : vector<1x16xf32>
    %273 = arith.truncf %272 : vector<1x16xf32> to vector<1x16xbf16>
    %c32_380 = arith.constant 32 : index
    %c0_381 = arith.constant 0 : index
    %274 = vector.load %arg14[%c32_380, %c0_381] : memref<64x2000xbf16, #tpu.memory_space<vmem>>, vector<16x2000xbf16>
    %cst_382 = arith.constant dense<0.000000e+00> : vector<1x2000xf32>
    %275 = tpu.matmul %273, %274, %cst_382 {dimension_numbers = #tpu.dot_dimension_numbers<[1], [0], [0], [1], [0, 0, 1, 1], [], []>} : vector<1x16xbf16>, vector<16x2000xbf16>, vector<1x2000xf32> -> vector<1x2000xf32>
    %276 = arith.addf %269, %275 : vector<1x2000xf32>
    %277 = vector.extract_strided_slice %254 {offsets = [5, 0], sizes = [1, 16], strides = [1, 1]} : vector<8x16xf32> to vector<1x16xf32>
    %278 = vector.extract_strided_slice %254 {offsets = [7, 0], sizes = [1, 16], strides = [1, 1]} : vector<8x16xf32> to vector<1x16xf32>
    %279 = arith.maximumf %277, %278 : vector<1x16xf32>
    %280 = arith.truncf %279 : vector<1x16xf32> to vector<1x16xbf16>
    %c48_383 = arith.constant 48 : index
    %c0_384 = arith.constant 0 : index
    %281 = vector.load %arg14[%c48_383, %c0_384] : memref<64x2000xbf16, #tpu.memory_space<vmem>>, vector<16x2000xbf16>
    %cst_385 = arith.constant dense<0.000000e+00> : vector<1x2000xf32>
    %282 = tpu.matmul %280, %281, %cst_385 {dimension_numbers = #tpu.dot_dimension_numbers<[1], [0], [0], [1], [0, 0, 1, 1], [], []>} : vector<1x16xbf16>, vector<16x2000xbf16>, vector<1x2000xf32> -> vector<1x2000xf32>
    %283 = arith.addf %276, %282 : vector<1x2000xf32>
    %284 = arith.truncf %283 : vector<1x2000xf32> to vector<1x2000xbf16>
    %c0_386 = arith.constant 0 : index
    %c0_387 = arith.constant 0 : index
    %285 = vector.load %arg16[%c0_386, %c0_387] : memref<2000x256xbf16, #tpu.memory_space<vmem>>, vector<2000x256xbf16>
    %cst_388 = arith.constant dense<0.000000e+00> : vector<1x256xf32>
    %286 = tpu.matmul %284, %285, %cst_388 {dimension_numbers = #tpu.dot_dimension_numbers<[1], [0], [0], [1], [0, 0, 1, 1], [], []>} : vector<1x2000xbf16>, vector<2000x256xbf16>, vector<1x256xf32> -> vector<1x256xf32>
    %c0_389 = arith.constant 0 : index
    %c0_390 = arith.constant 0 : index
    %287 = vector.load %arg17[%c0_389, %c0_390] : memref<1x256xf32, #tpu.memory_space<vmem>>, vector<1x256xf32>
    %288 = arith.addf %286, %287 : vector<1x256xf32>
    %c0_391 = arith.constant 0 : index
    %c0_392 = arith.constant 0 : index
    %c0_393 = arith.constant 0 : index
    %289 = vector.load %arg18[%c0_391, %c0_392, %c0_393] : memref<1x1x256xf32, #tpu.memory_space<vmem>>, vector<1x1x256xf32>
    %290 = vector.shape_cast %289 : vector<1x1x256xf32> to vector<1x256xf32>
    %291 = vector.shape_cast %288 : vector<1x256xf32> to vector<1x1x256xf32>
    tpu.vector_store %arg18[%c0_391, %c0_392, %c0_393], %291 {strides = array<i32>} : memref<1x1x256xf32, #tpu.memory_space<vmem>>, vector<1x1x256xf32>,
    return
  }
  func.func @transform_0(%arg0: i32) -> (i32, i32, i32, i32) {
    %c0_i32 = arith.constant 0 : i32
    %c0_i32_0 = arith.constant 0 : i32
    %c0_i32_1 = arith.constant 0 : i32
    %c0_i32_2 = arith.constant 0 : i32
    return %arg0, %c0_i32, %c0_i32_0, %c0_i32_1 : i32, i32, i32, i32
  }
  func.func @transform_1(%arg0: i32) -> (i32, i32) {
    %c0_i32 = arith.constant 0 : i32
    %c0_i32_0 = arith.constant 0 : i32
    %c0_i32_1 = arith.constant 0 : i32
    return %c0_i32, %c0_i32_0 : i32, i32
  }
  func.func @transform_2(%arg0: i32) -> (i32, i32) {
    %c0_i32 = arith.constant 0 : i32
    %c0_i32_0 = arith.constant 0 : i32
    %c0_i32_1 = arith.constant 0 : i32
    return %c0_i32, %c0_i32_0 : i32, i32
  }
  func.func @transform_3(%arg0: i32) -> (i32, i32) {
    %c0_i32 = arith.constant 0 : i32
    %c0_i32_0 = arith.constant 0 : i32
    %c0_i32_1 = arith.constant 0 : i32
    return %c0_i32, %c0_i32_0 : i32, i32
  }
  func.func @transform_4(%arg0: i32) -> (i32, i32) {
    %c0_i32 = arith.constant 0 : i32
    %c0_i32_0 = arith.constant 0 : i32
    %c0_i32_1 = arith.constant 0 : i32
    return %c0_i32, %c0_i32_0 : i32, i32
  }
  func.func @transform_5(%arg0: i32) -> (i32, i32) {
    %c0_i32 = arith.constant 0 : i32
    %c0_i32_0 = arith.constant 0 : i32
    %c0_i32_1 = arith.constant 0 : i32
    return %c0_i32, %c0_i32_0 : i32, i32
  }
  func.func @transform_6(%arg0: i32) -> (i32, i32) {
    %c0_i32 = arith.constant 0 : i32
    %c0_i32_0 = arith.constant 0 : i32
    %c0_i32_1 = arith.constant 0 : i32
    return %c0_i32, %c0_i32_0 : i32, i32
  }
  func.func @transform_7(%arg0: i32) -> (i32, i32) {
    %c0_i32 = arith.constant 0 : i32
    %c0_i32_0 = arith.constant 0 : i32
    %c0_i32_1 = arith.constant 0 : i32
    return %c0_i32, %c0_i32_0 : i32, i32
  }
  func.func @transform_8(%arg0: i32) -> (i32, i32) {
    %c0_i32 = arith.constant 0 : i32
    %c0_i32_0 = arith.constant 0 : i32
    %c0_i32_1 = arith.constant 0 : i32
    return %c0_i32, %c0_i32_0 : i32, i32
  }
  func.func @transform_9(%arg0: i32) -> (i32, i32) {
    %c0_i32 = arith.constant 0 : i32
    %c0_i32_0 = arith.constant 0 : i32
    %c0_i32_1 = arith.constant 0 : i32
    return %c0_i32, %c0_i32_0 : i32, i32
  }
  func.func @transform_10(%arg0: i32) -> (i32, i32) {
    %c0_i32 = arith.constant 0 : i32
    %c0_i32_0 = arith.constant 0 : i32
    %c0_i32_1 = arith.constant 0 : i32
    return %c0_i32, %c0_i32_0 : i32, i32
  }
  func.func @transform_11(%arg0: i32) -> (i32, i32) {
    %c0_i32 = arith.constant 0 : i32
    %c0_i32_0 = arith.constant 0 : i32
    %c0_i32_1 = arith.constant 0 : i32
    return %c0_i32, %c0_i32_0 : i32, i32
  }
  func.func @transform_12(%arg0: i32) -> (i32, i32) {
    %c0_i32 = arith.constant 0 : i32
    %c0_i32_0 = arith.constant 0 : i32
    %c0_i32_1 = arith.constant 0 : i32
    return %c0_i32, %c0_i32_0 : i32, i32
  }
  func.func @transform_13(%arg0: i32) -> (i32, i32) {
    %c0_i32 = arith.constant 0 : i32
    %c0_i32_0 = arith.constant 0 : i32
    %c0_i32_1 = arith.constant 0 : i32
    return %c0_i32, %c0_i32_0 : i32, i32
  }
  func.func @transform_14(%arg0: i32) -> (i32, i32) {
    %c0_i32 = arith.constant 0 : i32
    %c0_i32_0 = arith.constant 0 : i32
    %c0_i32_1 = arith.constant 0 : i32
    return %c0_i32, %c0_i32_0 : i32, i32
  }
  func.func @transform_15(%arg0: i32) -> (i32, i32) {
    %c0_i32 = arith.constant 0 : i32
    %c0_i32_0 = arith.constant 0 : i32
    %c0_i32_1 = arith.constant 0 : i32
    return %c0_i32, %c0_i32_0 : i32, i32
  }
  func.func @transform_16(%arg0: i32) -> (i32, i32) {
    %c0_i32 = arith.constant 0 : i32
    %c0_i32_0 = arith.constant 0 : i32
    %c0_i32_1 = arith.constant 0 : i32
    return %c0_i32, %c0_i32_0 : i32, i32
  }
  func.func @transform_17(%arg0: i32) -> (i32, i32, i32) {
    %c0_i32 = arith.constant 0 : i32
    %c0_i32_0 = arith.constant 0 : i32
    %c0_i32_1 = arith.constant 0 : i32
    return %arg0, %c0_i32, %c0_i32_0 : i32, i32, i32
  }
}

</mosaic_0001>

<bundles_post_ra>
// kernel: rmm_nn_4_forward.1
= control target key start
LH: loop header
LB: loop body
LE: loop exit
PB: predicated region body
PF: predicated region fallthrough
CT: control target
= control target key end

     0   :  { %s15674_s0 = inlined_call_operand.vmem [shape: f32[2,16,16,2], index: 0, kind: input, shape index: {}]   ;;  %s15675_s1 = inlined_call_operand.vmem [shape: f32[18,16], index: 1, kind: input, shape index: {}]   ;;  %s15676_s2 = inlined_call_operand.vmem [shape: f32[1,16], index: 2, kind: input, shape index: {}]   ;;  %s15677_s3 = inlined_call_operand.vmem [shape: f32[144,16], index: 3, kind: input, shape index: {}]   ;;  %s15678_s4 = inlined_call_operand.vmem [shape: f32[1,16], index: 4, kind: input, shape index: {}]   ;;  %s15679_s5 = inlined_call_operand.vmem [shape: f32[144,16], index: 5, kind: input, shape index: {}]   ;;  %s15680_s6 = inlined_call_operand.vmem [shape: f32[1,16], index: 6, kind: input, shape index: {}]   ;;  %s15681_s7 = inlined_call_operand.vmem [shape: f32[144,16], index: 7, kind: input, shape index: {}]   ;;  %s15682_s8 = inlined_call_operand.vmem [shape: f32[1,16], index: 8, kind: input, shape index: {}]   ;;  %s15683_s9 = inlined_call_operand.vmem [shape: f32[144,16], index: 9, kind: input, shape index: {}]   ;;  %s15684_s10 = inlined_call_operand.vmem [shape: f32[1,16], index: 10, kind: input, shape index: {}]   ;;  %s15685_s11 = inlined_call_operand.vmem [shape: f32[144,16], index: 11, kind: input, shape index: {}]   ;;  %s15686_s12 = inlined_call_operand.vmem [shape: f32[1,16], index: 12, kind: input, shape index: {}]   ;;  %s15687_s13 = inlined_call_operand.vmem [shape: bf16[64,2000], index: 13, kind: input, shape index: {}]   ;;  %s15688_s14 = inlined_call_operand.vmem [shape: f32[1,2000], index: 14, kind: input, shape index: {}]   ;;  %s15689_s15 = inlined_call_operand.hbm [shape: bf16[2000,256], index: 15, kind: input, shape index: {}]   ;;  %s15690_s16 = inlined_call_operand.vmem [shape: f32[1,256], index: 16, kind: input, shape index: {}]   ;;  %s15691_s17 = inlined_call_operand.vmem [shape: f32[2,1,256], index: 17, kind: output, shape index: {}]  }
   0x1   :  { %15711 = sst [smem:[#allocation11_spill]] %s15674_s0 }
   0x2   :  { %15712 = sst [smem:[#allocation12_spill]] %s15675_s1 }
   0x3   :  { %15713 = sst [smem:[#allocation13_spill]] %s15676_s2 }
   0x4   :  { %15714 = sst [smem:[#allocation14_spill]] %s15677_s3 }
   0x5   :  { %15715 = sst [smem:[#allocation15_spill]] %s15678_s4 }
   0x6   :  { %15716 = sst [smem:[#allocation16_spill]] %s15679_s5 }
   0x7   :  { %15717 = sst [smem:[#allocation17_spill]] %s15680_s6 }
   0x8   :  { %22 = vsyncpa [#allocation9], 0  ;;  %s12093_s24 = smov 0  }
   0x9 LB: > { %s12099_s25 = sadd.s32 4294967295, %s11980_s24   ;;  %p10786_p0 = scmp.ge.s32.totalorder %s11980_s24, 1  ;;  %s11980_s24 = sphi %s12093_s24, %s28_s24  }
   0xa   : > { %p421_p1 = scmp.lt.s32.totalorder %s11980_s24, 3  ;;  %s11982_s26 = smov [#allocation8]  }
   0xb   : > { %s475_s27 = sshll.u32 %s11982_s26, 4  ;;  %p15693_p3 = scmp.eq.s32.totalorder %s12099_s25, 0  ;;  %s476_s27 = int_to_ptr.vmem [resolvable:$true] %s475_s27 }
   0xc   : > { %p12103_p2 = pnand %p10786_p0, %p421_p1  ;;  %s11942_s18 = scalar_lea.hbm %s15689_s15, 32000 }
   0xd   : > { %p11943_p6 = scmp.ne.s32.totalorder %s15689_s15, %s11942_s18  ;;  %p11949_p10 = scmp.lt.u32.totalorder %s11942_s18, %s15689_s15 }
   0xe   : > { %s15718_s28 = scalar_select %p12103_p2, 1, 0 }
   0xf   : > { %p11493_p4 = pneg %p12103_p2 }
  0x11   : > { %p12112_p5 = pnand %p15693_p3, %p11493_p4 }
  0x13   : > { %p11944_p7 = pneg %p12112_p5 }
  0x15   : > { %p11945_p8 = pnand %p11944_p7, %p11943_p6 }
  0x17   : > { %p11946_p9 = pneg %p11945_p8 }
  0x19   : > { %p11951_p11 = pnand %p11949_p10, %p11946_p9 }
  0x1b   : > { %11954 = shalt.err (!%p11951_p11)
}
  0x1c   : > { %s11955_s22 = scalar_lea.vmem %s476_s27, 32000  ;;  %p11963_p1 = scmp.lt.s32.totalorder %s476_s27, %s476_s27 }
  0x1d   : > { %p11956_p12 = scmp.ne.s32.totalorder %s476_s27, %s11955_s22  ;;  %p11964_p4 = scmp.lt.s32.totalorder %s11955_s22, %s11955_s22 }
  0x1f   : > { %p11958_p13 = pnand %p11956_p12, %p11944_p7  ;;  %p11965_p3 = por %p11964_p4, %p11963_p1 }
  0x21   : > { %p11959_p0 = pneg %p11958_p13 }
  0x23   : > { %p11966_p2 = pnand %p11965_p3, %p11959_p0 }
  0x25   : > { %11969 = shalt.err (!%p11966_p2)
}
  0x26   : > { %s11983_s23 = smov 128   ;;  %s11984_s26 = smov 8  }
  0x27   : > { %11496 = dma.hbm_to_vmem [thread:$0]  (!%p12112_p5), %s15689_s15, 32000, %s476_s27, [#allocation9], %s11983_s23, %s11983_s23, %s11984_s26  }
  0x28   : > { %p15720_p6 = scmp.ne.s32.totalorder %s15718_s28, 0 }
  0x29   : > { %p15721_p8 = scmp.eq.s32.totalorder (!%p15720_p6), %s12099_s25, 0 }
  0x2a   : > { %502 = sbr.rel (%p15720_p6) target bundleno = 3651 (0xe43), region = 88 }
  0x31   : > { %11975 = dma.done.wait (%p15721_p8), [#allocation9], 32000   ;;  %p15722_p7 = pmov %p15721_p8 }
  0x32   : > { %vm563_vm0 = vcmask 130048   ;;  %v11985_v0 = vmov 0.0   ;;  %vm566_vm1 = vcmask 123904   ;;  %p553_p2 = scmp.lt.s32.totalorder %s12099_s25, 1  ;;  %vm679_vm2 = vcmask 15360   ;;  %s15723_s18 = sld [smem:[#allocation11_spill]] }
  0x33   : > { %11977 = vsyncadd (%p15722_p7), [#allocation9], 4294935296  ;;  %564 = vst.msk [vmem:[#allocation2] sm:$0xff] %vm563_vm0, %v11985_v0  ;;  %s15695_s1 = smov 4   ;;  %s11987_s20 = smov 2   ;;  %vm2460_vm3 = vcmask 1041408  }
  0x34   : > { %565 = vst.msk [vmem:[#allocation2 + $0x8] sm:$0xff] %vm563_vm0, %v11985_v0  ;;  %568 = vst.msk [vmem:[#allocation2 + $0x18] sm:$0xff] %vm563_vm0, %v11985_v0  ;;  %s15739_s25 = smov (!%p553_p2, %s12099_s25), 1  ;;  %s11988_s21 = smov 6   ;;  %vm936_vm4 = vcmask 31760   ;;  %vm1129_vm5 = vcmask 48160  }
  0x35   : > { %569 = vst.msk [vmem:[#allocation2 + $0x20] sm:$0xff] %vm563_vm0, %v11985_v0  ;;  %571 = vst.msk [vmem:[#allocation2 + $0x30] sm:$0xff] %vm563_vm0, %v11985_v0  ;;  %s11234_s27 = sshll.u32 %s15739_s25, 8  ;;  %s11989_s22 = smov 8   ;;  %vm1322_vm6 = vcmask 64560   ;;  %vm1515_vm7 = vcmask 80960  }
  0x36   : > { %572 = vst.msk [vmem:[#allocation2 + $0x38] sm:$0xff] %vm563_vm0, %v11985_v0  ;;  %574 = vst.msk [vmem:[#allocation2 + $0x48] sm:$0xff] %vm563_vm0, %v11985_v0  ;;  %s11990_s23 = smov 10   ;;  %s11991_s26 = smov 12   ;;  %vm1708_vm8 = vcmask 97360   ;;  %vm1902_vm9 = vcmask 113760  }
  0x37   : > { %575 = vst.msk [vmem:[#allocation2 + $0x50] sm:$0xff] %vm563_vm0, %v11985_v0  ;;  %577 = vst.msk [vmem:[#allocation2 + $0x60] sm:$0xff] %vm563_vm0, %v11985_v0  ;;  %s11992_s0 = smov 14   ;;  %s15724_s28 = sld [smem:[#allocation12_spill]]  ;;  %vm2095_vm10 = vcmask 130160   ;;  %vm2288_vm11 = vcmask 146560  }
  0x38   : > { %578 = vst.msk [vmem:[#allocation2 + $0x68] sm:$0xff] %vm563_vm0, %v11985_v0  ;;  %580 = vst.msk [vmem:[#allocation2 + $0x78] sm:$0xff] %vm563_vm0, %v11985_v0  ;;  %s12296_s19 = scalar_lea.vmem %s15723_s18, %s11234_s27  ;;  %s15725_s29 = smov 4   ;;  %vm2363_vm12 = vcmask 146432   ;;  %vm2977_vm13 = vcmask 261248   ;;  %vm3170_vm14 = vcmask 392448  }
  0x39   : > { %581 = vst.msk [vmem:[#allocation2 + $0x80] sm:$0xff] %vm563_vm0, %v11985_v0  ;;  %583 = vst.msk [vmem:[#allocation2 + $0x90] sm:$0xff] %vm563_vm0, %v11985_v0  ;;  %v646_v1 = vld [vmem:[%s12296_s19] sm:$0xff]  ;;  %v647_v2 = vld [vmem:[%s12296_s19 + $0x8] sm:$0xff]  ;;  %s15726_s2 = sld [smem:[#allocation13_spill]]  ;;  %s15727_s3 = sld [smem:[#allocation14_spill]] }
  0x3a   : > { %584 = vst.msk [vmem:[#allocation2 + $0x98] sm:$0xff] %vm563_vm0, %v11985_v0  ;;  %586 = vst.msk [vmem:[#allocation2 + $0xa8] sm:$0xff] %vm563_vm0, %v11985_v0  ;;  %v648_v3 = vld [vmem:[%s12296_s19 + $0x10] sm:$0xff]  ;;  %v649_v6 = vld [vmem:[%s12296_s19 + $0x18] sm:$0xff]  ;;  %s15701_s30 = smov 32   ;;  %s15699_s27 = smov 96  }
  0x3b   : > { %587 = vst.msk [vmem:[#allocation2 + $0xb0] sm:$0xff] %vm563_vm0, %v11985_v0  ;;  %589 = vst.msk [vmem:[#allocation2 + $0xc0] sm:$0xff] %vm563_vm0, %v11985_v0  ;;  %v969_v4 = vld [vmem:[#allocation2 + $0x2] sm:$0xff]  ;;  %v652_v11 = vld [vmem:[%s12296_s19 + $0x30] sm:$0xff]  ;;  %vm3363_vm15 = vcmask 523648   ;;  %s15728_s4 = sld [smem:[#allocation15_spill]] }
  0x3c   : > { %590 = vst.msk [vmem:[#allocation2 + $0xc8] sm:$0xff] %vm563_vm0, %v11985_v0  ;;  %592 = vst.msk [vmem:[#allocation2 + $0xd8] sm:$0xff] %vm563_vm0, %v11985_v0  ;;  %v776_v5 = vld [vmem:[#allocation2 + $0x1] sm:$0xff]  ;;  %1033 = vrot.lane.b32.xlu1 %v969_v4, %s15695_s1  ;;  %v653_v12 = vld [vmem:[%s12296_s19 + $0x38] sm:$0xff]  ;;  %s15729_s5 = sld [smem:[#allocation16_spill]]  ;;  %s15733_s6 = sld [smem:[#allocation17_spill]] }
  0x3d   : > { %593 = vst.msk [vmem:[#allocation2 + $0xe0] sm:$0xff] %vm563_vm0, %v11985_v0  ;;  %595 = vst.msk [vmem:[#allocation2 + $0xf0] sm:$0xff] %vm563_vm0, %v11985_v0  ;;  %840 = vrot.lane.b32.xlu0 %v776_v5, %s11987_s20  ;;  %v650_v9 = vld [vmem:[%s12296_s19 + $0x20] sm:$0xff]  ;;  %v651_v10 = vld [vmem:[%s12296_s19 + $0x28] sm:$0xff]  ;;  %s15734_s18 = smov 48  }
  0x3e   : > { %596 = vst.msk [vmem:[#allocation2 + $0xf8] sm:$0xff] %vm563_vm0, %v11985_v0  ;;  %598 = vst.msk [vmem:[#allocation2 + $0x108] sm:$0xff] %vm563_vm0, %v11985_v0  ;;  %v12316_v13 = vld [vmem:[#allocation2] sm:$0xff]  ;;  %v655_v15 = vld [vmem:[%s12296_s19 + $0x48] sm:$0xff] }
  0x3f   : > { %599 = vst.msk [vmem:[#allocation2 + $0x110] sm:$0xff] %vm563_vm0, %v11985_v0  ;;  %601 = vst.msk [vmem:[#allocation2 + $0x120] sm:$0xff] %vm563_vm0, %v11985_v0  ;;  %v654_v14 = vld [vmem:[%s12296_s19 + $0x40] sm:$0xff]  ;;  %v713_v16 = vld [vmem:[#allocation2 + $0x8] sm:$0xff] }
  0x40   : > { %602 = vst.msk [vmem:[#allocation2 + $0x128] sm:$0xff] %vm563_vm0, %v11985_v0  ;;  %604 = vst.msk [vmem:[#allocation2 + $0x138] sm:$0xff] %vm563_vm0, %v11985_v0  ;;  %v656_v30 = vld [vmem:[%s12296_s19 + $0x50] sm:$0xff]  ;;  %v657_v31 = vld [vmem:[%s12296_s19 + $0x58] sm:$0xff] }
  0x41   : > { %605 = vst.msk [vmem:[#allocation2 + $0x140] sm:$0xff] %vm563_vm0, %v11985_v0  ;;  %607 = vst.msk [vmem:[#allocation2 + $0x150] sm:$0xff] %vm563_vm0, %v11985_v0  ;;  %v2353_v36 = vld [vmem:[%s15724_s28] sm:$0xff]  ;;  %v2354_v37 = vld [vmem:[%s15724_s28 + $0x8] sm:$0xff] }
  0x42   : > { %608 = vst.msk [vmem:[#allocation2 + $0x158] sm:$0xff] %vm563_vm0, %v11985_v0  ;;  %610 = vst.msk [vmem:[#allocation2 + $0x168] sm:$0xff] %vm563_vm0, %v11985_v0  ;;  %v11324_v40 = vpack.c.bf16 %v2354_v37, %v2353_v36  ;;  %v2355_v41 = vld [vmem:[%s15724_s28 + $0x10] sm:$0x3]  ;;  %v658_v43 = vld [vmem:[%s12296_s19 + $0x60] sm:$0xff] }
  0x43   : > { %611 = vst.msk [vmem:[#allocation2 + $0x170] sm:$0xff] %vm563_vm0, %v11985_v0  ;;  %613 = vst.msk [vmem:[#allocation2 + $0x180] sm:$0xff] %vm563_vm0, %v11985_v0  ;;  %v659_v44 = vld [vmem:[%s12296_s19 + $0x68] sm:$0xff]  ;;  %v660_v51 = vld [vmem:[%s12296_s19 + $0x70] sm:$0xff] }
  0x44   : > { %614 = vst.msk [vmem:[#allocation2 + $0x188] sm:$0xff] %vm563_vm0, %v11985_v0  ;;  %616 = vst.msk [vmem:[#allocation2 + $0x198] sm:$0xff] %vm563_vm0, %v11985_v0  ;;  %11325 = vmatprep.subr.bf16.mxu0 %v11324_v40  ;;  %v661_v52 = vld [vmem:[%s12296_s19 + $0x78] sm:$0xff]  ;;  %v662_v59 = vld [vmem:[%s12296_s19 + $0x80] sm:$0xff] }
  0x45   : > { %617 = vst.msk [vmem:[#allocation2 + $0x1a0] sm:$0xff] %vm563_vm0, %v11985_v0  ;;  %619 = vst.msk [vmem:[#allocation3] sm:$0xff] %vm563_vm0, %v11985_v0  ;;  %11327 = vmatpush3.bf16.msra.mxu0 %v11324_v40  ;;  %v663_v60 = vld [vmem:[%s12296_s19 + $0x88] sm:$0xff] }
  0x46   : > { %621 = vst.msk [vmem:[#allocation3 + $0x10] sm:$0xff] %vm563_vm0, %v11985_v0  ;;  %623 = vst.msk [vmem:[#allocation3 + $0x20] sm:$0xff] %vm563_vm0, %v11985_v0  ;;  %11274 = vmatprep.subr.msk.mxu0 %vm2460_vm3, %v2355_v41 }
  0x47   : > { %625 = vst.msk [vmem:[#allocation3 + $0x30] sm:$0xff] %vm563_vm0, %v11985_v0  ;;  %627 = vst.msk [vmem:[#allocation3 + $0x40] sm:$0xff] %vm563_vm0, %v11985_v0 }
  0x48   : > { %629 = vst.msk [vmem:[#allocation3 + $0x50] sm:$0xff] %vm563_vm0, %v11985_v0  ;;  %631 = vst.msk [vmem:[#allocation3 + $0x60] sm:$0xff] %vm563_vm0, %v11985_v0 }
  0x49   : > { %633 = vst.msk [vmem:[#allocation3 + $0x70] sm:$0xff] %vm563_vm0, %v11985_v0  ;;  %635 = vst.msk [vmem:[#allocation3 + $0x80] sm:$0xff] %vm563_vm0, %v11985_v0  ;;  %11275 = vmatpush3.msk.msra.mxu0 %vm2460_vm3, %v2355_v41  ;;  %vm3942_vm3 = vcmask 917248  }
  0x4a   : > { %637 = vst.msk [vmem:[#allocation3 + $0x90] sm:$0xff] %vm563_vm0, %v11985_v0 }
  0x4b   : > { %567 = vst.msk [vmem:[#allocation2 + $0x10] sm:$0x3] %vm566_vm1, %v11985_v0  ;;  %570 = vst.msk [vmem:[#allocation2 + $0x28] sm:$0x3] %vm566_vm1, %v11985_v0 }
  0x4c   : > { %573 = vst.msk [vmem:[#allocation2 + $0x40] sm:$0x3] %vm566_vm1, %v11985_v0  ;;  %576 = vst.msk [vmem:[#allocation2 + $0x58] sm:$0x3] %vm566_vm1, %v11985_v0 }
  0x4d   : > { %579 = vst.msk [vmem:[#allocation2 + $0x70] sm:$0x3] %vm566_vm1, %v11985_v0  ;;  %582 = vst.msk [vmem:[#allocation2 + $0x88] sm:$0x3] %vm566_vm1, %v11985_v0 }
  0x4e   : > { %585 = vst.msk [vmem:[#allocation2 + $0xa0] sm:$0x3] %vm566_vm1, %v11985_v0  ;;  %588 = vst.msk [vmem:[#allocation2 + $0xb8] sm:$0x3] %vm566_vm1, %v11985_v0 }
  0x4f   : > { %591 = vst.msk [vmem:[#allocation2 + $0xd0] sm:$0x3] %vm566_vm1, %v11985_v0  ;;  %594 = vst.msk [vmem:[#allocation2 + $0xe8] sm:$0x3] %vm566_vm1, %v11985_v0 }
  0x50   : > { %597 = vst.msk [vmem:[#allocation2 + $0x100] sm:$0x3] %vm566_vm1, %v11985_v0  ;;  %600 = vst.msk [vmem:[#allocation2 + $0x118] sm:$0x3] %vm566_vm1, %v11985_v0 }
  0x51   : > { %603 = vst.msk [vmem:[#allocation2 + $0x130] sm:$0x3] %vm566_vm1, %v11985_v0  ;;  %606 = vst.msk [vmem:[#allocation2 + $0x148] sm:$0x3] %vm566_vm1, %v11985_v0 }
  0x52   : > { %609 = vst.msk [vmem:[#allocation2 + $0x160] sm:$0x3] %vm566_vm1, %v11985_v0  ;;  %612 = vst.msk [vmem:[#allocation2 + $0x178] sm:$0x3] %vm566_vm1, %v11985_v0  ;;  %v970_v7 = vld [vmem:[#allocation2 + $0xa] sm:$0xff] }
  0x53   : > { %615 = vst.msk [vmem:[#allocation2 + $0x190] sm:$0x3] %vm566_vm1, %v11985_v0  ;;  %618 = vst.msk [vmem:[#allocation2 + $0x1a8] sm:$0x3] %vm566_vm1, %v11985_v0  ;;  %v777_v8 = vld [vmem:[#allocation2 + $0x9] sm:$0xff]  ;;  %1035 = vrot.lane.b32.xlu1 %v970_v7, %s15695_s1 }
  0x54   : > { %620 = vst.msk [vmem:[#allocation3 + $0x8] sm:$0x3] %vm566_vm1, %v11985_v0  ;;  %622 = vst.msk [vmem:[#allocation3 + $0x18] sm:$0x3] %vm566_vm1, %v11985_v0  ;;  %842 = vrot.lane.b32.xlu0 %v777_v8, %s11987_s20 }
  0x55   : > { %624 = vst.msk [vmem:[#allocation3 + $0x28] sm:$0x3] %vm566_vm1, %v11985_v0  ;;  %626 = vst.msk [vmem:[#allocation3 + $0x38] sm:$0x3] %vm566_vm1, %v11985_v0 }
  0x56   : > { %628 = vst.msk [vmem:[#allocation3 + $0x48] sm:$0x3] %vm566_vm1, %v11985_v0  ;;  %630 = vst.msk [vmem:[#allocation3 + $0x58] sm:$0x3] %vm566_vm1, %v11985_v0 }
  0x57   : > { %632 = vst.msk [vmem:[#allocation3 + $0x68] sm:$0x3] %vm566_vm1, %v11985_v0  ;;  %634 = vst.msk [vmem:[#allocation3 + $0x78] sm:$0x3] %vm566_vm1, %v11985_v0 }
  0x58   : > { %636 = vst.msk [vmem:[#allocation3 + $0x88] sm:$0x3] %vm566_vm1, %v11985_v0  ;;  %638 = vst.msk [vmem:[#allocation3 + $0x98] sm:$0x3] %vm566_vm1, %v11985_v0  ;;  %vm3556_vm1 = vcmask 654848  }
  0x59   : > { %680 = vst.msk [vmem:[#allocation2 + $0x19] sm:$0xff] %vm679_vm2, %v646_v1  ;;  %681 = vst.msk [vmem:[#allocation2 + $0x21] sm:$0xff] %vm679_vm2, %v647_v2 }
  0x5a   : > { %682 = vst.msk [vmem:[#allocation2 + $0x31] sm:$0xff] %vm679_vm2, %v648_v3  ;;  %683 = vst.msk [vmem:[#allocation2 + $0x39] sm:$0xff] %vm679_vm2, %v649_v6 }
  0x5b   : > { %684 = vst.msk [vmem:[#allocation2 + $0x49] sm:$0xff] %vm679_vm2, %v650_v9  ;;  %685 = vst.msk [vmem:[#allocation2 + $0x51] sm:$0xff] %vm679_vm2, %v651_v10 }
  0x5c   : > { %686 = vst.msk [vmem:[#allocation2 + $0x61] sm:$0xff] %vm679_vm2, %v652_v11  ;;  %687 = vst.msk [vmem:[#allocation2 + $0x69] sm:$0xff] %vm679_vm2, %v653_v12 }
  0x5d   : > { %744 = vst.msk [vmem:[#allocation5] sm:$0xff] %vm679_vm2, %v12316_v13  ;;  %688 = vst.msk [vmem:[#allocation2 + $0x79] sm:$0xff] %vm679_vm2, %v654_v14 }
  0x5e   : > { %689 = vst.msk [vmem:[#allocation2 + $0x81] sm:$0xff] %vm679_vm2, %v655_v15  ;;  %745 = vst.msk [vmem:[#allocation5 + $0x10] sm:$0xff] %vm679_vm2, %v713_v16 }
  0x5f   : > { %690 = vst.msk [vmem:[#allocation2 + $0x91] sm:$0xff] %vm679_vm2, %v656_v30  ;;  %691 = vst.msk [vmem:[#allocation2 + $0x99] sm:$0xff] %vm679_vm2, %v657_v31 }
  0x60   : > { %v1163_v17 = vld [vmem:[#allocation2 + $0x20] sm:$0xff]  ;;  %v1162_v18 = vld [vmem:[#allocation2 + $0x18] sm:$0xff]  ;;  %692 = vst.msk [vmem:[#allocation2 + $0xa9] sm:$0xff] %vm679_vm2, %v658_v43  ;;  %693 = vst.msk [vmem:[#allocation2 + $0xb1] sm:$0xff] %vm679_vm2, %v659_v44 }
  0x61   : > { %v1742_v19 = vld [vmem:[#allocation2 + $0x30] sm:$0xff]  ;;  %746 = vst.msk [vmem:[#allocation5 + $0x20] sm:$0xff] %vm679_vm2, %v1162_v18  ;;  %747 = vst.msk [vmem:[#allocation5 + $0x30] sm:$0xff] %vm679_vm2, %v1163_v17  ;;  %1228 = vrot.lane.b32.xlu1 %v1163_v17, %s11988_s21  ;;  %1226 = vrot.lane.b32.xlu0 %v1162_v18, %s11988_s21  ;;  %v1743_v20 = vld [vmem:[#allocation2 + $0x38] sm:$0xff] }
  0x62   : > { %748 = vst.msk [vmem:[#allocation5 + $0x40] sm:$0xff] %vm679_vm2, %v1742_v19  ;;  %v778_v21 = vld [vmem:[#allocation2 + $0x19] sm:$0xff]  ;;  %749 = vst.msk [vmem:[#allocation5 + $0x50] sm:$0xff] %vm679_vm2, %v1743_v20  ;;  %v12333_v22 = vld [vmem:[#allocation2 + $0x50] sm:$0xff] }
  0x63   : > { %v12335_v23 = vld [vmem:[#allocation2 + $0x48] sm:$0xff]  ;;  %751 = vst.msk [vmem:[#allocation5 + $0x70] sm:$0xff] %vm679_vm2, %v12333_v22  ;;  %v12345_v25 = vld [vmem:[#allocation2 + $0x60] sm:$0xff]  ;;  %v1935_v35 = vld [vmem:[#allocation2 + $0x31] sm:$0xff] }
  0x64   : > { %750 = vst.msk [vmem:[#allocation5 + $0x60] sm:$0xff] %vm679_vm2, %v12335_v23  ;;  %v12343_v24 = vld [vmem:[#allocation2 + $0x68] sm:$0xff]  ;;  %v1548_v26 = vld [vmem:[#allocation2 + $0x1a] sm:$0xff]  ;;  %752 = vst.msk [vmem:[#allocation5 + $0x80] sm:$0xff] %vm679_vm2, %v12345_v25 }
  0x65   : > { %844 = vrot.lane.b32.xlu1 %v778_v21, %s11987_s20  ;;  %1419 = vrot.lane.b32.xlu0 %v778_v21, %s11989_s22  ;;  %v1356_v27 = vld [vmem:[#allocation2 + $0x21] sm:$0xff]  ;;  %753 = vst.msk [vmem:[#allocation5 + $0x90] sm:$0xff] %vm679_vm2, %v12343_v24  ;;  %v12353_v29 = vld [vmem:[#allocation2 + $0x78] sm:$0xff]  ;;  %v1937_v46 = vld [vmem:[#allocation2 + $0x49] sm:$0xff] }
  0x66   : > { %v12351_v28 = vld [vmem:[#allocation2 + $0x80] sm:$0xff]  ;;  %754 = vst.msk [vmem:[#allocation5 + $0xa0] sm:$0xff] %vm679_vm2, %v12353_v29  ;;  %v12369_v33 = vld [vmem:[#allocation2 + $0x98] sm:$0xff]  ;;  %v12371_v34 = vld [vmem:[#allocation2 + $0x90] sm:$0xff] }
  0x67   : > { %755 = vst.msk [vmem:[#allocation5 + $0xb0] sm:$0xff] %vm679_vm2, %v12351_v28  ;;  %v1549_v32 = vld [vmem:[#allocation2 + $0x22] sm:$0xff]  ;;  %756 = vst.msk [vmem:[#allocation5 + $0xc0] sm:$0xff] %vm679_vm2, %v12371_v34  ;;  %v2128_v38 = vld [vmem:[#allocation2 + $0x32] sm:$0xff] }
  0x68   : > { %757 = vst.msk [vmem:[#allocation5 + $0xd0] sm:$0xff] %vm679_vm2, %v12369_v33  ;;  %v1936_v39 = vld [vmem:[#allocation2 + $0x39] sm:$0xff]  ;;  %v1938_v45 = vld [vmem:[#allocation2 + $0x51] sm:$0xff]  ;;  %v12404_v48 = vld [vmem:[#allocation2 + $0xa8] sm:$0xff] }
  0x69   : > { %1612 = vrot.lane.b32.xlu1 %v1548_v26, %s11990_s23  ;;  %1421 = vrot.lane.b32.xlu0 %v1356_v27, %s11989_s22  ;;  %v1551_v42 = vld [vmem:[#allocation2 + $0x3a] sm:$0xff]  ;;  %v12402_v47 = vld [vmem:[#allocation2 + $0xb0] sm:$0xff]  ;;  %758 = vst.msk [vmem:[#allocation5 + $0xe0] sm:$0xff] %vm679_vm2, %v12404_v48  ;;  %694 = vst.msk [vmem:[#allocation2 + $0xc1] sm:$0xff] %vm679_vm2, %v660_v51 }
  0x6a   : > { %759 = vst.msk [vmem:[#allocation5 + $0xf0] sm:$0xff] %vm679_vm2, %v12402_v47  ;;  %v2130_v49 = vld [vmem:[#allocation2 + $0x4a] sm:$0xff]  ;;  %v2131_v50 = vld [vmem:[#allocation2 + $0x52] sm:$0xff]  ;;  %695 = vst.msk [vmem:[#allocation2 + $0xc9] sm:$0xff] %vm679_vm2, %v661_v52 }
  0x6b   : > { %v1940_v53 = vld [vmem:[#allocation2 + $0x69] sm:$0xff]  ;;  %v1939_v54 = vld [vmem:[#allocation2 + $0x61] sm:$0xff]  ;;  %696 = vst.msk [vmem:[#allocation2 + $0xd9] sm:$0xff] %vm679_vm2, %v662_v59  ;;  %697 = vst.msk [vmem:[#allocation2 + $0xe1] sm:$0xff] %vm679_vm2, %v663_v60 }
  0x6c   : > { %v2132_v57 = vld [vmem:[#allocation2 + $0x62] sm:$0xff]  ;;  %v2133_v58 = vld [vmem:[#allocation2 + $0x6a] sm:$0xff]  ;;  %v12482_v3 = vld [vmem:[#allocation2 + $0x79] sm:$0xff] }
  0x6d   : > { %1037 = vrot.lane.b32.xlu1 %v1548_v26, %s15695_s1  ;;  %846 = vrot.lane.b32.xlu0 %v1356_v27, %s11987_s20  ;;  %v12480_v2 = vld [vmem:[#allocation2 + $0x81] sm:$0xff]  ;;  %v12544_v27 = vld [vmem:[#allocation2 + $0x99] sm:$0xff] }
  0x6e   : > { %v12490_v6 = vld [vmem:[#allocation2 + $0x7a] sm:$0xff]  ;;  %v12497_v9 = vld [vmem:[#allocation2 + $0x82] sm:$0xff]  ;;  %v12554_v31 = vld [vmem:[#allocation2 + $0x92] sm:$0xff] }
  0x6f   : > { %v12562_v36 = vld [vmem:[#allocation2 + $0x9a] sm:$0xff] }
  0x70   : > { %v12436_v56 = vld [vmem:[#allocation2 + $0xc0] sm:$0xff] }
  0x71   : > { %1806 = vrot.lane.b32.xlu1 %v1742_v19, %s11991_s26  ;;  %1614 = vrot.lane.b32.xlu0 %v1549_v32, %s11990_s23  ;;  %v12434_v55 = vld [vmem:[#allocation2 + $0xc8] sm:$0xff]  ;;  %760 = vst.msk [vmem:[#allocation5 + $0x100] sm:$0xff] %vm679_vm2, %v12436_v56 }
  0x72   : > { %761 = vst.msk [vmem:[#allocation5 + $0x110] sm:$0xff] %vm679_vm2, %v12434_v55  ;;  %v12467_v63 = vld [vmem:[#allocation2 + $0xe0] sm:$0xff]  ;;  %v12469_v1 = vld [vmem:[#allocation2 + $0xd8] sm:$0xff] }
  0x73   : > { %762 = vst.msk [vmem:[#allocation5 + $0x120] sm:$0xff] %vm679_vm2, %v12469_v1  ;;  %763 = vst.msk [vmem:[#allocation5 + $0x130] sm:$0xff] %vm679_vm2, %v12467_v63 }
  0x75   : > { %1230 = vrot.lane.b32.xlu1 %v1742_v19, %s11988_s21  ;;  %1039 = vrot.lane.b32.xlu0 %v1549_v32, %s15695_s1  ;;  %s15703_s1 = smov 16   ;;  %v664_v19 = vld [vmem:[%s12296_s19 + $0x90] sm:$0xff] }
  0x76   : > { %698 = vst.msk [vmem:[#allocation2 + $0xf1] sm:$0xff] %vm679_vm2, %v664_v19 }
  0x79   : > { %1999 = vrot.lane.b32.xlu1 %v1935_v35, %s11992_s0  ;;  %1808 = vrot.lane.b32.xlu0 %v1743_v20, %s11991_s26 }
  0x7d   : > { %1423 = vrot.lane.b32.xlu1 %v1935_v35, %s11989_s22  ;;  %1232 = vrot.lane.b32.xlu0 %v1743_v20, %s11988_s21  ;;  %v665_v20 = vld [vmem:[%s12296_s19 + $0x98] sm:$0xff]  ;;  %v12534_v26 = vld [vmem:[#allocation2 + $0xf0] sm:$0xff] }
  0x7e   : > { %699 = vst.msk [vmem:[#allocation2 + $0xf9] sm:$0xff] %vm679_vm2, %v665_v20  ;;  %764 = vst.msk [vmem:[#allocation5 + $0x140] sm:$0xff] %vm679_vm2, %v12534_v26  ;;  %v12686_v20 = vld [vmem:[#allocation2 + $0xc9] sm:$0xff] }
  0x81   : > { %2192 = vrot.lane.b32.xlu1 %v2128_v38, %s15703_s1  ;;  %2001 = vrot.lane.b32.xlu0 %v1936_v39, %s11992_s0 }
  0x85   : > { %1616 = vrot.lane.b32.xlu1 %v2128_v38, %s11990_s23  ;;  %1425 = vrot.lane.b32.xlu0 %v1936_v39, %s11989_s22 }
  0x89   : > { %1618 = vrot.lane.b32.xlu1 %v1551_v42, %s11990_s23  ;;  %2194 = vrot.lane.b32.xlu0 %v1551_v42, %s15703_s1 }
  0x8d   : > { %1812 = vrot.lane.b32.xlu1 %v12333_v22, %s11991_s26  ;;  %1810 = vrot.lane.b32.xlu0 %v12335_v23, %s11991_s26 }
  0x91   : > { %2005 = vrot.lane.b32.xlu1 %v1938_v45, %s11992_s0  ;;  %2003 = vrot.lane.b32.xlu0 %v1937_v46, %s11992_s0 }
  0x95   : > { %848 = vrot.lane.b32.xlu1 %v1935_v35, %s11987_s20  ;;  %2196 = vrot.lane.b32.xlu0 %v2130_v49, %s15703_s1 }
  0x99   : > { %850 = vrot.lane.b32.xlu1 %v1936_v39, %s11987_s20  ;;  %2198 = vrot.lane.b32.xlu0 %v2131_v50, %s15703_s1 }
  0x9d   : > { %1043 = vrot.lane.b32.xlu1 %v1551_v42, %s15725_s29  ;;  %1041 = vrot.lane.b32.xlu0 %v2128_v38, %s15725_s29 }
  0xa1   : > { %1236 = vrot.lane.b32.xlu1 %v12333_v22, %s11988_s21  ;;  %1234 = vrot.lane.b32.xlu0 %v12335_v23, %s11988_s21 }
  0xa5   : > { %1429 = vrot.lane.b32.xlu1 %v1938_v45, %s11989_s22  ;;  %1427 = vrot.lane.b32.xlu0 %v1937_v46, %s11989_s22 }
  0xa9   : > { %1622 = vrot.lane.b32.xlu1 %v2131_v50, %s11990_s23  ;;  %1620 = vrot.lane.b32.xlu0 %v2130_v49, %s11990_s23 }
  0xad   : > { %1816 = vrot.lane.b32.xlu1 %v12343_v24, %s11991_s26  ;;  %1814 = vrot.lane.b32.xlu0 %v12345_v25, %s11991_s26 }
  0xae   : > { %v1034_v61 = vpop.permute.xlu1 %1033 }
  0xaf   : > { %v841_v62 = vpop.permute.xlu0 %840 }
  0xb0   : > { %937 = vst.msk [vmem:[#allocation5] sm:$0xff] %vm936_vm4, %v841_v62 }
  0xb1   : > { %2009 = vrot.lane.b32.xlu1 %v1940_v53, %s11992_s0  ;;  %2007 = vrot.lane.b32.xlu0 %v1939_v54, %s11992_s0  ;;  %1130 = vst.msk [vmem:[#allocation5] sm:$0xff] %vm1129_vm5, %v1034_v61  ;;  %v12627_v61 = vld [vmem:[#allocation2 + $0xaa] sm:$0xff] }
  0xb5   : > { %852 = vrot.lane.b32.xlu1 %v1937_v46, %s11987_s20  ;;  %2200 = vrot.lane.b32.xlu0 %v2132_v57, %s15703_s1  ;;  %v666_v46 = vld [vmem:[%s12296_s19 + $0xa0] sm:$0xff] }
  0xb6   : > { %700 = vst.msk [vmem:[#allocation2 + $0x109] sm:$0xff] %vm679_vm2, %v666_v46 }
  0xb9   : > { %854 = vrot.lane.b32.xlu1 %v1938_v45, %s11987_s20  ;;  %2202 = vrot.lane.b32.xlu0 %v2133_v58, %s15703_s1 }
  0xbd   : > { %1047 = vrot.lane.b32.xlu1 %v2131_v50, %s15725_s29  ;;  %1045 = vrot.lane.b32.xlu0 %v2130_v49, %s15725_s29  ;;  %v667_v49 = vld [vmem:[%s12296_s19 + $0xa8] sm:$0xff] }
  0xbe   : > { %701 = vst.msk [vmem:[#allocation2 + $0x111] sm:$0xff] %vm679_vm2, %v667_v49  ;;  %v12756_v49 = vld [vmem:[#allocation2 + $0xe1] sm:$0xff] }
  0xc1   : > { %1240 = vrot.lane.b32.xlu1 %v12343_v24, %s11988_s21  ;;  %1238 = vrot.lane.b32.xlu0 %v12345_v25, %s11988_s21  ;;  %v12532_v25 = vld [vmem:[#allocation2 + $0xf8] sm:$0xff] }
  0xc2   : > { %765 = vst.msk [vmem:[#allocation5 + $0x150] sm:$0xff] %vm679_vm2, %v12532_v25 }
  0xc5   : > { %1433 = vrot.lane.b32.xlu1 %v1940_v53, %s11989_s22  ;;  %1431 = vrot.lane.b32.xlu0 %v1939_v54, %s11989_s22  ;;  %v1036_v4 = vpop.permute.xlu1 %1035  ;;  %v12604_v52 = vld [vmem:[#allocation2 + $0x110] sm:$0xff] }
  0xc6   : > { %v843_v5 = vpop.permute.xlu0 %842  ;;  %767 = vst.msk [vmem:[#allocation5 + $0x170] sm:$0xff] %vm679_vm2, %v12604_v52 }
  0xc7   : > { %938 = vst.msk [vmem:[#allocation5 + $0x10] sm:$0xff] %vm936_vm4, %v843_v5 }
  0xc8   : > { %1131 = vst.msk [vmem:[#allocation5 + $0x10] sm:$0xff] %vm1129_vm5, %v1036_v4  ;;  %v12636_v4 = vld [vmem:[#allocation2 + $0xb2] sm:$0xff] }
  0xc9   : > { %1626 = vrot.lane.b32.xlu1 %v2133_v58, %s11990_s23  ;;  %1624 = vrot.lane.b32.xlu0 %v2132_v57, %s11990_s23 }
  0xcd   : > { %1820 = vrot.lane.b32.xlu1 %v12351_v28, %s11991_s26  ;;  %1818 = vrot.lane.b32.xlu0 %v12353_v29, %s11991_s26 }
  0xd1   : > { %2013 = vrot.lane.b32.xlu1 %v12480_v2, %s11992_s0  ;;  %2011 = vrot.lane.b32.xlu0 %v12482_v3, %s11992_s0 }
  0xd3   : > { %v1229_v7 = vpop.permute.xlu1 %1228  ;;  %v1227_v8 = vpop.permute.xlu0 %1226 }
  0xd4   : > { %1324 = vst.msk [vmem:[#allocation5 + $0x10] sm:$0xff] %vm1322_vm6, %v1229_v7  ;;  %1323 = vst.msk [vmem:[#allocation5] sm:$0xff] %vm1322_vm6, %v1227_v8 }
  0xd5   : > { %856 = vrot.lane.b32.xlu1 %v1939_v54, %s11987_s20  ;;  %2204 = vrot.lane.b32.xlu0 %v12490_v6, %s15703_s1  ;;  %v12616_v54 = vld [vmem:[#allocation2 + $0xb1] sm:$0xff] }
  0xd7   : > { %v845_v10 = vpop.permute.xlu1 %844  ;;  %v1420_v11 = vpop.permute.xlu0 %1419 }
  0xd8   : > { %939 = vst.msk [vmem:[#allocation5 + $0x20] sm:$0xff] %vm936_vm4, %v845_v10 }
  0xd9   : > { %1516 = vst.msk [vmem:[#allocation5] sm:$0xff] %vm1515_vm7, %v1420_v11  ;;  %858 = vrot.lane.b32.xlu1 %v1940_v53, %s11987_s20  ;;  %2206 = vrot.lane.b32.xlu0 %v12497_v9, %s15703_s1  ;;  %v12606_v53 = vld [vmem:[#allocation2 + $0x108] sm:$0xff] }
  0xda   : > { %766 = vst.msk [vmem:[#allocation5 + $0x160] sm:$0xff] %vm679_vm2, %v12606_v53 }
  0xdb   : > { %v1613_v12 = vpop.permute.xlu1 %1612  ;;  %v1422_v14 = vpop.permute.xlu0 %1421 }
  0xdc   : > { %1709 = vst.msk [vmem:[#allocation5] sm:$0xff] %vm1708_vm8, %v1613_v12 }
  0xdd   : > { %1517 = vst.msk [vmem:[#allocation5 + $0x10] sm:$0xff] %vm1515_vm7, %v1422_v14  ;;  %1051 = vrot.lane.b32.xlu1 %v2133_v58, %s15725_s29  ;;  %1049 = vrot.lane.b32.xlu0 %v2132_v57, %s15725_s29  ;;  %v12618_v57 = vld [vmem:[#allocation2 + $0xa9] sm:$0xff] }
  0xde   : > { %v668_v14 = vld [vmem:[%s12296_s19 + $0xb0] sm:$0xff] }
  0xdf   : > { %v1038_v15 = vpop.permute.xlu1 %1037  ;;  %v847_v16 = vpop.permute.xlu0 %846  ;;  %702 = vst.msk [vmem:[#allocation2 + $0x121] sm:$0xff] %vm679_vm2, %v668_v14 }
  0xe0   : > { %1132 = vst.msk [vmem:[#allocation5 + $0x20] sm:$0xff] %vm1129_vm5, %v1038_v15  ;;  %v669_v15 = vld [vmem:[%s12296_s19 + $0xb8] sm:$0xff] }
  0xe1   : > { %940 = vst.msk [vmem:[#allocation5 + $0x30] sm:$0xff] %vm936_vm4, %v847_v16  ;;  %1244 = vrot.lane.b32.xlu1 %v12351_v28, %s11988_s21  ;;  %1242 = vrot.lane.b32.xlu0 %v12353_v29, %s11988_s21  ;;  %v12546_v28 = vld [vmem:[#allocation2 + $0x91] sm:$0xff] }
  0xe2   : > { %703 = vst.msk [vmem:[#allocation2 + $0x129] sm:$0xff] %vm679_vm2, %v669_v15  ;;  %v12822_v15 = vld [vmem:[#allocation2 + $0xf9] sm:$0xff] }
  0xe3   : > { %v1807_v17 = vpop.permute.xlu1 %1806  ;;  %v1615_v18 = vpop.permute.xlu0 %1614 }
  0xe4   : > { %1903 = vst.msk [vmem:[#allocation5] sm:$0xff] %vm1902_vm9, %v1807_v17 }
  0xe5   : > { %1710 = vst.msk [vmem:[#allocation5 + $0x10] sm:$0xff] %vm1708_vm8, %v1615_v18  ;;  %1437 = vrot.lane.b32.xlu1 %v12480_v2, %s11989_s22  ;;  %1435 = vrot.lane.b32.xlu0 %v12482_v3, %s11989_s22 }
  0xe6   : > { %v12676_v19 = vld [vmem:[#allocation2 + $0x120] sm:$0xff] }
  0xe7   : > { %v1231_v21 = vpop.permute.xlu1 %1230  ;;  %v1040_v22 = vpop.permute.xlu0 %1039  ;;  %768 = vst.msk [vmem:[#allocation5 + $0x180] sm:$0xff] %vm679_vm2, %v12676_v19 }
  0xe8   : > { %1325 = vst.msk [vmem:[#allocation5 + $0x20] sm:$0xff] %vm1322_vm6, %v1231_v21  ;;  %v12688_v21 = vld [vmem:[#allocation2 + $0xc1] sm:$0xff] }
  0xe9   : > { %1133 = vst.msk [vmem:[#allocation5 + $0x30] sm:$0xff] %vm1129_vm5, %v1040_v22  ;;  %1630 = vrot.lane.b32.xlu1 %v12497_v9, %s11990_s23  ;;  %1628 = vrot.lane.b32.xlu0 %v12490_v6, %s11990_s23  ;;  %v12674_v18 = vld [vmem:[#allocation2 + $0x128] sm:$0xff] }
  0xea   : > { %769 = vst.msk [vmem:[#allocation5 + $0x190] sm:$0xff] %vm679_vm2, %v12674_v18 }
  0xeb   : > { %v2000_v23 = vpop.permute.xlu1 %1999  ;;  %v1809_v24 = vpop.permute.xlu0 %1808 }
  0xec   : > { %2096 = vst.msk [vmem:[#allocation5] sm:$0xff] %vm2095_vm10, %v2000_v23 }
  0xed   : > { %1904 = vst.msk [vmem:[#allocation5 + $0x10] sm:$0xff] %vm1902_vm9, %v1809_v24  ;;  %1824 = vrot.lane.b32.xlu1 %v12369_v33, %s11991_s26  ;;  %1822 = vrot.lane.b32.xlu0 %v12371_v34, %s11991_s26 }
  0xef   : > { %v1424_v29 = vpop.permute.xlu1 %1423  ;;  %v1233_v30 = vpop.permute.xlu0 %1232 }
  0xf0   : > { %1518 = vst.msk [vmem:[#allocation5 + $0x20] sm:$0xff] %vm1515_vm7, %v1424_v29 }
  0xf1   : > { %1326 = vst.msk [vmem:[#allocation5 + $0x30] sm:$0xff] %vm1322_vm6, %v1233_v30  ;;  %2017 = vrot.lane.b32.xlu1 %v12544_v27, %s11992_s0  ;;  %2015 = vrot.lane.b32.xlu0 %v12546_v28, %s11992_s0 }
  0xf3   : > { %v2193_v32 = vpop.permute.xlu1 %2192  ;;  %v2002_v35 = vpop.permute.xlu0 %2001 }
  0xf4   : > { %2289 = vst.msk [vmem:[#allocation5] sm:$0xff] %vm2288_vm11, %v2193_v32 }
  0xf5   : > { %2097 = vst.msk [vmem:[#allocation5 + $0x10] sm:$0xff] %vm2095_vm10, %v2002_v35  ;;  %860 = vrot.lane.b32.xlu1 %v12482_v3, %s11987_s20  ;;  %2208 = vrot.lane.b32.xlu0 %v12554_v31, %s15703_s1 }
  0xf7   : > { %v1617_v37 = vpop.permute.xlu1 %1616  ;;  %v1426_v38 = vpop.permute.xlu0 %1425 }
  0xf8   : > { %1711 = vst.msk [vmem:[#allocation5 + $0x20] sm:$0xff] %vm1708_vm8, %v1617_v37 }
  0xf9   : > { %1519 = vst.msk [vmem:[#allocation5 + $0x30] sm:$0xff] %vm1515_vm7, %v1426_v38  ;;  %862 = vrot.lane.b32.xlu1 %v12480_v2, %s11987_s20  ;;  %2210 = vrot.lane.b32.xlu0 %v12562_v36, %s15703_s1 }
  0xfb   : > { %v1619_v39 = vpop.permute.xlu1 %1618  ;;  %v2195_v40 = vpop.permute.xlu0 %2194  ;;  %v2321_v41 = vld [vmem:[#allocation5] sm:$0xff] }
  0xfc   : > { %1712 = vst.msk [vmem:[#allocation5 + $0x30] sm:$0xff] %vm1708_vm8, %v1619_v39  ;;  %11276 = vmatprep.mubr.msk.f32.mxu0 %vm2363_vm12, %v2321_v41 }
  0xfd   : > { %2290 = vst.msk [vmem:[#allocation5 + $0x10] sm:$0xff] %vm2288_vm11, %v2195_v40  ;;  %1055 = vrot.lane.b32.xlu1 %v12497_v9, %s15725_s29  ;;  %1053 = vrot.lane.b32.xlu0 %v12490_v6, %s15725_s29 }
  0xfe   : > { %2785 = vst.msk [vmem:[#allocation5] sm:$0xff] %vm563_vm0, %v12316_v13 }
  0xff   : > { %v1813_v42 = vpop.permute.xlu1 %1812  ;;  %v1811_v43 = vpop.permute.xlu0 %1810 }
 0x100   : > { %1906 = vst.msk [vmem:[#allocation5 + $0x30] sm:$0xff] %vm1902_vm9, %v1813_v42  ;;  %1905 = vst.msk [vmem:[#allocation5 + $0x20] sm:$0xff] %vm1902_vm9, %v1811_v43  ;;  %v670_v42 = vld [vmem:[%s12296_s19 + $0xc0] sm:$0xff]  ;;  %v671_v43 = vld [vmem:[%s12296_s19 + $0xc8] sm:$0xff] }
 0x101   : > { %1248 = vrot.lane.b32.xlu1 %v12369_v33, %s11988_s21  ;;  %1246 = vrot.lane.b32.xlu0 %v12371_v34, %s11988_s21  ;;  %704 = vst.msk [vmem:[#allocation2 + $0x139] sm:$0xff] %vm679_vm2, %v670_v42  ;;  %705 = vst.msk [vmem:[#allocation2 + $0x141] sm:$0xff] %vm679_vm2, %v671_v43  ;;  %v12892_v43 = vld [vmem:[#allocation2 + $0x111] sm:$0xff] }
 0x103   : > { %v2006_v13 = vpop.permute.xlu1 %2005  ;;  %v2004_v44 = vpop.permute.xlu0 %2003 }
 0x104   : > { %v2322_v45 = vld [vmem:[#allocation5 + $0x10] sm:$0xff]  ;;  %2099 = vst.msk [vmem:[#allocation5 + $0x30] sm:$0xff] %vm2095_vm10, %v2006_v13  ;;  %2098 = vst.msk [vmem:[#allocation5 + $0x20] sm:$0xff] %vm2095_vm10, %v2004_v44 }
 0x105   : > { %11277 = vmatmul.mubr.msk.f32.vlgmr.msra.gmra.mrb[0].mxu0 %vm2363_vm12, %v2322_v45  ;;  %1441 = vrot.lane.b32.xlu1 %v12544_v27, %s11989_s22 }
 0x106   : > { %1439 = vrot.lane.b32.xlu0 %v12546_v28, %s11989_s22 }
 0x107   : > { %v849_v33 = vpop.permute.xlu1 %848  ;;  %v2197_v34 = vpop.permute.xlu0 %2196 }
 0x108   : > { %941 = vst.msk [vmem:[#allocation5 + $0x40] sm:$0xff] %vm936_vm4, %v849_v33  ;;  %v12744_v45 = vld [vmem:[#allocation2 + $0x140] sm:$0xff]  ;;  %v12746_v46 = vld [vmem:[#allocation2 + $0x138] sm:$0xff] }
 0x109   : > { %2291 = vst.msk [vmem:[#allocation5 + $0x20] sm:$0xff] %vm2288_vm11, %v2197_v34  ;;  %1634 = vrot.lane.b32.xlu1 %v12562_v36, %s11990_s23  ;;  %v12758_v33 = vld [vmem:[#allocation2 + $0xd9] sm:$0xff] }
 0x10a   : > { %1632 = vrot.lane.b32.xlu0 %v12554_v31, %s11990_s23  ;;  %770 = vst.msk [vmem:[#allocation5 + $0x1a0] sm:$0xff] %vm679_vm2, %v12746_v46  ;;  %771 = vst.msk [vmem:[#allocation5 + $0x1b0] sm:$0xff] %vm679_vm2, %v12744_v45 }
 0x10b   : > { %v851_v50 = vpop.permute.xlu1 %850  ;;  %v2199_v51 = vpop.permute.xlu0 %2198 }
 0x10c   : > { %942 = vst.msk [vmem:[#allocation5 + $0x50] sm:$0xff] %vm936_vm4, %v851_v50 }
 0x10d   : > { %2292 = vst.msk [vmem:[#allocation5 + $0x30] sm:$0xff] %vm2288_vm11, %v2199_v51  ;;  %1828 = vrot.lane.b32.xlu1 %v12402_v47, %s11991_s26 }
 0x10e   : > { %1826 = vrot.lane.b32.xlu0 %v12404_v48, %s11991_s26 }
 0x10f   : > { %v1044_v58 = vpop.permute.xlu1 %1043  ;;  %v1042_v59 = vpop.permute.xlu0 %1041 }
 0x110   : > { %v2323_v60 = vld [vmem:[#allocation5 + $0x20] sm:$0xff]  ;;  %1135 = vst.msk [vmem:[#allocation5 + $0x50] sm:$0xff] %vm1129_vm5, %v1044_v58  ;;  %1134 = vst.msk [vmem:[#allocation5 + $0x40] sm:$0xff] %vm1129_vm5, %v1042_v59 }
 0x111   : > { %11279 = vmatprep.mubr.msk.f32.mxu0 %vm2363_vm12, %v2323_v60  ;;  %2021 = vrot.lane.b32.xlu1 %v12616_v54, %s11992_s0  ;;  %v12776_v60 = vld [vmem:[#allocation2 + $0xe2] sm:$0xff] }
 0x112   : > { %2019 = vrot.lane.b32.xlu0 %v12618_v57, %s11992_s0 }
 0x113   : > { %v1237_v62 = vpop.permute.xlu1 %1236  ;;  %v1235_v2 = vpop.permute.xlu0 %1234 }
 0x114   : > { %v2324_v3 = vld [vmem:[#allocation5 + $0x30] sm:$0xff]  ;;  %1328 = vst.msk [vmem:[#allocation5 + $0x50] sm:$0xff] %vm1322_vm6, %v1237_v62  ;;  %1327 = vst.msk [vmem:[#allocation5 + $0x40] sm:$0xff] %vm1322_vm6, %v1235_v2 }
 0x115   : > { %11280 = vmatmul.mubr.msk.f32.gmra.mrb[2].mxu0 %vm2363_vm12, %v2324_v3  ;;  %864 = vrot.lane.b32.xlu1 %v12546_v28, %s11987_s20 }
 0x116   : > { %2212 = vrot.lane.b32.xlu0 %v12627_v61, %s15703_s1 }
 0x117   : > { %v1430_v5 = vpop.permute.xlu1 %1429  ;;  %v1428_v6 = vpop.permute.xlu0 %1427 }
 0x118   : > { %1521 = vst.msk [vmem:[#allocation5 + $0x50] sm:$0xff] %vm1515_vm7, %v1430_v5  ;;  %1520 = vst.msk [vmem:[#allocation5 + $0x40] sm:$0xff] %vm1515_vm7, %v1428_v6 }
 0x119   : > { %866 = vrot.lane.b32.xlu1 %v12544_v27, %s11987_s20  ;;  %v12697_v27 = vld [vmem:[#allocation2 + $0xc2] sm:$0xff] }
 0x11a   : > { %2214 = vrot.lane.b32.xlu0 %v12636_v4, %s15703_s1 }
 0x11b   : > { %v1623_v7 = vpop.permute.xlu1 %1622  ;;  %v1621_v8 = vpop.permute.xlu0 %1620 }
 0x11c   : > { %1714 = vst.msk [vmem:[#allocation5 + $0x50] sm:$0xff] %vm1708_vm8, %v1623_v7  ;;  %1713 = vst.msk [vmem:[#allocation5 + $0x40] sm:$0xff] %vm1708_vm8, %v1621_v8  ;;  %v672_v8 = vld [vmem:[%s12296_s19 + $0xd0] sm:$0xff] }
 0x11d   : > { %1059 = vrot.lane.b32.xlu1 %v12562_v36, %s15725_s29  ;;  %706 = vst.msk [vmem:[#allocation2 + $0x151] sm:$0xff] %vm679_vm2, %v672_v8  ;;  %v12960_v8 = vld [vmem:[#allocation2 + $0x121] sm:$0xff] }
 0x11e   : > { %1057 = vrot.lane.b32.xlu0 %v12554_v31, %s15725_s29  ;;  %v12706_v31 = vld [vmem:[#allocation2 + $0xca] sm:$0xff] }
 0x11f   : > { %v1817_v9 = vpop.permute.xlu1 %1816  ;;  %v1815_v10 = vpop.permute.xlu0 %1814 }
 0x120   : > { %1908 = vst.msk [vmem:[#allocation5 + $0x50] sm:$0xff] %vm1902_vm9, %v1817_v9  ;;  %1907 = vst.msk [vmem:[#allocation5 + $0x40] sm:$0xff] %vm1902_vm9, %v1815_v10  ;;  %v673_v9 = vld [vmem:[%s12296_s19 + $0xd8] sm:$0xff] }
 0x121   : > { %1252 = vrot.lane.b32.xlu1 %v12402_v47, %s11988_s21  ;;  %707 = vst.msk [vmem:[#allocation2 + $0x159] sm:$0xff] %vm679_vm2, %v673_v9 }
 0x122   : > { %1250 = vrot.lane.b32.xlu0 %v12404_v48, %s11988_s21 }
 0x123   : > { %v2010_v11 = vpop.permute.xlu1 %2009  ;;  %v2008_v12 = vpop.permute.xlu0 %2007 }
 0x124   : > { %2101 = vst.msk [vmem:[#allocation5 + $0x50] sm:$0xff] %vm2095_vm10, %v2010_v11  ;;  %2100 = vst.msk [vmem:[#allocation5 + $0x40] sm:$0xff] %vm2095_vm10, %v2008_v12  ;;  %v12820_v14 = vld [vmem:[#allocation2 + $0x150] sm:$0xff] }
 0x125   : > { %1445 = vrot.lane.b32.xlu1 %v12616_v54, %s11989_s22  ;;  %772 = vst.msk [vmem:[#allocation5 + $0x1c0] sm:$0xff] %vm679_vm2, %v12820_v14 }
 0x126   : > { %1443 = vrot.lane.b32.xlu0 %v12618_v57, %s11989_s22 }
 0x127   : > { %v853_v47 = vpop.permute.xlu1 %852  ;;  %v2201_v48 = vpop.permute.xlu0 %2200 }
 0x128   : > { %943 = vst.msk [vmem:[#allocation5 + $0x60] sm:$0xff] %vm936_vm4, %v853_v47  ;;  %v12818_v12 = vld [vmem:[#allocation2 + $0x158] sm:$0xff] }
 0x129   : > { %2293 = vst.msk [vmem:[#allocation5 + $0x40] sm:$0xff] %vm2288_vm11, %v2201_v48  ;;  %1638 = vrot.lane.b32.xlu1 %v12636_v4, %s11990_s23  ;;  %v12824_v47 = vld [vmem:[#allocation2 + $0xf1] sm:$0xff] }
 0x12a   : > { %1636 = vrot.lane.b32.xlu0 %v12627_v61, %s11990_s23  ;;  %773 = vst.msk [vmem:[#allocation5 + $0x1d0] sm:$0xff] %vm679_vm2, %v12818_v12 }
 0x12b   : > { %v855_v16 = vpop.permute.xlu1 %854  ;;  %v2203_v17 = vpop.permute.xlu0 %2202 }
 0x12c   : > { %944 = vst.msk [vmem:[#allocation5 + $0x70] sm:$0xff] %vm936_vm4, %v855_v16 }
 0x12d   : > { %2294 = vst.msk [vmem:[#allocation5 + $0x50] sm:$0xff] %vm2288_vm11, %v2203_v17  ;;  %1832 = vrot.lane.b32.xlu1 %v12434_v55, %s11991_s26 }
 0x12e   : > { %1830 = vrot.lane.b32.xlu0 %v12436_v56, %s11991_s26 }
 0x12f   : > { %v1048_v22 = vpop.permute.xlu1 %1047  ;;  %v1046_v23 = vpop.permute.xlu0 %1045 }
 0x130   : > { %v2325_v24 = vld [vmem:[#allocation5 + $0x40] sm:$0xff]  ;;  %1137 = vst.msk [vmem:[#allocation5 + $0x70] sm:$0xff] %vm1129_vm5, %v1048_v22  ;;  %1136 = vst.msk [vmem:[#allocation5 + $0x60] sm:$0xff] %vm1129_vm5, %v1046_v23 }
 0x131   : > { %11282 = vmatprep.mubr.msk.f32.mxu0 %vm2363_vm12, %v2325_v24  ;;  %2025 = vrot.lane.b32.xlu1 %v12686_v20, %s11992_s0  ;;  %v12846_v24 = vld [vmem:[#allocation2 + $0xfa] sm:$0xff] }
 0x132   : > { %2023 = vrot.lane.b32.xlu0 %v12688_v21, %s11992_s0 }
 0x133   : > { %v1241_v28 = vpop.permute.xlu1 %1240  ;;  %v1239_v29 = vpop.permute.xlu0 %1238 }
 0x134   : > { %v2326_v30 = vld [vmem:[#allocation5 + $0x50] sm:$0xff]  ;;  %1330 = vst.msk [vmem:[#allocation5 + $0x70] sm:$0xff] %vm1322_vm6, %v1241_v28  ;;  %1329 = vst.msk [vmem:[#allocation5 + $0x60] sm:$0xff] %vm1322_vm6, %v1239_v29 }
 0x135   : > { %11283 = vmatmul.mubr.msk.f32.gmra.mrb[4].mxu0 %vm2363_vm12, %v2326_v30  ;;  %868 = vrot.lane.b32.xlu1 %v12618_v57, %s11987_s20 }
 0x136   : > { %2216 = vrot.lane.b32.xlu0 %v12697_v27, %s15703_s1 }
 0x137   : > { %v1434_v32 = vpop.permute.xlu1 %1433  ;;  %v1432_v35 = vpop.permute.xlu0 %1431 }
 0x138   : > { %1523 = vst.msk [vmem:[#allocation5 + $0x70] sm:$0xff] %vm1515_vm7, %v1434_v32  ;;  %1522 = vst.msk [vmem:[#allocation5 + $0x60] sm:$0xff] %vm1515_vm7, %v1432_v35 }
 0x139   : > { %870 = vrot.lane.b32.xlu1 %v12616_v54, %s11987_s20  ;;  %v12767_v54 = vld [vmem:[#allocation2 + $0xda] sm:$0xff] }
 0x13a   : > { %2218 = vrot.lane.b32.xlu0 %v12706_v31, %s15703_s1 }
 0x13b   : > { %v1627_v36 = vpop.permute.xlu1 %1626  ;;  %v1625_v37 = vpop.permute.xlu0 %1624 }
 0x13c   : > { %1716 = vst.msk [vmem:[#allocation5 + $0x70] sm:$0xff] %vm1708_vm8, %v1627_v36  ;;  %1715 = vst.msk [vmem:[#allocation5 + $0x60] sm:$0xff] %vm1708_vm8, %v1625_v37  ;;  %v674_v37 = vld [vmem:[%s12296_s19 + $0xe0] sm:$0xff] }
 0x13d   : > { %1063 = vrot.lane.b32.xlu1 %v12636_v4, %s15725_s29  ;;  %708 = vst.msk [vmem:[#allocation2 + $0x169] sm:$0xff] %vm679_vm2, %v674_v37  ;;  %v13027_v37 = vld [vmem:[#allocation2 + $0x13a] sm:$0xff] }
 0x13e   : > { %1061 = vrot.lane.b32.xlu0 %v12627_v61, %s15725_s29 }
 0x13f   : > { %v1821_v38 = vpop.permute.xlu1 %1820  ;;  %v1819_v39 = vpop.permute.xlu0 %1818 }
 0x140   : > { %1910 = vst.msk [vmem:[#allocation5 + $0x70] sm:$0xff] %vm1902_vm9, %v1821_v38  ;;  %1909 = vst.msk [vmem:[#allocation5 + $0x60] sm:$0xff] %vm1902_vm9, %v1819_v39  ;;  %v675_v38 = vld [vmem:[%s12296_s19 + $0xe8] sm:$0xff] }
 0x141   : > { %1256 = vrot.lane.b32.xlu1 %v12434_v55, %s11988_s21  ;;  %709 = vst.msk [vmem:[#allocation2 + $0x171] sm:$0xff] %vm679_vm2, %v675_v38 }
 0x142   : > { %1254 = vrot.lane.b32.xlu0 %v12436_v56, %s11988_s21 }
 0x143   : > { %v2014_v40 = vpop.permute.xlu1 %2013  ;;  %v2012_v41 = vpop.permute.xlu0 %2011 }
 0x144   : > { %2103 = vst.msk [vmem:[#allocation5 + $0x70] sm:$0xff] %vm2095_vm10, %v2014_v40  ;;  %2102 = vst.msk [vmem:[#allocation5 + $0x60] sm:$0xff] %vm2095_vm10, %v2012_v41  ;;  %v12890_v42 = vld [vmem:[#allocation2 + $0x168] sm:$0xff] }
 0x145   : > { %1449 = vrot.lane.b32.xlu1 %v12686_v20, %s11989_s22  ;;  %774 = vst.msk [vmem:[#allocation5 + $0x1e0] sm:$0xff] %vm679_vm2, %v12890_v42 }
 0x146   : > { %1447 = vrot.lane.b32.xlu0 %v12688_v21, %s11989_s22 }
 0x147   : > { %v857_v55 = vpop.permute.xlu1 %856  ;;  %v2205_v56 = vpop.permute.xlu0 %2204 }
 0x148   : > { %945 = vst.msk [vmem:[#allocation5 + $0x80] sm:$0xff] %vm936_vm4, %v857_v55  ;;  %v12888_v41 = vld [vmem:[#allocation2 + $0x170] sm:$0xff] }
 0x149   : > { %2295 = vst.msk [vmem:[#allocation5 + $0x60] sm:$0xff] %vm2288_vm11, %v2205_v56  ;;  %1642 = vrot.lane.b32.xlu1 %v12706_v31, %s11990_s23  ;;  %v12894_v55 = vld [vmem:[#allocation2 + $0x109] sm:$0xff] }
 0x14a   : > { %1640 = vrot.lane.b32.xlu0 %v12697_v27, %s11990_s23  ;;  %775 = vst.msk [vmem:[#allocation5 + $0x1f0] sm:$0xff] %vm679_vm2, %v12888_v41 }
 0x14b   : > { %v859_v13 = vpop.permute.xlu1 %858  ;;  %v2207_v44 = vpop.permute.xlu0 %2206 }
 0x14c   : > { %946 = vst.msk [vmem:[#allocation5 + $0x90] sm:$0xff] %vm936_vm4, %v859_v13 }
 0x14d   : > { %2296 = vst.msk [vmem:[#allocation5 + $0x70] sm:$0xff] %vm2288_vm11, %v2207_v44  ;;  %1836 = vrot.lane.b32.xlu1 %v12467_v63, %s11991_s26 }
 0x14e   : > { %1834 = vrot.lane.b32.xlu0 %v12469_v1, %s11991_s26 }
 0x14f   : > { %v1052_v34 = vpop.permute.xlu1 %1051  ;;  %v1050_v50 = vpop.permute.xlu0 %1049 }
 0x150   : > { %v2327_v51 = vld [vmem:[#allocation5 + $0x60] sm:$0xff]  ;;  %1139 = vst.msk [vmem:[#allocation5 + $0x90] sm:$0xff] %vm1129_vm5, %v1052_v34  ;;  %1138 = vst.msk [vmem:[#allocation5 + $0x80] sm:$0xff] %vm1129_vm5, %v1050_v50 }
 0x151   : > { %11285 = vmatprep.mubr.msk.f32.mxu0 %vm2363_vm12, %v2327_v51  ;;  %2029 = vrot.lane.b32.xlu1 %v12756_v49, %s11992_s0  ;;  %v12916_v51 = vld [vmem:[#allocation2 + $0x112] sm:$0xff] }
 0x152   : > { %2027 = vrot.lane.b32.xlu0 %v12758_v33, %s11992_s0 }
 0x153   : > { %v1245_v57 = vpop.permute.xlu1 %1244  ;;  %v1243_v58 = vpop.permute.xlu0 %1242 }
 0x154   : > { %v2328_v59 = vld [vmem:[#allocation5 + $0x70] sm:$0xff]  ;;  %1332 = vst.msk [vmem:[#allocation5 + $0x90] sm:$0xff] %vm1322_vm6, %v1245_v57  ;;  %1331 = vst.msk [vmem:[#allocation5 + $0x80] sm:$0xff] %vm1322_vm6, %v1243_v58 }
 0x155   : > { %11286 = vmatmul.mubr.msk.f32.gmra.mrb[6].mxu0 %vm2363_vm12, %v2328_v59  ;;  %872 = vrot.lane.b32.xlu1 %v12688_v21, %s11987_s20 }
 0x156   : > { %2220 = vrot.lane.b32.xlu0 %v12767_v54, %s15703_s1 }
 0x157   : > { %v1438_v61 = vpop.permute.xlu1 %1437  ;;  %v1436_v62 = vpop.permute.xlu0 %1435 }
 0x158   : > { %1525 = vst.msk [vmem:[#allocation5 + $0x90] sm:$0xff] %vm1515_vm7, %v1438_v61  ;;  %1524 = vst.msk [vmem:[#allocation5 + $0x80] sm:$0xff] %vm1515_vm7, %v1436_v62 }
 0x159   : > { %874 = vrot.lane.b32.xlu1 %v12686_v20, %s11987_s20  ;;  %v12837_v20 = vld [vmem:[#allocation2 + $0xf2] sm:$0xff] }
 0x15a   : > { %2222 = vrot.lane.b32.xlu0 %v12776_v60, %s15703_s1 }
 0x15b   : > { %v1631_v2 = vpop.permute.xlu1 %1630  ;;  %v1629_v3 = vpop.permute.xlu0 %1628 }
 0x15c   : > { %1718 = vst.msk [vmem:[#allocation5 + $0x90] sm:$0xff] %vm1708_vm8, %v1631_v2  ;;  %1717 = vst.msk [vmem:[#allocation5 + $0x80] sm:$0xff] %vm1708_vm8, %v1629_v3  ;;  %v676_v3 = vld [vmem:[%s12296_s19 + $0xf0] sm:$0xff] }
 0x15d   : > { %1067 = vrot.lane.b32.xlu1 %v12706_v31, %s15725_s29  ;;  %710 = vst.msk [vmem:[#allocation2 + $0x181] sm:$0xff] %vm679_vm2, %v676_v3 }
 0x15e   : > { %1065 = vrot.lane.b32.xlu0 %v12697_v27, %s15725_s29 }
 0x15f   : > { %v1825_v4 = vpop.permute.xlu1 %1824  ;;  %v1823_v5 = vpop.permute.xlu0 %1822 }
 0x160   : > { %1912 = vst.msk [vmem:[#allocation5 + $0x90] sm:$0xff] %vm1902_vm9, %v1825_v4  ;;  %1911 = vst.msk [vmem:[#allocation5 + $0x80] sm:$0xff] %vm1902_vm9, %v1823_v5  ;;  %v677_v4 = vld [vmem:[%s12296_s19 + $0xf8] sm:$0xff]  ;;  %s15697_s19 = smov 112  }
 0x161   : > { %1260 = vrot.lane.b32.xlu1 %v12467_v63, %s11988_s21  ;;  %711 = vst.msk [vmem:[#allocation2 + $0x189] sm:$0xff] %vm679_vm2, %v677_v4  ;;  %vm3749_vm2 = vcmask 786048  }
 0x162   : > { %1258 = vrot.lane.b32.xlu0 %v12469_v1, %s11988_s21 }
 0x163   : > { %v2018_v6 = vpop.permute.xlu1 %2017  ;;  %v2016_v7 = vpop.permute.xlu0 %2015 }
 0x164   : > { %2105 = vst.msk [vmem:[#allocation5 + $0x90] sm:$0xff] %vm2095_vm10, %v2018_v6  ;;  %2104 = vst.msk [vmem:[#allocation5 + $0x80] sm:$0xff] %vm2095_vm10, %v2016_v7  ;;  %v12958_v7 = vld [vmem:[#allocation2 + $0x129] sm:$0xff] }
 0x165   : > { %1453 = vrot.lane.b32.xlu1 %v12756_v49, %s11989_s22 }
 0x166   : > { %1451 = vrot.lane.b32.xlu0 %v12758_v33, %s11989_s22 }
 0x167   : > { %v861_v63 = vpop.permute.xlu1 %860  ;;  %v2209_v1 = vpop.permute.xlu0 %2208 }
 0x168   : > { %947 = vst.msk [vmem:[#allocation5 + $0xa0] sm:$0xff] %vm936_vm4, %v861_v63 }
 0x169   : > { %2297 = vst.msk [vmem:[#allocation5 + $0x80] sm:$0xff] %vm2288_vm11, %v2209_v1  ;;  %1646 = vrot.lane.b32.xlu1 %v12776_v60, %s11990_s23 }
 0x16a   : > { %1644 = vrot.lane.b32.xlu0 %v12767_v54, %s11990_s23 }
 0x16b   : > { %v863_v10 = vpop.permute.xlu1 %862  ;;  %v2211_v11 = vpop.permute.xlu0 %2210 }
 0x16c   : > { %948 = vst.msk [vmem:[#allocation5 + $0xb0] sm:$0xff] %vm936_vm4, %v863_v10  ;;  %v12969_v10 = vld [vmem:[#allocation2 + $0x122] sm:$0xff] }
 0x16d   : > { %2298 = vst.msk [vmem:[#allocation5 + $0x90] sm:$0xff] %vm2288_vm11, %v2211_v11  ;;  %1840 = vrot.lane.b32.xlu1 %v12532_v25, %s11991_s26 }
 0x16e   : > { %1838 = vrot.lane.b32.xlu0 %v12534_v26, %s11991_s26 }
 0x16f   : > { %v1056_v48 = vpop.permute.xlu1 %1055  ;;  %v1054_v16 = vpop.permute.xlu0 %1053 }
 0x170   : > { %v2329_v17 = vld [vmem:[#allocation5 + $0x80] sm:$0xff]  ;;  %1141 = vst.msk [vmem:[#allocation5 + $0xb0] sm:$0xff] %vm1129_vm5, %v1056_v48  ;;  %1140 = vst.msk [vmem:[#allocation5 + $0xa0] sm:$0xff] %vm1129_vm5, %v1054_v16  ;;  %v12978_v48 = vld [vmem:[#allocation2 + $0x12a] sm:$0xff] }
 0x171   : > { %11288 = vmatprep.mubr.msk.f32.mxu0 %vm2363_vm12, %v2329_v17  ;;  %2033 = vrot.lane.b32.xlu1 %v12822_v15, %s11992_s0 }
 0x172   : > { %2031 = vrot.lane.b32.xlu0 %v12824_v47, %s11992_s0 }
 0x173   : > { %v1249_v21 = vpop.permute.xlu1 %1248  ;;  %v1247_v22 = vpop.permute.xlu0 %1246 }
 0x174   : > { %v2330_v23 = vld [vmem:[#allocation5 + $0x90] sm:$0xff]  ;;  %1334 = vst.msk [vmem:[#allocation5 + $0xb0] sm:$0xff] %vm1322_vm6, %v1249_v21  ;;  %1333 = vst.msk [vmem:[#allocation5 + $0xa0] sm:$0xff] %vm1322_vm6, %v1247_v22 }
 0x175   : > { %11289 = vmatmul.mubr.msk.f32.gmra.mrb[8].mxu0 %vm2363_vm12, %v2330_v23  ;;  %876 = vrot.lane.b32.xlu1 %v12758_v33, %s11987_s20 }
 0x176   : > { %2224 = vrot.lane.b32.xlu0 %v12837_v20, %s15703_s1 }
 0x177   : > { %v1442_v27 = vpop.permute.xlu1 %1441 }
 0x178   : > { %v1440_v28 = vpop.permute.xlu0 %1439  ;;  %1527 = vst.msk [vmem:[#allocation5 + $0xb0] sm:$0xff] %vm1515_vm7, %v1442_v27 }
 0x179   : > { %1526 = vst.msk [vmem:[#allocation5 + $0xa0] sm:$0xff] %vm1515_vm7, %v1440_v28  ;;  %878 = vrot.lane.b32.xlu1 %v12756_v49, %s11987_s20  ;;  %v12907_v49 = vld [vmem:[#allocation2 + $0x10a] sm:$0xff] }
 0x17a   : > { %2226 = vrot.lane.b32.xlu0 %v12846_v24, %s15703_s1 }
 0x17b   : > { %v1635_v29 = vpop.permute.xlu1 %1634 }
 0x17c   : > { %v1633_v30 = vpop.permute.xlu0 %1632  ;;  %1720 = vst.msk [vmem:[#allocation5 + $0xb0] sm:$0xff] %vm1708_vm8, %v1635_v29 }
 0x17d   : > { %1719 = vst.msk [vmem:[#allocation5 + $0xa0] sm:$0xff] %vm1708_vm8, %v1633_v30  ;;  %1071 = vrot.lane.b32.xlu1 %v12776_v60, %s15725_s29  ;;  %v13016_v30 = vld [vmem:[#allocation2 + $0x141] sm:$0xff] }
 0x17e   : > { %1069 = vrot.lane.b32.xlu0 %v12767_v54, %s15725_s29 }
 0x17f   : > { %v1829_v31 = vpop.permute.xlu1 %1828 }
 0x180   : > { %v1827_v32 = vpop.permute.xlu0 %1826  ;;  %1914 = vst.msk [vmem:[#allocation5 + $0xb0] sm:$0xff] %vm1902_vm9, %v1829_v31  ;;  %v13018_v31 = vld [vmem:[#allocation2 + $0x139] sm:$0xff] }
 0x181   : > { %1913 = vst.msk [vmem:[#allocation5 + $0xa0] sm:$0xff] %vm1902_vm9, %v1827_v32  ;;  %1264 = vrot.lane.b32.xlu1 %v12532_v25, %s11988_s21 }
 0x182   : > { %1262 = vrot.lane.b32.xlu0 %v12534_v26, %s11988_s21 }
 0x183   : > { %v2022_v35 = vpop.permute.xlu1 %2021 }
 0x184   : > { %v2020_v36 = vpop.permute.xlu0 %2019  ;;  %2107 = vst.msk [vmem:[#allocation5 + $0xb0] sm:$0xff] %vm2095_vm10, %v2022_v35 }
 0x185   : > { %2106 = vst.msk [vmem:[#allocation5 + $0xa0] sm:$0xff] %vm2095_vm10, %v2020_v36  ;;  %1457 = vrot.lane.b32.xlu1 %v12822_v15, %s11989_s22 }
 0x186   : > { %1455 = vrot.lane.b32.xlu0 %v12824_v47, %s11989_s22 }
 0x187   : > { %v865_v25 = vpop.permute.xlu1 %864 }
 0x188   : > { %v2213_v26 = vpop.permute.xlu0 %2212  ;;  %949 = vst.msk [vmem:[#allocation5 + $0xc0] sm:$0xff] %vm936_vm4, %v865_v25 }
 0x189   : > { %2299 = vst.msk [vmem:[#allocation5 + $0xa0] sm:$0xff] %vm2288_vm11, %v2213_v26  ;;  %1650 = vrot.lane.b32.xlu1 %v12846_v24, %s11990_s23 }
 0x18a   : > { %1648 = vrot.lane.b32.xlu0 %v12837_v20, %s11990_s23 }
 0x18b   : > { %v867_v39 = vpop.permute.xlu1 %866 }
 0x18c   : > { %v2215_v40 = vpop.permute.xlu0 %2214  ;;  %950 = vst.msk [vmem:[#allocation5 + $0xd0] sm:$0xff] %vm936_vm4, %v867_v39  ;;  %v13039_v39 = vld [vmem:[%s15726_s2] ss:$0 sm:$0xff] }
 0x18d   : > { %2300 = vst.msk [vmem:[#allocation5 + $0xb0] sm:$0xff] %vm2288_vm11, %v2215_v40  ;;  %1844 = vrot.lane.b32.xlu1 %v12604_v52, %s11991_s26  ;;  %v13041_v40 = vld [vmem:[#allocation2 + $0x142] sm:$0xff] }
 0x18e   : > { %1842 = vrot.lane.b32.xlu0 %v12606_v53, %s11991_s26 }
 0x18f   : > { %v1060_v56 = vpop.permute.xlu1 %1059 }
 0x190   : > { %v1058_v13 = vpop.permute.xlu0 %1057  ;;  %v2331_v44 = vld [vmem:[#allocation5 + $0xa0] sm:$0xff]  ;;  %1143 = vst.msk [vmem:[#allocation5 + $0xd0] sm:$0xff] %vm1129_vm5, %v1060_v56 }
 0x191   : > { %1142 = vst.msk [vmem:[#allocation5 + $0xc0] sm:$0xff] %vm1129_vm5, %v1058_v13  ;;  %11291 = vmatprep.mubr.msk.f32.mxu0 %vm2363_vm12, %v2331_v44  ;;  %2037 = vrot.lane.b32.xlu1 %v12892_v43, %s11992_s0 }
 0x192   : > { %2035 = vrot.lane.b32.xlu0 %v12894_v55, %s11992_s0 }
 0x193   : > { %v1253_v33 = vpop.permute.xlu1 %1252 }
 0x194   : > { %v1251_v34 = vpop.permute.xlu0 %1250  ;;  %v2332_v50 = vld [vmem:[#allocation5 + $0xb0] sm:$0xff]  ;;  %1336 = vst.msk [vmem:[#allocation5 + $0xd0] sm:$0xff] %vm1322_vm6, %v1253_v33 }
 0x195   : > { %1335 = vst.msk [vmem:[#allocation5 + $0xc0] sm:$0xff] %vm1322_vm6, %v1251_v34  ;;  %11292 = vmatmul.mubr.msk.f32.gmra.mrb[10].mxu0 %vm2363_vm12, %v2332_v50  ;;  %880 = vrot.lane.b32.xlu1 %v12824_v47, %s11987_s20 }
 0x196   : > { %2228 = vrot.lane.b32.xlu0 %v12907_v49, %s15703_s1 }
 0x197   : > { %v1446_v54 = vpop.permute.xlu1 %1445 }
 0x198   : > { %v1444_v57 = vpop.permute.xlu0 %1443  ;;  %1529 = vst.msk [vmem:[#allocation5 + $0xd0] sm:$0xff] %vm1515_vm7, %v1446_v54 }
 0x199   : > { %1528 = vst.msk [vmem:[#allocation5 + $0xc0] sm:$0xff] %vm1515_vm7, %v1444_v57  ;;  %882 = vrot.lane.b32.xlu1 %v12822_v15, %s11987_s20 }
 0x19a   : > { %2230 = vrot.lane.b32.xlu0 %v12916_v51, %s15703_s1 }
 0x19b   : > { %v1639_v58 = vpop.permute.xlu1 %1638 }
 0x19c   : > { %v1637_v59 = vpop.permute.xlu0 %1636  ;;  %1722 = vst.msk [vmem:[#allocation5 + $0xd0] sm:$0xff] %vm1708_vm8, %v1639_v58 }
 0x19d   : > { %1721 = vst.msk [vmem:[#allocation5 + $0xc0] sm:$0xff] %vm1708_vm8, %v1637_v59  ;;  %1075 = vrot.lane.b32.xlu1 %v12846_v24, %s15725_s29 }
 0x19e   : > { %1073 = vrot.lane.b32.xlu0 %v12837_v20, %s15725_s29 }
 0x19f   : > { %v1833_v60 = vpop.permute.xlu1 %1832 }
 0x1a0   : > { %v1831_v61 = vpop.permute.xlu0 %1830  ;;  %1916 = vst.msk [vmem:[#allocation5 + $0xd0] sm:$0xff] %vm1902_vm9, %v1833_v60 }
 0x1a1   : > { %1915 = vst.msk [vmem:[#allocation5 + $0xc0] sm:$0xff] %vm1902_vm9, %v1831_v61  ;;  %1268 = vrot.lane.b32.xlu1 %v12604_v52, %s11988_s21 }
 0x1a2   : > { %1266 = vrot.lane.b32.xlu0 %v12606_v53, %s11988_s21 }
 0x1a3   : > { %v2026_v62 = vpop.permute.xlu1 %2025 }
 0x1a4   : > { %v2024_v2 = vpop.permute.xlu0 %2023  ;;  %2109 = vst.msk [vmem:[#allocation5 + $0xd0] sm:$0xff] %vm2095_vm10, %v2026_v62 }
 0x1a5   : > { %2108 = vst.msk [vmem:[#allocation5 + $0xc0] sm:$0xff] %vm2095_vm10, %v2024_v2  ;;  %1461 = vrot.lane.b32.xlu1 %v12892_v43, %s11989_s22 }
 0x1a6   : > { %1459 = vrot.lane.b32.xlu0 %v12894_v55, %s11989_s22 }
 0x1a7   : > { %v869_v52 = vpop.permute.xlu1 %868 }
 0x1a8   : > { %v2217_v53 = vpop.permute.xlu0 %2216  ;;  %951 = vst.msk [vmem:[#allocation5 + $0xe0] sm:$0xff] %vm936_vm4, %v869_v52 }
 0x1a9   : > { %2301 = vst.msk [vmem:[#allocation5 + $0xc0] sm:$0xff] %vm2288_vm11, %v2217_v53  ;;  %1654 = vrot.lane.b32.xlu1 %v12916_v51, %s11990_s23 }
 0x1aa   : > { %1652 = vrot.lane.b32.xlu0 %v12907_v49, %s11990_s23 }
 0x1ab   : > { %v871_v5 = vpop.permute.xlu1 %870 }
 0x1ac   : > { %v2219_v6 = vpop.permute.xlu0 %2218  ;;  %952 = vst.msk [vmem:[#allocation5 + $0xf0] sm:$0xff] %vm936_vm4, %v871_v5 }
 0x1ad   : > { %2302 = vst.msk [vmem:[#allocation5 + $0xd0] sm:$0xff] %vm2288_vm11, %v2219_v6  ;;  %1848 = vrot.lane.b32.xlu1 %v12674_v18, %s11991_s26 }
 0x1ae   : > { %1846 = vrot.lane.b32.xlu0 %v12676_v19, %s11991_s26 }
 0x1af   : > { %v1064_v9 = vpop.permute.xlu1 %1063 }
 0x1b0   : > { %v1062_v63 = vpop.permute.xlu0 %1061  ;;  %v2333_v1 = vld [vmem:[#allocation5 + $0xc0] sm:$0xff]  ;;  %1145 = vst.msk [vmem:[#allocation5 + $0xf0] sm:$0xff] %vm1129_vm5, %v1064_v9 }
 0x1b1   : > { %1144 = vst.msk [vmem:[#allocation5 + $0xe0] sm:$0xff] %vm1129_vm5, %v1062_v63  ;;  %11294 = vmatprep.mubr.msk.f32.mxu0 %vm2363_vm12, %v2333_v1  ;;  %2041 = vrot.lane.b32.xlu1 %v12958_v7, %s11992_s0 }
 0x1b2   : > { %2039 = vrot.lane.b32.xlu0 %v12960_v8, %s11992_s0 }
 0x1b3   : > { %v1257_v11 = vpop.permute.xlu1 %1256 }
 0x1b4   : > { %v1255_v15 = vpop.permute.xlu0 %1254  ;;  %v2334_v47 = vld [vmem:[#allocation5 + $0xd0] sm:$0xff]  ;;  %1338 = vst.msk [vmem:[#allocation5 + $0xf0] sm:$0xff] %vm1322_vm6, %v1257_v11 }
 0x1b5   : > { %1337 = vst.msk [vmem:[#allocation5 + $0xe0] sm:$0xff] %vm1322_vm6, %v1255_v15  ;;  %11295 = vmatmul.mubr.msk.f32.gmra.mrb[12].mxu0 %vm2363_vm12, %v2334_v47  ;;  %884 = vrot.lane.b32.xlu1 %v12894_v55, %s11987_s20 }
 0x1b6   : > { %2232 = vrot.lane.b32.xlu0 %v12969_v10, %s15703_s1 }
 0x1b7   : > { %v1450_v16 = vpop.permute.xlu1 %1449 }
 0x1b8   : > { %v1448_v17 = vpop.permute.xlu0 %1447  ;;  %1531 = vst.msk [vmem:[#allocation5 + $0xf0] sm:$0xff] %vm1515_vm7, %v1450_v16 }
 0x1b9   : > { %1530 = vst.msk [vmem:[#allocation5 + $0xe0] sm:$0xff] %vm1515_vm7, %v1448_v17  ;;  %886 = vrot.lane.b32.xlu1 %v12892_v43, %s11987_s20 }
 0x1ba   : > { %2234 = vrot.lane.b32.xlu0 %v12978_v48, %s15703_s1 }
 0x1bb   : > { %v1643_v20 = vpop.permute.xlu1 %1642 }
 0x1bc   : > { %v1641_v21 = vpop.permute.xlu0 %1640  ;;  %1724 = vst.msk [vmem:[#allocation5 + $0xf0] sm:$0xff] %vm1708_vm8, %v1643_v20  ;;  %v13123_v20 = vld [vmem:[#allocation2 + $0x15a] sm:$0xff] }
 0x1bd   : > { %1723 = vst.msk [vmem:[#allocation5 + $0xe0] sm:$0xff] %vm1708_vm8, %v1641_v21  ;;  %1079 = vrot.lane.b32.xlu1 %v12916_v51, %s15725_s29 }
 0x1be   : > { %1077 = vrot.lane.b32.xlu0 %v12907_v49, %s15725_s29 }
 0x1bf   : > { %v1837_v22 = vpop.permute.xlu1 %1836 }
 0x1c0   : > { %v1835_v23 = vpop.permute.xlu0 %1834  ;;  %1918 = vst.msk [vmem:[#allocation5 + $0xf0] sm:$0xff] %vm1902_vm9, %v1837_v22 }
 0x1c1   : > { %1917 = vst.msk [vmem:[#allocation5 + $0xe0] sm:$0xff] %vm1902_vm9, %v1835_v23  ;;  %1272 = vrot.lane.b32.xlu1 %v12674_v18, %s11988_s21 }
 0x1c2   : > { %1270 = vrot.lane.b32.xlu0 %v12676_v19, %s11988_s21 }
 0x1c3   : > { %v2030_v24 = vpop.permute.xlu1 %2029 }
 0x1c4   : > { %v2028_v27 = vpop.permute.xlu0 %2027  ;;  %2111 = vst.msk [vmem:[#allocation5 + $0xf0] sm:$0xff] %vm2095_vm10, %v2030_v24 }
 0x1c5   : > { %2110 = vst.msk [vmem:[#allocation5 + $0xe0] sm:$0xff] %vm2095_vm10, %v2028_v27  ;;  %1465 = vrot.lane.b32.xlu1 %v12958_v7, %s11989_s22 }
 0x1c6   : > { %1463 = vrot.lane.b32.xlu0 %v12960_v8, %s11989_s22 }
 0x1c7   : > { %v873_v28 = vpop.permute.xlu1 %872 }
 0x1c8   : > { %v2221_v29 = vpop.permute.xlu0 %2220  ;;  %953 = vst.msk [vmem:[#allocation5 + $0x100] sm:$0xff] %vm936_vm4, %v873_v28 }
 0x1c9   : > { %2303 = vst.msk [vmem:[#allocation5 + $0xe0] sm:$0xff] %vm2288_vm11, %v2221_v29  ;;  %1658 = vrot.lane.b32.xlu1 %v12978_v48, %s11990_s23 }
 0x1ca   : > { %1656 = vrot.lane.b32.xlu0 %v12969_v10, %s11990_s23 }
 0x1cb   : > { %v875_v18 = vpop.permute.xlu1 %874 }
 0x1cc   : > { %v2223_v19 = vpop.permute.xlu0 %2222  ;;  %954 = vst.msk [vmem:[#allocation5 + $0x110] sm:$0xff] %vm936_vm4, %v875_v18 }
 0x1cd   : > { %2304 = vst.msk [vmem:[#allocation5 + $0xf0] sm:$0xff] %vm2288_vm11, %v2223_v19  ;;  %1852 = vrot.lane.b32.xlu1 %v12744_v45, %s11991_s26 }
 0x1ce   : > { %1850 = vrot.lane.b32.xlu0 %v12746_v46, %s11991_s26 }
 0x1cf   : > { %v1068_v32 = vpop.permute.xlu1 %1067 }
 0x1d0   : > { %v1066_v35 = vpop.permute.xlu0 %1065  ;;  %v2335_v36 = vld [vmem:[#allocation5 + $0xe0] sm:$0xff]  ;;  %1147 = vst.msk [vmem:[#allocation5 + $0x110] sm:$0xff] %vm1129_vm5, %v1068_v32 }
 0x1d1   : > { %1146 = vst.msk [vmem:[#allocation5 + $0x100] sm:$0xff] %vm1129_vm5, %v1066_v35  ;;  %11297 = vmatprep.mubr.msk.f32.mxu0 %vm2363_vm12, %v2335_v36  ;;  %2045 = vrot.lane.b32.xlu1 %v13016_v30, %s11992_s0 }
 0x1d2   : > { %2043 = vrot.lane.b32.xlu0 %v13018_v31, %s11992_s0 }
 0x1d3   : > { %v1261_v38 = vpop.permute.xlu1 %1260 }
 0x1d4   : > { %v1259_v25 = vpop.permute.xlu0 %1258  ;;  %v2336_v26 = vld [vmem:[#allocation5 + $0xf0] sm:$0xff]  ;;  %1340 = vst.msk [vmem:[#allocation5 + $0x110] sm:$0xff] %vm1322_vm6, %v1261_v38 }
 0x1d5   : > { %1339 = vst.msk [vmem:[#allocation5 + $0x100] sm:$0xff] %vm1322_vm6, %v1259_v25  ;;  %11298 = vmatmul.mubr.msk.f32.gmra.mrb[14].mxu0 %vm2363_vm12, %v2336_v26  ;;  %888 = vrot.lane.b32.xlu1 %v12960_v8, %s11987_s20  ;;  %v13097_v8 = vld [vmem:[#allocation2 + $0x151] sm:$0xff] }
 0x1d6   : > { %2236 = vrot.lane.b32.xlu0 %v13027_v37, %s15703_s1 }
 0x1d7   : > { %v1454_v43 = vpop.permute.xlu1 %1453 }
 0x1d8   : > { %v1452_v55 = vpop.permute.xlu0 %1451  ;;  %1533 = vst.msk [vmem:[#allocation5 + $0x110] sm:$0xff] %vm1515_vm7, %v1454_v43  ;;  %v11278_v56 = vpop.f32.mrb[0].mxu0  ;;  %v13176_v43 = vld [vmem:[#allocation2 + $0x169] sm:$0xff] }
 0x1d9   : > { %1532 = vst.msk [vmem:[#allocation5 + $0x100] sm:$0xff] %vm1515_vm7, %v1452_v55  ;;  %v2536_v13 = vadd.f32 %v11278_v56, %v13039_v39  ;;  %v2530_v44 = vpop.f32.mrb[1].mxu0  ;;  %890 = vrot.lane.b32.xlu1 %v12958_v7, %s11987_s20  ;;  %v13095_v7 = vld [vmem:[#allocation2 + $0x159] sm:$0xff] }
 0x1da   : > { %2238 = vrot.lane.b32.xlu0 %v13041_v40, %s15703_s1  ;;  %v2531_v49 = vadd.f32 %v13039_v39, %v2530_v44  ;;  %v13185_v44 = vld [vmem:[#allocation2 + $0x16a] sm:$0xff] }
 0x1db   : > { %v2690_v33 = vmax.f32 %v2536_v13, 0.0  ;;  %v1647_v34 = vpop.permute.xlu1 %1646 }
 0x1dc   : > { %v1645_v50 = vpop.permute.xlu0 %1644  ;;  %v2689_v51 = vmax.f32 %v2531_v49, 0.0  ;;  %1726 = vst.msk [vmem:[#allocation5 + $0x110] sm:$0xff] %vm1708_vm8, %v1647_v34 }
 0x1dd   : > { %1725 = vst.msk [vmem:[#allocation5 + $0x100] sm:$0xff] %vm1708_vm8, %v1645_v50  ;;  %1083 = vrot.lane.b32.xlu1 %v12978_v48, %s15725_s29 }
 0x1de   : > { %2722 = vst.msk [vmem:[#allocation2 + $0x21] sm:$0xff] %vm563_vm0, %v2690_v33  ;;  %1081 = vrot.lane.b32.xlu0 %v12969_v10, %s15725_s29  ;;  %2721 = vst.msk [vmem:[#allocation2 + $0x19] sm:$0xff] %vm563_vm0, %v2689_v51  ;;  %v13106_v10 = vld [vmem:[#allocation2 + $0x152] sm:$0xff] }
 0x1df   : > { %v1841_v54 = vpop.permute.xlu1 %1840 }
 0x1e0   : > { %v1839_v57 = vpop.permute.xlu0 %1838  ;;  %1920 = vst.msk [vmem:[#allocation5 + $0x110] sm:$0xff] %vm1902_vm9, %v1841_v54 }
 0x1e1   : > { %1919 = vst.msk [vmem:[#allocation5 + $0x100] sm:$0xff] %vm1902_vm9, %v1839_v57  ;;  %1276 = vrot.lane.b32.xlu1 %v12744_v45, %s11988_s21  ;;  %v13202_v57 = vld [vmem:[#allocation2 + $0x172] sm:$0xff] }
 0x1e2   : > { %1274 = vrot.lane.b32.xlu0 %v12746_v46, %s11988_s21 }
 0x1e3   : > { %v2034_v58 = vpop.permute.xlu1 %2033 }
 0x1e4   : > { %v2032_v59 = vpop.permute.xlu0 %2031  ;;  %2113 = vst.msk [vmem:[#allocation5 + $0x110] sm:$0xff] %vm2095_vm10, %v2034_v58 }
 0x1e5   : > { %2112 = vst.msk [vmem:[#allocation5 + $0x100] sm:$0xff] %vm2095_vm10, %v2032_v59  ;;  %1469 = vrot.lane.b32.xlu1 %v13016_v30, %s11989_s22  ;;  %v13071_v60 = vld [vmem:[#allocation2 + $0x18] sm:$0xff]  ;;  %v13073_v61 = vld [vmem:[#allocation2 + $0x20] sm:$0xff] }
 0x1e6   : > { %1467 = vrot.lane.b32.xlu0 %v13018_v31, %s11989_s22  ;;  %2787 = vst.msk [vmem:[#allocation5 + $0x20] sm:$0xff] %vm563_vm0, %v13071_v60  ;;  %2788 = vst.msk [vmem:[#allocation5 + $0x30] sm:$0xff] %vm563_vm0, %v13073_v61 }
 0x1e7   : > { %v877_v45 = vpop.permute.xlu1 %876 }
 0x1e8   : > { %v2225_v46 = vpop.permute.xlu0 %2224  ;;  %955 = vst.msk [vmem:[#allocation5 + $0x120] sm:$0xff] %vm936_vm4, %v877_v45  ;;  %v11281_v62 = vpop.f32.mrb[2].mxu0 }
 0x1e9   : > { %2305 = vst.msk [vmem:[#allocation5 + $0x100] sm:$0xff] %vm2288_vm11, %v2225_v46  ;;  %v2546_v2 = vadd.f32 %v11281_v62, %v13039_v39  ;;  %v2540_v3 = vpop.f32.mrb[3].mxu0  ;;  %1662 = vrot.lane.b32.xlu1 %v13041_v40, %s11990_s23 }
 0x1ea   : > { %1660 = vrot.lane.b32.xlu0 %v13027_v37, %s11990_s23  ;;  %v2541_v4 = vadd.f32 %v13039_v39, %v2540_v3 }
 0x1eb   : > { %v2692_v52 = vmax.f32 %v2546_v2, 0.0  ;;  %v879_v53 = vpop.permute.xlu1 %878 }
 0x1ec   : > { %v2227_v5 = vpop.permute.xlu0 %2226  ;;  %v2691_v6 = vmax.f32 %v2541_v4, 0.0  ;;  %956 = vst.msk [vmem:[#allocation5 + $0x130] sm:$0xff] %vm936_vm4, %v879_v53 }
 0x1ed   : > { %2306 = vst.msk [vmem:[#allocation5 + $0x110] sm:$0xff] %vm2288_vm11, %v2227_v5  ;;  %1856 = vrot.lane.b32.xlu1 %v12818_v12, %s11991_s26 }
 0x1ee   : > { %2724 = vst.msk [vmem:[#allocation2 + $0x39] sm:$0xff] %vm563_vm0, %v2692_v52  ;;  %1854 = vrot.lane.b32.xlu0 %v12820_v14, %s11991_s26  ;;  %2723 = vst.msk [vmem:[#allocation2 + $0x31] sm:$0xff] %vm563_vm0, %v2691_v6 }
 0x1ef   : > { %v1072_v9 = vpop.permute.xlu1 %1071 }
 0x1f0   : > { %v1070_v63 = vpop.permute.xlu0 %1069  ;;  %v2337_v1 = vld [vmem:[#allocation5 + $0x100] sm:$0xff]  ;;  %1149 = vst.msk [vmem:[#allocation5 + $0x130] sm:$0xff] %vm1129_vm5, %v1072_v9 }
 0x1f1   : > { %1148 = vst.msk [vmem:[#allocation5 + $0x120] sm:$0xff] %vm1129_vm5, %v1070_v63  ;;  %11300 = vmatprep.mubr.msk.f32.mxu0 %vm2363_vm12, %v2337_v1  ;;  %2049 = vrot.lane.b32.xlu1 %v13095_v7, %s11992_s0  ;;  %v1770_v9 = vld [vmem:[#allocation2 + $0x180] sm:$0xff] }
 0x1f2   : > { %2047 = vrot.lane.b32.xlu0 %v13097_v8, %s11992_s0 }
 0x1f3   : > { %v1265_v11 = vpop.permute.xlu1 %1264 }
 0x1f4   : > { %v1263_v15 = vpop.permute.xlu0 %1262  ;;  %v2338_v47 = vld [vmem:[#allocation5 + $0x110] sm:$0xff]  ;;  %1342 = vst.msk [vmem:[#allocation5 + $0x130] sm:$0xff] %vm1322_vm6, %v1265_v11 }
 0x1f5   : > { %1341 = vst.msk [vmem:[#allocation5 + $0x120] sm:$0xff] %vm1322_vm6, %v1263_v15  ;;  %11301 = vmatmul.mubr.msk.f32.gmra.mrb[16].mxu0 %vm2363_vm12, %v2338_v47  ;;  %v13111_v48 = vld [vmem:[#allocation2 + $0x3a] sm:$0xff]  ;;  %892 = vrot.lane.b32.xlu1 %v13018_v31, %s11987_s20  ;;  %v13117_v16 = vld [vmem:[#allocation2 + $0x32] sm:$0xff]  ;;  %v1964_v15 = vld [vmem:[#allocation2 + $0x189] sm:$0xff] }
 0x1f6   : > { %2240 = vrot.lane.b32.xlu0 %v13106_v10, %s15703_s1  ;;  %v13119_v17 = vld [vmem:[#allocation2 + $0x30] sm:$0xff]  ;;  %4201 = vst.msk [vmem:[#allocation5 + $0x18] sm:$0xff] %vm563_vm0, %v13111_v48  ;;  %4200 = vst.msk [vmem:[#allocation5 + $0x8] sm:$0xff] %vm563_vm0, %v13117_v16  ;;  %v13127_v21 = vld [vmem:[#allocation2 + $0x38] sm:$0xff] }
 0x1f7   : > { %2789 = vst.msk [vmem:[#allocation5 + $0x40] sm:$0xff] %vm563_vm0, %v13119_v17  ;;  %v1458_v22 = vpop.permute.xlu1 %1457  ;;  %2790 = vst.msk [vmem:[#allocation5 + $0x50] sm:$0xff] %vm563_vm0, %v13127_v21  ;;  %v1963_v47 = vld [vmem:[#allocation2 + $0x181] sm:$0xff] }
 0x1f8   : > { %v1456_v23 = vpop.permute.xlu0 %1455  ;;  %1535 = vst.msk [vmem:[#allocation5 + $0x130] sm:$0xff] %vm1515_vm7, %v1458_v22 }
 0x1f9   : > { %1534 = vst.msk [vmem:[#allocation5 + $0x120] sm:$0xff] %vm1515_vm7, %v1456_v23  ;;  %894 = vrot.lane.b32.xlu1 %v13016_v30, %s11987_s20 }
 0x1fa   : > { %2242 = vrot.lane.b32.xlu0 %v13123_v20, %s15703_s1 }
 0x1fb   : > { %v1651_v24 = vpop.permute.xlu1 %1650 }
 0x1fc   : > { %v1649_v27 = vpop.permute.xlu0 %1648  ;;  %1728 = vst.msk [vmem:[#allocation5 + $0x130] sm:$0xff] %vm1708_vm8, %v1651_v24  ;;  %v13255_v24 = vld [vmem:[#allocation2 + $0x182] sm:$0xff] }
 0x1fd   : > { %1727 = vst.msk [vmem:[#allocation5 + $0x120] sm:$0xff] %vm1708_vm8, %v1649_v27  ;;  %1087 = vrot.lane.b32.xlu1 %v13041_v40, %s15725_s29  ;;  %v4233_v28 = vld [vmem:[#allocation5 + $0x8] sm:$0xff]  ;;  %v13174_v40 = vld [vmem:[#allocation2 + $0x171] sm:$0xff] }
 0x1fe   : > { %1085 = vrot.lane.b32.xlu0 %v13027_v37, %s15725_s29  ;;  %10829 = vmatprep.mubr.msk.f32.mxu1 %vm563_vm0, %v4233_v28 }
 0x1ff   : > { %v1845_v29 = vpop.permute.xlu1 %1844 }
 0x200   : > { %v1843_v18 = vpop.permute.xlu0 %1842  ;;  %1922 = vst.msk [vmem:[#allocation5 + $0x130] sm:$0xff] %vm1902_vm9, %v1845_v29 }
 0x201   : > { %1921 = vst.msk [vmem:[#allocation5 + $0x120] sm:$0xff] %vm1902_vm9, %v1843_v18  ;;  %1280 = vrot.lane.b32.xlu1 %v12818_v12, %s11988_s21 }
 0x202   : > { %1278 = vrot.lane.b32.xlu0 %v12820_v14, %s11988_s21 }
 0x203   : > { %v2038_v19 = vpop.permute.xlu1 %2037 }
 0x204   : > { %v2036_v30 = vpop.permute.xlu0 %2035  ;;  %2115 = vst.msk [vmem:[#allocation5 + $0x130] sm:$0xff] %vm2095_vm10, %v2038_v19 }
 0x205   : > { %2114 = vst.msk [vmem:[#allocation5 + $0x120] sm:$0xff] %vm2095_vm10, %v2036_v30  ;;  %1473 = vrot.lane.b32.xlu1 %v13095_v7, %s11989_s22 }
 0x206   : > { %1471 = vrot.lane.b32.xlu0 %v13097_v8, %s11989_s22 }
 0x207   : > { %v881_v31 = vpop.permute.xlu1 %880 }
 0x208   : > { %v2229_v32 = vpop.permute.xlu0 %2228  ;;  %957 = vst.msk [vmem:[#allocation5 + $0x140] sm:$0xff] %vm936_vm4, %v881_v31  ;;  %v11284_v12 = vpop.f32.mrb[4].mxu0  ;;  %v2157_v31 = vld [vmem:[#allocation2 + $0x18a] sm:$0xff] }
 0x209   : > { %2307 = vst.msk [vmem:[#allocation5 + $0x120] sm:$0xff] %vm2288_vm11, %v2229_v32  ;;  %v2556_v14 = vadd.f32 %v11284_v12, %v13039_v39  ;;  %v2550_v35 = vpop.f32.mrb[5].mxu0  ;;  %1666 = vrot.lane.b32.xlu1 %v13123_v20, %s11990_s23 }
 0x20a   : > { %1664 = vrot.lane.b32.xlu0 %v13106_v10, %s11990_s23  ;;  %v2551_v36 = vadd.f32 %v13039_v39, %v2550_v35 }
 0x20b   : > { %v2694_v37 = vmax.f32 %v2556_v14, 0.0  ;;  %v883_v38 = vpop.permute.xlu1 %882 }
 0x20c   : > { %v2231_v25 = vpop.permute.xlu0 %2230  ;;  %v2693_v26 = vmax.f32 %v2551_v36, 0.0  ;;  %958 = vst.msk [vmem:[#allocation5 + $0x150] sm:$0xff] %vm936_vm4, %v883_v38 }
 0x20d   : > { %2308 = vst.msk [vmem:[#allocation5 + $0x130] sm:$0xff] %vm2288_vm11, %v2231_v25  ;;  %1860 = vrot.lane.b32.xlu1 %v12888_v41, %s11991_s26  ;;  %v4296_v25 = vld [vmem:[%s15727_s3] sm:$0xff] }
 0x20e   : > { %2726 = vst.msk [vmem:[#allocation2 + $0x51] sm:$0xff] %vm563_vm0, %v2694_v37  ;;  %1858 = vrot.lane.b32.xlu0 %v12890_v42, %s11991_s26  ;;  %2725 = vst.msk [vmem:[#allocation2 + $0x49] sm:$0xff] %vm563_vm0, %v2693_v26  ;;  %v4297_v26 = vld [vmem:[%s15727_s3 + $0x8] sm:$0xff] }
 0x20f   : > { %v1076_v55 = vpop.permute.xlu1 %1075 }
 0x210   : > { %v1074_v56 = vpop.permute.xlu0 %1073  ;;  %v2339_v13 = vld [vmem:[#allocation5 + $0x120] sm:$0xff]  ;;  %1151 = vst.msk [vmem:[#allocation5 + $0x150] sm:$0xff] %vm1129_vm5, %v1076_v55 }
 0x211   : > { %1150 = vst.msk [vmem:[#allocation5 + $0x140] sm:$0xff] %vm1129_vm5, %v1074_v56  ;;  %11303 = vmatprep.mubr.msk.f32.mxu0 %vm2363_vm12, %v2339_v13  ;;  %2053 = vrot.lane.b32.xlu1 %v13174_v40, %s11992_s0  ;;  %v4298_v13 = vld [vmem:[%s15727_s3 + $0x10] sm:$0xff] }
 0x212   : > { %2051 = vrot.lane.b32.xlu0 %v13176_v43, %s11992_s0 }
 0x213   : > { %v1269_v49 = vpop.permute.xlu1 %1268 }
 0x214   : > { %v1267_v33 = vpop.permute.xlu0 %1266  ;;  %v2340_v34 = vld [vmem:[#allocation5 + $0x130] sm:$0xff]  ;;  %1344 = vst.msk [vmem:[#allocation5 + $0x150] sm:$0xff] %vm1322_vm6, %v1269_v49 }
 0x215   : > { %1343 = vst.msk [vmem:[#allocation5 + $0x140] sm:$0xff] %vm1322_vm6, %v1267_v33  ;;  %11304 = vmatmul.mubr.msk.f32.gmra.mrb[18].mxu0 %vm2363_vm12, %v2340_v34  ;;  %v13190_v50 = vld [vmem:[#allocation2 + $0x52] sm:$0xff]  ;;  %896 = vrot.lane.b32.xlu1 %v13097_v8, %s11987_s20  ;;  %v13196_v51 = vld [vmem:[#allocation2 + $0x48] sm:$0xff] }
 0x216   : > { %2244 = vrot.lane.b32.xlu0 %v13185_v44, %s15703_s1  ;;  %v13198_v54 = vld [vmem:[#allocation2 + $0x50] sm:$0xff]  ;;  %4203 = vst.msk [vmem:[#allocation5 + $0x38] sm:$0xff] %vm563_vm0, %v13190_v50  ;;  %2791 = vst.msk [vmem:[#allocation5 + $0x60] sm:$0xff] %vm563_vm0, %v13196_v51  ;;  %v1771_v8 = vld [vmem:[#allocation2 + $0x188] sm:$0xff] }
 0x217   : > { %v13204_v58 = vld [vmem:[#allocation2 + $0x4a] sm:$0xff]  ;;  %2792 = vst.msk [vmem:[#allocation5 + $0x70] sm:$0xff] %vm563_vm0, %v13198_v54  ;;  %v1462_v59 = vpop.permute.xlu1 %1461 }
 0x218   : > { %v1460_v45 = vpop.permute.xlu0 %1459  ;;  %4202 = vst.msk [vmem:[#allocation5 + $0x28] sm:$0xff] %vm563_vm0, %v13204_v58 }
 0x219   : > { %1537 = vst.msk [vmem:[#allocation5 + $0x150] sm:$0xff] %vm1515_vm7, %v1462_v59  ;;  %1536 = vst.msk [vmem:[#allocation5 + $0x140] sm:$0xff] %vm1515_vm7, %v1460_v45  ;;  %898 = vrot.lane.b32.xlu1 %v13095_v7, %s11987_s20  ;;  %v4300_v59 = vld [vmem:[%s15727_s3 + $0x20] sm:$0xff]  ;;  %v4301_v45 = vld [vmem:[%s15727_s3 + $0x28] sm:$0xff] }
 0x21a   : > { %2246 = vrot.lane.b32.xlu0 %v13202_v57, %s15703_s1 }
 0x21b   : > { %v1655_v46 = vpop.permute.xlu1 %1654 }
 0x21c   : > { %v1653_v62 = vpop.permute.xlu0 %1652  ;;  %1730 = vst.msk [vmem:[#allocation5 + $0x150] sm:$0xff] %vm1708_vm8, %v1655_v46 }
 0x21d   : > { %1729 = vst.msk [vmem:[#allocation5 + $0x140] sm:$0xff] %vm1708_vm8, %v1653_v62  ;;  %1091 = vrot.lane.b32.xlu1 %v13123_v20, %s15725_s29 }
 0x21e   : > { %1089 = vrot.lane.b32.xlu0 %v13106_v10, %s15725_s29 }
 0x21f   : > { %v1849_v2 = vpop.permute.xlu1 %1848 }
 0x220   : > { %v1847_v3 = vpop.permute.xlu0 %1846  ;;  %1924 = vst.msk [vmem:[#allocation5 + $0x150] sm:$0xff] %vm1902_vm9, %v1849_v2  ;;  %v11335_v2 = vpack.c.bf16 %v4301_v45, %v4300_v59  ;;  %v4311_v59 = vld [vmem:[%s15727_s3 + $0x78] sm:$0xff]  ;;  %v2818_v45 = vld [vmem:[#allocation2 + $0x9] sm:$0xff] }
 0x221   : > { %1923 = vst.msk [vmem:[#allocation5 + $0x140] sm:$0xff] %vm1902_vm9, %v1847_v3  ;;  %1284 = vrot.lane.b32.xlu1 %v12888_v41, %s11988_s21 }
 0x222   : > { %1282 = vrot.lane.b32.xlu0 %v12890_v42, %s11988_s21 }
 0x223   : > { %v2042_v4 = vpop.permute.xlu1 %2041 }
 0x224   : > { %v2040_v52 = vpop.permute.xlu0 %2039  ;;  %2117 = vst.msk [vmem:[#allocation5 + $0x150] sm:$0xff] %vm2095_vm10, %v2042_v4  ;;  %v1773_v4 = vld [vmem:[#allocation2 + $0x1a0] sm:$0xff] }
 0x225   : > { %2116 = vst.msk [vmem:[#allocation5 + $0x140] sm:$0xff] %vm2095_vm10, %v2040_v52  ;;  %1477 = vrot.lane.b32.xlu1 %v13174_v40, %s11989_s22  ;;  %v1772_v52 = vld [vmem:[#allocation2 + $0x198] sm:$0xff] }
 0x226   : > { %1475 = vrot.lane.b32.xlu0 %v13176_v43, %s11989_s22 }
 0x227   : > { %v885_v53 = vpop.permute.xlu1 %884 }
 0x228   : > { %v2233_v5 = vpop.permute.xlu0 %2232  ;;  %959 = vst.msk [vmem:[#allocation5 + $0x160] sm:$0xff] %vm936_vm4, %v885_v53  ;;  %v11287_v41 = vpop.f32.mrb[6].mxu0 }
 0x229   : > { %2309 = vst.msk [vmem:[#allocation5 + $0x140] sm:$0xff] %vm2288_vm11, %v2233_v5  ;;  %v2566_v42 = vadd.f32 %v11287_v41, %v13039_v39  ;;  %v2560_v6 = vpop.f32.mrb[7].mxu0  ;;  %1670 = vrot.lane.b32.xlu1 %v13202_v57, %s11990_s23 }
 0x22a   : > { %1668 = vrot.lane.b32.xlu0 %v13185_v44, %s11990_s23  ;;  %v2561_v7 = vadd.f32 %v13039_v39, %v2560_v6  ;;  %v4302_v6 = vld [vmem:[%s15727_s3 + $0x30] sm:$0xff] }
 0x22b   : > { %v2696_v63 = vmax.f32 %v2566_v42, 0.0  ;;  %v887_v1 = vpop.permute.xlu1 %886 }
 0x22c   : > { %v2235_v10 = vpop.permute.xlu0 %2234  ;;  %v2695_v11 = vmax.f32 %v2561_v7, 0.0  ;;  %960 = vst.msk [vmem:[#allocation5 + $0x170] sm:$0xff] %vm936_vm4, %v887_v1  ;;  %v4303_v7 = vld [vmem:[%s15727_s3 + $0x38] sm:$0xff] }
 0x22d   : > { %2310 = vst.msk [vmem:[#allocation5 + $0x150] sm:$0xff] %vm2288_vm11, %v2235_v10  ;;  %1864 = vrot.lane.b32.xlu1 %v1771_v8, %s11991_s26 }
 0x22e   : > { %2728 = vst.msk [vmem:[#allocation2 + $0x69] sm:$0xff] %vm563_vm0, %v2696_v63  ;;  %1862 = vrot.lane.b32.xlu0 %v1770_v9, %s11991_s26  ;;  %2727 = vst.msk [vmem:[#allocation2 + $0x61] sm:$0xff] %vm563_vm0, %v2695_v11  ;;  %v1965_v63 = vld [vmem:[#allocation2 + $0x199] sm:$0xff] }
 0x22f   : > { %v1080_v20 = vpop.permute.xlu1 %1079 }
 0x230   : > { %v1078_v22 = vpop.permute.xlu0 %1077  ;;  %v2341_v23 = vld [vmem:[#allocation5 + $0x140] sm:$0xff]  ;;  %1153 = vst.msk [vmem:[#allocation5 + $0x170] sm:$0xff] %vm1129_vm5, %v1080_v20 }
 0x231   : > { %1152 = vst.msk [vmem:[#allocation5 + $0x160] sm:$0xff] %vm1129_vm5, %v1078_v22  ;;  %11306 = vmatprep.mubr.msk.f32.mxu0 %vm2363_vm12, %v2341_v23  ;;  %2057 = vrot.lane.b32.xlu1 %v1964_v15, %s11992_s0  ;;  %v2159_v22 = vld [vmem:[#allocation2 + $0x1a2] sm:$0xff]  ;;  %v2158_v23 = vld [vmem:[#allocation2 + $0x19a] sm:$0xff] }
 0x232   : > { %2055 = vrot.lane.b32.xlu0 %v1963_v47, %s11992_s0 }
 0x233   : > { %v1273_v27 = vpop.permute.xlu1 %1272 }
 0x234   : > { %v1271_v28 = vpop.permute.xlu0 %1270  ;;  %v2342_v29 = vld [vmem:[#allocation5 + $0x150] sm:$0xff]  ;;  %1346 = vst.msk [vmem:[#allocation5 + $0x170] sm:$0xff] %vm1322_vm6, %v1273_v27 }
 0x235   : > { %1345 = vst.msk [vmem:[#allocation5 + $0x160] sm:$0xff] %vm1322_vm6, %v1271_v28  ;;  %11307 = vmatmul.mubr.msk.f32.gmra.mrb[20].mxu0 %vm2363_vm12, %v2342_v29  ;;  %v13260_v18 = vld [vmem:[#allocation2 + $0x6a] sm:$0xff]  ;;  %900 = vrot.lane.b32.xlu1 %v13176_v43, %s11987_s20  ;;  %v13266_v19 = vld [vmem:[#allocation2 + $0x60] sm:$0xff]  ;;  %v11994_v43 = vmov 0.0|0.0  }
 0x236   : > { %2248 = vrot.lane.b32.xlu0 %v13255_v24, %s15703_s1  ;;  %v13268_v30 = vld [vmem:[#allocation2 + $0x68] sm:$0xff]  ;;  %4205 = vst.msk [vmem:[#allocation5 + $0x58] sm:$0xff] %vm563_vm0, %v13260_v18  ;;  %2793 = vst.msk [vmem:[#allocation5 + $0x80] sm:$0xff] %vm563_vm0, %v13266_v19  ;;  %11328 = vmatprep.subr.bf16.mxu1 %v11994_v43 }
 0x237   : > { %v13272_v32 = vld [vmem:[#allocation2 + $0x62] sm:$0xff]  ;;  %2794 = vst.msk [vmem:[#allocation5 + $0x90] sm:$0xff] %vm563_vm0, %v13268_v30  ;;  %v1466_v12 = vpop.permute.xlu1 %1465  ;;  %11355 = vmatprep.subr.bf16.mxu0 %v11994_v43 }
 0x238   : > { %v1464_v14 = vpop.permute.xlu0 %1463  ;;  %4204 = vst.msk [vmem:[#allocation5 + $0x48] sm:$0xff] %vm563_vm0, %v13272_v32  ;;  %v3010_v29 = vld [vmem:[#allocation2 + $0x2] sm:$0xff] }
 0x239   : > { %1539 = vst.msk [vmem:[#allocation5 + $0x170] sm:$0xff] %vm1515_vm7, %v1466_v12  ;;  %1538 = vst.msk [vmem:[#allocation5 + $0x160] sm:$0xff] %vm1515_vm7, %v1464_v14  ;;  %902 = vrot.lane.b32.xlu1 %v13174_v40, %s11987_s20  ;;  %v11329_v40 = vpack.c.bf16 %v4297_v26, %v4296_v25  ;;  %v4306_v12 = vld [vmem:[%s15727_s3 + $0x50] sm:$0xff]  ;;  %v2817_v14 = vld [vmem:[#allocation2 + $0x1] sm:$0xff] }
 0x23a   : > { %2250 = vrot.lane.b32.xlu0 %v2157_v31, %s15703_s1 }
 0x23b   : > { %v1659_v35 = vpop.permute.xlu1 %1658  ;;  %11330 = vmatpush1.bf16.msra.mxu1 %v11329_v40 }
 0x23c   : > { %v1657_v36 = vpop.permute.xlu0 %1656  ;;  %1732 = vst.msk [vmem:[#allocation5 + $0x170] sm:$0xff] %vm1708_vm8, %v1659_v35  ;;  %11331 = vmatprep.subr.bf16.mxu1 %v11994_v43 }
 0x23d   : > { %1731 = vst.msk [vmem:[#allocation5 + $0x160] sm:$0xff] %vm1708_vm8, %v1657_v36  ;;  %1095 = vrot.lane.b32.xlu1 %v13202_v57, %s15725_s29 }
 0x23e   : > { %1093 = vrot.lane.b32.xlu0 %v13185_v44, %s15725_s29  ;;  %v4299_v44 = vld [vmem:[%s15727_s3 + $0x18] sm:$0xff] }
 0x23f   : > { %v1853_v37 = vpop.permute.xlu1 %1852  ;;  %v11332_v49 = vpack.c.bf16 %v4299_v44, %v4298_v13  ;;  %v4309_v13 = vld [vmem:[%s15727_s3 + $0x68] sm:$0xff] }
 0x240   : > { %v1851_v38 = vpop.permute.xlu0 %1850  ;;  %1926 = vst.msk [vmem:[#allocation5 + $0x170] sm:$0xff] %vm1902_vm9, %v1853_v37 }
 0x241   : > { %1925 = vst.msk [vmem:[#allocation5 + $0x160] sm:$0xff] %vm1902_vm9, %v1851_v38  ;;  %1288 = vrot.lane.b32.xlu1 %v1771_v8, %s11988_s21  ;;  %11333 = vmatpush1.bf16.msra.mxu1 %v11332_v49  ;;  %v11338_v8 = vpack.c.bf16 %v4303_v7, %v4302_v6  ;;  %v4307_v38 = vld [vmem:[%s15727_s3 + $0x58] sm:$0xff] }
 0x242   : > { %1286 = vrot.lane.b32.xlu0 %v1770_v9, %s11988_s21  ;;  %11334 = vmatprep.subr.bf16.mxu1 %v11994_v43  ;;  %v1966_v9 = vld [vmem:[#allocation2 + $0x1a1] sm:$0xff] }
 0x243   : > { %v2046_v55 = vpop.permute.xlu1 %2045 }
 0x244   : > { %v2044_v56 = vpop.permute.xlu0 %2043  ;;  %2119 = vst.msk [vmem:[#allocation5 + $0x170] sm:$0xff] %vm2095_vm10, %v2046_v55  ;;  %v11344_v55 = vpack.c.bf16 %v4307_v38, %v4306_v12 }
 0x245   : > { %2118 = vst.msk [vmem:[#allocation5 + $0x160] sm:$0xff] %vm2095_vm10, %v2044_v56  ;;  %1481 = vrot.lane.b32.xlu1 %v1964_v15, %s11989_s22  ;;  %11336 = vmatpush1.bf16.msra.mxu1 %v11335_v2  ;;  %v4304_v15 = vld [vmem:[%s15727_s3 + $0x40] sm:$0xff] }
 0x246   : > { %1479 = vrot.lane.b32.xlu0 %v1963_v47, %s11989_s22  ;;  %11337 = vmatprep.subr.bf16.mxu1 %v11994_v43  ;;  %v4305_v47 = vld [vmem:[%s15727_s3 + $0x48] sm:$0xff]  ;;  %v4308_v56 = vld [vmem:[%s15727_s3 + $0x60] sm:$0xff]  ;;  %s15707_s22 = smov 48  }
 0x247   : > { %v889_v33 = vpop.permute.xlu1 %888  ;;  %v11341_v20 = vpack.c.bf16 %v4305_v47, %v4304_v15  ;;  %v11347_v44 = vpack.c.bf16 %v4309_v13, %v4308_v56 }
 0x248   : > { %v2237_v34 = vpop.permute.xlu0 %2236  ;;  %961 = vst.msk [vmem:[#allocation5 + $0x180] sm:$0xff] %vm936_vm4, %v889_v33  ;;  %v11290_v57 = vpop.f32.mrb[8].mxu0 }
 0x249   : > { %2311 = vst.msk [vmem:[#allocation5 + $0x160] sm:$0xff] %vm2288_vm11, %v2237_v34  ;;  %v2576_v46 = vadd.f32 %v11290_v57, %v13039_v39  ;;  %v2570_v62 = vpop.f32.mrb[9].mxu0  ;;  %1674 = vrot.lane.b32.xlu1 %v2157_v31, %s11990_s23  ;;  %11339 = vmatpush1.bf16.msra.mxu1 %v11338_v8  ;;  %v2754_v31 = vld [vmem:[#allocation2 + $0x8] sm:$0xff]  ;;  %v3396_v34 = vld [vmem:[#allocation2 + $0x19] sm:$0xff]  ;;  %v4310_v57 = vld [vmem:[%s15727_s3 + $0x70] sm:$0xff] }
 0x24a   : > { %1672 = vrot.lane.b32.xlu0 %v13255_v24, %s11990_s23  ;;  %v2571_v3 = vadd.f32 %v13039_v39, %v2570_v62  ;;  %11340 = vmatprep.subr.bf16.mxu1 %v11994_v43  ;;  %2786 = vst.msk [vmem:[#allocation5 + $0x10] sm:$0xff] %vm563_vm0, %v2754_v31  ;;  %v13424_v8 = vld [vmem:[#allocation2 + $0x31] sm:$0xff]  ;;  %s15732_s23 = smov 112  }
 0x24b   : > { %v2698_v53 = vmax.f32 %v2576_v46, 0.0  ;;  %v891_v5 = vpop.permute.xlu1 %890  ;;  %v11350_v46 = vpack.c.bf16 %v4311_v59, %v4310_v57 }
 0x24c   : > { %v2239_v41 = vpop.permute.xlu0 %2238  ;;  %v2697_v42 = vmax.f32 %v2571_v3, 0.0  ;;  %962 = vst.msk [vmem:[#allocation5 + $0x190] sm:$0xff] %vm936_vm4, %v891_v5  ;;  %v3589_v3 = vld [vmem:[#allocation2 + $0x1a] sm:$0xff] }
 0x24d   : > { %2312 = vst.msk [vmem:[#allocation5 + $0x170] sm:$0xff] %vm2288_vm11, %v2239_v41  ;;  %1868 = vrot.lane.b32.xlu1 %v1773_v4, %s11991_s26  ;;  %11342 = vmatpush1.bf16.msra.mxu1 %v11341_v20  ;;  %v4312_v4 = vld [vmem:[%s15727_s3 + $0x80] sm:$0xff] }
 0x24e   : > { %2730 = vst.msk [vmem:[#allocation2 + $0x81] sm:$0xff] %vm563_vm0, %v2698_v53  ;;  %1866 = vrot.lane.b32.xlu0 %v1772_v52, %s11991_s26  ;;  %2729 = vst.msk [vmem:[#allocation2 + $0x79] sm:$0xff] %vm563_vm0, %v2697_v42  ;;  %11343 = vmatprep.subr.bf16.mxu1 %v11994_v43  ;;  %s15705_s26 = smov 80   ;;  %v3011_v52 = vld [vmem:[#allocation2 + $0xa] sm:$0xff]  ;;  %v3397_v20 = vld [vmem:[#allocation2 + $0x21] sm:$0xff] }
 0x24f   : > { %v1084_v1 = vpop.permute.xlu1 %1083 }
 0x250   : > { %v1082_v10 = vpop.permute.xlu0 %1081  ;;  %v2343_v11 = vld [vmem:[#allocation5 + $0x160] sm:$0xff]  ;;  %1155 = vst.msk [vmem:[#allocation5 + $0x190] sm:$0xff] %vm1129_vm5, %v1084_v1 }
 0x251   : > { %1154 = vst.msk [vmem:[#allocation5 + $0x180] sm:$0xff] %vm1129_vm5, %v1082_v10  ;;  %11309 = vmatprep.mubr.msk.f32.mxu0 %vm2363_vm12, %v2343_v11  ;;  %2061 = vrot.lane.b32.xlu1 %v1966_v9, %s11992_s0 }
 0x252   : > { %2059 = vrot.lane.b32.xlu0 %v1965_v63, %s11992_s0  ;;  %11345 = vmatpush1.bf16.msra.mxu1 %v11344_v55  ;;  %s15709_s0 = smov 64  }
 0x253   : > { %v1277_v24 = vpop.permute.xlu1 %1276  ;;  %11346 = vmatprep.subr.bf16.mxu1 %v11994_v43 }
 0x254   : > { %v1275_v27 = vpop.permute.xlu0 %1274  ;;  %v2344_v28 = vld [vmem:[#allocation5 + $0x170] sm:$0xff]  ;;  %1348 = vst.msk [vmem:[#allocation5 + $0x190] sm:$0xff] %vm1322_vm6, %v1277_v24  ;;  %v3590_v24 = vld [vmem:[#allocation2 + $0x22] sm:$0xff] }
 0x255   : > { %1347 = vst.msk [vmem:[#allocation5 + $0x180] sm:$0xff] %vm1322_vm6, %v1275_v27  ;;  %11310 = vmatmul.mubr.msk.f32.gmra.mrb[22].mxu0 %vm2363_vm12, %v2344_v28  ;;  %2254 = vrot.lane.b32.xlu1 %v2159_v22, %s15703_s1  ;;  %v13362_v35 = vld [vmem:[#allocation2 + $0x78] sm:$0xff]  ;;  %v13364_v36 = vld [vmem:[#allocation2 + $0x80] sm:$0xff] }
 0x256   : > { %2252 = vrot.lane.b32.xlu0 %v2158_v23, %s15703_s1  ;;  %v13367_v37 = vld [vmem:[#allocation2 + $0x7a] sm:$0xff]  ;;  %v13372_v25 = vld [vmem:[#allocation2 + $0x82] sm:$0xff]  ;;  %2795 = vst.msk [vmem:[#allocation5 + $0xa0] sm:$0xff] %vm563_vm0, %v13362_v35  ;;  %2796 = vst.msk [vmem:[#allocation5 + $0xb0] sm:$0xff] %vm563_vm0, %v13364_v36  ;;  %11348 = vmatpush1.bf16.msra.mxu1 %v11347_v44 }
 0x257   : > { %v1470_v26 = vpop.permute.xlu1 %1469  ;;  %4206 = vst.msk [vmem:[#allocation5 + $0x68] sm:$0xff] %vm563_vm0, %v13367_v37  ;;  %4207 = vst.msk [vmem:[#allocation5 + $0x78] sm:$0xff] %vm563_vm0, %v13372_v25  ;;  %11349 = vmatprep.subr.bf16.mxu1 %v11994_v43 }
 0x258   : > { %v1468_v40 = vpop.permute.xlu0 %1467  ;;  %1541 = vst.msk [vmem:[#allocation5 + $0x190] sm:$0xff] %vm1515_vm7, %v1470_v26 }
 0x259   : > { %1540 = vst.msk [vmem:[#allocation5 + $0x180] sm:$0xff] %vm1515_vm7, %v1468_v40  ;;  %3074 = vrot.lane.b32.xlu1 %v3010_v29, %s15701_s30 }
 0x25a   : > { %2881 = vrot.lane.b32.xlu0 %v2817_v14, %s15703_s1  ;;  %11351 = vmatpush1.bf16.msra.mxu1 %v11350_v46 }
 0x25b   : > { %v1663_v49 = vpop.permute.xlu1 %1662  ;;  %11352 = vmatprep.subr.bf16.mxu1 %v11994_v43 }
 0x25c   : > { %v1661_v33 = vpop.permute.xlu0 %1660  ;;  %1734 = vst.msk [vmem:[#allocation5 + $0x190] sm:$0xff] %vm1708_vm8, %v1663_v49 }
 0x25d   : > { %1733 = vst.msk [vmem:[#allocation5 + $0x180] sm:$0xff] %vm1708_vm8, %v1661_v33  ;;  %3460 = vrot.lane.b32.xlu1 %v3396_v34, %s15709_s0 }
 0x25e   : > { %3267 = vrot.lane.b32.xlu0 %v13071_v60, %s15707_s22  ;;  %v4313_v60 = vld [vmem:[%s15727_s3 + $0x88] sm:$0xff] }
 0x25f   : > { %v1857_v62 = vpop.permute.xlu1 %1856  ;;  %v11353_v53 = vpack.c.bf16 %v4313_v60, %v4312_v4 }
 0x260   : > { %v1855_v2 = vpop.permute.xlu0 %1854  ;;  %1928 = vst.msk [vmem:[#allocation5 + $0x190] sm:$0xff] %vm1902_vm9, %v1857_v62 }
 0x261   : > { %1927 = vst.msk [vmem:[#allocation5 + $0x180] sm:$0xff] %vm1902_vm9, %v1855_v2  ;;  %3653 = vrot.lane.b32.xlu1 %v3589_v3, %s15705_s26  ;;  %11354 = vmatpush1.bf16.msra.mxu1 %v11353_v53 }
 0x262   : > { %2883 = vrot.lane.b32.xlu0 %v2818_v45, %s15703_s1  ;;  %11436 = vmatprep.subr.bf16.mxu1 %v11994_v43 }
 0x263   : > { %v2050_v5 = vpop.permute.xlu1 %2049 }
 0x264   : > { %v2048_v41 = vpop.permute.xlu0 %2047  ;;  %2121 = vst.msk [vmem:[#allocation5 + $0x190] sm:$0xff] %vm2095_vm10, %v2050_v5 }
 0x265   : > { %2120 = vst.msk [vmem:[#allocation5 + $0x180] sm:$0xff] %vm2095_vm10, %v2048_v41  ;;  %3846 = vrot.lane.b32.xlu1 %v13119_v17, %s15699_s27 }
 0x266   : > { %3076 = vrot.lane.b32.xlu0 %v3011_v52, %s15701_s30 }
 0x267   : > { %v893_v42 = vpop.permute.xlu1 %892 }
 0x268   : > { %v2241_v6 = vpop.permute.xlu0 %2240  ;;  %963 = vst.msk [vmem:[#allocation5 + $0x1a0] sm:$0xff] %vm936_vm4, %v893_v42  ;;  %v11293_v7 = vpop.f32.mrb[10].mxu0  ;;  %v13518_v42 = vld [vmem:[#allocation2 + $0x51] sm:$0xff] }
 0x269   : > { %2313 = vst.msk [vmem:[#allocation5 + $0x180] sm:$0xff] %vm2288_vm11, %v2241_v6  ;;  %v2586_v9 = vadd.f32 %v11293_v7, %v13039_v39  ;;  %v2580_v63 = vpop.f32.mrb[11].mxu0  ;;  %4039 = vrot.lane.b32.xlu1 %v13424_v8, %s15697_s19 }
 0x26a   : > { %3269 = vrot.lane.b32.xlu0 %v13073_v61, %s15707_s22  ;;  %v2581_v1 = vadd.f32 %v13039_v39, %v2580_v63 }
 0x26b   : > { %v2700_v10 = vmax.f32 %v2586_v9, 0.0  ;;  %v895_v11 = vpop.permute.xlu1 %894 }
 0x26c   : > { %v2243_v15 = vpop.permute.xlu0 %2242  ;;  %v2699_v47 = vmax.f32 %v2581_v1, 0.0  ;;  %964 = vst.msk [vmem:[#allocation5 + $0x1b0] sm:$0xff] %vm936_vm4, %v895_v11 }
 0x26d   : > { %2314 = vst.msk [vmem:[#allocation5 + $0x190] sm:$0xff] %vm2288_vm11, %v2243_v15  ;;  %2885 = vrot.lane.b32.xlu1 %v3396_v34, %s15703_s1  ;;  %v13486_v34 = vld [vmem:[#allocation2 + $0x49] sm:$0xff] }
 0x26e   : > { %2732 = vst.msk [vmem:[#allocation2 + $0x99] sm:$0xff] %vm563_vm0, %v2700_v10  ;;  %3462 = vrot.lane.b32.xlu0 %v3397_v20, %s15709_s0  ;;  %2731 = vst.msk [vmem:[#allocation2 + $0x91] sm:$0xff] %vm563_vm0, %v2699_v47  ;;  %v13554_v47 = vld [vmem:[#allocation2 + $0x61] sm:$0xff] }
 0x26f   : > { %v1088_v61 = vpop.permute.xlu1 %1087 }
 0x270   : > { %v1086_v22 = vpop.permute.xlu0 %1085  ;;  %v2345_v23 = vld [vmem:[#allocation5 + $0x180] sm:$0xff]  ;;  %1157 = vst.msk [vmem:[#allocation5 + $0x1b0] sm:$0xff] %vm1129_vm5, %v1088_v61 }
 0x271   : > { %1156 = vst.msk [vmem:[#allocation5 + $0x1a0] sm:$0xff] %vm1129_vm5, %v1086_v22  ;;  %11312 = vmatprep.mubr.msk.f32.mxu0 %vm2363_vm12, %v2345_v23  ;;  %3078 = vrot.lane.b32.xlu1 %v3589_v3, %s15701_s30  ;;  %v13571_v23 = vld [vmem:[%s15726_s2] ss:$0 sm:$0xff] }
 0x272   : > { %3655 = vrot.lane.b32.xlu0 %v3590_v24, %s15705_s26 }
 0x273   : > { %v1281_v27 = vpop.permute.xlu1 %1280 }
 0x274   : > { %v1279_v28 = vpop.permute.xlu0 %1278  ;;  %v2346_v29 = vld [vmem:[#allocation5 + $0x190] sm:$0xff]  ;;  %1350 = vst.msk [vmem:[#allocation5 + $0x1b0] sm:$0xff] %vm1322_vm6, %v1281_v27 }
 0x275   : > { %1349 = vst.msk [vmem:[#allocation5 + $0x1a0] sm:$0xff] %vm1322_vm6, %v1279_v28  ;;  %11313 = vmatmul.mubr.msk.f32.gmra.mrb[24].mxu0 %vm2363_vm12, %v2346_v29  ;;  %v13446_v31 = vld [vmem:[#allocation2 + $0x9a] sm:$0xff]  ;;  %3271 = vrot.lane.b32.xlu1 %v13119_v17, %s15707_s22  ;;  %v13452_v12 = vld [vmem:[#allocation2 + $0x90] sm:$0xff] }
 0x276   : > { %3848 = vrot.lane.b32.xlu0 %v13127_v21, %s15699_s27  ;;  %v13454_v14 = vld [vmem:[#allocation2 + $0x98] sm:$0xff]  ;;  %4209 = vst.msk [vmem:[#allocation5 + $0x98] sm:$0xff] %vm563_vm0, %v13446_v31  ;;  %2797 = vst.msk [vmem:[#allocation5 + $0xc0] sm:$0xff] %vm563_vm0, %v13452_v12 }
 0x277   : > { %v13458_v38 = vld [vmem:[#allocation2 + $0x92] sm:$0xff]  ;;  %2798 = vst.msk [vmem:[#allocation5 + $0xd0] sm:$0xff] %vm563_vm0, %v13454_v14  ;;  %v1474_v26 = vpop.permute.xlu1 %1473 }
 0x278   : > { %v1472_v40 = vpop.permute.xlu0 %1471  ;;  %4208 = vst.msk [vmem:[#allocation5 + $0x88] sm:$0xff] %vm563_vm0, %v13458_v38  ;;  %v13468_v17 = vld [vmem:[#allocation2 + $0x39] sm:$0xff] }
 0x279   : > { %1543 = vst.msk [vmem:[#allocation5 + $0x1b0] sm:$0xff] %vm1515_vm7, %v1474_v26  ;;  %1542 = vst.msk [vmem:[#allocation5 + $0x1a0] sm:$0xff] %vm1515_vm7, %v1472_v40  ;;  %3464 = vrot.lane.b32.xlu1 %v13424_v8, %s15709_s0 }
 0x27a   : > { %4041 = vrot.lane.b32.xlu0 %v13468_v17, %s15697_s19 }
 0x27b   : > { %v1667_v55 = vpop.permute.xlu1 %1666 }
 0x27c   : > { %v1665_v56 = vpop.permute.xlu0 %1664  ;;  %1736 = vst.msk [vmem:[#allocation5 + $0x1b0] sm:$0xff] %vm1708_vm8, %v1667_v55 }
 0x27d   : > { %1735 = vst.msk [vmem:[#allocation5 + $0x1a0] sm:$0xff] %vm1708_vm8, %v1665_v56  ;;  %3657 = vrot.lane.b32.xlu1 %v13117_v16, %s15705_s26 }
 0x27e   : > { %2887 = vrot.lane.b32.xlu0 %v3397_v20, %s15703_s1 }
 0x27f   : > { %v1861_v13 = vpop.permute.xlu1 %1860 }
 0x280   : > { %v1859_v44 = vpop.permute.xlu0 %1858  ;;  %1930 = vst.msk [vmem:[#allocation5 + $0x1b0] sm:$0xff] %vm1902_vm9, %v1861_v13  ;;  %v13590_v13 = vld [vmem:[#allocation2 + $0x69] sm:$0xff] }
 0x281   : > { %1929 = vst.msk [vmem:[#allocation5 + $0x1a0] sm:$0xff] %vm1902_vm9, %v1859_v44  ;;  %3850 = vrot.lane.b32.xlu1 %v13196_v51, %s15699_s27 }
 0x282   : > { %3080 = vrot.lane.b32.xlu0 %v3590_v24, %s15701_s30 }
 0x283   : > { %v2054_v49 = vpop.permute.xlu1 %2053 }
 0x284   : > { %v2052_v33 = vpop.permute.xlu0 %2051  ;;  %2123 = vst.msk [vmem:[#allocation5 + $0x1b0] sm:$0xff] %vm2095_vm10, %v2054_v49 }
 0x285   : > { %2122 = vst.msk [vmem:[#allocation5 + $0x1a0] sm:$0xff] %vm2095_vm10, %v2052_v33  ;;  %4043 = vrot.lane.b32.xlu1 %v13486_v34, %s15697_s19 }
 0x286   : > { %3273 = vrot.lane.b32.xlu0 %v13127_v21, %s15707_s22 }
 0x287   : > { %v897_v57 = vpop.permute.xlu1 %896 }
 0x288   : > { %v2245_v59 = vpop.permute.xlu0 %2244  ;;  %965 = vst.msk [vmem:[#allocation5 + $0x1c0] sm:$0xff] %vm936_vm4, %v897_v57  ;;  %v11296_v45 = vpop.f32.mrb[12].mxu0 }
 0x289   : > { %2315 = vst.msk [vmem:[#allocation5 + $0x1a0] sm:$0xff] %vm2288_vm11, %v2245_v59  ;;  %v2596_v46 = vadd.f32 %v11296_v45, %v13039_v39  ;;  %v2590_v62 = vpop.f32.mrb[13].mxu0  ;;  %2889 = vrot.lane.b32.xlu1 %v13424_v8, %s15703_s1 }
 0x28a   : > { %3466 = vrot.lane.b32.xlu0 %v13468_v17, %s15709_s0  ;;  %v2591_v21 = vadd.f32 %v13039_v39, %v2590_v62  ;;  %v13625_v62 = vld [vmem:[#allocation5 + $0x78] sm:$0xff] }
 0x28b   : > { %v2702_v2 = vmax.f32 %v2596_v46, 0.0  ;;  %v899_v3 = vpop.permute.xlu1 %898 }
 0x28c   : > { %v2247_v4 = vpop.permute.xlu0 %2246  ;;  %v2701_v60 = vmax.f32 %v2591_v21, 0.0  ;;  %966 = vst.msk [vmem:[#allocation5 + $0x1d0] sm:$0xff] %vm936_vm4, %v899_v3  ;;  %v5195_v21 = vld [vmem:[#allocation3 + $0x92] sm:$0xff] }
 0x28d   : > { %2316 = vst.msk [vmem:[#allocation5 + $0x1b0] sm:$0xff] %vm2288_vm11, %v2247_v4  ;;  %3082 = vrot.lane.b32.xlu1 %v13117_v16, %s15701_s30  ;;  %v13630_v4 = vld [vmem:[#allocation2 + $0x79] sm:$0xff] }
 0x28e   : > { %2734 = vst.msk [vmem:[#allocation2 + $0xb1] sm:$0xff] %vm563_vm0, %v2702_v2  ;;  %3659 = vrot.lane.b32.xlu0 %v13111_v48, %s15705_s26  ;;  %2733 = vst.msk [vmem:[#allocation2 + $0xa9] sm:$0xff] %vm563_vm0, %v2701_v60 }
 0x28f   : > { %v1092_v52 = vpop.permute.xlu1 %1091  ;;  %5203 = vst.msk [vmem:[#allocation5 + $0x78] sm:$0xff] %vm563_vm0, %v5195_v21 }
 0x290   : > { %v1090_v39 = vpop.permute.xlu0 %1089  ;;  %v2347_v53 = vld [vmem:[#allocation5 + $0x1a0] sm:$0xff]  ;;  %1159 = vst.msk [vmem:[#allocation5 + $0x1d0] sm:$0xff] %vm1129_vm5, %v1092_v52 }
 0x291   : > { %1158 = vst.msk [vmem:[#allocation5 + $0x1c0] sm:$0xff] %vm1129_vm5, %v1090_v39  ;;  %11315 = vmatprep.mubr.msk.f32.mxu0 %vm2363_vm12, %v2347_v53  ;;  %3275 = vrot.lane.b32.xlu1 %v13196_v51, %s15707_s22 }
 0x292   : > { %3852 = vrot.lane.b32.xlu0 %v13198_v54, %s15699_s27 }
 0x293   : > { %v1285_v5 = vpop.permute.xlu1 %1284 }
 0x294   : > { %v1283_v41 = vpop.permute.xlu0 %1282  ;;  %v2348_v16 = vld [vmem:[#allocation5 + $0x1b0] sm:$0xff]  ;;  %1352 = vst.msk [vmem:[#allocation5 + $0x1d0] sm:$0xff] %vm1322_vm6, %v1285_v5 }
 0x295   : > { %1351 = vst.msk [vmem:[#allocation5 + $0x1c0] sm:$0xff] %vm1322_vm6, %v1283_v41  ;;  %11316 = vmatmul.mubr.msk.f32.gmra.mrb[26].mxu0 %vm2363_vm12, %v2348_v16  ;;  %v13520_v6 = vld [vmem:[#allocation2 + $0xb2] sm:$0xff]  ;;  %3468 = vrot.lane.b32.xlu1 %v13486_v34, %s15709_s0  ;;  %v13526_v51 = vld [vmem:[#allocation2 + $0xa8] sm:$0xff] }
 0x296   : > { %4045 = vrot.lane.b32.xlu0 %v13518_v42, %s15697_s19  ;;  %v13528_v7 = vld [vmem:[#allocation2 + $0xb0] sm:$0xff]  ;;  %4211 = vst.msk [vmem:[#allocation5 + $0xb8] sm:$0xff] %vm563_vm0, %v13520_v6  ;;  %2799 = vst.msk [vmem:[#allocation5 + $0xe0] sm:$0xff] %vm563_vm0, %v13526_v51 }
 0x297   : > { %v13532_v8 = vld [vmem:[#allocation2 + $0xaa] sm:$0xff]  ;;  %2800 = vst.msk [vmem:[#allocation5 + $0xf0] sm:$0xff] %vm563_vm0, %v13528_v7  ;;  %v1478_v9 = vpop.permute.xlu1 %1477 }
 0x298   : > { %v1476_v63 = vpop.permute.xlu0 %1475  ;;  %4210 = vst.msk [vmem:[#allocation5 + $0xa8] sm:$0xff] %vm563_vm0, %v13532_v8 }
 0x299   : > { %1545 = vst.msk [vmem:[#allocation5 + $0x1d0] sm:$0xff] %vm1515_vm7, %v1478_v9  ;;  %1544 = vst.msk [vmem:[#allocation5 + $0x1c0] sm:$0xff] %vm1515_vm7, %v1476_v63  ;;  %3661 = vrot.lane.b32.xlu1 %v13204_v58, %s15705_s26 }
 0x29a   : > { %2891 = vrot.lane.b32.xlu0 %v13468_v17, %s15703_s1 }
 0x29b   : > { %v1671_v1 = vpop.permute.xlu1 %1670 }
 0x29c   : > { %v1669_v10 = vpop.permute.xlu0 %1668  ;;  %1738 = vst.msk [vmem:[#allocation5 + $0x1d0] sm:$0xff] %vm1708_vm8, %v1671_v1 }
 0x29d   : > { %1737 = vst.msk [vmem:[#allocation5 + $0x1c0] sm:$0xff] %vm1708_vm8, %v1669_v10  ;;  %3854 = vrot.lane.b32.xlu1 %v13266_v19, %s15699_s27  ;;  %v13657_v10 = vld [vmem:[#allocation2 + $0x81] sm:$0xff] }
 0x29e   : > { %3084 = vrot.lane.b32.xlu0 %v13111_v48, %s15701_s30 }
 0x29f   : > { %v1865_v11 = vpop.permute.xlu1 %1864 }
 0x2a0   : > { %v1863_v15 = vpop.permute.xlu0 %1862  ;;  %1932 = vst.msk [vmem:[#allocation5 + $0x1d0] sm:$0xff] %vm1902_vm9, %v1865_v11 }
 0x2a1   : > { %1931 = vst.msk [vmem:[#allocation5 + $0x1c0] sm:$0xff] %vm1902_vm9, %v1863_v15  ;;  %4047 = vrot.lane.b32.xlu1 %v13554_v47, %s15697_s19 }
 0x2a2   : > { %3277 = vrot.lane.b32.xlu0 %v13198_v54, %s15707_s22 }
 0x2a3   : > { %v2058_v20 = vpop.permute.xlu1 %2057 }
 0x2a4   : > { %v2056_v61 = vpop.permute.xlu0 %2055  ;;  %2125 = vst.msk [vmem:[#allocation5 + $0x1d0] sm:$0xff] %vm2095_vm10, %v2058_v20 }
 0x2a5   : > { %2124 = vst.msk [vmem:[#allocation5 + $0x1c0] sm:$0xff] %vm2095_vm10, %v2056_v61  ;;  %2893 = vrot.lane.b32.xlu1 %v13486_v34, %s15703_s1 }
 0x2a6   : > { %3470 = vrot.lane.b32.xlu0 %v13518_v42, %s15709_s0 }
 0x2a7   : > { %v901_v48 = vpop.permute.xlu1 %900 }
 0x2a8   : > { %v2249_v22 = vpop.permute.xlu0 %2248  ;;  %967 = vst.msk [vmem:[#allocation5 + $0x1e0] sm:$0xff] %vm936_vm4, %v901_v48  ;;  %v11299_v54 = vpop.f32.mrb[14].mxu0 }
 0x2a9   : > { %2317 = vst.msk [vmem:[#allocation5 + $0x1c0] sm:$0xff] %vm2288_vm11, %v2249_v22  ;;  %v2606_v24 = vadd.f32 %v13571_v23, %v11299_v54  ;;  %v2600_v27 = vpop.f32.mrb[15].mxu0  ;;  %3086 = vrot.lane.b32.xlu1 %v13204_v58, %s15701_s30 }
 0x2aa   : > { %3663 = vrot.lane.b32.xlu0 %v13190_v50, %s15705_s26  ;;  %v2601_v28 = vadd.f32 %v13571_v23, %v2600_v27 }
 0x2ab   : > { %v2704_v29 = vmax.f32 %v2606_v24, 0.0  ;;  %v903_v26 = vpop.permute.xlu1 %902 }
 0x2ac   : > { %v2251_v40 = vpop.permute.xlu0 %2250  ;;  %v2703_v17 = vmax.f32 %v2601_v28, 0.0  ;;  %968 = vst.msk [vmem:[#allocation5 + $0x1f0] sm:$0xff] %vm936_vm4, %v903_v26  ;;  %v13700_v28 = vld [vmem:[#allocation2 + $0x91] sm:$0xff]  ;;  %vm4135_vm4 = vcmask 1048448  }
 0x2ad   : > { %2318 = vst.msk [vmem:[#allocation5 + $0x1d0] sm:$0xff] %vm2288_vm11, %v2251_v40  ;;  %3279 = vrot.lane.b32.xlu1 %v13266_v19, %s15707_s22 }
 0x2ae   : > { %2736 = vst.msk [vmem:[#allocation2 + $0xc9] sm:$0xff] %vm563_vm0, %v2704_v29  ;;  %3856 = vrot.lane.b32.xlu0 %v13268_v30, %s15699_s27  ;;  %2735 = vst.msk [vmem:[#allocation2 + $0xc1] sm:$0xff] %vm563_vm0, %v2703_v17 }
 0x2af   : > { %v1096_v58 = vpop.permute.xlu1 %1095 }
 0x2b0   : > { %v1094_v55 = vpop.permute.xlu0 %1093  ;;  %v2349_v56 = vld [vmem:[#allocation5 + $0x1c0] sm:$0xff]  ;;  %1161 = vst.msk [vmem:[#allocation5 + $0x1f0] sm:$0xff] %vm1129_vm5, %v1096_v58 }
 0x2b1   : > { %1160 = vst.msk [vmem:[#allocation5 + $0x1e0] sm:$0xff] %vm1129_vm5, %v1094_v55  ;;  %11318 = vmatprep.mubr.msk.f32.mxu0 %vm2363_vm12, %v2349_v56  ;;  %3472 = vrot.lane.b32.xlu1 %v13554_v47, %s15709_s0  ;;  %v4235_v56 = vld [vmem:[#allocation5 + $0x18] sm:$0xff] }
 0x2b2   : > { %4049 = vrot.lane.b32.xlu0 %v13590_v13, %s15697_s19 }
 0x2b3   : > { %v1289_v19 = vpop.permute.xlu1 %1288 }
 0x2b4   : > { %v1287_v44 = vpop.permute.xlu0 %1286  ;;  %v2350_v49 = vld [vmem:[#allocation5 + $0x1d0] sm:$0xff]  ;;  %1354 = vst.msk [vmem:[#allocation5 + $0x1f0] sm:$0xff] %vm1322_vm6, %v1289_v19 }
 0x2b5   : > { %1353 = vst.msk [vmem:[#allocation5 + $0x1e0] sm:$0xff] %vm1322_vm6, %v1287_v44  ;;  %11319 = vmatmul.mubr.msk.f32.gmra.mrb[28].mxu0 %vm2363_vm12, %v2350_v49  ;;  %v13599_v33 = vld [vmem:[#allocation2 + $0xca] sm:$0xff]  ;;  %3665 = vrot.lane.b32.xlu1 %v13272_v32, %s15705_s26  ;;  %v13605_v34 = vld [vmem:[#allocation2 + $0xc0] sm:$0xff] }
 0x2b6   : > { %2895 = vrot.lane.b32.xlu0 %v13518_v42, %s15703_s1  ;;  %v13607_v57 = vld [vmem:[#allocation2 + $0xc8] sm:$0xff]  ;;  %4213 = vst.msk [vmem:[#allocation5 + $0xd8] sm:$0xff] %vm563_vm0, %v13599_v33  ;;  %2801 = vst.msk [vmem:[#allocation5 + $0x100] sm:$0xff] %vm563_vm0, %v13605_v34 }
 0x2b7   : > { %v13611_v59 = vld [vmem:[#allocation2 + $0xc2] sm:$0xff]  ;;  %2802 = vst.msk [vmem:[#allocation5 + $0x110] sm:$0xff] %vm563_vm0, %v13607_v57  ;;  %v1482_v45 = vpop.permute.xlu1 %1481 }
 0x2b8   : > { %v1480_v46 = vpop.permute.xlu0 %1479  ;;  %4212 = vst.msk [vmem:[#allocation5 + $0xc8] sm:$0xff] %vm563_vm0, %v13611_v59 }
 0x2b9   : > { %1547 = vst.msk [vmem:[#allocation5 + $0x1f0] sm:$0xff] %vm1515_vm7, %v1482_v45  ;;  %1546 = vst.msk [vmem:[#allocation5 + $0x1e0] sm:$0xff] %vm1515_vm7, %v1480_v46  ;;  %3858 = vrot.lane.b32.xlu1 %v13362_v35, %s15699_s27  ;;  %v13725_v45 = vld [vmem:[#allocation2 + $0x99] sm:$0xff] }
 0x2ba   : > { %3088 = vrot.lane.b32.xlu0 %v13190_v50, %s15701_s30 }
 0x2bb   : > { %v1675_v2 = vpop.permute.xlu1 %1674 }
 0x2bc   : > { %v1673_v3 = vpop.permute.xlu0 %1672  ;;  %1740 = vst.msk [vmem:[#allocation5 + $0x1f0] sm:$0xff] %vm1708_vm8, %v1675_v2 }
 0x2bd   : > { %1739 = vst.msk [vmem:[#allocation5 + $0x1e0] sm:$0xff] %vm1708_vm8, %v1673_v3  ;;  %4051 = vrot.lane.b32.xlu1 %v13630_v4, %s15697_s19 }
 0x2be   : > { %3281 = vrot.lane.b32.xlu0 %v13268_v30, %s15707_s22 }
 0x2bf   : > { %v1869_v50 = vpop.permute.xlu1 %1868 }
 0x2c0   : > { %v1867_v60 = vpop.permute.xlu0 %1866  ;;  %1934 = vst.msk [vmem:[#allocation5 + $0x1f0] sm:$0xff] %vm1902_vm9, %v1869_v50 }
 0x2c1   : > { %1933 = vst.msk [vmem:[#allocation5 + $0x1e0] sm:$0xff] %vm1902_vm9, %v1867_v60  ;;  %2897 = vrot.lane.b32.xlu1 %v13554_v47, %s15703_s1 }
 0x2c2   : > { %3474 = vrot.lane.b32.xlu0 %v13590_v13, %s15709_s0 }
 0x2c3   : > { %v2062_v52 = vpop.permute.xlu1 %2061 }
 0x2c4   : > { %v2060_v39 = vpop.permute.xlu0 %2059  ;;  %2127 = vst.msk [vmem:[#allocation5 + $0x1f0] sm:$0xff] %vm2095_vm10, %v2062_v52 }
 0x2c5   : > { %2126 = vst.msk [vmem:[#allocation5 + $0x1e0] sm:$0xff] %vm2095_vm10, %v2060_v39  ;;  %3090 = vrot.lane.b32.xlu1 %v13272_v32, %s15701_s30 }
 0x2c6   : > { %3667 = vrot.lane.b32.xlu0 %v13260_v18, %s15705_s26 }
 0x2c7   : > { %v2255_v30 = vpop.permute.xlu1 %2254 }
 0x2c8   : > { %v2253_v53 = vpop.permute.xlu0 %2252  ;;  %2320 = vst.msk [vmem:[#allocation5 + $0x1f0] sm:$0xff] %vm2288_vm11, %v2255_v30  ;;  %v11302_v5 = vpop.f32.mrb[16].mxu0 }
 0x2c9   : > { %2319 = vst.msk [vmem:[#allocation5 + $0x1e0] sm:$0xff] %vm2288_vm11, %v2253_v53  ;;  %v2616_v41 = vadd.f32 %v13571_v23, %v11302_v5  ;;  %v2610_v16 = vpop.f32.mrb[17].mxu0  ;;  %3283 = vrot.lane.b32.xlu1 %v13362_v35, %s15707_s22  ;;  %v4237_v53 = vld [vmem:[#allocation5 + $0x28] sm:$0xff] }
 0x2ca   : > { %3860 = vrot.lane.b32.xlu0 %v13364_v36, %s15699_s27  ;;  %v2611_v42 = vadd.f32 %v13571_v23, %v2610_v16 }
 0x2cb   : > { %v2706_v32 = vmax.f32 %v2616_v41, 0.0  ;;  %v3075_v9 = vpop.permute.xlu1 %3074 }
 0x2cc   : > { %v2882_v63 = vpop.permute.xlu0 %2881  ;;  %v2705_v1 = vmax.f32 %v2611_v42, 0.0 }
 0x2cd   : > { %2978 = vst.msk [vmem:[#allocation5] sm:$0xff] %vm2977_vm13, %v2882_v63  ;;  %3476 = vrot.lane.b32.xlu1 %v13630_v4, %s15709_s0 }
 0x2ce   : > { %2738 = vst.msk [vmem:[#allocation2 + $0xe1] sm:$0xff] %vm563_vm0, %v2706_v32  ;;  %4053 = vrot.lane.b32.xlu0 %v13657_v10, %s15697_s19  ;;  %2737 = vst.msk [vmem:[#allocation2 + $0xd9] sm:$0xff] %vm563_vm0, %v2705_v1 }
 0x2cf   : > { %3171 = vst.msk [vmem:[#allocation5] sm:$0xff] %vm3170_vm14, %v3075_v9  ;;  %v3461_v35 = vpop.permute.xlu1 %3460  ;;  %v2352_v47 = vld [vmem:[#allocation5 + $0x1f0] sm:$0xff] }
 0x2d0   : > { %v3268_v11 = vpop.permute.xlu0 %3267  ;;  %v2351_v15 = vld [vmem:[#allocation5 + $0x1e0] sm:$0xff] }
 0x2d1   : > { %3364 = vst.msk [vmem:[#allocation5] sm:$0xff] %vm3363_vm15, %v3268_v11  ;;  %11321 = vmatprep.mubr.msk.f32.mxu0 %vm2363_vm12, %v2351_v15  ;;  %3669 = vrot.lane.b32.xlu1 %v13367_v37, %s15705_s26  ;;  %v13792_v15 = vld [vmem:[#allocation2 + $0xb1] sm:$0xff] }
 0x2d2   : > { %11322 = vmatmul.mubr.msk.f32.gmra.mrb[30].mxu0 %vm2363_vm12, %v2352_v47  ;;  %2899 = vrot.lane.b32.xlu0 %v13590_v13, %s15703_s1  ;;  %3557 = vst.msk [vmem:[#allocation5] sm:$0xff] %vm3556_vm1, %v3461_v35  ;;  %v4239_v35 = vld [vmem:[#allocation5 + $0x38] sm:$0xff] }
 0x2d3   : > { %v3654_v20 = vpop.permute.xlu1 %3653 }
 0x2d4   : > { %v2884_v61 = vpop.permute.xlu0 %2883  ;;  %3750 = vst.msk [vmem:[#allocation5] sm:$0xff] %vm3749_vm2, %v3654_v20 }
 0x2d5   : > { %2979 = vst.msk [vmem:[#allocation5 + $0x10] sm:$0xff] %vm2977_vm13, %v2884_v61  ;;  %v13676_v48 = vld [vmem:[#allocation2 + $0xe2] sm:$0xff]  ;;  %v13680_v22 = vld [vmem:[#allocation2 + $0xd8] sm:$0xff]  ;;  %3862 = vrot.lane.b32.xlu1 %v13452_v12, %s15699_s27 }
 0x2d6   : > { %3092 = vrot.lane.b32.xlu0 %v13260_v18, %s15701_s30  ;;  %v13682_v54 = vld [vmem:[#allocation2 + $0xe0] sm:$0xff]  ;;  %4215 = vst.msk [vmem:[#allocation5 + $0xf8] sm:$0xff] %vm563_vm0, %v13676_v48  ;;  %2803 = vst.msk [vmem:[#allocation5 + $0x120] sm:$0xff] %vm563_vm0, %v13680_v22 }
 0x2d7   : > { %v13688_v24 = vld [vmem:[#allocation2 + $0xda] sm:$0xff]  ;;  %2804 = vst.msk [vmem:[#allocation5 + $0x130] sm:$0xff] %vm563_vm0, %v13682_v54  ;;  %v3847_v18 = vpop.permute.xlu1 %3846 }
 0x2d8   : > { %v3077_v27 = vpop.permute.xlu0 %3076  ;;  %4214 = vst.msk [vmem:[#allocation5 + $0xe8] sm:$0xff] %vm563_vm0, %v13688_v24 }
 0x2d9   : > { %3943 = vst.msk [vmem:[#allocation5] sm:$0xff] %vm3942_vm3, %v3847_v18  ;;  %4055 = vrot.lane.b32.xlu1 %v13700_v28, %s15697_s19 }
 0x2da   : > { %3172 = vst.msk [vmem:[#allocation5 + $0x10] sm:$0xff] %vm3170_vm14, %v3077_v27  ;;  %3285 = vrot.lane.b32.xlu0 %v13364_v36, %s15707_s22 }
 0x2db   : > { %v4040_v29 = vpop.permute.xlu1 %4039 }
 0x2dc   : > { %v3270_v26 = vpop.permute.xlu0 %3269  ;;  %4136 = vst.msk [vmem:[#allocation5] sm:$0xff] %vm4135_vm4, %v4040_v29 }
 0x2dd   : > { %3365 = vst.msk [vmem:[#allocation5 + $0x10] sm:$0xff] %vm3363_vm15, %v3270_v26  ;;  %2901 = vrot.lane.b32.xlu1 %v13630_v4, %s15703_s1 }
 0x2de   : > { %3478 = vrot.lane.b32.xlu0 %v13657_v10, %s15709_s0 }
 0x2df   : > { %v2886_v36 = vpop.permute.xlu1 %2885 }
 0x2e0   : > { %v3463_v40 = vpop.permute.xlu0 %3462  ;;  %2980 = vst.msk [vmem:[#allocation5 + $0x20] sm:$0xff] %vm2977_vm13, %v2886_v36 }
 0x2e1   : > { %3558 = vst.msk [vmem:[#allocation5 + $0x10] sm:$0xff] %vm3556_vm1, %v3463_v40  ;;  %3094 = vrot.lane.b32.xlu1 %v13367_v37, %s15701_s30 }
 0x2e2   : > { %3671 = vrot.lane.b32.xlu0 %v13372_v25, %s15705_s26 }
 0x2e3   : > { %v3079_v58 = vpop.permute.xlu1 %3078  ;;  %v4232_v55 = vld [vmem:[#allocation5] sm:$0xff] }
 0x2e4   : > { %v3656_v17 = vpop.permute.xlu0 %3655  ;;  %3173 = vst.msk [vmem:[#allocation5 + $0x20] sm:$0xff] %vm3170_vm14, %v3079_v58  ;;  %4482 = vmatmul.mubr.f32.vlgmr.msra.gmra.mrb[0].mxu1 %v4232_v55  ;;  %v4241_v55 = vld [vmem:[#allocation5 + $0x48] sm:$0xff] }
 0x2e5   : > { %3751 = vst.msk [vmem:[#allocation5 + $0x10] sm:$0xff] %vm3749_vm2, %v3656_v17  ;;  %10830 = vmatprep.mubr.msk.f32.mxu1 %vm563_vm0, %v4235_v56  ;;  %3287 = vrot.lane.b32.xlu1 %v13452_v12, %s15707_s22  ;;  %v13819_v56 = vld [vmem:[#allocation2 + $0xc1] sm:$0xff] }
 0x2e6   : > { %3864 = vrot.lane.b32.xlu0 %v13454_v14, %s15699_s27 }
 0x2e7   : > { %v3272_v44 = vpop.permute.xlu1 %3271 }
 0x2e8   : > { %v11305_v13 = vpop.f32.mrb[18].mxu0  ;;  %v3849_v19 = vpop.permute.xlu0 %3848  ;;  %3366 = vst.msk [vmem:[#allocation5 + $0x20] sm:$0xff] %vm3363_vm15, %v3272_v44 }
 0x2e9   : > { %v2626_v37 = vadd.f32 %v13571_v23, %v11305_v13  ;;  %3944 = vst.msk [vmem:[#allocation5 + $0x10] sm:$0xff] %vm3942_vm3, %v3849_v19  ;;  %v2620_v49 = vpop.f32.mrb[19].mxu0  ;;  %3480 = vrot.lane.b32.xlu1 %v13700_v28, %s15709_s0 }
 0x2ea   : > { %v2621_v46 = vadd.f32 %v13571_v23, %v2620_v49  ;;  %4057 = vrot.lane.b32.xlu0 %v13725_v45, %s15697_s19 }
 0x2eb   : > { %v2708_v21 = vmax.f32 %v2626_v37, 0.0  ;;  %v3465_v3 = vpop.permute.xlu1 %3464 }
 0x2ec   : > { %v2707_v12 = vmax.f32 %v2621_v46, 0.0  ;;  %v4042_v2 = vpop.permute.xlu0 %4041  ;;  %3559 = vst.msk [vmem:[#allocation5 + $0x20] sm:$0xff] %vm3556_vm1, %v3465_v3 }
 0x2ed   : > { %2740 = vst.msk [vmem:[#allocation2 + $0xf9] sm:$0xff] %vm563_vm0, %v2708_v21  ;;  %3673 = vrot.lane.b32.xlu1 %v13458_v38, %s15705_s26 }
 0x2ee   : > { %4137 = vst.msk [vmem:[#allocation5 + $0x10] sm:$0xff] %vm4135_vm4, %v4042_v2  ;;  %2903 = vrot.lane.b32.xlu0 %v13657_v10, %s15703_s1  ;;  %v4243_v2 = vld [vmem:[#allocation5 + $0x58] sm:$0xff] }
 0x2ef   : > { %2739 = vst.msk [vmem:[#allocation2 + $0xf1] sm:$0xff] %vm563_vm0, %v2707_v12  ;;  %v3658_v50 = vpop.permute.xlu1 %3657 }
 0x2f0   : > { %v2888_v4 = vpop.permute.xlu0 %2887  ;;  %3752 = vst.msk [vmem:[#allocation5 + $0x20] sm:$0xff] %vm3749_vm2, %v3658_v50 }
 0x2f1   : > { %2981 = vst.msk [vmem:[#allocation5 + $0x30] sm:$0xff] %vm2977_vm13, %v2888_v4  ;;  %3866 = vrot.lane.b32.xlu1 %v13526_v51, %s15699_s27  ;;  %v13860_v4 = vld [vmem:[#allocation2 + $0xc9] sm:$0xff] }
 0x2f2   : > { %3096 = vrot.lane.b32.xlu0 %v13372_v25, %s15701_s30  ;;  %v13760_v25 = vld [vmem:[#allocation2 + $0xa9] sm:$0xff] }
 0x2f3   : > { %v3851_v30 = vpop.permute.xlu1 %3850 }
 0x2f4   : > { %v3081_v60 = vpop.permute.xlu0 %3080  ;;  %v13747_v39 = vld [vmem:[#allocation2 + $0xfa] sm:$0xff]  ;;  %3945 = vst.msk [vmem:[#allocation5 + $0x20] sm:$0xff] %vm3942_vm3, %v3851_v30 }
 0x2f5   : > { %v4234_v52 = vld [vmem:[#allocation5 + $0x10] sm:$0xff]  ;;  %3174 = vst.msk [vmem:[#allocation5 + $0x30] sm:$0xff] %vm3170_vm14, %v3081_v60  ;;  %4059 = vrot.lane.b32.xlu1 %v13760_v25, %s15697_s19 }
 0x2f6   : > { %4487 = vmatmul.mubr.f32.gmra.mrb[2].mxu1 %v4234_v52  ;;  %v13750_v5 = vld [vmem:[#allocation2 + $0xf0] sm:$0xff]  ;;  %v13752_v41 = vld [vmem:[#allocation2 + $0xf8] sm:$0xff]  ;;  %4217 = vst.msk [vmem:[#allocation5 + $0x118] sm:$0xff] %vm563_vm0, %v13747_v39  ;;  %3289 = vrot.lane.b32.xlu0 %v13454_v14, %s15707_s22 }
 0x2f7   : > { %10831 = vmatprep.mubr.msk.f32.mxu1 %vm563_vm0, %v4237_v53  ;;  %v13762_v16 = vld [vmem:[#allocation2 + $0xf2] sm:$0xff]  ;;  %2805 = vst.msk [vmem:[#allocation5 + $0x140] sm:$0xff] %vm563_vm0, %v13750_v5  ;;  %2806 = vst.msk [vmem:[#allocation5 + $0x150] sm:$0xff] %vm563_vm0, %v13752_v41  ;;  %v4044_v14 = vpop.permute.xlu1 %4043 }
 0x2f8   : > { %4216 = vst.msk [vmem:[#allocation5 + $0x108] sm:$0xff] %vm563_vm0, %v13762_v16  ;;  %v3274_v42 = vpop.permute.xlu0 %3273 }
 0x2f9   : > { %3367 = vst.msk [vmem:[#allocation5 + $0x30] sm:$0xff] %vm3363_vm15, %v3274_v42  ;;  %2905 = vrot.lane.b32.xlu1 %v13700_v28, %s15703_s1 }
 0x2fa   : > { %4138 = vst.msk [vmem:[#allocation5 + $0x20] sm:$0xff] %vm4135_vm4, %v4044_v14  ;;  %3482 = vrot.lane.b32.xlu0 %v13725_v45, %s15709_s0 }
 0x2fb   : > { %v2890_v9 = vpop.permute.xlu1 %2889 }
 0x2fc   : > { %v3467_v32 = vpop.permute.xlu0 %3466  ;;  %2982 = vst.msk [vmem:[#allocation5 + $0x40] sm:$0xff] %vm2977_vm13, %v2890_v9 }
 0x2fd   : > { %3560 = vst.msk [vmem:[#allocation5 + $0x30] sm:$0xff] %vm3556_vm1, %v3467_v32  ;;  %3098 = vrot.lane.b32.xlu1 %v13458_v38, %s15701_s30 }
 0x2fe   : > { %3675 = vrot.lane.b32.xlu0 %v13446_v31, %s15705_s26 }
 0x2ff   : > { %v3083_v1 = vpop.permute.xlu1 %3082 }
 0x300   : > { %v3660_v63 = vpop.permute.xlu0 %3659  ;;  %3175 = vst.msk [vmem:[#allocation5 + $0x40] sm:$0xff] %vm3170_vm14, %v3083_v1 }
 0x301   : > { %3753 = vst.msk [vmem:[#allocation5 + $0x30] sm:$0xff] %vm3749_vm2, %v3660_v63  ;;  %v4236_v10 = vld [vmem:[#allocation5 + $0x20] sm:$0xff]  ;;  %3291 = vrot.lane.b32.xlu1 %v13526_v51, %s15707_s22 }
 0x302   : > { %4492 = vmatmul.mubr.f32.gmra.mrb[4].mxu1 %v4236_v10  ;;  %3868 = vrot.lane.b32.xlu0 %v13528_v7, %s15699_s27  ;;  %v4245_v10 = vld [vmem:[#allocation5 + $0x68] sm:$0xff] }
 0x303   : > { %10832 = vmatprep.mubr.msk.f32.mxu1 %vm563_vm0, %v4239_v35  ;;  %v3276_v38 = vpop.permute.xlu1 %3275 }
 0x304   : > { %v3853_v11 = vpop.permute.xlu0 %3852  ;;  %3368 = vst.msk [vmem:[#allocation5 + $0x40] sm:$0xff] %vm3363_vm15, %v3276_v38 }
 0x305   : > { %3946 = vst.msk [vmem:[#allocation5 + $0x30] sm:$0xff] %vm3942_vm3, %v3853_v11  ;;  %3484 = vrot.lane.b32.xlu1 %v13760_v25, %s15709_s0 }
 0x306   : > { %4061 = vrot.lane.b32.xlu0 %v13792_v15, %s15697_s19 }
 0x307   : > { %v3469_v61 = vpop.permute.xlu1 %3468 }
 0x308   : > { %v11308_v47 = vpop.f32.mrb[20].mxu0  ;;  %v4046_v20 = vpop.permute.xlu0 %4045  ;;  %3561 = vst.msk [vmem:[#allocation5 + $0x40] sm:$0xff] %vm3556_vm1, %v3469_v61 }
 0x309   : > { %v2636_v51 = vadd.f32 %v13571_v23, %v11308_v47  ;;  %4139 = vst.msk [vmem:[#allocation5 + $0x30] sm:$0xff] %vm4135_vm4, %v4046_v20  ;;  %v2630_v18 = vpop.f32.mrb[21].mxu0  ;;  %3677 = vrot.lane.b32.xlu1 %v13532_v8, %s15705_s26 }
 0x30a   : > { %v2631_v27 = vadd.f32 %v13571_v23, %v2630_v18  ;;  %2907 = vrot.lane.b32.xlu0 %v13725_v45, %s15703_s1 }
 0x30b   : > { %v2710_v28 = vmax.f32 %v2636_v51, 0.0  ;;  %v3662_v40 = vpop.permute.xlu1 %3661 }
 0x30c   : > { %v2709_v29 = vmax.f32 %v2631_v27, 0.0  ;;  %v2892_v26 = vpop.permute.xlu0 %2891  ;;  %3754 = vst.msk [vmem:[#allocation5 + $0x40] sm:$0xff] %vm3749_vm2, %v3662_v40 }
 0x30d   : > { %2742 = vst.msk [vmem:[#allocation2 + $0x111] sm:$0xff] %vm563_vm0, %v2710_v28  ;;  %3870 = vrot.lane.b32.xlu1 %v13605_v34, %s15699_s27 }
 0x30e   : > { %2983 = vst.msk [vmem:[#allocation5 + $0x50] sm:$0xff] %vm2977_vm13, %v2892_v26  ;;  %3100 = vrot.lane.b32.xlu0 %v13446_v31, %s15701_s30 }
 0x30f   : > { %2741 = vst.msk [vmem:[#allocation2 + $0x109] sm:$0xff] %vm563_vm0, %v2709_v29  ;;  %v3855_v58 = vpop.permute.xlu1 %3854  ;;  %v13929_v29 = vld [vmem:[#allocation2 + $0xe1] sm:$0xff] }
 0x310   : > { %v3085_v36 = vpop.permute.xlu0 %3084  ;;  %v4238_v17 = vld [vmem:[#allocation5 + $0x30] sm:$0xff]  ;;  %3947 = vst.msk [vmem:[#allocation5 + $0x40] sm:$0xff] %vm3942_vm3, %v3855_v58 }
 0x311   : > { %3176 = vst.msk [vmem:[#allocation5 + $0x50] sm:$0xff] %vm3170_vm14, %v3085_v36  ;;  %4497 = vmatmul.mubr.f32.gmra.mrb[6].mxu1 %v4238_v17  ;;  %4063 = vrot.lane.b32.xlu1 %v13819_v56, %s15697_s19 }
 0x312   : > { %3293 = vrot.lane.b32.xlu0 %v13528_v7, %s15707_s22  ;;  %10833 = vmatprep.mubr.msk.f32.mxu1 %vm563_vm0, %v4241_v55 }
 0x313   : > { %v4048_v19 = vpop.permute.xlu1 %4047 }
 0x314   : > { %v3278_v31 = vpop.permute.xlu0 %3277  ;;  %v13824_v13 = vld [vmem:[#allocation2 + $0x112] sm:$0xff]  ;;  %4140 = vst.msk [vmem:[#allocation5 + $0x40] sm:$0xff] %vm4135_vm4, %v4048_v19  ;;  %v4249_v19 = vld [vmem:[#allocation5 + $0x88] sm:$0xff] }
 0x315   : > { %3369 = vst.msk [vmem:[#allocation5 + $0x50] sm:$0xff] %vm3363_vm15, %v3278_v31  ;;  %2909 = vrot.lane.b32.xlu1 %v13760_v25, %s15703_s1 }
 0x316   : > { %v13827_v37 = vld [vmem:[#allocation2 + $0x108] sm:$0xff]  ;;  %v13829_v44 = vld [vmem:[#allocation2 + $0x110] sm:$0xff]  ;;  %4219 = vst.msk [vmem:[#allocation5 + $0x138] sm:$0xff] %vm563_vm0, %v13824_v13  ;;  %3486 = vrot.lane.b32.xlu0 %v13792_v15, %s15709_s0 }
 0x317   : > { %v13836_v7 = vld [vmem:[#allocation2 + $0x10a] sm:$0xff]  ;;  %2807 = vst.msk [vmem:[#allocation5 + $0x160] sm:$0xff] %vm563_vm0, %v13827_v37  ;;  %2808 = vst.msk [vmem:[#allocation5 + $0x170] sm:$0xff] %vm563_vm0, %v13829_v44  ;;  %v2894_v45 = vpop.permute.xlu1 %2893 }
 0x318   : > { %4218 = vst.msk [vmem:[#allocation5 + $0x128] sm:$0xff] %vm563_vm0, %v13836_v7  ;;  %v3471_v49 = vpop.permute.xlu0 %3470 }
 0x319   : > { %3562 = vst.msk [vmem:[#allocation5 + $0x50] sm:$0xff] %vm3556_vm1, %v3471_v49  ;;  %3102 = vrot.lane.b32.xlu1 %v13532_v8, %s15701_s30 }
 0x31a   : > { %2984 = vst.msk [vmem:[#allocation5 + $0x60] sm:$0xff] %vm2977_vm13, %v2894_v45  ;;  %3679 = vrot.lane.b32.xlu0 %v13520_v6, %s15705_s26 }
 0x31b   : > { %v3087_v21 = vpop.permute.xlu1 %3086  ;;  %v4240_v12 = vld [vmem:[#allocation5 + $0x40] sm:$0xff] }
 0x31c   : > { %v3664_v46 = vpop.permute.xlu0 %3663  ;;  %3177 = vst.msk [vmem:[#allocation5 + $0x60] sm:$0xff] %vm3170_vm14, %v3087_v21  ;;  %4502 = vmatmul.mubr.f32.gmra.mrb[8].mxu1 %v4240_v12 }
 0x31d   : > { %3755 = vst.msk [vmem:[#allocation5 + $0x50] sm:$0xff] %vm3749_vm2, %v3664_v46  ;;  %3295 = vrot.lane.b32.xlu1 %v13605_v34, %s15707_s22  ;;  %10834 = vmatprep.mubr.msk.f32.mxu1 %vm563_vm0, %v4243_v2 }
 0x31e   : > { %3872 = vrot.lane.b32.xlu0 %v13607_v57, %s15699_s27 }
 0x31f   : > { %v3280_v8 = vpop.permute.xlu1 %3279 }
 0x320   : > { %v3857_v3 = vpop.permute.xlu0 %3856  ;;  %3370 = vst.msk [vmem:[#allocation5 + $0x60] sm:$0xff] %vm3363_vm15, %v3280_v8 }
 0x321   : > { %3948 = vst.msk [vmem:[#allocation5 + $0x50] sm:$0xff] %vm3942_vm3, %v3857_v3  ;;  %3488 = vrot.lane.b32.xlu1 %v13819_v56, %s15709_s0 }
 0x322   : > { %4065 = vrot.lane.b32.xlu0 %v13860_v4, %s15697_s19 }
 0x323   : > { %v3473_v34 = vpop.permute.xlu1 %3472 }
 0x324   : > { %v4050_v50 = vpop.permute.xlu0 %4049  ;;  %3563 = vst.msk [vmem:[#allocation5 + $0x60] sm:$0xff] %vm3556_vm1, %v3473_v34 }
 0x325   : > { %4141 = vst.msk [vmem:[#allocation5 + $0x50] sm:$0xff] %vm4135_vm4, %v4050_v50  ;;  %3681 = vrot.lane.b32.xlu1 %v13611_v59, %s15705_s26 }
 0x326   : > { %2911 = vrot.lane.b32.xlu0 %v13792_v15, %s15703_s1 }
 0x327   : > { %v3666_v53 = vpop.permute.xlu1 %3665 }
 0x328   : > { %v11311_v60 = vpop.f32.mrb[22].mxu0  ;;  %v2896_v52 = vpop.permute.xlu0 %2895  ;;  %3756 = vst.msk [vmem:[#allocation5 + $0x60] sm:$0xff] %vm3749_vm2, %v3666_v53 }
 0x329   : > { %v2646_v30 = vadd.f32 %v13571_v23, %v11311_v60  ;;  %2985 = vst.msk [vmem:[#allocation5 + $0x70] sm:$0xff] %vm2977_vm13, %v2896_v52  ;;  %v2640_v25 = vpop.f32.mrb[23].mxu0  ;;  %3874 = vrot.lane.b32.xlu1 %v13680_v22, %s15699_s27  ;;  %v4251_v60 = vld [vmem:[#allocation5 + $0x98] sm:$0xff] }
 0x32a   : > { %v2641_v42 = vadd.f32 %v13571_v23, %v2640_v25  ;;  %3104 = vrot.lane.b32.xlu0 %v13520_v6, %s15701_s30  ;;  %v13887_v6 = vld [vmem:[#allocation2 + $0xd9] sm:$0xff] }
 0x32b   : > { %v2712_v14 = vmax.f32 %v2646_v30, 0.0  ;;  %v3859_v1 = vpop.permute.xlu1 %3858  ;;  %v13997_v25 = vld [vmem:[#allocation2 + $0xf9] sm:$0xff] }
 0x32c   : > { %v2711_v32 = vmax.f32 %v2641_v42, 0.0  ;;  %v3089_v9 = vpop.permute.xlu0 %3088  ;;  %v4242_v63 = vld [vmem:[#allocation5 + $0x50] sm:$0xff]  ;;  %3949 = vst.msk [vmem:[#allocation5 + $0x60] sm:$0xff] %vm3942_vm3, %v3859_v1 }
 0x32d   : > { %2744 = vst.msk [vmem:[#allocation2 + $0x129] sm:$0xff] %vm563_vm0, %v2712_v14  ;;  %4507 = vmatmul.mubr.f32.gmra.mrb[10].mxu1 %v4242_v63  ;;  %4067 = vrot.lane.b32.xlu1 %v13887_v6, %s15697_s19 }
 0x32e   : > { %3178 = vst.msk [vmem:[#allocation5 + $0x70] sm:$0xff] %vm3170_vm14, %v3089_v9  ;;  %3297 = vrot.lane.b32.xlu0 %v13607_v57, %s15707_s22  ;;  %10835 = vmatprep.mubr.msk.f32.mxu1 %vm563_vm0, %v4245_v10  ;;  %v4253_v10 = vld [vmem:[#allocation5 + $0xa8] sm:$0xff] }
 0x32f   : > { %2743 = vst.msk [vmem:[#allocation2 + $0x121] sm:$0xff] %vm563_vm0, %v2711_v32  ;;  %v4052_v11 = vpop.permute.xlu1 %4051 }
 0x330   : > { %v3282_v35 = vpop.permute.xlu0 %3281  ;;  %4142 = vst.msk [vmem:[#allocation5 + $0x60] sm:$0xff] %vm4135_vm4, %v4052_v11 }
 0x331   : > { %3371 = vst.msk [vmem:[#allocation5 + $0x70] sm:$0xff] %vm3363_vm15, %v3282_v35  ;;  %2913 = vrot.lane.b32.xlu1 %v13819_v56, %s15703_s1 }
 0x332   : > { %3490 = vrot.lane.b32.xlu0 %v13860_v4, %s15709_s0 }
 0x333   : > { %v2898_v15 = vpop.permute.xlu1 %2897 }
 0x334   : > { %v3475_v57 = vpop.permute.xlu0 %3474  ;;  %v13898_v38 = vld [vmem:[#allocation2 + $0x12a] sm:$0xff]  ;;  %2986 = vst.msk [vmem:[#allocation5 + $0x80] sm:$0xff] %vm2977_vm13, %v2898_v15 }
 0x335   : > { %3564 = vst.msk [vmem:[#allocation5 + $0x70] sm:$0xff] %vm3556_vm1, %v3475_v57  ;;  %3106 = vrot.lane.b32.xlu1 %v13611_v59, %s15701_s30 }
 0x336   : > { %v13901_v47 = vld [vmem:[#allocation2 + $0x120] sm:$0xff]  ;;  %v13903_v20 = vld [vmem:[#allocation2 + $0x128] sm:$0xff]  ;;  %4221 = vst.msk [vmem:[#allocation5 + $0x158] sm:$0xff] %vm563_vm0, %v13898_v38  ;;  %3683 = vrot.lane.b32.xlu0 %v13599_v33, %s15705_s26 }
 0x337   : > { %v13910_v51 = vld [vmem:[#allocation2 + $0x122] sm:$0xff]  ;;  %2809 = vst.msk [vmem:[#allocation5 + $0x180] sm:$0xff] %vm563_vm0, %v13901_v47  ;;  %2810 = vst.msk [vmem:[#allocation5 + $0x190] sm:$0xff] %vm563_vm0, %v13903_v20  ;;  %v3091_v18 = vpop.permute.xlu1 %3090 }
 0x338   : > { %4220 = vst.msk [vmem:[#allocation5 + $0x148] sm:$0xff] %vm563_vm0, %v13910_v51  ;;  %v3668_v61 = vpop.permute.xlu0 %3667  ;;  %v4244_v27 = vld [vmem:[#allocation5 + $0x60] sm:$0xff] }
 0x339   : > { %3757 = vst.msk [vmem:[#allocation5 + $0x70] sm:$0xff] %vm3749_vm2, %v3668_v61  ;;  %4512 = vmatmul.mubr.f32.gmra.mrb[12].mxu1 %v4244_v27  ;;  %3299 = vrot.lane.b32.xlu1 %v13680_v22, %s15707_s22 }
 0x33a   : > { %3179 = vst.msk [vmem:[#allocation5 + $0x80] sm:$0xff] %vm3170_vm14, %v3091_v18  ;;  %3876 = vrot.lane.b32.xlu0 %v13682_v54, %s15699_s27  ;;  %10836 = vmatprep.mubr.msk.f32.mxu1 %vm563_vm0, %v13625_v62 }
 0x33b   : > { %v3284_v28 = vpop.permute.xlu1 %3283 }
 0x33c   : > { %v3861_v59 = vpop.permute.xlu0 %3860  ;;  %3372 = vst.msk [vmem:[#allocation5 + $0x80] sm:$0xff] %vm3363_vm15, %v3284_v28 }
 0x33d   : > { %3950 = vst.msk [vmem:[#allocation5 + $0x70] sm:$0xff] %vm3942_vm3, %v3861_v59  ;;  %3492 = vrot.lane.b32.xlu1 %v13887_v6, %s15709_s0 }
 0x33e   : > { %4069 = vrot.lane.b32.xlu0 %v13929_v29, %s15697_s19 }
 0x33f   : > { %v3477_v22 = vpop.permute.xlu1 %3476 }
 0x340   : > { %v4054_v26 = vpop.permute.xlu0 %4053  ;;  %3565 = vst.msk [vmem:[#allocation5 + $0x80] sm:$0xff] %vm3556_vm1, %v3477_v22 }
 0x341   : > { %4143 = vst.msk [vmem:[#allocation5 + $0x70] sm:$0xff] %vm4135_vm4, %v4054_v26  ;;  %3685 = vrot.lane.b32.xlu1 %v13688_v24, %s15705_s26  ;;  %v4255_v26 = vld [vmem:[#allocation5 + $0xb8] sm:$0xff] }
 0x342   : > { %2915 = vrot.lane.b32.xlu0 %v13860_v4, %s15703_s1 }
 0x343   : > { %v3670_v40 = vpop.permute.xlu1 %3669 }
 0x344   : > { %v2900_v62 = vpop.permute.xlu0 %2899  ;;  %3758 = vst.msk [vmem:[#allocation5 + $0x80] sm:$0xff] %vm3749_vm2, %v3670_v40  ;;  %v14051_v40 = vld [vmem:[#allocation2 + $0x111] sm:$0xff] }
 0x345   : > { %2987 = vst.msk [vmem:[#allocation5 + $0x90] sm:$0xff] %vm2977_vm13, %v2900_v62  ;;  %3878 = vrot.lane.b32.xlu1 %v13750_v5, %s15699_s27 }
 0x346   : > { %3108 = vrot.lane.b32.xlu0 %v13599_v33, %s15701_s30  ;;  %v13954_v33 = vld [vmem:[#allocation2 + $0xf1] sm:$0xff] }
 0x347   : > { %v3863_v56 = vpop.permute.xlu1 %3862 }
 0x348   : > { %v11314_v36 = vpop.f32.mrb[24].mxu0  ;;  %v3093_v17 = vpop.permute.xlu0 %3092  ;;  %v4246_v58 = vld [vmem:[#allocation5 + $0x70] sm:$0xff]  ;;  %3951 = vst.msk [vmem:[#allocation5 + $0x80] sm:$0xff] %vm3942_vm3, %v3863_v56 }
 0x349   : > { %v2656_v55 = vadd.f32 %v13571_v23, %v11314_v36  ;;  %3180 = vst.msk [vmem:[#allocation5 + $0x90] sm:$0xff] %vm3170_vm14, %v3093_v17  ;;  %v2650_v31 = vpop.f32.mrb[25].mxu0  ;;  %4517 = vmatmul.mubr.f32.gmra.mrb[14].mxu1 %v4246_v58  ;;  %4071 = vrot.lane.b32.xlu1 %v13954_v33, %s15697_s19 }
 0x34a   : > { %v2651_v49 = vadd.f32 %v13571_v23, %v2650_v31  ;;  %3301 = vrot.lane.b32.xlu0 %v13682_v54, %s15707_s22  ;;  %10837 = vmatprep.mubr.msk.f32.mxu1 %vm563_vm0, %v4249_v19 }
 0x34b   : > { %v2714_v45 = vmax.f32 %v2656_v55, 0.0  ;;  %v4056_v12 = vpop.permute.xlu1 %4055 }
 0x34c   : > { %v2713_v46 = vmax.f32 %v2651_v49, 0.0  ;;  %v3286_v21 = vpop.permute.xlu0 %3285  ;;  %4144 = vst.msk [vmem:[#allocation5 + $0x80] sm:$0xff] %vm4135_vm4, %v4056_v12 }
 0x34d   : > { %2746 = vst.msk [vmem:[#allocation2 + $0x141] sm:$0xff] %vm563_vm0, %v2714_v45  ;;  %2917 = vrot.lane.b32.xlu1 %v13887_v6, %s15703_s1  ;;  %v14020_v6 = vld [vmem:[#allocation2 + $0x109] sm:$0xff] }
 0x34e   : > { %3373 = vst.msk [vmem:[#allocation5 + $0x90] sm:$0xff] %vm3363_vm15, %v3286_v21  ;;  %3494 = vrot.lane.b32.xlu0 %v13929_v29, %s15709_s0  ;;  %v4257_v45 = vld [vmem:[#allocation5 + $0xc8] sm:$0xff] }
 0x34f   : > { %2745 = vst.msk [vmem:[#allocation2 + $0x139] sm:$0xff] %vm563_vm0, %v2713_v46  ;;  %v2902_v2 = vpop.permute.xlu1 %2901  ;;  %v14088_v46 = vld [vmem:[#allocation2 + $0x121] sm:$0xff] }
 0x350   : > { %v3479_v54 = vpop.permute.xlu0 %3478  ;;  %2988 = vst.msk [vmem:[#allocation5 + $0xa0] sm:$0xff] %vm2977_vm13, %v2902_v2 }
 0x351   : > { %3566 = vst.msk [vmem:[#allocation5 + $0x90] sm:$0xff] %vm3556_vm1, %v3479_v54  ;;  %3110 = vrot.lane.b32.xlu1 %v13688_v24, %s15701_s30  ;;  %v14102_v54 = vld [vmem:[%s15726_s2] ss:$0 sm:$0xff] }
 0x352   : > { %3687 = vrot.lane.b32.xlu0 %v13676_v48, %s15705_s26 }
 0x353   : > { %v3095_v4 = vpop.permute.xlu1 %3094  ;;  %v4248_v50 = vld [vmem:[#allocation5 + $0x80] sm:$0xff] }
 0x354   : > { %v3672_v3 = vpop.permute.xlu0 %3671  ;;  %v13973_v8 = vld [vmem:[#allocation2 + $0x142] sm:$0xff]  ;;  %3181 = vst.msk [vmem:[#allocation5 + $0xa0] sm:$0xff] %vm3170_vm14, %v3095_v4  ;;  %4522 = vmatmul.mubr.f32.gmra.mrb[16].mxu1 %v4248_v50 }
 0x355   : > { %3759 = vst.msk [vmem:[#allocation5 + $0x90] sm:$0xff] %vm3749_vm2, %v3672_v3  ;;  %3303 = vrot.lane.b32.xlu1 %v13750_v5, %s15707_s22  ;;  %10838 = vmatprep.mubr.msk.f32.mxu1 %vm563_vm0, %v4251_v60 }
 0x356   : > { %v13976_v34 = vld [vmem:[#allocation2 + $0x138] sm:$0xff]  ;;  %4223 = vst.msk [vmem:[#allocation5 + $0x178] sm:$0xff] %vm563_vm0, %v13973_v8  ;;  %3880 = vrot.lane.b32.xlu0 %v13752_v41, %s15699_s27  ;;  %v13983_v24 = vld [vmem:[#allocation2 + $0x140] sm:$0xff] }
 0x357   : > { %v13985_v52 = vld [vmem:[#allocation2 + $0x13a] sm:$0xff]  ;;  %2811 = vst.msk [vmem:[#allocation5 + $0x1a0] sm:$0xff] %vm563_vm0, %v13976_v34  ;;  %2812 = vst.msk [vmem:[#allocation5 + $0x1b0] sm:$0xff] %vm563_vm0, %v13983_v24  ;;  %v3288_v53 = vpop.permute.xlu1 %3287 }
 0x358   : > { %4222 = vst.msk [vmem:[#allocation5 + $0x168] sm:$0xff] %vm563_vm0, %v13985_v52  ;;  %v3865_v30 = vpop.permute.xlu0 %3864 }
 0x359   : > { %3952 = vst.msk [vmem:[#allocation5 + $0x90] sm:$0xff] %vm3942_vm3, %v3865_v30  ;;  %3496 = vrot.lane.b32.xlu1 %v13954_v33, %s15709_s0 }
 0x35a   : > { %3374 = vst.msk [vmem:[#allocation5 + $0xa0] sm:$0xff] %vm3363_vm15, %v3288_v53  ;;  %4073 = vrot.lane.b32.xlu0 %v13997_v25, %s15697_s19 }
 0x35b   : > { %v3481_v42 = vpop.permute.xlu1 %3480 }
 0x35c   : > { %v4058_v5 = vpop.permute.xlu0 %4057  ;;  %3567 = vst.msk [vmem:[#allocation5 + $0xa0] sm:$0xff] %vm3556_vm1, %v3481_v42  ;;  %v4259_v42 = vld [vmem:[#allocation5 + $0xd8] sm:$0xff] }
 0x35d   : > { %4145 = vst.msk [vmem:[#allocation5 + $0x90] sm:$0xff] %vm4135_vm4, %v4058_v5  ;;  %3689 = vrot.lane.b32.xlu1 %v13762_v16, %s15705_s26 }
 0x35e   : > { %2919 = vrot.lane.b32.xlu0 %v13929_v29, %s15703_s1 }
 0x35f   : > { %v3674_v32 = vpop.permute.xlu1 %3673 }
 0x360   : > { %v2904_v14 = vpop.permute.xlu0 %2903  ;;  %3760 = vst.msk [vmem:[#allocation5 + $0xa0] sm:$0xff] %vm3749_vm2, %v3674_v32  ;;  %v14122_v32 = vld [vmem:[#allocation2 + $0x129] sm:$0xff] }
 0x361   : > { %2989 = vst.msk [vmem:[#allocation5 + $0xb0] sm:$0xff] %vm2977_vm13, %v2904_v14  ;;  %3882 = vrot.lane.b32.xlu1 %v13827_v37, %s15699_s27 }
 0x362   : > { %3112 = vrot.lane.b32.xlu0 %v13676_v48, %s15701_s30 }
 0x363   : > { %v3867_v1 = vpop.permute.xlu1 %3866 }
 0x364   : > { %v3097_v9 = vpop.permute.xlu0 %3096  ;;  %v4250_v63 = vld [vmem:[#allocation5 + $0x90] sm:$0xff]  ;;  %3953 = vst.msk [vmem:[#allocation5 + $0xa0] sm:$0xff] %vm3942_vm3, %v3867_v1 }
 0x365   : > { %3182 = vst.msk [vmem:[#allocation5 + $0xb0] sm:$0xff] %vm3170_vm14, %v3097_v9  ;;  %4527 = vmatmul.mubr.f32.gmra.mrb[18].mxu1 %v4250_v63  ;;  %4075 = vrot.lane.b32.xlu1 %v14020_v6, %s15697_s19 }
 0x366   : > { %3305 = vrot.lane.b32.xlu0 %v13752_v41, %s15707_s22  ;;  %10839 = vmatprep.mubr.msk.f32.mxu1 %vm563_vm0, %v4253_v10 }
 0x367   : > { %v4060_v57 = vpop.permute.xlu1 %4059 }
 0x368   : > { %v11317_v48 = vpop.f32.mrb[26].mxu0  ;;  %v3290_v35 = vpop.permute.xlu0 %3289  ;;  %4146 = vst.msk [vmem:[#allocation5 + $0xa0] sm:$0xff] %vm4135_vm4, %v4060_v57 }
 0x369   : > { %v2666_v11 = vadd.f32 %v13571_v23, %v11317_v48  ;;  %3375 = vst.msk [vmem:[#allocation5 + $0xb0] sm:$0xff] %vm3363_vm15, %v3290_v35  ;;  %v2660_v15 = vpop.f32.mrb[27].mxu0  ;;  %2921 = vrot.lane.b32.xlu1 %v13954_v33, %s15703_s1 }
 0x36a   : > { %v2661_v61 = vadd.f32 %v13571_v23, %v2660_v15  ;;  %3498 = vrot.lane.b32.xlu0 %v13997_v25, %s15709_s0 }
 0x36b   : > { %v2716_v41 = vmax.f32 %v2666_v11, 0.0  ;;  %v2906_v59 = vpop.permute.xlu1 %2905 }
 0x36c   : > { %v2715_v18 = vmax.f32 %v2661_v61, 0.0  ;;  %v3483_v27 = vpop.permute.xlu0 %3482  ;;  %2990 = vst.msk [vmem:[#allocation5 + $0xc0] sm:$0xff] %vm2977_vm13, %v2906_v59  ;;  %v4261_v61 = vld [vmem:[#allocation5 + $0xe8] sm:$0xff] }
 0x36d   : > { %2748 = vst.msk [vmem:[#allocation2 + $0x159] sm:$0xff] %vm563_vm0, %v2716_v41  ;;  %3114 = vrot.lane.b32.xlu1 %v13762_v16, %s15701_s30  ;;  %v14161_v41 = vld [vmem:[#allocation2 + $0x139] sm:$0xff] }
 0x36e   : > { %3568 = vst.msk [vmem:[#allocation5 + $0xb0] sm:$0xff] %vm3556_vm1, %v3483_v27  ;;  %3691 = vrot.lane.b32.xlu0 %v13747_v39, %s15705_s26 }
 0x36f   : > { %2747 = vst.msk [vmem:[#allocation2 + $0x151] sm:$0xff] %vm563_vm0, %v2715_v18  ;;  %v3099_v28 = vpop.permute.xlu1 %3098  ;;  %v4252_v29 = vld [vmem:[#allocation5 + $0xa0] sm:$0xff] }
 0x370   : > { %v3676_v23 = vpop.permute.xlu0 %3675  ;;  %3183 = vst.msk [vmem:[#allocation5 + $0xc0] sm:$0xff] %vm3170_vm14, %v3099_v28  ;;  %4532 = vmatmul.mubr.f32.gmra.mrb[20].mxu1 %v4252_v29 }
 0x371   : > { %3761 = vst.msk [vmem:[#allocation5 + $0xb0] sm:$0xff] %vm3749_vm2, %v3676_v23  ;;  %3307 = vrot.lane.b32.xlu1 %v13827_v37, %s15707_s22  ;;  %10840 = vmatprep.mubr.msk.f32.mxu1 %vm563_vm0, %v4255_v26 }
 0x372   : > { %3884 = vrot.lane.b32.xlu0 %v13829_v44, %s15699_s27 }
 0x373   : > { %v3292_v16 = vpop.permute.xlu1 %3291 }
 0x374   : > { %v3869_v22 = vpop.permute.xlu0 %3868  ;;  %v14048_v62 = vld [vmem:[#allocation2 + $0x15a] sm:$0xff]  ;;  %3376 = vst.msk [vmem:[#allocation5 + $0xc0] sm:$0xff] %vm3363_vm15, %v3292_v16 }
 0x375   : > { %3954 = vst.msk [vmem:[#allocation5 + $0xb0] sm:$0xff] %vm3942_vm3, %v3869_v22  ;;  %3500 = vrot.lane.b32.xlu1 %v14020_v6, %s15709_s0 }
 0x376   : > { %v14053_v36 = vld [vmem:[#allocation2 + $0x150] sm:$0xff]  ;;  %v14055_v17 = vld [vmem:[#allocation2 + $0x158] sm:$0xff]  ;;  %4225 = vst.msk [vmem:[#allocation5 + $0x198] sm:$0xff] %vm563_vm0, %v14048_v62  ;;  %4077 = vrot.lane.b32.xlu0 %v14051_v40, %s15697_s19 }
 0x377   : > { %v14062_v37 = vld [vmem:[#allocation2 + $0x152] sm:$0xff]  ;;  %2813 = vst.msk [vmem:[#allocation5 + $0x1c0] sm:$0xff] %vm563_vm0, %v14053_v36  ;;  %2814 = vst.msk [vmem:[#allocation5 + $0x1d0] sm:$0xff] %vm563_vm0, %v14055_v17  ;;  %v3485_v55 = vpop.permute.xlu1 %3484 }
 0x378   : > { %4224 = vst.msk [vmem:[#allocation5 + $0x188] sm:$0xff] %vm563_vm0, %v14062_v37  ;;  %v4062_v58 = vpop.permute.xlu0 %4061 }
 0x379   : > { %4147 = vst.msk [vmem:[#allocation5 + $0xb0] sm:$0xff] %vm4135_vm4, %v4062_v58  ;;  %3693 = vrot.lane.b32.xlu1 %v13836_v7, %s15705_s26 }
 0x37a   : > { %3569 = vst.msk [vmem:[#allocation5 + $0xc0] sm:$0xff] %vm3556_vm1, %v3485_v55  ;;  %2923 = vrot.lane.b32.xlu0 %v13997_v25, %s15703_s1  ;;  %v4263_v55 = vld [vmem:[#allocation5 + $0xf8] sm:$0xff] }
 0x37b   : > { %v3678_v31 = vpop.permute.xlu1 %3677 }
 0x37c   : > { %v2908_v56 = vpop.permute.xlu0 %2907  ;;  %3762 = vst.msk [vmem:[#allocation5 + $0xc0] sm:$0xff] %vm3749_vm2, %v3678_v31  ;;  %v14190_v31 = vld [vmem:[#allocation2 + $0x141] sm:$0xff] }
 0x37d   : > { %2991 = vst.msk [vmem:[#allocation5 + $0xd0] sm:$0xff] %vm2977_vm13, %v2908_v56  ;;  %3886 = vrot.lane.b32.xlu1 %v13901_v47, %s15699_s27 }
 0x37e   : > { %3116 = vrot.lane.b32.xlu0 %v13747_v39, %s15701_s30 }
 0x37f   : > { %v3871_v33 = vpop.permute.xlu1 %3870 }
 0x380   : > { %v3101_v19 = vpop.permute.xlu0 %3100  ;;  %v4254_v49 = vld [vmem:[#allocation5 + $0xb0] sm:$0xff]  ;;  %3955 = vst.msk [vmem:[#allocation5 + $0xc0] sm:$0xff] %vm3942_vm3, %v3871_v33 }
 0x381   : > { %3184 = vst.msk [vmem:[#allocation5 + $0xd0] sm:$0xff] %vm3170_vm14, %v3101_v19  ;;  %4537 = vmatmul.mubr.f32.gmra.mrb[22].mxu1 %v4254_v49  ;;  %4079 = vrot.lane.b32.xlu1 %v14088_v46, %s15697_s19 }
 0x382   : > { %3309 = vrot.lane.b32.xlu0 %v13829_v44, %s15707_s22  ;;  %10841 = vmatprep.mubr.msk.f32.mxu1 %vm563_vm0, %v4257_v45 }
 0x383   : > { %v4064_v21 = vpop.permute.xlu1 %4063 }
 0x384   : > { %v3294_v39 = vpop.permute.xlu0 %3293  ;;  %4148 = vst.msk [vmem:[#allocation5 + $0xc0] sm:$0xff] %vm4135_vm4, %v4064_v21 }
 0x385   : > { %3377 = vst.msk [vmem:[#allocation5 + $0xd0] sm:$0xff] %vm3363_vm15, %v3294_v39  ;;  %2925 = vrot.lane.b32.xlu1 %v14020_v6, %s15703_s1  ;;  %v14218_v39 = vld [vmem:[%s15728_s4] ss:$0 sm:$0xff] }
 0x386   : > { %3502 = vrot.lane.b32.xlu0 %v14051_v40, %s15709_s0 }
 0x387   : > { %v2910_v3 = vpop.permute.xlu1 %2909 }
 0x388   : > { %v11320_v44 = vpop.f32.mrb[28].mxu0  ;;  %v3487_v12 = vpop.permute.xlu0 %3486  ;;  %2992 = vst.msk [vmem:[#allocation5 + $0xe0] sm:$0xff] %vm2977_vm13, %v2910_v3 }
 0x389   : > { %v2676_v2 = vadd.f32 %v14102_v54, %v11320_v44  ;;  %3570 = vst.msk [vmem:[#allocation5 + $0xd0] sm:$0xff] %vm3556_vm1, %v3487_v12  ;;  %v2670_v4 = vpop.f32.mrb[29].mxu0  ;;  %3118 = vrot.lane.b32.xlu1 %v13836_v7, %s15701_s30 }
 0x38a   : > { %v2671_v50 = vadd.f32 %v14102_v54, %v2670_v4  ;;  %3695 = vrot.lane.b32.xlu0 %v13824_v13, %s15705_s26  ;;  %v4265_v4 = vld [vmem:[#allocation5 + $0x108] sm:$0xff] }
 0x38b   : > { %v2718_v60 = vmax.f32 %v2676_v2, 0.0  ;;  %v3103_v25 = vpop.permute.xlu1 %3102  ;;  %v4256_v5 = vld [vmem:[#allocation5 + $0xc0] sm:$0xff] }
 0x38c   : > { %v2717_v30 = vmax.f32 %v2671_v50, 0.0  ;;  %v3680_v53 = vpop.permute.xlu0 %3679  ;;  %3185 = vst.msk [vmem:[#allocation5 + $0xe0] sm:$0xff] %vm3170_vm14, %v3103_v25  ;;  %4542 = vmatmul.mubr.f32.gmra.mrb[24].mxu1 %v4256_v5 }
 0x38d   : > { %2750 = vst.msk [vmem:[#allocation2 + $0x171] sm:$0xff] %vm563_vm0, %v2718_v60  ;;  %3311 = vrot.lane.b32.xlu1 %v13901_v47, %s15707_s22  ;;  %10842 = vmatprep.mubr.msk.f32.mxu1 %vm563_vm0, %v4259_v42 }
 0x38e   : > { %3763 = vst.msk [vmem:[#allocation5 + $0xd0] sm:$0xff] %vm3749_vm2, %v3680_v53  ;;  %3888 = vrot.lane.b32.xlu0 %v13903_v20, %s15699_s27 }
 0x38f   : > { %2749 = vst.msk [vmem:[#allocation2 + $0x169] sm:$0xff] %vm563_vm0, %v2717_v30  ;;  %v3296_v14 = vpop.permute.xlu1 %3295 }
 0x390   : > { %v3873_v7 = vpop.permute.xlu0 %3872  ;;  %3378 = vst.msk [vmem:[#allocation5 + $0xe0] sm:$0xff] %vm3363_vm15, %v3296_v14 }
 0x391   : > { %3956 = vst.msk [vmem:[#allocation5 + $0xd0] sm:$0xff] %vm3942_vm3, %v3873_v7  ;;  %3504 = vrot.lane.b32.xlu1 %v14088_v46, %s15709_s0  ;;  %v4267_v7 = vld [vmem:[#allocation5 + $0x118] sm:$0xff] }
 0x392   : > { %4081 = vrot.lane.b32.xlu0 %v14122_v32, %s15697_s19 }
 0x393   : > { %v3489_v47 = vpop.permute.xlu1 %3488 }
 0x394   : > { %v4066_v9 = vpop.permute.xlu0 %4065  ;;  %v14129_v63 = vld [vmem:[#allocation2 + $0x172] sm:$0xff]  ;;  %3571 = vst.msk [vmem:[#allocation5 + $0xe0] sm:$0xff] %vm3556_vm1, %v3489_v47 }
 0x395   : > { %4149 = vst.msk [vmem:[#allocation5 + $0xd0] sm:$0xff] %vm4135_vm4, %v4066_v9  ;;  %3697 = vrot.lane.b32.xlu1 %v13910_v51, %s15705_s26 }
 0x396   : > { %v14132_v1 = vld [vmem:[#allocation2 + $0x168] sm:$0xff]  ;;  %v14134_v10 = vld [vmem:[#allocation2 + $0x170] sm:$0xff]  ;;  %4227 = vst.msk [vmem:[#allocation5 + $0x1b8] sm:$0xff] %vm563_vm0, %v14129_v63  ;;  %2927 = vrot.lane.b32.xlu0 %v14051_v40, %s15703_s1 }
 0x397   : > { %v14141_v6 = vld [vmem:[#allocation2 + $0x16a] sm:$0xff]  ;;  %2815 = vst.msk [vmem:[#allocation5 + $0x1e0] sm:$0xff] %vm563_vm0, %v14132_v1  ;;  %2816 = vst.msk [vmem:[#allocation5 + $0x1f0] sm:$0xff] %vm563_vm0, %v14134_v10  ;;  %v3682_v35 = vpop.permute.xlu1 %3681 }
 0x398   : > { %4226 = vst.msk [vmem:[#allocation5 + $0x1a8] sm:$0xff] %vm563_vm0, %v14141_v6  ;;  %v2912_v48 = vpop.permute.xlu0 %2911 }
 0x399   : > { %2993 = vst.msk [vmem:[#allocation5 + $0xf0] sm:$0xff] %vm2977_vm13, %v2912_v48  ;;  %3890 = vrot.lane.b32.xlu1 %v13976_v34, %s15699_s27  ;;  %v14254_v48 = vld [vmem:[#allocation2 + $0x159] sm:$0xff] }
 0x39a   : > { %3764 = vst.msk [vmem:[#allocation5 + $0xe0] sm:$0xff] %vm3749_vm2, %v3682_v35  ;;  %3120 = vrot.lane.b32.xlu0 %v13824_v13, %s15701_s30 }
 0x39b   : > { %v3875_v15 = vpop.permute.xlu1 %3874 }
 0x39c   : > { %v3105_v11 = vpop.permute.xlu0 %3104  ;;  %v4258_v57 = vld [vmem:[#allocation5 + $0xd0] sm:$0xff]  ;;  %3957 = vst.msk [vmem:[#allocation5 + $0xe0] sm:$0xff] %vm3942_vm3, %v3875_v15 }
 0x39d   : > { %3186 = vst.msk [vmem:[#allocation5 + $0xf0] sm:$0xff] %vm3170_vm14, %v3105_v11  ;;  %4547 = vmatmul.mubr.f32.gmra.mrb[26].mxu1 %v4258_v57  ;;  %4083 = vrot.lane.b32.xlu1 %v14161_v41, %s15697_s19 }
 0x39e   : > { %3313 = vrot.lane.b32.xlu0 %v13903_v20, %s15707_s22  ;;  %10843 = vmatprep.mubr.msk.f32.mxu1 %vm563_vm0, %v4261_v61 }
 0x39f   : > { %v4068_v18 = vpop.permute.xlu1 %4067 }
 0x3a0   : > { %v3298_v13 = vpop.permute.xlu0 %3297  ;;  %4150 = vst.msk [vmem:[#allocation5 + $0xe0] sm:$0xff] %vm4135_vm4, %v4068_v18 }
 0x3a1   : > { %3379 = vst.msk [vmem:[#allocation5 + $0xf0] sm:$0xff] %vm3363_vm15, %v3298_v13  ;;  %2929 = vrot.lane.b32.xlu1 %v14088_v46, %s15703_s1 }
 0x3a2   : > { %3506 = vrot.lane.b32.xlu0 %v14122_v32, %s15709_s0 }
 0x3a3   : > { %v2914_v27 = vpop.permute.xlu1 %2913 }
 0x3a4   : > { %v3491_v20 = vpop.permute.xlu0 %3490  ;;  %2994 = vst.msk [vmem:[#allocation5 + $0x100] sm:$0xff] %vm2977_vm13, %v2914_v27 }
 0x3a5   : > { %3572 = vst.msk [vmem:[#allocation5 + $0xf0] sm:$0xff] %vm3556_vm1, %v3491_v20  ;;  %v11323_v59 = vpop.f32.mrb[30].mxu0  ;;  %3122 = vrot.lane.b32.xlu1 %v13910_v51, %s15701_s30 }
 0x3a6   : > { %v2686_v23 = vadd.f32 %v14102_v54, %v11323_v59  ;;  %v2680_v28 = vpop.f32.mrb[31].mxu0  ;;  %3699 = vrot.lane.b32.xlu0 %v13898_v38, %s15705_s26 }
 0x3a7   : > { %v2681_v29 = vadd.f32 %v14102_v54, %v2680_v28  ;;  %v3107_v40 = vpop.permute.xlu1 %3106  ;;  %v4260_v58 = vld [vmem:[#allocation5 + $0xe0] sm:$0xff] }
 0x3a8   : > { %v2720_v26 = vmax.f32 %v2686_v23, 0.0  ;;  %v3684_v22 = vpop.permute.xlu0 %3683  ;;  %3187 = vst.msk [vmem:[#allocation5 + $0x100] sm:$0xff] %vm3170_vm14, %v3107_v40  ;;  %4552 = vmatmul.mubr.f32.gmra.mrb[28].mxu1 %v4260_v58  ;;  %v4269_v23 = vld [vmem:[#allocation5 + $0x128] sm:$0xff] }
 0x3a9   : > { %v2719_v16 = vmax.f32 %v2681_v29, 0.0  ;;  %3765 = vst.msk [vmem:[#allocation5 + $0xf0] sm:$0xff] %vm3749_vm2, %v3684_v22  ;;  %3315 = vrot.lane.b32.xlu1 %v13976_v34, %s15707_s22  ;;  %10844 = vmatprep.mubr.msk.f32.mxu1 %vm563_vm0, %v4263_v55 }
 0x3aa   : > { %2752 = vst.msk [vmem:[#allocation2 + $0x189] sm:$0xff] %vm563_vm0, %v2720_v26  ;;  %3892 = vrot.lane.b32.xlu0 %v13983_v24, %s15699_s27 }
 0x3ab   : > { %2751 = vst.msk [vmem:[#allocation2 + $0x181] sm:$0xff] %vm563_vm0, %v2719_v16  ;;  %v3300_v56 = vpop.permute.xlu1 %3299 }
 0x3ac   : > { %v3877_v51 = vpop.permute.xlu0 %3876  ;;  %3380 = vst.msk [vmem:[#allocation5 + $0x100] sm:$0xff] %vm3363_vm15, %v3300_v56  ;;  %v4271_v56 = vld [vmem:[#allocation5 + $0x138] sm:$0xff] }
 0x3ad   : > { %3958 = vst.msk [vmem:[#allocation5 + $0xf0] sm:$0xff] %vm3942_vm3, %v3877_v51  ;;  %3508 = vrot.lane.b32.xlu1 %v14161_v41, %s15709_s0 }
 0x3ae   : > { %4085 = vrot.lane.b32.xlu0 %v14190_v31, %s15697_s19 }
 0x3af   : > { %v3493_v34 = vpop.permute.xlu1 %3492 }
 0x3b0   : > { %v4070_v19 = vpop.permute.xlu0 %4069  ;;  %3573 = vst.msk [vmem:[#allocation5 + $0x100] sm:$0xff] %vm3556_vm1, %v3493_v34 }
 0x3b1   : > { %4151 = vst.msk [vmem:[#allocation5 + $0xf0] sm:$0xff] %vm4135_vm4, %v4070_v19  ;;  %v14198_v49 = vld [vmem:[#allocation2 + $0x18a] sm:$0xff]  ;;  %3701 = vrot.lane.b32.xlu1 %v13985_v52, %s15705_s26 }
 0x3b2   : > { %2931 = vrot.lane.b32.xlu0 %v14122_v32, %s15703_s1  ;;  %4229 = vst.msk [vmem:[#allocation5 + $0x1d8] sm:$0xff] %vm563_vm0, %v14198_v49  ;;  %v14207_v33 = vld [vmem:[#allocation2 + $0x182] sm:$0xff] }
 0x3b3   : > { %4228 = vst.msk [vmem:[#allocation5 + $0x1c8] sm:$0xff] %vm563_vm0, %v14207_v33  ;;  %v3686_v46 = vpop.permute.xlu1 %3685 }
 0x3b4   : > { %v2916_v45 = vpop.permute.xlu0 %2915  ;;  %3766 = vst.msk [vmem:[#allocation5 + $0x100] sm:$0xff] %vm3749_vm2, %v3686_v46  ;;  %v14307_v46 = vld [vmem:[#allocation2 + $0x171] sm:$0xff] }
 0x3b5   : > { %2995 = vst.msk [vmem:[#allocation5 + $0x110] sm:$0xff] %vm2977_vm13, %v2916_v45  ;;  %3894 = vrot.lane.b32.xlu1 %v14053_v36, %s15699_s27 }
 0x3b6   : > { %3124 = vrot.lane.b32.xlu0 %v13898_v38, %s15701_s30  ;;  %v14227_v38 = vld [vmem:[#allocation2 + $0x151] sm:$0xff] }
 0x3b7   : > { %v4483_v21 = vpop.f32.mrb[0].mxu1  ;;  %v3879_v2 = vpop.permute.xlu1 %3878 }
 0x3b8   : > { %v3109_v44 = vpop.permute.xlu0 %3108  ;;  %v4262_v12 = vld [vmem:[#allocation5 + $0xf0] sm:$0xff]  ;;  %v4484_v54 = vadd.f32 %v14218_v39, %v4483_v21  ;;  %v4485_v3 = vpop.f32.mrb[1].mxu1  ;;  %3959 = vst.msk [vmem:[#allocation5 + $0x100] sm:$0xff] %vm3942_vm3, %v3879_v2  ;;  %v3810_v2 = vld [vmem:[#allocation2 + $0x180] sm:$0xff] }
 0x3b9   : > { %3188 = vst.msk [vmem:[#allocation5 + $0x110] sm:$0xff] %vm3170_vm14, %v3109_v44  ;;  %4557 = vmatmul.mubr.f32.gmra.mrb[30].mxu1 %v4262_v12  ;;  %4087 = vrot.lane.b32.xlu1 %v14227_v38, %s15697_s19 }
 0x3ba   : > { %3317 = vrot.lane.b32.xlu0 %v13983_v24, %s15707_s22  ;;  %10845 = vmatprep.mubr.msk.f32.mxu1 %vm563_vm0, %v4265_v4  ;;  %v4642_v50 = vmax.f32 %v4484_v54, 0.0 }
 0x3bb   : > { %v4072_v30 = vpop.permute.xlu1 %4071 }
 0x3bc   : > { %v3302_v60 = vpop.permute.xlu0 %3301  ;;  %4674 = vst.msk [vmem:[#allocation6] sm:$0xff] %vm563_vm0, %v4642_v50 }
 0x3bd   : > { %3381 = vst.msk [vmem:[#allocation5 + $0x110] sm:$0xff] %vm3363_vm15, %v3302_v60  ;;  %2933 = vrot.lane.b32.xlu1 %v14161_v41, %s15703_s1 }
 0x3be   : > { %4152 = vst.msk [vmem:[#allocation5 + $0x100] sm:$0xff] %vm4135_vm4, %v4072_v30  ;;  %3510 = vrot.lane.b32.xlu0 %v14190_v31, %s15709_s0 }
 0x3bf   : > { %v2918_v53 = vpop.permute.xlu1 %2917 }
 0x3c0   : > { %v3495_v24 = vpop.permute.xlu0 %3494  ;;  %2996 = vst.msk [vmem:[#allocation5 + $0x120] sm:$0xff] %vm2977_vm13, %v2918_v53  ;;  %v4273_v53 = vld [vmem:[#allocation5 + $0x148] sm:$0xff] }
 0x3c1   : > { %3574 = vst.msk [vmem:[#allocation5 + $0x110] sm:$0xff] %vm3556_vm1, %v3495_v24  ;;  %3126 = vrot.lane.b32.xlu1 %v13985_v52, %s15701_s30 }
 0x3c2   : > { %3703 = vrot.lane.b32.xlu0 %v13973_v8, %s15705_s26 }
 0x3c3   : > { %v3111_v5 = vpop.permute.xlu1 %3110 }
 0x3c4   : > { %v3688_v25 = vpop.permute.xlu0 %3687  ;;  %3189 = vst.msk [vmem:[#allocation5 + $0x120] sm:$0xff] %vm3170_vm14, %v3111_v5 }
 0x3c5   : > { %3767 = vst.msk [vmem:[#allocation5 + $0x110] sm:$0xff] %vm3749_vm2, %v3688_v25  ;;  %v4264_v42 = vld [vmem:[#allocation5 + $0x100] sm:$0xff]  ;;  %3319 = vrot.lane.b32.xlu1 %v14053_v36, %s15707_s22 }
 0x3c6   : > { %4562 = vmatmul.mubr.f32.gmra.mrb[32].mxu1 %v4264_v42  ;;  %3896 = vrot.lane.b32.xlu0 %v14055_v17, %s15699_s27 }
 0x3c7   : > { %10846 = vmatprep.mubr.msk.f32.mxu1 %vm563_vm0, %v4267_v7  ;;  %v3304_v9 = vpop.permute.xlu1 %3303 }
 0x3c8   : > { %v3881_v32 = vpop.permute.xlu0 %3880  ;;  %3382 = vst.msk [vmem:[#allocation5 + $0x120] sm:$0xff] %vm3363_vm15, %v3304_v9 }
 0x3c9   : > { %v4488_v14 = vpop.f32.mrb[2].mxu1  ;;  %3960 = vst.msk [vmem:[#allocation5 + $0x110] sm:$0xff] %vm3942_vm3, %v3881_v32  ;;  %3512 = vrot.lane.b32.xlu1 %v14227_v38, %s15709_s0 }
 0x3ca   : > { %v4489_v52 = vadd.f32 %v14218_v39, %v4488_v14  ;;  %v4490_v47 = vpop.f32.mrb[3].mxu1  ;;  %4089 = vrot.lane.b32.xlu0 %v14254_v48, %s15697_s19 }
 0x3cb   : > { %v3497_v11 = vpop.permute.xlu1 %3496 }
 0x3cc   : > { %v4643_v35 = vmax.f32 %v4489_v52, 0.0  ;;  %v4074_v36 = vpop.permute.xlu0 %4073  ;;  %3575 = vst.msk [vmem:[#allocation5 + $0x120] sm:$0xff] %vm3556_vm1, %v3497_v11  ;;  %v3811_v11 = vld [vmem:[#allocation2 + $0x188] sm:$0xff] }
 0x3cd   : > { %4153 = vst.msk [vmem:[#allocation5 + $0x110] sm:$0xff] %vm4135_vm4, %v4074_v36  ;;  %3705 = vrot.lane.b32.xlu1 %v14062_v37, %s15705_s26 }
 0x3ce   : > { %4675 = vst.msk [vmem:[#allocation6 + $0x8] sm:$0xff] %vm563_vm0, %v4643_v35  ;;  %2935 = vrot.lane.b32.xlu0 %v14190_v31, %s15703_s1 }
 0x3cf   : > { %v3690_v15 = vpop.permute.xlu1 %3689 }
 0x3d0   : > { %v2920_v57 = vpop.permute.xlu0 %2919  ;;  %3768 = vst.msk [vmem:[#allocation5 + $0x120] sm:$0xff] %vm3749_vm2, %v3690_v15 }
 0x3d1   : > { %2997 = vst.msk [vmem:[#allocation5 + $0x130] sm:$0xff] %vm2977_vm13, %v2920_v57  ;;  %3898 = vrot.lane.b32.xlu1 %v14132_v1, %s15699_s27  ;;  %v4275_v57 = vld [vmem:[#allocation5 + $0x158] sm:$0xff] }
 0x3d2   : > { %3128 = vrot.lane.b32.xlu0 %v13973_v8, %s15701_s30  ;;  %v14279_v8 = vld [vmem:[#allocation2 + $0x169] sm:$0xff] }
 0x3d3   : > { %v3883_v27 = vpop.permute.xlu1 %3882 }
 0x3d4   : > { %v3113_v13 = vpop.permute.xlu0 %3112  ;;  %v4266_v18 = vld [vmem:[#allocation5 + $0x110] sm:$0xff]  ;;  %3961 = vst.msk [vmem:[#allocation5 + $0x120] sm:$0xff] %vm3942_vm3, %v3883_v27 }
 0x3d5   : > { %v4706_v61 = vld [vmem:[#allocation6] ss:$2 sm:$0xff]  ;;  %v4738_v41 = vld [vmem:[#allocation6 + $0x1] ss:$2 sm:$0xff]  ;;  %3190 = vst.msk [vmem:[#allocation5 + $0x130] sm:$0xff] %vm3170_vm14, %v3113_v13  ;;  %v4493_v59 = vpop.f32.mrb[4].mxu1  ;;  %4567 = vmatmul.mubr.f32.gmra.mrb[34].mxu1 %v4266_v18  ;;  %4091 = vrot.lane.b32.xlu1 %v14279_v8, %s15697_s19 }
 0x3d6   : > { %v4769_v20 = vmax.f32 %v4706_v61, %v4738_v41  ;;  %v4494_v28 = vadd.f32 %v14218_v39, %v4493_v59  ;;  %v4495_v29 = vpop.f32.mrb[5].mxu1  ;;  %3321 = vrot.lane.b32.xlu0 %v14055_v17, %s15707_s22  ;;  %10847 = vmatprep.mubr.msk.f32.mxu1 %vm563_vm0, %v4269_v23  ;;  %v4004_v18 = vld [vmem:[#allocation2 + $0x189] sm:$0xff] }
 0x3d7   : > { %v4076_v16 = vpop.permute.xlu1 %4075 }
 0x3d8   : > { %4785 = vst.msk [vmem:[#allocation7] sm:$0xff] %vm563_vm0, %v4769_v20  ;;  %v4644_v26 = vmax.f32 %v4494_v28, 0.0  ;;  %v3306_v22 = vpop.permute.xlu0 %3305  ;;  %v4198_v20 = vld [vmem:[#allocation2 + $0x19a] sm:$0xff] }
 0x3d9   : > { %3383 = vst.msk [vmem:[#allocation5 + $0x130] sm:$0xff] %vm3363_vm15, %v3306_v22  ;;  %2937 = vrot.lane.b32.xlu1 %v14227_v38, %s15703_s1  ;;  %v14374_v22 = vld [vmem:[#allocation3] sm:$0xff] }
 0x3da   : > { %4676 = vst.msk [vmem:[#allocation6 + $0x10] sm:$0xff] %vm563_vm0, %v4644_v26  ;;  %3514 = vrot.lane.b32.xlu0 %v14254_v48, %s15709_s0  ;;  %4230 = vst.msk [vmem:[#allocation5 + $0x1e8] sm:$0xff] %vm563_vm0, %v4198_v20 }
 0x3db   : > { %4154 = vst.msk [vmem:[#allocation5 + $0x120] sm:$0xff] %vm4135_vm4, %v4076_v16  ;;  %v2922_v40 = vpop.permute.xlu1 %2921  ;;  %v4005_v16 = vld [vmem:[#allocation2 + $0x199] sm:$0xff] }
 0x3dc   : > { %v3499_v17 = vpop.permute.xlu0 %3498  ;;  %2998 = vst.msk [vmem:[#allocation5 + $0x140] sm:$0xff] %vm2977_vm13, %v2922_v40 }
 0x3dd   : > { %3576 = vst.msk [vmem:[#allocation5 + $0x130] sm:$0xff] %vm3556_vm1, %v3499_v17  ;;  %3130 = vrot.lane.b32.xlu1 %v14062_v37, %s15701_s30  ;;  %v4199_v17 = vld [vmem:[#allocation2 + $0x1a2] sm:$0xff] }
 0x3de   : > { %3707 = vrot.lane.b32.xlu0 %v14048_v62, %s15705_s26  ;;  %4843 = vst.msk [vmem:[#allocation5] sm:$0xff] %vm563_vm0, %v14374_v22  ;;  %4231 = vst.msk [vmem:[#allocation5 + $0x1f8] sm:$0xff] %vm563_vm0, %v4199_v17 }
 0x3df   : > { %v3115_v55 = vpop.permute.xlu1 %3114  ;;  %v4801_v52 = vld [vmem:[#allocation7] sm:$0xff] }
 0x3e0   : > { %v3692_v58 = vpop.permute.xlu0 %3691  ;;  %3191 = vst.msk [vmem:[#allocation5 + $0x140] sm:$0xff] %vm3170_vm14, %v3115_v55 }
 0x3e1   : > { %3769 = vst.msk [vmem:[#allocation5 + $0x130] sm:$0xff] %vm3749_vm2, %v3692_v58  ;;  %3323 = vrot.lane.b32.xlu1 %v14132_v1, %s15707_s22 }
 0x3e2   : > { %v4268_v51 = vld [vmem:[#allocation5 + $0x120] sm:$0xff]  ;;  %3900 = vrot.lane.b32.xlu0 %v14134_v10, %s15699_s27 }
 0x3e3   : > { %4572 = vmatmul.mubr.f32.gmra.mrb[36].mxu1 %v4268_v51  ;;  %v3308_v37 = vpop.permute.xlu1 %3307 }
 0x3e4   : > { %10848 = vmatprep.mubr.msk.f32.mxu1 %vm563_vm0, %v4271_v56  ;;  %v3885_v31 = vpop.permute.xlu0 %3884  ;;  %v4498_v19 = vpop.f32.mrb[6].mxu1  ;;  %3384 = vst.msk [vmem:[#allocation5 + $0x140] sm:$0xff] %vm3363_vm15, %v3308_v37 }
 0x3e5   : > { %3962 = vst.msk [vmem:[#allocation5 + $0x130] sm:$0xff] %vm3942_vm3, %v3885_v31  ;;  %v4499_v34 = vadd.f32 %v14218_v39, %v4498_v19  ;;  %v4500_v45 = vpop.f32.mrb[7].mxu1  ;;  %3516 = vrot.lane.b32.xlu1 %v14279_v8, %s15709_s0  ;;  %v4277_v31 = vld [vmem:[#allocation5 + $0x168] sm:$0xff] }
 0x3e6   : > { %4093 = vrot.lane.b32.xlu0 %v14307_v46, %s15697_s19 }
 0x3e7   : > { %v4645_v21 = vmax.f32 %v4499_v34, 0.0  ;;  %v3501_v44 = vpop.permute.xlu1 %3500 }
 0x3e8   : > { %v4078_v1 = vpop.permute.xlu0 %4077  ;;  %3577 = vst.msk [vmem:[#allocation5 + $0x140] sm:$0xff] %vm3556_vm1, %v3501_v44  ;;  %v4006_v44 = vld [vmem:[#allocation2 + $0x1a1] sm:$0xff] }
 0x3e9   : > { %4677 = vst.msk [vmem:[#allocation6 + $0x18] sm:$0xff] %vm563_vm0, %v4645_v21  ;;  %3709 = vrot.lane.b32.xlu1 %v14141_v6, %s15705_s26  ;;  %v3813_v21 = vld [vmem:[#allocation2 + $0x1a0] sm:$0xff] }
 0x3ea   : > { %4155 = vst.msk [vmem:[#allocation5 + $0x130] sm:$0xff] %vm4135_vm4, %v4078_v1  ;;  %2939 = vrot.lane.b32.xlu0 %v14254_v48, %s15703_s1 }
 0x3eb   : > { %v3694_v54 = vpop.permute.xlu1 %3693 }
 0x3ec   : > { %v2924_v12 = vpop.permute.xlu0 %2923  ;;  %3770 = vst.msk [vmem:[#allocation5 + $0x140] sm:$0xff] %vm3749_vm2, %v3694_v54  ;;  %v4851_v54 = vld [vmem:[#allocation3 + $0x1] sm:$0xff] }
 0x3ed   : > { %2999 = vst.msk [vmem:[#allocation5 + $0x150] sm:$0xff] %vm2977_vm13, %v2924_v12  ;;  %3902 = vrot.lane.b32.xlu1 %v3810_v2, %s15699_s27 }
 0x3ee   : > { %3132 = vrot.lane.b32.xlu0 %v14048_v62, %s15701_s30  ;;  %v4003_v62 = vld [vmem:[#allocation2 + $0x181] sm:$0xff] }
 0x3ef   : > { %v3887_v30 = vpop.permute.xlu1 %3886  ;;  %v4503_v24 = vpop.f32.mrb[8].mxu1 }
 0x3f0   : > { %v4708_v3 = vld [vmem:[#allocation6 + $0x10] ss:$2 sm:$0xff]  ;;  %v4740_v4 = vld [vmem:[#allocation6 + $0x11] ss:$2 sm:$0xff]  ;;  %v3117_v38 = vpop.permute.xlu0 %3116  ;;  %3963 = vst.msk [vmem:[#allocation5 + $0x140] sm:$0xff] %vm3942_vm3, %v3887_v30  ;;  %v4504_v25 = vadd.f32 %v14218_v39, %v4503_v24  ;;  %v4505_v5 = vpop.f32.mrb[9].mxu1 }
 0x3f1   : > { %v4270_v50 = vld [vmem:[#allocation5 + $0x130] sm:$0xff]  ;;  %v4770_v60 = vmax.f32 %v4708_v3, %v4740_v4  ;;  %3192 = vst.msk [vmem:[#allocation5 + $0x150] sm:$0xff] %vm3170_vm14, %v3117_v38  ;;  %4095 = vrot.lane.b32.xlu1 %v4003_v62, %s15697_s19 }
 0x3f2   : > { %4577 = vmatmul.mubr.f32.gmra.mrb[38].mxu1 %v4270_v50  ;;  %3325 = vrot.lane.b32.xlu0 %v14134_v10, %s15707_s22  ;;  %v4646_v42 = vmax.f32 %v4504_v25, 0.0  ;;  %v4899_v3 = vld [vmem:[#allocation3 + $0x2] sm:$0xff]  ;;  %v5221_v50 = vld [vmem:[%s15729_s5 + $0x8] sm:$0xff] }
 0x3f3   : > { %10849 = vmatprep.mubr.msk.f32.mxu1 %vm563_vm0, %v4273_v53  ;;  %4786 = vst.msk [vmem:[#allocation7 + $0x8] sm:$0xff] %vm563_vm0, %v4770_v60  ;;  %v4080_v14 = vpop.permute.xlu1 %4079  ;;  %v4279_v60 = vld [vmem:[#allocation5 + $0x178] sm:$0xff] }
 0x3f4   : > { %v3310_v7 = vpop.permute.xlu0 %3309  ;;  %4678 = vst.msk [vmem:[#allocation6 + $0x20] sm:$0xff] %vm563_vm0, %v4646_v42  ;;  %v5222_v42 = vld [vmem:[%s15729_s5 + $0x10] sm:$0xff] }
 0x3f5   : > { %3385 = vst.msk [vmem:[#allocation5 + $0x150] sm:$0xff] %vm3363_vm15, %v3310_v7  ;;  %2941 = vrot.lane.b32.xlu1 %v14279_v8, %s15703_s1  ;;  %v3812_v8 = vld [vmem:[#allocation2 + $0x198] sm:$0xff] }
 0x3f6   : > { %4156 = vst.msk [vmem:[#allocation5 + $0x140] sm:$0xff] %vm4135_vm4, %v4080_v14  ;;  %3518 = vrot.lane.b32.xlu0 %v14307_v46, %s15709_s0  ;;  %v5223_v7 = vld [vmem:[%s15729_s5 + $0x18] sm:$0xff] }
 0x3f7   : > { %v2926_v32 = vpop.permute.xlu1 %2925 }
 0x3f8   : > { %v3503_v10 = vpop.permute.xlu0 %3502  ;;  %3000 = vst.msk [vmem:[#allocation5 + $0x160] sm:$0xff] %vm2977_vm13, %v2926_v32  ;;  %v5224_v32 = vld [vmem:[%s15729_s5 + $0x20] sm:$0xff] }
 0x3f9   : > { %3578 = vst.msk [vmem:[#allocation5 + $0x150] sm:$0xff] %vm3556_vm1, %v3503_v10  ;;  %3134 = vrot.lane.b32.xlu1 %v14141_v6, %s15701_s30  ;;  %v11359_v10 = vpack.c.bf16 %v5223_v7, %v5222_v42 }
 0x3fa   : > { %3711 = vrot.lane.b32.xlu0 %v14129_v63, %s15705_s26  ;;  %v4810_v9 = vld [vmem:[#allocation7 + $0x8] sm:$0xff] }
 0x3fb   : > { %v4818_v47 = vmax.f32 %v4801_v52, %v4810_v9  ;;  %v3119_v35 = vpop.permute.xlu1 %3118  ;;  %v5225_v52 = vld [vmem:[%s15729_s5 + $0x28] sm:$0xff] }
 0x3fc   : > { %v3696_v48 = vpop.permute.xlu0 %3695  ;;  %3193 = vst.msk [vmem:[#allocation5 + $0x160] sm:$0xff] %vm3170_vm14, %v3119_v35 }
 0x3fd   : > { %3771 = vst.msk [vmem:[#allocation5 + $0x150] sm:$0xff] %vm3749_vm2, %v3696_v48  ;;  %v4272_v36 = vld [vmem:[#allocation5 + $0x140] sm:$0xff]  ;;  %3327 = vrot.lane.b32.xlu1 %v3810_v2, %s15707_s22  ;;  %v11362_v48 = vpack.c.bf16 %v5225_v52, %v5224_v32 }
 0x3fe   : > { %4827 = vst.msk [vmem:[#allocation3 + $0x11] sm:$0xff] %vm563_vm0, %v4818_v47  ;;  %4582 = vmatmul.mubr.f32.gmra.mrb[40].mxu1 %v4272_v36  ;;  %3904 = vrot.lane.b32.xlu0 %v3811_v11, %s15699_s27  ;;  %v5226_v36 = vld [vmem:[%s15729_s5 + $0x30] sm:$0xff] }
 0x3ff   : > { %10850 = vmatprep.mubr.msk.f32.mxu1 %vm563_vm0, %v4275_v57  ;;  %v3312_v61 = vpop.permute.xlu1 %3311 }
 0x400   : > { %v3889_v6 = vpop.permute.xlu0 %3888  ;;  %v4508_v15 = vpop.f32.mrb[10].mxu1  ;;  %3386 = vst.msk [vmem:[#allocation5 + $0x160] sm:$0xff] %vm3363_vm15, %v3312_v61 }
 0x401   : > { %3964 = vst.msk [vmem:[#allocation5 + $0x150] sm:$0xff] %vm3942_vm3, %v3889_v6  ;;  %v4509_v41 = vadd.f32 %v14218_v39, %v4508_v15  ;;  %v4510_v13 = vpop.f32.mrb[11].mxu1  ;;  %3520 = vrot.lane.b32.xlu1 %v4003_v62, %s15709_s0 }
 0x402   : > { %4097 = vrot.lane.b32.xlu0 %v4004_v18, %s15697_s19 }
 0x403   : > { %v4647_v27 = vmax.f32 %v4509_v41, 0.0  ;;  %v3505_v28 = vpop.permute.xlu1 %3504 }
 0x404   : > { %v4082_v59 = vpop.permute.xlu0 %4081  ;;  %3579 = vst.msk [vmem:[#allocation5 + $0x160] sm:$0xff] %vm3556_vm1, %v3505_v28  ;;  %v4281_v28 = vld [vmem:[#allocation5 + $0x188] sm:$0xff] }
 0x405   : > { %v14359_v23 = vld [vmem:[#allocation3 + $0x10] sm:$0xff]  ;;  %4679 = vst.msk [vmem:[#allocation6 + $0x28] sm:$0xff] %vm563_vm0, %v4647_v27  ;;  %3713 = vrot.lane.b32.xlu1 %v14207_v33, %s15705_s26 }
 0x406   : > { %4157 = vst.msk [vmem:[#allocation5 + $0x150] sm:$0xff] %vm4135_vm4, %v4082_v59  ;;  %2943 = vrot.lane.b32.xlu0 %v14307_v46, %s15703_s1  ;;  %v4995_v14 = vld [vmem:[#allocation3 + $0x11] sm:$0xff] }
 0x407   : > { %4844 = vst.msk [vmem:[#allocation5 + $0x10] sm:$0xff] %vm563_vm0, %v14359_v23  ;;  %v3698_v26 = vpop.permute.xlu1 %3697  ;;  %v5043_v57 = vld [vmem:[#allocation3 + $0x12] sm:$0xff] }
 0x408   : > { %v2928_v29 = vpop.permute.xlu0 %2927  ;;  %3772 = vst.msk [vmem:[#allocation5 + $0x160] sm:$0xff] %vm3749_vm2, %v3698_v26 }
 0x409   : > { %3001 = vst.msk [vmem:[#allocation5 + $0x170] sm:$0xff] %vm2977_vm13, %v2928_v29  ;;  %3906 = vrot.lane.b32.xlu1 %v3812_v8, %s15699_s27  ;;  %v5228_v29 = vld [vmem:[%s15729_s5 + $0x40] sm:$0xff]  ;;  %v5229_v8 = vld [vmem:[%s15729_s5 + $0x48] sm:$0xff] }
 0x40a   : > { %3136 = vrot.lane.b32.xlu0 %v14129_v63, %s15701_s30  ;;  %v11368_v17 = vpack.c.bf16 %v5229_v8, %v5228_v29  ;;  %v4287_v8 = vld [vmem:[#allocation5 + $0x1b8] sm:$0xff] }
 0x40b   : > { %v3891_v56 = vpop.permute.xlu1 %3890 }
 0x40c   : > { %v4710_v33 = vld [vmem:[#allocation6 + $0x20] ss:$2 sm:$0xff]  ;;  %v4742_v40 = vld [vmem:[#allocation6 + $0x21] ss:$2 sm:$0xff]  ;;  %v3121_v58 = vpop.permute.xlu0 %3120  ;;  %v4513_v63 = vpop.f32.mrb[12].mxu1  ;;  %3965 = vst.msk [vmem:[#allocation5 + $0x160] sm:$0xff] %vm3942_vm3, %v3891_v56 }
 0x40d   : > { %v4274_v55 = vld [vmem:[#allocation5 + $0x150] sm:$0xff]  ;;  %v4771_v51 = vmax.f32 %v4710_v33, %v4742_v40  ;;  %3194 = vst.msk [vmem:[#allocation5 + $0x170] sm:$0xff] %vm3170_vm14, %v3121_v58  ;;  %v4514_v19 = vadd.f32 %v14218_v39, %v4513_v63  ;;  %v4515_v37 = vpop.f32.mrb[13].mxu1  ;;  %4099 = vrot.lane.b32.xlu1 %v4005_v16, %s15697_s19 }
 0x40e   : > { %4587 = vmatmul.mubr.f32.gmra.mrb[42].mxu1 %v4274_v55  ;;  %3329 = vrot.lane.b32.xlu0 %v3811_v11, %s15707_s22  ;;  %v5227_v11 = vld [vmem:[%s15729_s5 + $0x38] sm:$0xff]  ;;  %v5230_v55 = vld [vmem:[%s15729_s5 + $0x50] sm:$0xff]  ;;  %v5233_v37 = vld [vmem:[%s15729_s5 + $0x68] sm:$0xff] }
 0x40f   : > { %10851 = vmatprep.mubr.msk.f32.mxu1 %vm563_vm0, %v4277_v31  ;;  %4787 = vst.msk [vmem:[#allocation7 + $0x10] sm:$0xff] %vm563_vm0, %v4771_v51  ;;  %v4648_v34 = vmax.f32 %v4514_v19, 0.0  ;;  %v4084_v46 = vpop.permute.xlu1 %4083  ;;  %v11365_v15 = vpack.c.bf16 %v5227_v11, %v5226_v36  ;;  %v5231_v51 = vld [vmem:[%s15729_s5 + $0x58] sm:$0xff]  ;;  %v5232_v19 = vld [vmem:[%s15729_s5 + $0x60] sm:$0xff] }
 0x410   : > { %v3314_v45 = vpop.permute.xlu0 %3313  ;;  %4158 = vst.msk [vmem:[#allocation5 + $0x160] sm:$0xff] %vm4135_vm4, %v4084_v46  ;;  %v11371_v56 = vpack.c.bf16 %v5231_v51, %v5230_v55  ;;  %v11374_v46 = vpack.c.bf16 %v5233_v37, %v5232_v19 }
 0x411   : > { %3387 = vst.msk [vmem:[#allocation5 + $0x170] sm:$0xff] %vm3363_vm15, %v3314_v45  ;;  %3715 = vrot.lane.b32.xlu1 %v14198_v49, %s15705_s26  ;;  %v5220_v49 = vld [vmem:[%s15729_s5] sm:$0xff] }
 0x412   : > { %4680 = vst.msk [vmem:[#allocation6 + $0x30] sm:$0xff] %vm563_vm0, %v4648_v34  ;;  %3522 = vrot.lane.b32.xlu0 %v4004_v18, %s15709_s0  ;;  %v11356_v30 = vpack.c.bf16 %v5221_v50, %v5220_v49 }
 0x413   : > { %v2930_v12 = vpop.permute.xlu1 %2929 }
 0x414   : > { %v3507_v1 = vpop.permute.xlu0 %3506  ;;  %3002 = vst.msk [vmem:[#allocation5 + $0x180] sm:$0xff] %vm2977_vm13, %v2930_v12  ;;  %11357 = vmatpush1.bf16.msra.mxu0 %v11356_v30 }
 0x415   : > { %3580 = vst.msk [vmem:[#allocation5 + $0x170] sm:$0xff] %vm3556_vm1, %v3507_v1  ;;  %4101 = vrot.lane.b32.xlu1 %v4006_v44, %s15697_s19  ;;  %11358 = vmatprep.subr.bf16.mxu0 %v11994_v43 }
 0x416   : > { %3908 = vrot.lane.b32.xlu0 %v3813_v21, %s15699_s27  ;;  %s15730_s27 = smov 32   ;;  %v4802_v34 = vld [vmem:[#allocation7 + $0x10] sm:$0xff] }
 0x417   : > { %v3123_v4 = vpop.permute.xlu1 %3122  ;;  %v4276_v38 = vld [vmem:[#allocation5 + $0x160] sm:$0xff] }
 0x418   : > { %v3700_v2 = vpop.permute.xlu0 %3699  ;;  %3195 = vst.msk [vmem:[#allocation5 + $0x180] sm:$0xff] %vm3170_vm14, %v3123_v4  ;;  %4592 = vmatmul.mubr.f32.gmra.mrb[44].mxu1 %v4276_v38  ;;  %11360 = vmatpush1.bf16.msra.mxu0 %v11359_v10 }
 0x419   : > { %3773 = vst.msk [vmem:[#allocation5 + $0x170] sm:$0xff] %vm3749_vm2, %v3700_v2  ;;  %4915 = vrot.lane.b32.xlu1 %v4899_v3, %s15701_s30  ;;  %10852 = vmatprep.mubr.msk.f32.mxu1 %vm563_vm0, %v4279_v60  ;;  %v5235_v2 = vld [vmem:[%s15729_s5 + $0x78] sm:$0xff]  ;;  %s15731_s30 = smov 96  }
 0x41a   : > { %4867 = vrot.lane.b32.xlu0 %v4851_v54, %s15703_s1  ;;  %11361 = vmatprep.subr.bf16.mxu0 %v11994_v43  ;;  %v5234_v54 = vld [vmem:[%s15729_s5 + $0x70] sm:$0xff]  ;;  %v4283_v3 = vld [vmem:[#allocation5 + $0x198] sm:$0xff] }
 0x41b   : > { %v3316_v25 = vpop.permute.xlu1 %3315  ;;  %v11377_v4 = vpack.c.bf16 %v5235_v2, %v5234_v54 }
 0x41c   : > { %v3893_v24 = vpop.permute.xlu0 %3892  ;;  %v4518_v53 = vpop.f32.mrb[14].mxu1  ;;  %3388 = vst.msk [vmem:[#allocation5 + $0x180] sm:$0xff] %vm3363_vm15, %v3316_v25  ;;  %11363 = vmatpush1.bf16.msra.mxu0 %v11362_v48 }
 0x41d   : > { %3966 = vst.msk [vmem:[#allocation5 + $0x170] sm:$0xff] %vm3942_vm3, %v3893_v24  ;;  %v4519_v5 = vadd.f32 %v14218_v39, %v4518_v53  ;;  %v4520_v62 = vpop.f32.mrb[15].mxu1  ;;  %5011 = vrot.lane.b32.xlu1 %v4995_v14, %s15709_s0  ;;  %11364 = vmatprep.subr.bf16.mxu0 %v11994_v43  ;;  %v5236_v24 = vld [vmem:[%s15729_s5 + $0x80] sm:$0xff]  ;;  %v5237_v53 = vld [vmem:[%s15729_s5 + $0x88] sm:$0xff]  ;;  %s15737_s5 = smov 64  }
 0x41e   : > { %4963 = vrot.lane.b32.xlu0 %v14359_v23, %s15707_s22  ;;  %v11380_v25 = vpack.c.bf16 %v5237_v53, %v5236_v24 }
 0x41f   : > { %v4649_v9 = vmax.f32 %v4519_v5, 0.0  ;;  %v3509_v35 = vpop.permute.xlu1 %3508 }
 0x420   : > { %v4086_v47 = vpop.permute.xlu0 %4085  ;;  %3581 = vst.msk [vmem:[#allocation5 + $0x180] sm:$0xff] %vm3556_vm1, %v3509_v35  ;;  %11366 = vmatpush1.bf16.msra.mxu0 %v11365_v15 }
 0x421   : > { %4681 = vst.msk [vmem:[#allocation6 + $0x38] sm:$0xff] %vm563_vm0, %v4649_v9  ;;  %5059 = vrot.lane.b32.xlu1 %v5043_v57, %s15705_s26  ;;  %11367 = vmatprep.subr.bf16.mxu0 %v11994_v43 }
 0x422   : > { %4159 = vst.msk [vmem:[#allocation5 + $0x170] sm:$0xff] %vm4135_vm4, %v4086_v47  ;;  %4869 = vrot.lane.b32.xlu0 %v4995_v14, %s15703_s1 }
 0x423   : > { %v3702_v61 = vpop.permute.xlu1 %3701 }
 0x424   : > { %v2932_v6 = vpop.permute.xlu0 %2931  ;;  %3774 = vst.msk [vmem:[#allocation5 + $0x180] sm:$0xff] %vm3749_vm2, %v3702_v61  ;;  %11369 = vmatpush1.bf16.msra.mxu0 %v11368_v17 }
 0x425   : > { %3003 = vst.msk [vmem:[#allocation5 + $0x190] sm:$0xff] %vm2977_vm13, %v2932_v6  ;;  %11370 = vmatprep.subr.bf16.mxu0 %v11994_v43 }
 0x426   : > { %4917 = vrot.lane.b32.xlu0 %v5043_v57, %s15730_s27 }
 0x427   : > { %v3895_v59 = vpop.permute.xlu1 %3894  ;;  %v4523_v23 = vpop.f32.mrb[16].mxu1 }
 0x428   : > { %v4712_v41 = vld [vmem:[#allocation6 + $0x30] ss:$2 sm:$0xff]  ;;  %v4744_v13 = vld [vmem:[#allocation6 + $0x31] ss:$2 sm:$0xff]  ;;  %v3125_v18 = vpop.permute.xlu0 %3124  ;;  %3967 = vst.msk [vmem:[#allocation5 + $0x180] sm:$0xff] %vm3942_vm3, %v3895_v59  ;;  %v4524_v26 = vadd.f32 %v14218_v39, %v4523_v23  ;;  %v4525_v16 = vpop.f32.mrb[17].mxu1  ;;  %11372 = vmatpush1.bf16.msra.mxu0 %v11371_v56 }
 0x429   : > { %v4278_v20 = vld [vmem:[#allocation5 + $0x170] sm:$0xff]  ;;  %v4772_v27 = vmax.f32 %v4712_v41, %v4744_v13  ;;  %3196 = vst.msk [vmem:[#allocation5 + $0x190] sm:$0xff] %vm3170_vm14, %v3125_v18  ;;  %11373 = vmatprep.subr.bf16.mxu0 %v11994_v43  ;;  %v4285_v41 = vld [vmem:[#allocation5 + $0x1a8] sm:$0xff] }
 0x42a   : > { %4597 = vmatmul.mubr.f32.gmra.mrb[46].mxu1 %v4278_v20  ;;  %v4650_v33 = vmax.f32 %v4524_v26, 0.0 }
 0x42b   : > { %10853 = vmatprep.mubr.msk.f32.mxu1 %vm563_vm0, %v4281_v28  ;;  %4788 = vst.msk [vmem:[#allocation7 + $0x18] sm:$0xff] %vm563_vm0, %v4772_v27  ;;  %v4088_v58 = vpop.permute.xlu1 %4087 }
 0x42c   : > { %v3318_v40 = vpop.permute.xlu0 %3317  ;;  %4682 = vst.msk [vmem:[#allocation6 + $0x40] sm:$0xff] %vm563_vm0, %v4650_v33  ;;  %11375 = vmatpush1.bf16.msra.mxu0 %v11374_v46 }
 0x42d   : > { %3389 = vst.msk [vmem:[#allocation5 + $0x190] sm:$0xff] %vm3363_vm15, %v3318_v40  ;;  %11376 = vmatprep.subr.bf16.mxu0 %v11994_v43 }
 0x42e   : > { %4160 = vst.msk [vmem:[#allocation5 + $0x180] sm:$0xff] %vm4135_vm4, %v4088_v58 }
 0x42f   : > { %v2934_v31 = vpop.permute.xlu1 %2933 }
 0x430   : > { %v3511_v63 = vpop.permute.xlu0 %3510  ;;  %3004 = vst.msk [vmem:[#allocation5 + $0x1a0] sm:$0xff] %vm2977_vm13, %v2934_v31  ;;  %11378 = vmatpush1.bf16.msra.mxu0 %v11377_v4 }
 0x431   : > { %3582 = vst.msk [vmem:[#allocation5 + $0x190] sm:$0xff] %vm3556_vm1, %v3511_v63  ;;  %11379 = vmatprep.subr.bf16.mxu0 %v11994_v43 }
 0x432   : > { %v4811_v45 = vld [vmem:[#allocation7 + $0x18] sm:$0xff] }
 0x433   : > { %v4819_v21 = vmax.f32 %v4802_v34, %v4811_v45  ;;  %v3127_v44 = vpop.permute.xlu1 %3126 }
 0x434   : > { %v3704_v1 = vpop.permute.xlu0 %3703  ;;  %3197 = vst.msk [vmem:[#allocation5 + $0x1a0] sm:$0xff] %vm3170_vm14, %v3127_v44  ;;  %11381 = vmatpush1.bf16.msra.mxu0 %v11380_v25  ;;  %v4291_v25 = vld [vmem:[#allocation5 + $0x1d8] sm:$0xff] }
 0x435   : > { %3775 = vst.msk [vmem:[#allocation5 + $0x190] sm:$0xff] %vm3749_vm2, %v3704_v1  ;;  %v4280_v12 = vld [vmem:[#allocation5 + $0x180] sm:$0xff]  ;;  %11382 = vmatprep.subr.bf16.mxu0 %v11994_v43  ;;  %v4289_v1 = vld [vmem:[#allocation5 + $0x1c8] sm:$0xff] }
 0x436   : > { %4828 = vst.msk [vmem:[#allocation3 + $0x21] sm:$0xff] %vm563_vm0, %v4819_v21  ;;  %4602 = vmatmul.mubr.f32.gmra.mrb[48].mxu1 %v4280_v12 }
 0x437   : > { %10854 = vmatprep.mubr.msk.f32.mxu1 %vm563_vm0, %v4283_v3  ;;  %v3320_v50 = vpop.permute.xlu1 %3319 }
 0x438   : > { %v3897_v38 = vpop.permute.xlu0 %3896  ;;  %v4528_v49 = vpop.f32.mrb[18].mxu1  ;;  %3390 = vst.msk [vmem:[#allocation5 + $0x1a0] sm:$0xff] %vm3363_vm15, %v3320_v50 }
 0x439   : > { %3968 = vst.msk [vmem:[#allocation5 + $0x190] sm:$0xff] %vm3942_vm3, %v3897_v38  ;;  %v4529_v60 = vadd.f32 %v14218_v39, %v4528_v49  ;;  %v4530_v30 = vpop.f32.mrb[19].mxu1 }
 0x43b   : > { %v4651_v5 = vmax.f32 %v4529_v60, 0.0  ;;  %v3513_v14 = vpop.permute.xlu1 %3512 }
 0x43c   : > { %v4090_v62 = vpop.permute.xlu0 %4089  ;;  %3583 = vst.msk [vmem:[#allocation5 + $0x1a0] sm:$0xff] %vm3556_vm1, %v3513_v14 }
 0x43d   : > { %v5092_v42 = vld [vmem:[#allocation3 + $0x20] sm:$0xff]  ;;  %4683 = vst.msk [vmem:[#allocation6 + $0x48] sm:$0xff] %vm563_vm0, %v4651_v5 }
 0x43e   : > { %v5188_v7 = vld [vmem:[#allocation3 + $0x22] sm:$0xff]  ;;  %4161 = vst.msk [vmem:[#allocation5 + $0x190] sm:$0xff] %vm4135_vm4, %v4090_v62  ;;  %5108 = vrot.lane.b32.xlu1 %v5092_v42, %s15731_s30  ;;  %4965 = vrot.lane.b32.xlu0 %v5092_v42, %s15707_s22 }
 0x43f   : > { %5196 = vst.msk [vmem:[#allocation5 + $0x8] sm:$0xff] %vm563_vm0, %v5188_v7  ;;  %4845 = vst.msk [vmem:[#allocation5 + $0x20] sm:$0xff] %vm563_vm0, %v5092_v42  ;;  %v5140_v32 = vld [vmem:[#allocation3 + $0x21] sm:$0xff]  ;;  %v3706_v52 = vpop.permute.xlu1 %3705 }
 0x440   : > { %v2936_v10 = vpop.permute.xlu0 %2935  ;;  %3776 = vst.msk [vmem:[#allocation5 + $0x1a0] sm:$0xff] %vm3749_vm2, %v3706_v52 }
 0x441   : > { %3005 = vst.msk [vmem:[#allocation5 + $0x1b0] sm:$0xff] %vm2977_vm13, %v2936_v10 }
 0x442   : > { %5156 = vrot.lane.b32.xlu1 %v5140_v32, %s15732_s23  ;;  %5013 = vrot.lane.b32.xlu0 %v5140_v32, %s15709_s0 }
 0x443   : > { %v3899_v11 = vpop.permute.xlu1 %3898  ;;  %v4533_v57 = vpop.f32.mrb[20].mxu1 }
 0x444   : > { %v4714_v9 = vld [vmem:[#allocation6 + $0x40] ss:$2 sm:$0xff]  ;;  %v4746_v47 = vld [vmem:[#allocation6 + $0x41] ss:$2 sm:$0xff]  ;;  %v3129_v48 = vpop.permute.xlu0 %3128  ;;  %3969 = vst.msk [vmem:[#allocation5 + $0x1a0] sm:$0xff] %vm3942_vm3, %v3899_v11  ;;  %v4534_v15 = vadd.f32 %v14218_v39, %v4533_v57  ;;  %v4535_v61 = vpop.f32.mrb[21].mxu1 }
 0x445   : > { %v4282_v35 = vld [vmem:[#allocation5 + $0x190] sm:$0xff]  ;;  %v4773_v36 = vmax.f32 %v4714_v9, %v4746_v47  ;;  %3198 = vst.msk [vmem:[#allocation5 + $0x1b0] sm:$0xff] %vm3170_vm14, %v3129_v48 }
 0x446   : > { %4607 = vmatmul.mubr.f32.gmra.mrb[50].mxu1 %v4282_v35  ;;  %v5205_v6 = vld [vmem:[#allocation5 + $0x8] sm:$0xff]  ;;  %4871 = vrot.lane.b32.xlu1 %v5140_v32, %s15703_s1  ;;  %v4652_v13 = vmax.f32 %v4534_v15, 0.0 }
 0x447   : > { %10862 = vmatprep.mubr.msk.f32.mxu0 %vm563_vm0, %v5205_v6  ;;  %5061 = vrot.lane.b32.xlu0 %v5188_v7, %s15705_s26  ;;  %4789 = vst.msk [vmem:[#allocation7 + $0x20] sm:$0xff] %vm563_vm0, %v4773_v36  ;;  %v4092_v20 = vpop.permute.xlu1 %4091  ;;  %v4293_v36 = vld [vmem:[#allocation5 + $0x1e8] sm:$0xff] }
 0x448   : > { %10855 = vmatprep.mubr.msk.f32.mxu1 %vm563_vm0, %v4285_v41  ;;  %v3322_v18 = vpop.permute.xlu0 %3321  ;;  %4684 = vst.msk [vmem:[#allocation6 + $0x50] sm:$0xff] %vm563_vm0, %v4652_v13 }
 0x449   : > { %3391 = vst.msk [vmem:[#allocation5 + $0x1b0] sm:$0xff] %vm3363_vm15, %v3322_v18  ;;  %v14566_v18 = vld [vmem:[%s15728_s4] ss:$0 sm:$0xff] }
 0x44a   : > { %4919 = vrot.lane.b32.xlu1 %v5188_v7, %s15730_s27  ;;  %4162 = vst.msk [vmem:[#allocation5 + $0x1a0] sm:$0xff] %vm4135_vm4, %v4092_v20 }
 0x44b   : > { %v2938_v59 = vpop.permute.xlu1 %2937 }
 0x44c   : > { %v3515_v27 = vpop.permute.xlu0 %3514  ;;  %3006 = vst.msk [vmem:[#allocation5 + $0x1c0] sm:$0xff] %vm2977_vm13, %v2938_v59 }
 0x44d   : > { %3584 = vst.msk [vmem:[#allocation5 + $0x1b0] sm:$0xff] %vm3556_vm1, %v3515_v27 }
 0x44e   : > { %v4803_v49 = vld [vmem:[#allocation7 + $0x20] sm:$0xff] }
 0x44f   : > { %v3131_v28 = vpop.permute.xlu1 %3130 }
 0x450   : > { %v3708_v23 = vpop.permute.xlu0 %3707  ;;  %3199 = vst.msk [vmem:[#allocation5 + $0x1c0] sm:$0xff] %vm3170_vm14, %v3131_v28 }
 0x451   : > { %3777 = vst.msk [vmem:[#allocation5 + $0x1b0] sm:$0xff] %vm3749_vm2, %v3708_v23  ;;  %v4284_v29 = vld [vmem:[#allocation5 + $0x1a0] sm:$0xff] }
 0x452   : > { %4612 = vmatmul.mubr.f32.gmra.mrb[52].mxu1 %v4284_v29 }
 0x453   : > { %10856 = vmatprep.mubr.msk.f32.mxu1 %vm563_vm0, %v4287_v8  ;;  %v3324_v17 = vpop.permute.xlu1 %3323 }
 0x454   : > { %v3901_v26 = vpop.permute.xlu0 %3900  ;;  %v4538_v16 = vpop.f32.mrb[22].mxu1  ;;  %3392 = vst.msk [vmem:[#allocation5 + $0x1c0] sm:$0xff] %vm3363_vm15, %v3324_v17 }
 0x455   : > { %3970 = vst.msk [vmem:[#allocation5 + $0x1b0] sm:$0xff] %vm3942_vm3, %v3901_v26  ;;  %v4539_v33 = vadd.f32 %v14218_v39, %v4538_v16  ;;  %v4540_v40 = vpop.f32.mrb[23].mxu1  ;;  %v4295_v16 = vld [vmem:[#allocation5 + $0x1f8] sm:$0xff] }
 0x457   : > { %v4653_v58 = vmax.f32 %v4539_v33, 0.0  ;;  %v3517_v51 = vpop.permute.xlu1 %3516 }
 0x458   : > { %v4094_v55 = vpop.permute.xlu0 %4093  ;;  %3585 = vst.msk [vmem:[#allocation5 + $0x1c0] sm:$0xff] %vm3556_vm1, %v3517_v51 }
 0x459   : > { %4685 = vst.msk [vmem:[#allocation6 + $0x58] sm:$0xff] %vm563_vm0, %v4653_v58 }
 0x45a   : > { %4163 = vst.msk [vmem:[#allocation5 + $0x1b0] sm:$0xff] %vm4135_vm4, %v4094_v55 }
 0x45b   : > { %v3710_v63 = vpop.permute.xlu1 %3709 }
 0x45c   : > { %v2940_v56 = vpop.permute.xlu0 %2939  ;;  %3778 = vst.msk [vmem:[#allocation5 + $0x1c0] sm:$0xff] %vm3749_vm2, %v3710_v63 }
 0x45d   : > { %3007 = vst.msk [vmem:[#allocation5 + $0x1d0] sm:$0xff] %vm2977_vm13, %v2940_v56 }
 0x45f   : > { %v3903_v46 = vpop.permute.xlu1 %3902  ;;  %v4543_v21 = vpop.f32.mrb[24].mxu1 }
 0x460   : > { %v4716_v31 = vld [vmem:[#allocation6 + $0x50] ss:$2 sm:$0xff]  ;;  %v4748_v19 = vld [vmem:[#allocation6 + $0x51] ss:$2 sm:$0xff]  ;;  %v3133_v37 = vpop.permute.xlu0 %3132  ;;  %3971 = vst.msk [vmem:[#allocation5 + $0x1c0] sm:$0xff] %vm3942_vm3, %v3903_v46  ;;  %v4544_v44 = vadd.f32 %v14218_v39, %v4543_v21  ;;  %v4545_v12 = vpop.f32.mrb[25].mxu1 }
 0x461   : > { %v4286_v34 = vld [vmem:[#allocation5 + $0x1b0] sm:$0xff]  ;;  %v4774_v45 = vmax.f32 %v4716_v31, %v4748_v19  ;;  %3200 = vst.msk [vmem:[#allocation5 + $0x1d0] sm:$0xff] %vm3170_vm14, %v3133_v37 }
 0x462   : > { %4617 = vmatmul.mubr.f32.gmra.mrb[54].mxu1 %v4286_v34  ;;  %v4654_v54 = vmax.f32 %v4544_v44, 0.0 }
 0x463   : > { %10857 = vmatprep.mubr.msk.f32.mxu1 %vm563_vm0, %v4289_v1  ;;  %4790 = vst.msk [vmem:[#allocation7 + $0x28] sm:$0xff] %vm563_vm0, %v4774_v45  ;;  %v4096_v3 = vpop.permute.xlu1 %4095 }
 0x464   : > { %v3326_v2 = vpop.permute.xlu0 %3325  ;;  %4686 = vst.msk [vmem:[#allocation6 + $0x60] sm:$0xff] %vm563_vm0, %v4654_v54 }
 0x465   : > { %3393 = vst.msk [vmem:[#allocation5 + $0x1d0] sm:$0xff] %vm3363_vm15, %v3326_v2 }
 0x466   : > { %4164 = vst.msk [vmem:[#allocation5 + $0x1c0] sm:$0xff] %vm4135_vm4, %v4096_v3 }
 0x467   : > { %v2942_v38 = vpop.permute.xlu1 %2941 }
 0x468   : > { %v3519_v4 = vpop.permute.xlu0 %3518  ;;  %3008 = vst.msk [vmem:[#allocation5 + $0x1e0] sm:$0xff] %vm2977_vm13, %v2942_v38 }
 0x469   : > { %3586 = vst.msk [vmem:[#allocation5 + $0x1d0] sm:$0xff] %vm3556_vm1, %v3519_v4 }
 0x46a   : > { %v4812_v50 = vld [vmem:[#allocation7 + $0x28] sm:$0xff] }
 0x46b   : > { %v4820_v60 = vmax.f32 %v4803_v49, %v4812_v50  ;;  %v3135_v24 = vpop.permute.xlu1 %3134 }
 0x46c   : > { %v3712_v30 = vpop.permute.xlu0 %3711  ;;  %3201 = vst.msk [vmem:[#allocation5 + $0x1e0] sm:$0xff] %vm3170_vm14, %v3135_v24 }
 0x46d   : > { %3779 = vst.msk [vmem:[#allocation5 + $0x1d0] sm:$0xff] %vm3749_vm2, %v3712_v30  ;;  %v4288_v53 = vld [vmem:[#allocation5 + $0x1c0] sm:$0xff] }
 0x46e   : > { %4829 = vst.msk [vmem:[#allocation3 + $0x31] sm:$0xff] %vm563_vm0, %v4820_v60  ;;  %4622 = vmatmul.mubr.f32.gmra.mrb[56].mxu1 %v4288_v53 }
 0x46f   : > { %10858 = vmatprep.mubr.msk.f32.mxu1 %vm563_vm0, %v4291_v25  ;;  %v3328_v42 = vpop.permute.xlu1 %3327 }
 0x470   : > { %v3905_v5 = vpop.permute.xlu0 %3904  ;;  %v4548_v62 = vpop.f32.mrb[26].mxu1  ;;  %3394 = vst.msk [vmem:[#allocation5 + $0x1e0] sm:$0xff] %vm3363_vm15, %v3328_v42 }
 0x471   : > { %3972 = vst.msk [vmem:[#allocation5 + $0x1d0] sm:$0xff] %vm3942_vm3, %v3905_v5  ;;  %v4549_v7 = vadd.f32 %v14218_v39, %v4548_v62  ;;  %v4550_v14 = vpop.f32.mrb[27].mxu1 }
 0x473   : > { %v4655_v10 = vmax.f32 %v4549_v7, 0.0  ;;  %v3521_v47 = vpop.permute.xlu1 %3520 }
 0x474   : > { %v4098_v32 = vpop.permute.xlu0 %4097  ;;  %3587 = vst.msk [vmem:[#allocation5 + $0x1e0] sm:$0xff] %vm3556_vm1, %v3521_v47 }
 0x475   : > { %v4949_v52 = vld [vmem:[#allocation3 + $0x30] sm:$0xff]  ;;  %4687 = vst.msk [vmem:[#allocation6 + $0x68] sm:$0xff] %vm563_vm0, %v4655_v10 }
 0x476   : > { %v5045_v9 = vld [vmem:[#allocation3 + $0x32] sm:$0xff]  ;;  %4165 = vst.msk [vmem:[#allocation5 + $0x1d0] sm:$0xff] %vm4135_vm4, %v4098_v32  ;;  %4967 = vrot.lane.b32.xlu1 %v4949_v52, %s15707_s22  ;;  %5110 = vrot.lane.b32.xlu0 %v4949_v52, %s15731_s30 }
 0x477   : > { %5197 = vst.msk [vmem:[#allocation5 + $0x18] sm:$0xff] %vm563_vm0, %v5045_v9  ;;  %4846 = vst.msk [vmem:[#allocation5 + $0x30] sm:$0xff] %vm563_vm0, %v4949_v52  ;;  %v4997_v48 = vld [vmem:[#allocation3 + $0x31] sm:$0xff]  ;;  %v3714_v35 = vpop.permute.xlu1 %3713 }
 0x478   : > { %v2944_v39 = vpop.permute.xlu0 %2943  ;;  %3780 = vst.msk [vmem:[#allocation5 + $0x1e0] sm:$0xff] %vm3749_vm2, %v3714_v35 }
 0x479   : > { %3009 = vst.msk [vmem:[#allocation5 + $0x1f0] sm:$0xff] %vm2977_vm13, %v2944_v39 }
 0x47a   : > { %5015 = vrot.lane.b32.xlu1 %v4997_v48, %s15709_s0  ;;  %5158 = vrot.lane.b32.xlu0 %v4997_v48, %s15732_s23 }
 0x47b   : > { %v3907_v41 = vpop.permute.xlu1 %3906  ;;  %v4553_v13 = vpop.f32.mrb[28].mxu1 }
 0x47c   : > { %v4718_v11 = vld [vmem:[#allocation6 + $0x60] ss:$2 sm:$0xff]  ;;  %v4750_v57 = vld [vmem:[#allocation6 + $0x61] ss:$2 sm:$0xff]  ;;  %v3137_v6 = vpop.permute.xlu0 %3136  ;;  %3973 = vst.msk [vmem:[#allocation5 + $0x1e0] sm:$0xff] %vm3942_vm3, %v3907_v41  ;;  %v4554_v20 = vadd.f32 %v14566_v18, %v4553_v13  ;;  %v4555_v27 = vpop.f32.mrb[29].mxu1 }
 0x47d   : > { %v4290_v15 = vld [vmem:[#allocation5 + $0x1d0] sm:$0xff]  ;;  %v4775_v61 = vmax.f32 %v4718_v11, %v4750_v57  ;;  %3202 = vst.msk [vmem:[#allocation5 + $0x1f0] sm:$0xff] %vm3170_vm14, %v3137_v6 }
 0x47e   : > { %4627 = vmatmul.mubr.f32.gmra.mrb[58].mxu1 %v4290_v15  ;;  %5063 = vrot.lane.b32.xlu1 %v5045_v9, %s15705_s26  ;;  %v4656_v59 = vmax.f32 %v4554_v20, 0.0  ;;  %v5207_v6 = vld [vmem:[#allocation5 + $0x18] sm:$0xff] }
 0x47f   : > { %4873 = vrot.lane.b32.xlu0 %v4997_v48, %s15703_s1  ;;  %10859 = vmatprep.mubr.msk.f32.mxu1 %vm563_vm0, %v4293_v36  ;;  %4791 = vst.msk [vmem:[#allocation7 + $0x30] sm:$0xff] %vm563_vm0, %v4775_v61  ;;  %v4100_v28 = vpop.permute.xlu1 %4099 }
 0x480   : > { %v3330_v23 = vpop.permute.xlu0 %3329  ;;  %4688 = vst.msk [vmem:[#allocation6 + $0x70] sm:$0xff] %vm563_vm0, %v4656_v59 }
 0x481   : > { %3395 = vst.msk [vmem:[#allocation5 + $0x1f0] sm:$0xff] %vm3363_vm15, %v3330_v23 }
 0x482   : > { %4166 = vst.msk [vmem:[#allocation5 + $0x1e0] sm:$0xff] %vm4135_vm4, %v4100_v28 }
 0x483   : > { %4921 = vrot.lane.b32.xlu0 %v5045_v9, %s15730_s27  ;;  %v3716_v8 = vpop.permute.xlu1 %3715 }
 0x484   : > { %v3523_v29 = vpop.permute.xlu0 %3522 }
 0x485   : > { %3588 = vst.msk [vmem:[#allocation5 + $0x1f0] sm:$0xff] %vm3556_vm1, %v3523_v29 }
 0x486   : > { %3781 = vst.msk [vmem:[#allocation5 + $0x1f0] sm:$0xff] %vm3749_vm2, %v3716_v8  ;;  %v4804_v4 = vld [vmem:[#allocation7 + $0x30] sm:$0xff] }
 0x487   : > { %v4102_v17 = vpop.permute.xlu1 %4101 }
 0x488   : > { %v3909_v26 = vpop.permute.xlu0 %3908 }
 0x489   : > { %3974 = vst.msk [vmem:[#allocation5 + $0x1f0] sm:$0xff] %vm3942_vm3, %v3909_v26  ;;  %v4292_v33 = vld [vmem:[#allocation5 + $0x1e0] sm:$0xff] }
 0x48a   : > { %4167 = vst.msk [vmem:[#allocation5 + $0x1f0] sm:$0xff] %vm4135_vm4, %v4102_v17  ;;  %4632 = vmatmul.mubr.f32.gmra.mrb[60].mxu1 %v4292_v33 }
 0x48b   : > { %10860 = vmatprep.mubr.msk.f32.mxu1 %vm563_vm0, %v4295_v16  ;;  %v4916_v55 = vpop.permute.xlu1 %4915 }
 0x48c   : > { %v4868_v40 = vpop.permute.xlu0 %4867  ;;  %v4558_v58 = vpop.f32.mrb[30].mxu1 }
 0x48d   : > { %4891 = vst.msk [vmem:[#allocation5] sm:$0xff] %vm2977_vm13, %v4868_v40  ;;  %v4559_v51 = vadd.f32 %v14566_v18, %v4558_v58  ;;  %v4560_v56 = vpop.f32.mrb[31].mxu1 }
 0x48e   : > { %4939 = vst.msk [vmem:[#allocation5] sm:$0xff] %vm3170_vm14, %v4916_v55 }
 0x48f   : > { %v4657_v63 = vmax.f32 %v4559_v51, 0.0  ;;  %v5012_v19 = vpop.permute.xlu1 %5011 }
 0x490   : > { %v4964_v31 = vpop.permute.xlu0 %4963 }
 0x491   : > { %4689 = vst.msk [vmem:[#allocation6 + $0x78] sm:$0xff] %vm563_vm0, %v4657_v63  ;;  %v4294_v37 = vld [vmem:[#allocation5 + $0x1f0] sm:$0xff] }
 0x492   : > { %4987 = vst.msk [vmem:[#allocation5] sm:$0xff] %vm3363_vm15, %v4964_v31  ;;  %4637 = vmatmul.mubr.f32.gmra.mrb[62].mxu1 %v4294_v37 }
 0x493   : > { %5035 = vst.msk [vmem:[#allocation5] sm:$0xff] %vm3556_vm1, %v5012_v19  ;;  %v5060_v45 = vpop.permute.xlu1 %5059 }
 0x494   : > { %v4870_v34 = vpop.permute.xlu0 %4869  ;;  %5083 = vst.msk [vmem:[#allocation5] sm:$0xff] %vm3749_vm2, %v5060_v45 }
 0x495   : > { %4892 = vst.msk [vmem:[#allocation5 + $0x10] sm:$0xff] %vm2977_vm13, %v4870_v34 }
 0x498   : > { %v4720_v46 = vld [vmem:[#allocation6 + $0x70] ss:$2 sm:$0xff]  ;;  %v4752_v21 = vld [vmem:[#allocation6 + $0x71] ss:$2 sm:$0xff]  ;;  %v4918_v1 = vpop.permute.xlu0 %4917 }
 0x499   : > { %v4776_v44 = vmax.f32 %v4720_v46, %v4752_v21  ;;  %v4563_v12 = vpop.f32.mrb[32].mxu1  ;;  %4940 = vst.msk [vmem:[#allocation5 + $0x10] sm:$0xff] %vm3170_vm14, %v4918_v1 }
 0x49a   : > { %v4564_v54 = vadd.f32 %v14566_v18, %v4563_v12  ;;  %v4565_v2 = vpop.f32.mrb[33].mxu1 }
 0x49b   : > { %4792 = vst.msk [vmem:[#allocation7 + $0x38] sm:$0xff] %vm563_vm0, %v4776_v44 }
 0x49c   : > { %v4658_v3 = vmax.f32 %v4564_v54, 0.0 }
 0x49e   : > { %4690 = vst.msk [vmem:[#allocation6 + $0x80] sm:$0xff] %vm563_vm0, %v4658_v3 }
 0x4a2   : > { %v4813_v38 = vld [vmem:[#allocation7 + $0x38] sm:$0xff] }
 0x4a3   : > { %v4821_v49 = vmax.f32 %v4804_v4, %v4813_v38 }
 0x4a5   : > { %4830 = vst.msk [vmem:[#allocation3 + $0x41] sm:$0xff] %vm563_vm0, %v4821_v49 }
 0x4a8   : > { %v4568_v50 = vpop.f32.mrb[34].mxu1 }
 0x4a9   : > { %v4569_v60 = vadd.f32 %v14566_v18, %v4568_v50  ;;  %v4570_v30 = vpop.f32.mrb[35].mxu1 }
 0x4ab   : > { %v4659_v24 = vmax.f32 %v4569_v60, 0.0 }
 0x4ac   : > { %v5094_v53 = vld [vmem:[#allocation3 + $0x40] sm:$0xff] }
 0x4ad   : > { %v5046_v25 = vld [vmem:[#allocation3 + $0x42] sm:$0xff]  ;;  %4691 = vst.msk [vmem:[#allocation6 + $0x88] sm:$0xff] %vm563_vm0, %v4659_v24  ;;  %5112 = vrot.lane.b32.xlu1 %v5094_v53, %s15731_s30  ;;  %4969 = vrot.lane.b32.xlu0 %v5094_v53, %s15707_s22  ;;  %4847 = vst.msk [vmem:[#allocation5 + $0x40] sm:$0xff] %vm563_vm0, %v5094_v53 }
 0x4ae   : > { %5198 = vst.msk [vmem:[#allocation5 + $0x28] sm:$0xff] %vm563_vm0, %v5046_v25  ;;  %v5142_v42 = vld [vmem:[#allocation3 + $0x41] sm:$0xff] }
 0x4b0   : > { %v5109_v5 = vpop.permute.xlu1 %5108  ;;  %v4966_v62 = vpop.permute.xlu0 %4965 }
 0x4b1   : > { %5132 = vst.msk [vmem:[#allocation5] sm:$0xff] %vm3942_vm3, %v5109_v5  ;;  %5160 = vrot.lane.b32.xlu1 %v5142_v42, %s15732_s23  ;;  %5017 = vrot.lane.b32.xlu0 %v5142_v42, %s15709_s0 }
 0x4b2   : > { %4988 = vst.msk [vmem:[#allocation5 + $0x10] sm:$0xff] %vm3363_vm15, %v4966_v62 }
 0x4b4   : > { %v5157_v7 = vpop.permute.xlu1 %5156  ;;  %v5014_v14 = vpop.permute.xlu0 %5013  ;;  %v4722_v10 = vld [vmem:[#allocation6 + $0x80] ss:$2 sm:$0xff]  ;;  %v4754_v32 = vld [vmem:[#allocation6 + $0x81] ss:$2 sm:$0xff] }
 0x4b5   : > { %5180 = vst.msk [vmem:[#allocation5] sm:$0xff] %vm4135_vm4, %v5157_v7  ;;  %v4777_v52 = vmax.f32 %v4722_v10, %v4754_v32  ;;  %4875 = vrot.lane.b32.xlu1 %v5142_v42, %s15703_s1  ;;  %5065 = vrot.lane.b32.xlu0 %v5046_v25, %s15705_s26  ;;  %v5209_v38 = vld [vmem:[#allocation5 + $0x28] sm:$0xff] }
 0x4b6   : > { %5036 = vst.msk [vmem:[#allocation5 + $0x10] sm:$0xff] %vm3556_vm1, %v5014_v14  ;;  %v4573_v9 = vpop.f32.mrb[36].mxu1 }
 0x4b7   : > { %v4574_v47 = vadd.f32 %v14566_v18, %v4573_v9  ;;  %v4575_v39 = vpop.f32.mrb[37].mxu1  ;;  %4793 = vst.msk [vmem:[#allocation7 + $0x40] sm:$0xff] %vm563_vm0, %v4777_v52 }
 0x4b8   : > { %v4872_v48 = vpop.permute.xlu1 %4871 }
 0x4b9   : > { %v4660_v35 = vmax.f32 %v4574_v47, 0.0  ;;  %4893 = vst.msk [vmem:[#allocation5 + $0x20] sm:$0xff] %vm2977_vm13, %v4872_v48  ;;  %v5062_v36 = vpop.permute.xlu0 %5061  ;;  %4923 = vrot.lane.b32.xlu1 %v5046_v25, %s15730_s27 }
 0x4ba   : > { %5084 = vst.msk [vmem:[#allocation5 + $0x10] sm:$0xff] %vm3749_vm2, %v5062_v36 }
 0x4bb   : > { %4692 = vst.msk [vmem:[#allocation6 + $0x90] sm:$0xff] %vm563_vm0, %v4660_v35 }
 0x4bc   : > { %v4920_v11 = vpop.permute.xlu1 %4919  ;;  %v5204_v57 = vld [vmem:[#allocation5] sm:$0xff] }
 0x4bd   : > { %4941 = vst.msk [vmem:[#allocation5 + $0x20] sm:$0xff] %vm3170_vm14, %v4920_v11  ;;  %5334 = vmatmul.mubr.f32.vlgmr.msra.gmra.mrb[32].mxu0 %v5204_v57 }
 0x4be   : > { %5414 = vst.msk [vmem:[#allocation5] sm:$0xff] %vm563_vm0, %v14374_v22  ;;  %10863 = vmatprep.mubr.msk.f32.mxu0 %vm563_vm0, %v5207_v6  ;;  %v4805_v22 = vld [vmem:[#allocation7 + $0x40] sm:$0xff] }
 0x4c5   : > { %v4578_v15 = vpop.f32.mrb[38].mxu1 }
 0x4c6   : > { %v4579_v61 = vadd.f32 %v14566_v18, %v4578_v15  ;;  %v4580_v41 = vpop.f32.mrb[39].mxu1 }
 0x4c8   : > { %v4661_v13 = vmax.f32 %v4579_v61, 0.0 }
 0x4ca   : > { %4693 = vst.msk [vmem:[#allocation6 + $0x98] sm:$0xff] %vm563_vm0, %v4661_v13 }
 0x4d1   : > { %v4724_v20 = vld [vmem:[#allocation6 + $0x90] ss:$2 sm:$0xff]  ;;  %v4756_v27 = vld [vmem:[#allocation6 + $0x91] ss:$2 sm:$0xff]  ;;  %v4583_v23 = vpop.f32.mrb[40].mxu1 }
 0x4d2   : > { %v4778_v59 = vmax.f32 %v4724_v20, %v4756_v27  ;;  %v4584_v28 = vadd.f32 %v14566_v18, %v4583_v23  ;;  %v4585_v29 = vpop.f32.mrb[41].mxu1 }
 0x4d4   : > { %4794 = vst.msk [vmem:[#allocation7 + $0x48] sm:$0xff] %vm563_vm0, %v4778_v59  ;;  %v4662_v8 = vmax.f32 %v4584_v28, 0.0 }
 0x4d6   : > { %4694 = vst.msk [vmem:[#allocation6 + $0xa0] sm:$0xff] %vm563_vm0, %v4662_v8 }
 0x4db   : > { %v4814_v26 = vld [vmem:[#allocation7 + $0x48] sm:$0xff] }
 0x4dc   : > { %v4822_v16 = vmax.f32 %v4805_v22, %v4814_v26 }
 0x4de   : > { %4831 = vst.msk [vmem:[#allocation3 + $0x51] sm:$0xff] %vm563_vm0, %v4822_v16 }
 0x4e1   : > { %v4588_v17 = vpop.f32.mrb[42].mxu1 }
 0x4e2   : > { %v4589_v33 = vadd.f32 %v14566_v18, %v4588_v17  ;;  %v4590_v40 = vpop.f32.mrb[43].mxu1 }
 0x4e4   : > { %v4663_v58 = vmax.f32 %v4589_v33, 0.0 }
 0x4e5   : > { %v4951_v55 = vld [vmem:[#allocation3 + $0x50] sm:$0xff] }
 0x4e6   : > { %v5047_v51 = vld [vmem:[#allocation3 + $0x52] sm:$0xff]  ;;  %4695 = vst.msk [vmem:[#allocation6 + $0xa8] sm:$0xff] %vm563_vm0, %v4663_v58  ;;  %4971 = vrot.lane.b32.xlu1 %v4951_v55, %s15707_s22  ;;  %5114 = vrot.lane.b32.xlu0 %v4951_v55, %s15731_s30  ;;  %4848 = vst.msk [vmem:[#allocation5 + $0x50] sm:$0xff] %vm563_vm0, %v4951_v55 }
 0x4e7   : > { %5199 = vst.msk [vmem:[#allocation5 + $0x38] sm:$0xff] %vm563_vm0, %v5047_v51  ;;  %v4999_v31 = vld [vmem:[#allocation3 + $0x51] sm:$0xff] }
 0x4e8   : > { %v4968_v56 = vpop.permute.xlu1 %4967  ;;  %v5111_v63 = vpop.permute.xlu0 %5110 }
 0x4e9   : > { %4989 = vst.msk [vmem:[#allocation5 + $0x20] sm:$0xff] %vm3363_vm15, %v4968_v56 }
 0x4ea   : > { %5133 = vst.msk [vmem:[#allocation5 + $0x10] sm:$0xff] %vm3942_vm3, %v5111_v63  ;;  %5019 = vrot.lane.b32.xlu1 %v4999_v31, %s15709_s0  ;;  %5162 = vrot.lane.b32.xlu0 %v4999_v31, %s15732_s23 }
 0x4eb   : > { %v4593_v21 = vpop.f32.mrb[44].mxu1 }
 0x4ec   : > { %v5016_v19 = vpop.permute.xlu1 %5015  ;;  %v5159_v37 = vpop.permute.xlu0 %5158  ;;  %v4594_v1 = vadd.f32 %v14566_v18, %v4593_v21 }
 0x4ed   : > { %v4726_v34 = vld [vmem:[#allocation6 + $0xa0] ss:$2 sm:$0xff]  ;;  %v4758_v45 = vld [vmem:[#allocation6 + $0xa1] ss:$2 sm:$0xff]  ;;  %5037 = vst.msk [vmem:[#allocation5 + $0x20] sm:$0xff] %vm3556_vm1, %v5016_v19  ;;  %v4595_v44 = vpop.f32.mrb[45].mxu1 }
 0x4ee   : > { %5181 = vst.msk [vmem:[#allocation5 + $0x10] sm:$0xff] %vm4135_vm4, %v5159_v37  ;;  %v4779_v46 = vmax.f32 %v4726_v34, %v4758_v45  ;;  %5067 = vrot.lane.b32.xlu1 %v5047_v51, %s15705_s26  ;;  %4877 = vrot.lane.b32.xlu0 %v4999_v31, %s15703_s1  ;;  %v4664_v54 = vmax.f32 %v4594_v1, 0.0  ;;  %v5211_v26 = vld [vmem:[#allocation5 + $0x38] sm:$0xff] }
 0x4f0   : > { %4795 = vst.msk [vmem:[#allocation7 + $0x50] sm:$0xff] %vm563_vm0, %v4779_v46  ;;  %v5064_v12 = vpop.permute.xlu1 %5063  ;;  %4696 = vst.msk [vmem:[#allocation6 + $0xb0] sm:$0xff] %vm563_vm0, %v4664_v54 }
 0x4f1   : > { %5085 = vst.msk [vmem:[#allocation5 + $0x20] sm:$0xff] %vm3749_vm2, %v5064_v12  ;;  %v4874_v2 = vpop.permute.xlu0 %4873 }
 0x4f2   : > { %4894 = vst.msk [vmem:[#allocation5 + $0x30] sm:$0xff] %vm2977_vm13, %v4874_v2  ;;  %4925 = vrot.lane.b32.xlu0 %v5047_v51, %s15730_s27 }
 0x4f5   : > { %v5206_v3 = vld [vmem:[#allocation5 + $0x10] sm:$0xff]  ;;  %v4922_v4 = vpop.permute.xlu0 %4921 }
 0x4f6   : > { %5339 = vmatmul.mubr.f32.gmra.mrb[34].mxu0 %v5206_v3  ;;  %4942 = vst.msk [vmem:[#allocation5 + $0x30] sm:$0xff] %vm3170_vm14, %v4922_v4 }
 0x4f7   : > { %10864 = vmatprep.mubr.msk.f32.mxu0 %vm563_vm0, %v5209_v38  ;;  %v4806_v14 = vld [vmem:[#allocation7 + $0x50] sm:$0xff] }
 0x4fd   : > { %v4598_v49 = vpop.f32.mrb[46].mxu1 }
 0x4fe   : > { %v4599_v50 = vadd.f32 %v14566_v18, %v4598_v49  ;;  %v4600_v60 = vpop.f32.mrb[47].mxu1 }
 0x500   : > { %v4665_v30 = vmax.f32 %v4599_v50, 0.0 }
 0x502   : > { %4697 = vst.msk [vmem:[#allocation6 + $0xb8] sm:$0xff] %vm563_vm0, %v4665_v30 }
 0x509   : > { %v4728_v24 = vld [vmem:[#allocation6 + $0xb0] ss:$2 sm:$0xff]  ;;  %v4760_v53 = vld [vmem:[#allocation6 + $0xb1] ss:$2 sm:$0xff]  ;;  %v4603_v5 = vpop.f32.mrb[48].mxu1 }
 0x50a   : > { %v4780_v25 = vmax.f32 %v4728_v24, %v4760_v53  ;;  %v4604_v62 = vadd.f32 %v14566_v18, %v4603_v5  ;;  %v4605_v42 = vpop.f32.mrb[49].mxu1 }
 0x50c   : > { %4796 = vst.msk [vmem:[#allocation7 + $0x58] sm:$0xff] %vm563_vm0, %v4780_v25  ;;  %v4666_v7 = vmax.f32 %v4604_v62, 0.0 }
 0x50e   : > { %4698 = vst.msk [vmem:[#allocation6 + $0xc0] sm:$0xff] %vm563_vm0, %v4666_v7 }
 0x513   : > { %v4815_v10 = vld [vmem:[#allocation7 + $0x58] sm:$0xff] }
 0x514   : > { %v4823_v32 = vmax.f32 %v4806_v14, %v4815_v10 }
 0x516   : > { %4832 = vst.msk [vmem:[#allocation3 + $0x61] sm:$0xff] %vm563_vm0, %v4823_v32 }
 0x519   : > { %v4608_v52 = vpop.f32.mrb[50].mxu1 }
 0x51a   : > { %v4609_v9 = vadd.f32 %v14566_v18, %v4608_v52  ;;  %v4610_v47 = vpop.f32.mrb[51].mxu1 }
 0x51c   : > { %v4667_v39 = vmax.f32 %v4609_v9, 0.0 }
 0x51d   : > { %v5096_v48 = vld [vmem:[#allocation3 + $0x60] sm:$0xff] }
 0x51e   : > { %v5048_v35 = vld [vmem:[#allocation3 + $0x62] sm:$0xff]  ;;  %4699 = vst.msk [vmem:[#allocation6 + $0xc8] sm:$0xff] %vm563_vm0, %v4667_v39  ;;  %5116 = vrot.lane.b32.xlu1 %v5096_v48, %s15731_s30  ;;  %4973 = vrot.lane.b32.xlu0 %v5096_v48, %s15707_s22  ;;  %4849 = vst.msk [vmem:[#allocation5 + $0x60] sm:$0xff] %vm563_vm0, %v5096_v48 }
 0x51f   : > { %5200 = vst.msk [vmem:[#allocation5 + $0x48] sm:$0xff] %vm563_vm0, %v5048_v35  ;;  %v5113_v36 = vpop.permute.xlu1 %5112  ;;  %v4970_v11 = vpop.permute.xlu0 %4969  ;;  %v5144_v57 = vld [vmem:[#allocation3 + $0x61] sm:$0xff] }
 0x520   : > { %5134 = vst.msk [vmem:[#allocation5 + $0x20] sm:$0xff] %vm3942_vm3, %v5113_v36 }
 0x521   : > { %4990 = vst.msk [vmem:[#allocation5 + $0x30] sm:$0xff] %vm3363_vm15, %v4970_v11 }
 0x522   : > { %5164 = vrot.lane.b32.xlu1 %v5144_v57, %s15732_s23  ;;  %5021 = vrot.lane.b32.xlu0 %v5144_v57, %s15709_s0 }
 0x523   : > { %v5161_v6 = vpop.permute.xlu1 %5160  ;;  %v5018_v15 = vpop.permute.xlu0 %5017 }
 0x524   : > { %5182 = vst.msk [vmem:[#allocation5 + $0x20] sm:$0xff] %vm4135_vm4, %v5161_v6 }
 0x525   : > { %v4730_v61 = vld [vmem:[#allocation6 + $0xc0] ss:$2 sm:$0xff]  ;;  %v4762_v41 = vld [vmem:[#allocation6 + $0xc1] ss:$2 sm:$0xff]  ;;  %5038 = vst.msk [vmem:[#allocation5 + $0x30] sm:$0xff] %vm3556_vm1, %v5018_v15  ;;  %v4613_v20 = vpop.f32.mrb[52].mxu1 }
 0x526   : > { %v4781_v13 = vmax.f32 %v4730_v61, %v4762_v41  ;;  %4879 = vrot.lane.b32.xlu1 %v5144_v57, %s15703_s1  ;;  %5069 = vrot.lane.b32.xlu0 %v5048_v35, %s15705_s26  ;;  %v4614_v27 = vadd.f32 %v14566_v18, %v4613_v20  ;;  %v4615_v59 = vpop.f32.mrb[53].mxu1  ;;  %v5213_v10 = vld [vmem:[#allocation5 + $0x48] sm:$0xff]  ;;  %v14709_v61 = vld [vmem:[#allocation5 + $0x78] sm:$0xff]  ;;  %v14719_v20 = vld [vmem:[%s15733_s6] ss:$0 sm:$0xff] }
 0x527   : > { %v4876_v23 = vpop.permute.xlu1 %4875  ;;  %v5066_v28 = vpop.permute.xlu0 %5065  ;;  %v5765_v41 = vld [vmem:[#allocation3 + $0x92] sm:$0xff] }
 0x528   : > { %4797 = vst.msk [vmem:[#allocation7 + $0x60] sm:$0xff] %vm563_vm0, %v4781_v13  ;;  %v4668_v29 = vmax.f32 %v4614_v27, 0.0  ;;  %5773 = vst.msk [vmem:[#allocation5 + $0x78] sm:$0xff] %vm563_vm0, %v5765_v41  ;;  %v14714_v13 = vld [vmem:[#allocation3 + $0x90] sm:$0xff] }
 0x529   : > { %4895 = vst.msk [vmem:[#allocation5 + $0x40] sm:$0xff] %vm2977_vm13, %v4876_v23  ;;  %v14724_v23 = vld [vmem:[#allocation3 + $0x91] sm:$0xff] }
 0x52a   : > { %5086 = vst.msk [vmem:[#allocation5 + $0x30] sm:$0xff] %vm3749_vm2, %v5066_v28  ;;  %4927 = vrot.lane.b32.xlu1 %v5048_v35, %s15730_s27  ;;  %v5422_v28 = vld [vmem:[#allocation3 + $0x1] sm:$0xff] }
 0x52b   : > { %4700 = vst.msk [vmem:[#allocation6 + $0xd0] sm:$0xff] %vm563_vm0, %v4668_v29  ;;  %v4924_v8 = vpop.permute.xlu1 %4923  ;;  %v5208_v22 = vld [vmem:[#allocation5 + $0x20] sm:$0xff] }
 0x52c   : > { %4943 = vst.msk [vmem:[#allocation5 + $0x40] sm:$0xff] %vm3170_vm14, %v4924_v8  ;;  %5344 = vmatmul.mubr.f32.gmra.mrb[36].mxu0 %v5208_v22 }
 0x52d   : > { %10865 = vmatprep.mubr.msk.f32.mxu0 %vm563_vm0, %v5211_v26 }
 0x52f   : > { %v4807_v37 = vld [vmem:[#allocation7 + $0x60] sm:$0xff] }
 0x535   : > { %v4618_v16 = vpop.f32.mrb[54].mxu1 }
 0x536   : > { %v4619_v17 = vadd.f32 %v14566_v18, %v4618_v16  ;;  %v4620_v33 = vpop.f32.mrb[55].mxu1 }
 0x538   : > { %v4669_v40 = vmax.f32 %v4619_v17, 0.0  ;;  %v5470_v17 = vld [vmem:[#allocation3 + $0x2] sm:$0xff] }
 0x53a   : > { %4701 = vst.msk [vmem:[#allocation6 + $0xd8] sm:$0xff] %vm563_vm0, %v4669_v40 }
 0x541   : > { %v4732_v58 = vld [vmem:[#allocation6 + $0xd0] ss:$2 sm:$0xff]  ;;  %v4764_v55 = vld [vmem:[#allocation6 + $0xd1] ss:$2 sm:$0xff]  ;;  %v4623_v56 = vpop.f32.mrb[56].mxu1 }
 0x542   : > { %v4782_v51 = vmax.f32 %v4732_v58, %v4764_v55  ;;  %v4624_v63 = vadd.f32 %v14566_v18, %v4623_v56  ;;  %v4625_v31 = vpop.f32.mrb[57].mxu1  ;;  %v5791_v56 = vld [vmem:[%s15681_s7 + $0x8] sm:$0xff] }
 0x544   : > { %4798 = vst.msk [vmem:[#allocation7 + $0x68] sm:$0xff] %vm563_vm0, %v4782_v51  ;;  %v4670_v19 = vmax.f32 %v4624_v63, 0.0  ;;  %v5790_v51 = vld [vmem:[%s15681_s7] sm:$0xff] }
 0x545   : > { %v11383_v63 = vpack.c.bf16 %v5791_v56, %v5790_v51 }
 0x546   : > { %4702 = vst.msk [vmem:[#allocation6 + $0xe0] sm:$0xff] %vm563_vm0, %v4670_v19 }
 0x547   : > { %11384 = vmatpush1.bf16.msra.mxu0 %v11383_v63 }
 0x548   : > { %11385 = vmatprep.subr.bf16.mxu0 %v11994_v43 }
 0x54b   : > { %v4816_v34 = vld [vmem:[#allocation7 + $0x68] sm:$0xff] }
 0x54c   : > { %v4824_v45 = vmax.f32 %v4807_v37, %v4816_v34  ;;  %v5792_v37 = vld [vmem:[%s15681_s7 + $0x10] sm:$0xff]  ;;  %v5793_v34 = vld [vmem:[%s15681_s7 + $0x18] sm:$0xff] }
 0x54e   : > { %4833 = vst.msk [vmem:[#allocation3 + $0x71] sm:$0xff] %vm563_vm0, %v4824_v45 }
 0x551   : > { %v4628_v46 = vpop.f32.mrb[58].mxu1 }
 0x552   : > { %v4629_v21 = vadd.f32 %v14566_v18, %v4628_v46  ;;  %v4630_v1 = vpop.f32.mrb[59].mxu1 }
 0x553   : > { %v11386_v1 = vpack.c.bf16 %v5793_v34, %v5792_v37 }
 0x554   : > { %v4671_v44 = vmax.f32 %v4629_v21, 0.0 }
 0x555   : > { %v4953_v12 = vld [vmem:[#allocation3 + $0x70] sm:$0xff]  ;;  %11387 = vmatpush1.bf16.msra.mxu0 %v11386_v1 }
 0x556   : > { %v5049_v54 = vld [vmem:[#allocation3 + $0x72] sm:$0xff]  ;;  %4703 = vst.msk [vmem:[#allocation6 + $0xe8] sm:$0xff] %vm563_vm0, %v4671_v44  ;;  %4975 = vrot.lane.b32.xlu1 %v4953_v12, %s15707_s22  ;;  %5118 = vrot.lane.b32.xlu0 %v4953_v12, %s15731_s30  ;;  %4850 = vst.msk [vmem:[#allocation5 + $0x70] sm:$0xff] %vm563_vm0, %v4953_v12 }
 0x557   : > { %5201 = vst.msk [vmem:[#allocation5 + $0x58] sm:$0xff] %vm563_vm0, %v5049_v54  ;;  %v5001_v4 = vld [vmem:[#allocation3 + $0x71] sm:$0xff]  ;;  %11388 = vmatprep.subr.bf16.mxu0 %v11994_v43 }
 0x558   : > { %v4972_v2 = vpop.permute.xlu1 %4971  ;;  %v5115_v3 = vpop.permute.xlu0 %5114  ;;  %v5794_v12 = vld [vmem:[%s15681_s7 + $0x20] sm:$0xff] }
 0x559   : > { %4991 = vst.msk [vmem:[#allocation5 + $0x40] sm:$0xff] %vm3363_vm15, %v4972_v2 }
 0x55a   : > { %5135 = vst.msk [vmem:[#allocation5 + $0x30] sm:$0xff] %vm3942_vm3, %v5115_v3  ;;  %5023 = vrot.lane.b32.xlu1 %v5001_v4, %s15709_s0  ;;  %5166 = vrot.lane.b32.xlu0 %v5001_v4, %s15732_s23  ;;  %v5796_v3 = vld [vmem:[%s15681_s7 + $0x30] sm:$0xff] }
 0x55c   : > { %v5020_v38 = vpop.permute.xlu1 %5019  ;;  %v5163_v49 = vpop.permute.xlu0 %5162 }
 0x55d   : > { %v4734_v50 = vld [vmem:[#allocation6 + $0xe0] ss:$2 sm:$0xff]  ;;  %v4766_v60 = vld [vmem:[#allocation6 + $0xe1] ss:$2 sm:$0xff]  ;;  %5039 = vst.msk [vmem:[#allocation5 + $0x40] sm:$0xff] %vm3556_vm1, %v5020_v38  ;;  %v4633_v24 = vpop.f32.mrb[60].mxu1 }
 0x55e   : > { %5183 = vst.msk [vmem:[#allocation5 + $0x30] sm:$0xff] %vm4135_vm4, %v5163_v49  ;;  %v4783_v30 = vmax.f32 %v4734_v50, %v4766_v60  ;;  %5071 = vrot.lane.b32.xlu1 %v5049_v54, %s15705_s26  ;;  %4881 = vrot.lane.b32.xlu0 %v5001_v4, %s15703_s1  ;;  %v4634_v53 = vadd.f32 %v14566_v18, %v4633_v24  ;;  %v4635_v25 = vpop.f32.mrb[61].mxu1  ;;  %v5215_v21 = vld [vmem:[#allocation5 + $0x58] sm:$0xff]  ;;  %v5798_v38 = vld [vmem:[%s15681_s7 + $0x40] sm:$0xff]  ;;  %v5799_v50 = vld [vmem:[%s15681_s7 + $0x48] sm:$0xff] }
 0x55f   : > { %v5797_v4 = vld [vmem:[%s15681_s7 + $0x38] sm:$0xff]  ;;  %v11395_v60 = vpack.c.bf16 %v5799_v50, %v5798_v38 }
 0x560   : > { %4799 = vst.msk [vmem:[#allocation7 + $0x70] sm:$0xff] %vm563_vm0, %v4783_v30  ;;  %v5068_v5 = vpop.permute.xlu1 %5067  ;;  %v4878_v62 = vpop.permute.xlu0 %4877  ;;  %v4672_v42 = vmax.f32 %v4634_v53, 0.0  ;;  %v11392_v49 = vpack.c.bf16 %v5797_v4, %v5796_v3  ;;  %v5800_v30 = vld [vmem:[%s15681_s7 + $0x50] sm:$0xff]  ;;  %v5801_v24 = vld [vmem:[%s15681_s7 + $0x58] sm:$0xff] }
 0x561   : > { %5087 = vst.msk [vmem:[#allocation5 + $0x40] sm:$0xff] %vm3749_vm2, %v5068_v5  ;;  %v11398_v53 = vpack.c.bf16 %v5801_v24, %v5800_v30 }
 0x562   : > { %4896 = vst.msk [vmem:[#allocation5 + $0x50] sm:$0xff] %vm2977_vm13, %v4878_v62  ;;  %4929 = vrot.lane.b32.xlu0 %v5049_v54, %s15730_s27  ;;  %v5795_v54 = vld [vmem:[%s15681_s7 + $0x28] sm:$0xff] }
 0x563   : > { %4704 = vst.msk [vmem:[#allocation6 + $0xf0] sm:$0xff] %vm563_vm0, %v4672_v42  ;;  %v11389_v2 = vpack.c.bf16 %v5795_v54, %v5794_v12 }
 0x564   : > { %v4926_v7 = vpop.permute.xlu0 %4925 }
 0x565   : > { %v5210_v14 = vld [vmem:[#allocation5 + $0x30] sm:$0xff]  ;;  %4944 = vst.msk [vmem:[#allocation5 + $0x50] sm:$0xff] %vm3170_vm14, %v4926_v7  ;;  %v4638_v32 = vpop.f32.mrb[62].mxu1  ;;  %11390 = vmatpush1.bf16.msra.mxu0 %v11389_v2 }
 0x566   : > { %5349 = vmatmul.mubr.f32.gmra.mrb[38].mxu0 %v5210_v14  ;;  %v4639_v52 = vadd.f32 %v14566_v18, %v4638_v32  ;;  %v4640_v9 = vpop.f32.mrb[63].mxu1  ;;  %11391 = vmatprep.subr.bf16.mxu0 %v11994_v43  ;;  %v5802_v14 = vld [vmem:[%s15681_s7 + $0x60] sm:$0xff] }
 0x567   : > { %10866 = vmatprep.mubr.msk.f32.mxu0 %vm563_vm0, %v5213_v10  ;;  %v4808_v36 = vld [vmem:[#allocation7 + $0x70] sm:$0xff]  ;;  %v5803_v10 = vld [vmem:[%s15681_s7 + $0x68] sm:$0xff] }
 0x568   : > { %v4673_v47 = vmax.f32 %v4639_v52, 0.0  ;;  %v11401_v32 = vpack.c.bf16 %v5803_v10, %v5802_v14 }
 0x569   : > { %11393 = vmatpush1.bf16.msra.mxu0 %v11392_v49 }
 0x56a   : > { %4705 = vst.msk [vmem:[#allocation6 + $0xf8] sm:$0xff] %vm563_vm0, %v4673_v47  ;;  %11394 = vmatprep.subr.bf16.mxu0 %v11994_v43 }
 0x56d   : > { %11396 = vmatpush1.bf16.msra.mxu0 %v11395_v60 }
 0x56e   : > { %11397 = vmatprep.subr.bf16.mxu0 %v11994_v43 }
 0x571   : > { %v4736_v39 = vld [vmem:[#allocation6 + $0xf0] ss:$2 sm:$0xff]  ;;  %v4768_v48 = vld [vmem:[#allocation6 + $0xf1] ss:$2 sm:$0xff]  ;;  %11399 = vmatpush1.bf16.msra.mxu0 %v11398_v53 }
 0x572   : > { %v4784_v35 = vmax.f32 %v4736_v39, %v4768_v48  ;;  %11400 = vmatprep.subr.bf16.mxu0 %v11994_v43  ;;  %v5804_v48 = vld [vmem:[%s15681_s7 + $0x70] sm:$0xff] }
 0x574   : > { %4800 = vst.msk [vmem:[#allocation7 + $0x78] sm:$0xff] %vm563_vm0, %v4784_v35  ;;  %v5805_v35 = vld [vmem:[%s15681_s7 + $0x78] sm:$0xff] }
 0x575   : > { %11402 = vmatpush1.bf16.msra.mxu0 %v11401_v32 }
 0x576   : > { %11403 = vmatprep.subr.bf16.mxu0 %v11994_v43 }
 0x57b   : > { %v4817_v11 = vld [vmem:[#allocation7 + $0x78] sm:$0xff] }
 0x57c   : > { %v4825_v57 = vmax.f32 %v4808_v36, %v4817_v11  ;;  %v11404_v36 = vpack.c.bf16 %v5805_v35, %v5804_v48 }
 0x57e   : > { %4834 = vst.msk [vmem:[#allocation3 + $0x81] sm:$0xff] %vm563_vm0, %v4825_v57  ;;  %11405 = vmatpush1.bf16.msra.mxu0 %v11404_v36 }
 0x57f   : > { %11406 = vmatprep.subr.bf16.mxu0 %v11994_v43 }
 0x585   : > { %v5098_v6 = vld [vmem:[#allocation3 + $0x80] sm:$0xff] }
 0x586   : > { %v5050_v15 = vld [vmem:[#allocation3 + $0x82] sm:$0xff]  ;;  %5120 = vrot.lane.b32.xlu1 %v5098_v6, %s15731_s30  ;;  %4977 = vrot.lane.b32.xlu0 %v5098_v6, %s15707_s22  ;;  %s15736_s22 = smov 16   ;;  %v5806_v6 = vld [vmem:[%s15681_s7 + $0x80] sm:$0xff] }
 0x587   : > { %5202 = vst.msk [vmem:[#allocation5 + $0x68] sm:$0xff] %vm563_vm0, %v5050_v15  ;;  %v5146_v18 = vld [vmem:[#allocation3 + $0x81] sm:$0xff] }
 0x58a   : > { %5168 = vrot.lane.b32.xlu1 %v5146_v18, %s15732_s23  ;;  %5025 = vrot.lane.b32.xlu0 %v5146_v18, %s15709_s0 }
 0x58e   : > { %5073 = vrot.lane.b32.xlu1 %v5050_v15, %s15705_s26  ;;  %5122 = vrot.lane.b32.xlu0 %v14714_v13, %s15731_s30  ;;  %v5807_v15 = vld [vmem:[%s15681_s7 + $0x88] sm:$0xff] }
 0x58f   : > { %v11407_v18 = vpack.c.bf16 %v5807_v15, %v5806_v6 }
 0x590   : > { %v5117_v27 = vpop.permute.xlu1 %5116  ;;  %v5335_v59 = vpop.f32.mrb[32].mxu0 }
 0x591   : > { %5136 = vst.msk [vmem:[#allocation5 + $0x40] sm:$0xff] %vm3942_vm3, %v5117_v27  ;;  %v5336_v29 = vadd.f32 %v14719_v20, %v5335_v59  ;;  %v4974_v8 = vpop.permute.xlu0 %4973  ;;  %v5337_v22 = vpop.f32.mrb[33].mxu0  ;;  %v5217_v59 = vld [vmem:[#allocation5 + $0x68] sm:$0xff]  ;;  %11408 = vmatpush1.bf16.msra.mxu0 %v11407_v18 }
 0x592   : > { %4992 = vst.msk [vmem:[#allocation5 + $0x50] sm:$0xff] %vm3363_vm15, %v4974_v8  ;;  %5170 = vrot.lane.b32.xlu1 %v14724_v23, %s15732_s23  ;;  %5438 = vrot.lane.b32.xlu0 %v5422_v28, %s15703_s1  ;;  %s15735_s1 = smov 80  }
 0x593   : > { %vm5374_vm5 = vcmp.gt.f32.partialorder %v5336_v29, 0.0  ;;  %v5382_v26 = vmul.f32 0.01, %v5336_v29  ;;  %11409 = vmatprep.subr.bf16.mxu0 %v11994_v43 }
 0x594   : > { %v5165_v16 = vpop.permute.xlu1 %5164 }
 0x595   : > { %v5390_v33 = vsel %vm5374_vm5, %v5336_v29, %v5382_v26  ;;  %5184 = vst.msk [vmem:[#allocation5 + $0x40] sm:$0xff] %vm4135_vm4, %v5165_v16  ;;  %v5022_v40 = vpop.permute.xlu0 %5021  ;;  %vm639_vm5 = vcmask 128000  }
 0x596   : > { %5398 = vst.msk [vmem:[#allocation3 + $0x11] sm:$0xff] %vm563_vm0, %v5390_v33  ;;  %5486 = vrot.lane.b32.xlu1 %v5470_v17, %s15730_s27 }
 0x597   : > { %5040 = vst.msk [vmem:[#allocation5 + $0x50] sm:$0xff] %vm3556_vm1, %v5022_v40 }
 0x598   : > { %v4880_v58 = vpop.permute.xlu1 %4879  ;;  %640 = vst.msk [vmem:[#allocation4] sm:$0x3f] %vm639_vm5, %v11985_v0  ;;  %641 = vst.msk [vmem:[#allocation4 + $0x8] sm:$0x3f] %vm639_vm5, %v11985_v0 }
 0x599   : > { %4897 = vst.msk [vmem:[#allocation5 + $0x60] sm:$0xff] %vm2977_vm13, %v4880_v58  ;;  %v5070_v55 = vpop.permute.xlu0 %5069 }
 0x59a   : > { %5088 = vst.msk [vmem:[#allocation5 + $0x50] sm:$0xff] %vm3749_vm2, %v5070_v55 }
 0x59b   : > { %642 = vst.msk [vmem:[#allocation4 + $0x10] sm:$0x3f] %vm639_vm5, %v11985_v0  ;;  %643 = vst.msk [vmem:[#allocation4 + $0x18] sm:$0x3f] %vm639_vm5, %v11985_v0 }
 0x59c   : > { %v4928_v31 = vpop.permute.xlu1 %4927  ;;  %v5212_v19 = vld [vmem:[#allocation5 + $0x40] sm:$0xff]  ;;  %644 = vst.msk [vmem:[#allocation4 + $0x20] sm:$0x3f] %vm639_vm5, %v11985_v0  ;;  %645 = vst.msk [vmem:[#allocation4 + $0x28] sm:$0x3f] %vm639_vm5, %v11985_v0 }
 0x59d   : > { %4945 = vst.msk [vmem:[#allocation5 + $0x60] sm:$0xff] %vm3170_vm14, %v4928_v31  ;;  %5354 = vmatmul.mubr.f32.gmra.mrb[40].mxu0 %v5212_v19  ;;  %v5566_v45 = vld [vmem:[#allocation3 + $0x11] sm:$0xff] }
 0x59e   : > { %v5518_v46 = vld [vmem:[#allocation3 + $0x10] sm:$0xff]  ;;  %5582 = vrot.lane.b32.xlu1 %v5566_v45, %s15709_s0  ;;  %10867 = vmatprep.mubr.msk.f32.mxu0 %vm563_vm0, %v5215_v21 }
 0x59f   : > { %5534 = vrot.lane.b32.xlu0 %v5518_v46, %s15734_s18  ;;  %5415 = vst.msk [vmem:[#allocation5 + $0x10] sm:$0xff] %vm563_vm0, %v5518_v46  ;;  %v5614_v44 = vld [vmem:[#allocation3 + $0x12] sm:$0xff] }
 0x5a2   : > { %5630 = vrot.lane.b32.xlu1 %v5614_v44, %s15735_s1 }
 0x5a3   : > { %5440 = vrot.lane.b32.xlu0 %v5566_v45, %s15736_s22 }
 0x5a7   : > { %5488 = vrot.lane.b32.xlu0 %v5614_v44, %s15730_s27 }
 0x5c8   : > { %v4976_v25 = vpop.permute.xlu1 %4975  ;;  %v5119_v5 = vpop.permute.xlu0 %5118 }
 0x5c9   : > { %4993 = vst.msk [vmem:[#allocation5 + $0x60] sm:$0xff] %vm3363_vm15, %v4976_v25  ;;  %v5340_v62 = vpop.f32.mrb[34].mxu0 }
 0x5ca   : > { %5137 = vst.msk [vmem:[#allocation5 + $0x50] sm:$0xff] %vm3942_vm3, %v5119_v5  ;;  %v5341_v42 = vadd.f32 %v14719_v20, %v5340_v62  ;;  %v5342_v7 = vpop.f32.mrb[35].mxu0 }
 0x5cc   : > { %vm5375_vm6 = vcmp.gt.f32.partialorder %v5341_v42, 0.0  ;;  %v5383_v52 = vmul.f32 0.01, %v5341_v42  ;;  %v5024_v9 = vpop.permute.xlu1 %5023  ;;  %v5167_v47 = vpop.permute.xlu0 %5166 }
 0x5cd   : > { %5041 = vst.msk [vmem:[#allocation5 + $0x60] sm:$0xff] %vm3556_vm1, %v5024_v9 }
 0x5ce   : > { %5185 = vst.msk [vmem:[#allocation5 + $0x50] sm:$0xff] %vm4135_vm4, %v5167_v47  ;;  %v5391_v39 = vsel %vm5375_vm6, %v5341_v42, %v5383_v52  ;;  %vm5984_vm6 = vcmask 125952  }
 0x5cf   : > { %5399 = vst.msk [vmem:[#allocation3 + $0x21] sm:$0xff] %vm563_vm0, %v5391_v39 }
 0x5d0   : > { %v5072_v11 = vpop.permute.xlu1 %5071  ;;  %v4882_v57 = vpop.permute.xlu0 %4881 }
 0x5d1   : > { %5089 = vst.msk [vmem:[#allocation5 + $0x60] sm:$0xff] %vm3749_vm2, %v5072_v11 }
 0x5d2   : > { %4898 = vst.msk [vmem:[#allocation5 + $0x70] sm:$0xff] %vm2977_vm13, %v4882_v57 }
 0x5d4   : > { %v4930_v41 = vpop.permute.xlu0 %4929 }
 0x5d5   : > { %v5214_v27 = vld [vmem:[#allocation5 + $0x50] sm:$0xff]  ;;  %4946 = vst.msk [vmem:[#allocation5 + $0x70] sm:$0xff] %vm3170_vm14, %v4930_v41 }
 0x5d6   : > { %5359 = vmatmul.mubr.f32.gmra.mrb[42].mxu0 %v5214_v27  ;;  %v5662_v28 = vld [vmem:[#allocation3 + $0x20] sm:$0xff] }
 0x5d7   : > { %10868 = vmatprep.mubr.msk.f32.mxu0 %vm563_vm0, %v5217_v59  ;;  %v5615_v29 = vld [vmem:[#allocation3 + $0x22] sm:$0xff]  ;;  %5678 = vrot.lane.b32.xlu1 %v5662_v28, %s15731_s30  ;;  %5416 = vst.msk [vmem:[#allocation5 + $0x20] sm:$0xff] %vm563_vm0, %v5662_v28 }
 0x5d8   : > { %5536 = vrot.lane.b32.xlu0 %v5662_v28, %s15734_s18  ;;  %5766 = vst.msk [vmem:[#allocation5 + $0x8] sm:$0xff] %vm563_vm0, %v5615_v29  ;;  %v5710_v8 = vld [vmem:[#allocation3 + $0x21] sm:$0xff] }
 0x5db   : > { %5726 = vrot.lane.b32.xlu1 %v5710_v8, %s15732_s23 }
 0x5dc   : > { %5584 = vrot.lane.b32.xlu0 %v5710_v8, %s15737_s5 }
 0x5df   : > { %5442 = vrot.lane.b32.xlu1 %v5710_v8, %s15736_s22  ;;  %v5775_v21 = vld [vmem:[#allocation5 + $0x8] sm:$0xff] }
 0x5e0   : > { %5632 = vrot.lane.b32.xlu0 %v5615_v29, %s15735_s1 }
 0x5e3   : > { %5490 = vrot.lane.b32.xlu1 %v5615_v29, %s15730_s27 }
 0x5f8   : > { %v5121_v22 = vpop.permute.xlu1 %5120  ;;  %v4978_v26 = vpop.permute.xlu0 %4977 }
 0x5f9   : > { %5138 = vst.msk [vmem:[#allocation5 + $0x60] sm:$0xff] %vm3942_vm3, %v5121_v22 }
 0x5fa   : > { %4994 = vst.msk [vmem:[#allocation5 + $0x70] sm:$0xff] %vm3363_vm15, %v4978_v26 }
 0x5fc   : > { %v5169_v16 = vpop.permute.xlu1 %5168  ;;  %v5026_v17 = vpop.permute.xlu0 %5025 }
 0x5fd   : > { %5186 = vst.msk [vmem:[#allocation5 + $0x60] sm:$0xff] %vm4135_vm4, %v5169_v16 }
 0x5fe   : > { %5042 = vst.msk [vmem:[#allocation5 + $0x70] sm:$0xff] %vm3556_vm1, %v5026_v17 }
 0x5ff   : > { %v5345_v33 = vpop.f32.mrb[36].mxu0 }
 0x600   : > { %v5346_v40 = vadd.f32 %v14719_v20, %v5345_v33  ;;  %v5074_v58 = vpop.permute.xlu1 %5073  ;;  %v5347_v55 = vpop.f32.mrb[37].mxu0 }
 0x601   : > { %5090 = vst.msk [vmem:[#allocation5 + $0x70] sm:$0xff] %vm3749_vm2, %v5074_v58  ;;  %v5123_v51 = vpop.permute.xlu0 %5122 }
 0x602   : > { %vm5376_vm7 = vcmp.gt.f32.partialorder %v5346_v40, 0.0  ;;  %v5384_v56 = vmul.f32 0.01, %v5346_v40  ;;  %5139 = vst.msk [vmem:[#allocation5 + $0x70] sm:$0xff] %vm3942_vm3, %v5123_v51 }
 0x604   : > { %v5392_v63 = vsel %vm5376_vm7, %v5346_v40, %v5384_v56  ;;  %v5171_v31 = vpop.permute.xlu1 %5170  ;;  %v5216_v19 = vld [vmem:[#allocation5 + $0x60] sm:$0xff] }
 0x605   : > { %5400 = vst.msk [vmem:[#allocation3 + $0x31] sm:$0xff] %vm563_vm0, %v5392_v63  ;;  %5364 = vmatmul.mubr.f32.gmra.mrb[44].mxu0 %v5216_v19  ;;  %v5439_v37 = vpop.permute.xlu0 %5438 }
 0x606   : > { %5187 = vst.msk [vmem:[#allocation5 + $0x70] sm:$0xff] %vm4135_vm4, %v5171_v31  ;;  %10869 = vmatprep.mubr.msk.f32.mxu0 %vm563_vm0, %v14709_v61 }
 0x607   : > { %5462 = vst.msk [vmem:[#allocation5] sm:$0xff] %vm2977_vm13, %v5439_v37 }
 0x608   : > { %v5487_v34 = vpop.permute.xlu1 %5486 }
 0x609   : > { %5510 = vst.msk [vmem:[#allocation5] sm:$0xff] %vm3170_vm14, %v5487_v34 }
 0x60c   : > { %v5663_v46 = vld [vmem:[#allocation3 + $0x30] sm:$0xff] }
 0x60d   : > { %v5218_v45 = vld [vmem:[#allocation5 + $0x70] sm:$0xff]  ;;  %5680 = vrot.lane.b32.xlu0 %v5663_v46, %s15731_s30  ;;  %v5616_v1 = vld [vmem:[#allocation3 + $0x32] sm:$0xff]  ;;  %5417 = vst.msk [vmem:[#allocation5 + $0x30] sm:$0xff] %vm563_vm0, %v5663_v46  ;;  %5538 = vrot.lane.b32.xlu1 %v5663_v46, %s15734_s18 }
 0x60e   : > { %5369 = vmatmul.mubr.f32.gmra.mrb[46].mxu0 %v5218_v45  ;;  %5767 = vst.msk [vmem:[#allocation5 + $0x18] sm:$0xff] %vm563_vm0, %v5616_v1  ;;  %v5711_v12 = vld [vmem:[#allocation3 + $0x31] sm:$0xff] }
 0x60f   : > { %10871 = vmatprep.mubr.msk.f32.mxu0 %vm563_vm0, %v5775_v21 }
 0x610   : > { %v5583_v44 = vpop.permute.xlu1 %5582 }
 0x611   : > { %v5535_v61 = vpop.permute.xlu0 %5534  ;;  %5728 = vrot.lane.b32.xlu0 %v5711_v12, %s15732_s23  ;;  %5586 = vrot.lane.b32.xlu1 %v5711_v12, %s15737_s5 }
 0x612   : > { %5558 = vst.msk [vmem:[#allocation5] sm:$0xff] %vm3363_vm15, %v5535_v61 }
 0x613   : > { %5606 = vst.msk [vmem:[#allocation5] sm:$0xff] %vm3556_vm1, %v5583_v44 }
 0x614   : > { %v5631_v54 = vpop.permute.xlu1 %5630 }
 0x615   : > { %v5441_v2 = vpop.permute.xlu0 %5440  ;;  %5654 = vst.msk [vmem:[#allocation5] sm:$0xff] %vm3749_vm2, %v5631_v54  ;;  %5444 = vrot.lane.b32.xlu0 %v5711_v12, %s15736_s22  ;;  %5634 = vrot.lane.b32.xlu1 %v5616_v1, %s15735_s1  ;;  %v5777_v52 = vld [vmem:[#allocation5 + $0x18] sm:$0xff] }
 0x616   : > { %5463 = vst.msk [vmem:[#allocation5 + $0x10] sm:$0xff] %vm2977_vm13, %v5441_v2 }
 0x619   : > { %v5489_v3 = vpop.permute.xlu0 %5488  ;;  %5492 = vrot.lane.b32.xlu0 %v5616_v1, %s15730_s27 }
 0x61a   : > { %5511 = vst.msk [vmem:[#allocation5 + $0x10] sm:$0xff] %vm3170_vm14, %v5489_v3 }
 0x639   : > { %v5350_v4 = vpop.f32.mrb[38].mxu0 }
 0x63a   : > { %v5351_v38 = vadd.f32 %v14719_v20, %v5350_v4  ;;  %v5352_v49 = vpop.f32.mrb[39].mxu0 }
 0x63c   : > { %vm5377_vm8 = vcmp.gt.f32.partialorder %v5351_v38, 0.0  ;;  %v5385_v50 = vmul.f32 0.01, %v5351_v38 }
 0x63e   : > { %v5393_v60 = vsel %vm5377_vm8, %v5351_v38, %v5385_v50 }
 0x63f   : > { %5401 = vst.msk [vmem:[#allocation3 + $0x41] sm:$0xff] %vm563_vm0, %v5393_v60 }
 0x646   : > { %v5521_v30 = vld [vmem:[#allocation3 + $0x40] sm:$0xff] }
 0x647   : > { %v5617_v24 = vld [vmem:[#allocation3 + $0x42] sm:$0xff]  ;;  %5540 = vrot.lane.b32.xlu0 %v5521_v30, %s15734_s18  ;;  %5682 = vrot.lane.b32.xlu1 %v5521_v30, %s15731_s30  ;;  %5418 = vst.msk [vmem:[#allocation5 + $0x40] sm:$0xff] %vm563_vm0, %v5521_v30 }
 0x648   : > { %5768 = vst.msk [vmem:[#allocation5 + $0x28] sm:$0xff] %vm563_vm0, %v5617_v24  ;;  %v5569_v5 = vld [vmem:[#allocation3 + $0x41] sm:$0xff] }
 0x649   : > { %v5679_v53 = vpop.permute.xlu1 %5678 }
 0x64a   : > { %v5537_v25 = vpop.permute.xlu0 %5536  ;;  %5702 = vst.msk [vmem:[#allocation5] sm:$0xff] %vm3942_vm3, %v5679_v53 }
 0x64b   : > { %5559 = vst.msk [vmem:[#allocation5 + $0x10] sm:$0xff] %vm3363_vm15, %v5537_v25  ;;  %5588 = vrot.lane.b32.xlu0 %v5569_v5, %s15737_s5  ;;  %5730 = vrot.lane.b32.xlu1 %v5569_v5, %s15732_s23 }
 0x64d   : > { %v5727_v62 = vpop.permute.xlu1 %5726 }
 0x64e   : > { %v5585_v42 = vpop.permute.xlu0 %5584  ;;  %5750 = vst.msk [vmem:[#allocation5] sm:$0xff] %vm4135_vm4, %v5727_v62 }
 0x64f   : > { %5607 = vst.msk [vmem:[#allocation5 + $0x10] sm:$0xff] %vm3556_vm1, %v5585_v42  ;;  %5636 = vrot.lane.b32.xlu0 %v5617_v24, %s15735_s1  ;;  %5446 = vrot.lane.b32.xlu1 %v5569_v5, %s15736_s22  ;;  %v5779_v8 = vld [vmem:[#allocation5 + $0x28] sm:$0xff] }
 0x651   : > { %v5443_v14 = vpop.permute.xlu1 %5442 }
 0x652   : > { %v5633_v7 = vpop.permute.xlu0 %5632  ;;  %5464 = vst.msk [vmem:[#allocation5 + $0x20] sm:$0xff] %vm2977_vm13, %v5443_v14 }
 0x653   : > { %5655 = vst.msk [vmem:[#allocation5 + $0x10] sm:$0xff] %vm3749_vm2, %v5633_v7  ;;  %5494 = vrot.lane.b32.xlu1 %v5617_v24, %s15730_s27 }
 0x655   : > { %v5491_v10 = vpop.permute.xlu1 %5490  ;;  %v5774_v32 = vld [vmem:[#allocation5] sm:$0xff] }
 0x656   : > { %5512 = vst.msk [vmem:[#allocation5 + $0x20] sm:$0xff] %vm3170_vm14, %v5491_v10  ;;  %5904 = vmatmul.mubr.f32.vlgmr.msra.gmra.mrb[48].mxu0 %v5774_v32 }
 0x657   : > { %10872 = vmatprep.mubr.msk.f32.mxu0 %vm563_vm0, %v5777_v52  ;;  %v14953_v52 = vld [vmem:[%s15682_s8] ss:$0 sm:$0xff] }
 0x670   : > { %v5355_v9 = vpop.f32.mrb[40].mxu0 }
 0x671   : > { %v5356_v47 = vadd.f32 %v14719_v20, %v5355_v9  ;;  %v5357_v39 = vpop.f32.mrb[41].mxu0 }
 0x673   : > { %vm5378_vm9 = vcmp.gt.f32.partialorder %v5356_v47, 0.0  ;;  %v5386_v48 = vmul.f32 0.01, %v5356_v47 }
 0x675   : > { %v5394_v35 = vsel %vm5378_vm9, %v5356_v47, %v5386_v48 }
 0x676   : > { %5402 = vst.msk [vmem:[#allocation3 + $0x51] sm:$0xff] %vm563_vm0, %v5394_v35 }
 0x67d   : > { %v5665_v36 = vld [vmem:[#allocation3 + $0x50] sm:$0xff] }
 0x67e   : > { %v5618_v11 = vld [vmem:[#allocation3 + $0x52] sm:$0xff]  ;;  %5684 = vrot.lane.b32.xlu0 %v5665_v36, %s15731_s30  ;;  %5542 = vrot.lane.b32.xlu1 %v5665_v36, %s15734_s18  ;;  %5419 = vst.msk [vmem:[#allocation5 + $0x50] sm:$0xff] %vm563_vm0, %v5665_v36 }
 0x67f   : > { %5769 = vst.msk [vmem:[#allocation5 + $0x38] sm:$0xff] %vm563_vm0, %v5618_v11  ;;  %v5681_v57 = vpop.permute.xlu0 %5680  ;;  %v5539_v6 = vpop.permute.xlu1 %5538  ;;  %v5713_v15 = vld [vmem:[#allocation3 + $0x51] sm:$0xff] }
 0x680   : > { %5703 = vst.msk [vmem:[#allocation5 + $0x10] sm:$0xff] %vm3942_vm3, %v5681_v57 }
 0x681   : > { %5560 = vst.msk [vmem:[#allocation5 + $0x20] sm:$0xff] %vm3363_vm15, %v5539_v6 }
 0x682   : > { %5732 = vrot.lane.b32.xlu0 %v5713_v15, %s15732_s23  ;;  %5590 = vrot.lane.b32.xlu1 %v5713_v15, %s15737_s5 }
 0x683   : > { %v5729_v18 = vpop.permute.xlu0 %5728  ;;  %v5587_v41 = vpop.permute.xlu1 %5586 }
 0x684   : > { %5751 = vst.msk [vmem:[#allocation5 + $0x10] sm:$0xff] %vm4135_vm4, %v5729_v18 }
 0x685   : > { %5608 = vst.msk [vmem:[#allocation5 + $0x20] sm:$0xff] %vm3556_vm1, %v5587_v41 }
 0x686   : > { %5448 = vrot.lane.b32.xlu0 %v5713_v15, %s15736_s22  ;;  %5638 = vrot.lane.b32.xlu1 %v5618_v11, %s15735_s1  ;;  %v5781_v46 = vld [vmem:[#allocation5 + $0x38] sm:$0xff] }
 0x687   : > { %v5445_v27 = vpop.permute.xlu0 %5444  ;;  %v5635_v59 = vpop.permute.xlu1 %5634 }
 0x688   : > { %5465 = vst.msk [vmem:[#allocation5 + $0x30] sm:$0xff] %vm2977_vm13, %v5445_v27 }
 0x689   : > { %5656 = vst.msk [vmem:[#allocation5 + $0x20] sm:$0xff] %vm3749_vm2, %v5635_v59 }
 0x68a   : > { %5496 = vrot.lane.b32.xlu0 %v5618_v11, %s15730_s27 }
 0x68b   : > { %v5493_v28 = vpop.permute.xlu0 %5492  ;;  %v5776_v29 = vld [vmem:[#allocation5 + $0x10] sm:$0xff] }
 0x68c   : > { %5513 = vst.msk [vmem:[#allocation5 + $0x30] sm:$0xff] %vm3170_vm14, %v5493_v28  ;;  %5909 = vmatmul.mubr.f32.gmra.mrb[50].mxu0 %v5776_v29 }
 0x68d   : > { %10873 = vmatprep.mubr.msk.f32.mxu0 %vm563_vm0, %v5779_v8 }
 0x6a9   : > { %v5360_v22 = vpop.f32.mrb[42].mxu0 }
 0x6aa   : > { %v5361_v26 = vadd.f32 %v14719_v20, %v5360_v22  ;;  %v5362_v16 = vpop.f32.mrb[43].mxu0 }
 0x6ac   : > { %vm5379_vm10 = vcmp.gt.f32.partialorder %v5361_v26, 0.0  ;;  %v5387_v17 = vmul.f32 0.01, %v5361_v26 }
 0x6ae   : > { %v5395_v33 = vsel %vm5379_vm10, %v5361_v26, %v5387_v17 }
 0x6af   : > { %5403 = vst.msk [vmem:[#allocation3 + $0x61] sm:$0xff] %vm563_vm0, %v5395_v33 }
 0x6b6   : > { %v5523_v40 = vld [vmem:[#allocation3 + $0x60] sm:$0xff] }
 0x6b7   : > { %v5619_v58 = vld [vmem:[#allocation3 + $0x62] sm:$0xff]  ;;  %5544 = vrot.lane.b32.xlu0 %v5523_v40, %s15734_s18  ;;  %5686 = vrot.lane.b32.xlu1 %v5523_v40, %s15731_s30  ;;  %5420 = vst.msk [vmem:[#allocation5 + $0x60] sm:$0xff] %vm563_vm0, %v5523_v40 }
 0x6b8   : > { %5770 = vst.msk [vmem:[#allocation5 + $0x48] sm:$0xff] %vm563_vm0, %v5619_v58  ;;  %v5571_v56 = vld [vmem:[#allocation3 + $0x61] sm:$0xff] }
 0x6b9   : > { %v5541_v55 = vpop.permute.xlu0 %5540  ;;  %v5683_v51 = vpop.permute.xlu1 %5682 }
 0x6ba   : > { %5561 = vst.msk [vmem:[#allocation5 + $0x30] sm:$0xff] %vm3363_vm15, %v5541_v55 }
 0x6bb   : > { %5704 = vst.msk [vmem:[#allocation5 + $0x20] sm:$0xff] %vm3942_vm3, %v5683_v51  ;;  %5592 = vrot.lane.b32.xlu0 %v5571_v56, %s15737_s5  ;;  %5734 = vrot.lane.b32.xlu1 %v5571_v56, %s15732_s23 }
 0x6bd   : > { %v5589_v63 = vpop.permute.xlu0 %5588  ;;  %v5731_v31 = vpop.permute.xlu1 %5730 }
 0x6be   : > { %5609 = vst.msk [vmem:[#allocation5 + $0x30] sm:$0xff] %vm3556_vm1, %v5589_v63 }
 0x6bf   : > { %5752 = vst.msk [vmem:[#allocation5 + $0x20] sm:$0xff] %vm4135_vm4, %v5731_v31  ;;  %5640 = vrot.lane.b32.xlu0 %v5619_v58, %s15735_s1  ;;  %5450 = vrot.lane.b32.xlu1 %v5571_v56, %s15736_s22  ;;  %v5783_v32 = vld [vmem:[#allocation5 + $0x48] sm:$0xff] }
 0x6c1   : > { %v5637_v19 = vpop.permute.xlu0 %5636  ;;  %v5447_v37 = vpop.permute.xlu1 %5446 }
 0x6c2   : > { %5657 = vst.msk [vmem:[#allocation5 + $0x30] sm:$0xff] %vm3749_vm2, %v5637_v19 }
 0x6c3   : > { %5466 = vst.msk [vmem:[#allocation5 + $0x40] sm:$0xff] %vm2977_vm13, %v5447_v37  ;;  %5498 = vrot.lane.b32.xlu1 %v5619_v58, %s15730_s27 }
 0x6c5   : > { %v5495_v34 = vpop.permute.xlu1 %5494 }
 0x6c6   : > { %v5778_v45 = vld [vmem:[#allocation5 + $0x20] sm:$0xff]  ;;  %5514 = vst.msk [vmem:[#allocation5 + $0x40] sm:$0xff] %vm3170_vm14, %v5495_v34 }
 0x6c7   : > { %5914 = vmatmul.mubr.f32.gmra.mrb[52].mxu0 %v5778_v45 }
 0x6c8   : > { %10874 = vmatprep.mubr.msk.f32.mxu0 %vm563_vm0, %v5781_v46  ;;  %v5789_v46 = vld [vmem:[#allocation5 + $0x78] sm:$0xff] }
 0x6d8   : > { %v5365_v21 = vpop.f32.mrb[44].mxu0 }
 0x6d9   : > { %v5366_v1 = vadd.f32 %v14719_v20, %v5365_v21  ;;  %v5367_v44 = vpop.f32.mrb[45].mxu0 }
 0x6db   : > { %vm5380_vm11 = vcmp.gt.f32.partialorder %v5366_v1, 0.0  ;;  %v5388_v61 = vmul.f32 0.01, %v5366_v1 }
 0x6dd   : > { %v5396_v12 = vsel %vm5380_vm11, %v5366_v1, %v5388_v61 }
 0x6de   : > { %5404 = vst.msk [vmem:[#allocation3 + $0x71] sm:$0xff] %vm563_vm0, %v5396_v12 }
 0x6e1   : > { %v5370_v54 = vpop.f32.mrb[46].mxu0 }
 0x6e2   : > { %v5371_v2 = vadd.f32 %v14719_v20, %v5370_v54  ;;  %v5372_v3 = vpop.f32.mrb[47].mxu0 }
 0x6e4   : > { %vm5381_vm12 = vcmp.gt.f32.partialorder %v5371_v2, 0.0  ;;  %v5389_v4 = vmul.f32 0.01, %v5371_v2 }
 0x6e5   : > { %v5667_v49 = vld [vmem:[#allocation3 + $0x70] sm:$0xff] }
 0x6e6   : > { %v5397_v38 = vsel %vm5381_vm12, %v5371_v2, %v5389_v4  ;;  %v5620_v50 = vld [vmem:[#allocation3 + $0x72] sm:$0xff]  ;;  %5688 = vrot.lane.b32.xlu0 %v5667_v49, %s15731_s30  ;;  %5546 = vrot.lane.b32.xlu1 %v5667_v49, %s15734_s18  ;;  %5421 = vst.msk [vmem:[#allocation5 + $0x70] sm:$0xff] %vm563_vm0, %v5667_v49 }
 0x6e7   : > { %5405 = vst.msk [vmem:[#allocation3 + $0x81] sm:$0xff] %vm563_vm0, %v5397_v38  ;;  %5771 = vst.msk [vmem:[#allocation5 + $0x58] sm:$0xff] %vm563_vm0, %v5620_v50  ;;  %v5715_v60 = vld [vmem:[#allocation3 + $0x71] sm:$0xff] }
 0x6ea   : > { %5736 = vrot.lane.b32.xlu0 %v5715_v60, %s15732_s23  ;;  %5594 = vrot.lane.b32.xlu1 %v5715_v60, %s15737_s5 }
 0x6ee   : > { %v5621_v20 = vld [vmem:[#allocation3 + $0x82] sm:$0xff]  ;;  %5452 = vrot.lane.b32.xlu0 %v5715_v60, %s15736_s22  ;;  %5642 = vrot.lane.b32.xlu1 %v5620_v50, %s15735_s1 }
 0x6ef   : > { %5772 = vst.msk [vmem:[#allocation5 + $0x68] sm:$0xff] %vm563_vm0, %v5621_v20  ;;  %v5668_v53 = vld [vmem:[#allocation3 + $0x80] sm:$0xff]  ;;  %v5785_v15 = vld [vmem:[#allocation5 + $0x58] sm:$0xff] }
 0x6f0   : > { %v5685_v30 = vpop.permute.xlu0 %5684  ;;  %v5543_v24 = vpop.permute.xlu1 %5542  ;;  %v5716_v62 = vld [vmem:[#allocation3 + $0x81] sm:$0xff] }
 0x6f1   : > { %5705 = vst.msk [vmem:[#allocation5 + $0x30] sm:$0xff] %vm3942_vm3, %v5685_v30 }
 0x6f2   : > { %5562 = vst.msk [vmem:[#allocation5 + $0x40] sm:$0xff] %vm3363_vm15, %v5543_v24  ;;  %5500 = vrot.lane.b32.xlu0 %v5620_v50, %s15730_s27  ;;  %5690 = vrot.lane.b32.xlu1 %v5668_v53, %s15731_s30 }
 0x6f4   : > { %v5733_v25 = vpop.permute.xlu0 %5732  ;;  %v5591_v5 = vpop.permute.xlu1 %5590 }
 0x6f5   : > { %5753 = vst.msk [vmem:[#allocation5 + $0x30] sm:$0xff] %vm4135_vm4, %v5733_v25 }
 0x6f6   : > { %5610 = vst.msk [vmem:[#allocation5 + $0x40] sm:$0xff] %vm3556_vm1, %v5591_v5  ;;  %5548 = vrot.lane.b32.xlu0 %v5668_v53, %s15734_s18  ;;  %5738 = vrot.lane.b32.xlu1 %v5716_v62, %s15732_s23  ;;  %v5787_v58 = vld [vmem:[#allocation5 + $0x68] sm:$0xff] }
 0x6f8   : > { %v5449_v42 = vpop.permute.xlu0 %5448  ;;  %v5639_v7 = vpop.permute.xlu1 %5638 }
 0x6f9   : > { %5467 = vst.msk [vmem:[#allocation5 + $0x50] sm:$0xff] %vm2977_vm13, %v5449_v42 }
 0x6fa   : > { %5658 = vst.msk [vmem:[#allocation5 + $0x40] sm:$0xff] %vm3749_vm2, %v5639_v7  ;;  %5596 = vrot.lane.b32.xlu0 %v5716_v62, %s15737_s5  ;;  %5644 = vrot.lane.b32.xlu1 %v5621_v20, %s15735_s1 }
 0x6fc   : > { %v5497_v14 = vpop.permute.xlu0 %5496  ;;  %v5780_v10 = vld [vmem:[#allocation5 + $0x30] sm:$0xff] }
 0x6fd   : > { %5515 = vst.msk [vmem:[#allocation5 + $0x50] sm:$0xff] %vm3170_vm14, %v5497_v14  ;;  %5919 = vmatmul.mubr.f32.gmra.mrb[54].mxu0 %v5780_v10 }
 0x6fe   : > { %10875 = vmatprep.mubr.msk.f32.mxu0 %vm563_vm0, %v5783_v32  ;;  %5692 = vrot.lane.b32.xlu0 %v14714_v13, %s15731_s30 }
 0x6ff   : > { %5740 = vrot.lane.b32.xlu1 %v14724_v23, %s15732_s23 }
 0x729   : > { %v5545_v9 = vpop.permute.xlu0 %5544  ;;  %v5687_v47 = vpop.permute.xlu1 %5686 }
 0x72a   : > { %v5905_v0 = vpop.f32.mrb[48].mxu0  ;;  %5563 = vst.msk [vmem:[#allocation5 + $0x50] sm:$0xff] %vm3363_vm15, %v5545_v9 }
 0x72b   : > { %5706 = vst.msk [vmem:[#allocation5 + $0x40] sm:$0xff] %vm3942_vm3, %v5687_v47  ;;  %v5906_v39 = vadd.f32 %v14953_v52, %v5905_v0  ;;  %v5907_v48 = vpop.f32.mrb[49].mxu0 }
 0x72c   : > { %v6169_v48 = vld [vmem:[%s15683_s9] sm:$0xff] }
 0x72d   : > { %v5944_v35 = vmax.f32 %v5906_v39, 0.0  ;;  %v5593_v13 = vpop.permute.xlu0 %5592  ;;  %v5735_v36 = vpop.permute.xlu1 %5734 }
 0x72e   : > { %5611 = vst.msk [vmem:[#allocation5 + $0x50] sm:$0xff] %vm3556_vm1, %v5593_v13  ;;  %v6171_v13 = vld [vmem:[%s15683_s9 + $0x10] sm:$0xff] }
 0x72f   : > { %5754 = vst.msk [vmem:[#allocation5 + $0x40] sm:$0xff] %vm4135_vm4, %v5735_v36 }
 0x730   : > { %5952 = vst.msk [vmem:[#allocation6] sm:$0xff] %vm563_vm0, %v5944_v35  ;;  %v6170_v35 = vld [vmem:[%s15683_s9 + $0x8] sm:$0xff] }
 0x731   : > { %v5641_v23 = vpop.permute.xlu0 %5640  ;;  %v5451_v11 = vpop.permute.xlu1 %5450  ;;  %v11410_v36 = vpack.c.bf16 %v6170_v35, %v6169_v48 }
 0x732   : > { %5659 = vst.msk [vmem:[#allocation5 + $0x50] sm:$0xff] %vm3749_vm2, %v5641_v23  ;;  %v6172_v23 = vld [vmem:[%s15683_s9 + $0x18] sm:$0xff] }
 0x733   : > { %5468 = vst.msk [vmem:[#allocation5 + $0x60] sm:$0xff] %vm2977_vm13, %v5451_v11  ;;  %11411 = vmatpush1.bf16.msra.mxu0 %v11410_v36  ;;  %v11413_v11 = vpack.c.bf16 %v6172_v23, %v6171_v13 }
 0x734   : > { %11412 = vmatprep.subr.bf16.mxu0 %v11994_v43 }
 0x735   : > { %v5499_v57 = vpop.permute.xlu1 %5498 }
 0x736   : > { %v5782_v6 = vld [vmem:[#allocation5 + $0x40] sm:$0xff]  ;;  %5516 = vst.msk [vmem:[#allocation5 + $0x60] sm:$0xff] %vm3170_vm14, %v5499_v57 }
 0x737   : > { %5924 = vmatmul.mubr.f32.gmra.mrb[56].mxu0 %v5782_v6  ;;  %v6173_v57 = vld [vmem:[%s15683_s9 + $0x20] sm:$0xff]  ;;  %v6174_v6 = vld [vmem:[%s15683_s9 + $0x28] sm:$0xff] }
 0x738   : > { %10876 = vmatprep.mubr.msk.f32.mxu0 %vm563_vm0, %v5785_v15  ;;  %11414 = vmatpush1.bf16.msra.mxu0 %v11413_v11  ;;  %v11416_v15 = vpack.c.bf16 %v6174_v6, %v6173_v57 }
 0x739   : > { %11415 = vmatprep.subr.bf16.mxu0 %v11994_v43 }
 0x73c   : > { %11417 = vmatpush1.bf16.msra.mxu0 %v11416_v15 }
 0x73d   : > { %11418 = vmatprep.subr.bf16.mxu0 %v11994_v43 }
 0x758   : > { %v5689_v18 = vpop.permute.xlu0 %5688  ;;  %v5547_v41 = vpop.permute.xlu1 %5546 }
 0x759   : > { %5707 = vst.msk [vmem:[#allocation5 + $0x50] sm:$0xff] %vm3942_vm3, %v5689_v18  ;;  %v6175_v18 = vld [vmem:[%s15683_s9 + $0x30] sm:$0xff] }
 0x75a   : > { %5564 = vst.msk [vmem:[#allocation5 + $0x60] sm:$0xff] %vm3363_vm15, %v5547_v41  ;;  %v6176_v41 = vld [vmem:[%s15683_s9 + $0x38] sm:$0xff] }
 0x75c   : > { %v5737_v27 = vpop.permute.xlu0 %5736  ;;  %v5595_v59 = vpop.permute.xlu1 %5594 }
 0x75d   : > { %5755 = vst.msk [vmem:[#allocation5 + $0x50] sm:$0xff] %vm4135_vm4, %v5737_v27  ;;  %v11419_v27 = vpack.c.bf16 %v6176_v41, %v6175_v18 }
 0x75e   : > { %5612 = vst.msk [vmem:[#allocation5 + $0x60] sm:$0xff] %vm3556_vm1, %v5595_v59  ;;  %v6177_v59 = vld [vmem:[%s15683_s9 + $0x40] sm:$0xff] }
 0x75f   : > { %v5910_v28 = vpop.f32.mrb[50].mxu0  ;;  %11420 = vmatpush1.bf16.msra.mxu0 %v11419_v27 }
 0x760   : > { %v5911_v29 = vadd.f32 %v14953_v52, %v5910_v28  ;;  %v5912_v8 = vpop.f32.mrb[51].mxu0  ;;  %v5453_v22 = vpop.permute.xlu0 %5452  ;;  %v6178_v28 = vld [vmem:[%s15683_s9 + $0x48] sm:$0xff]  ;;  %11421 = vmatprep.subr.bf16.mxu0 %v11994_v43 }
 0x761   : > { %5469 = vst.msk [vmem:[#allocation5 + $0x70] sm:$0xff] %vm2977_vm13, %v5453_v22  ;;  %v5643_v26 = vpop.permute.xlu1 %5642 }
 0x762   : > { %v5945_v16 = vmax.f32 %v5911_v29, 0.0  ;;  %5660 = vst.msk [vmem:[#allocation5 + $0x60] sm:$0xff] %vm3749_vm2, %v5643_v26  ;;  %v11422_v26 = vpack.c.bf16 %v6178_v28, %v6177_v59 }
 0x764   : > { %5953 = vst.msk [vmem:[#allocation6 + $0x8] sm:$0xff] %vm563_vm0, %v5945_v16  ;;  %v5501_v17 = vpop.permute.xlu0 %5500  ;;  %v5784_v33 = vld [vmem:[#allocation5 + $0x50] sm:$0xff]  ;;  %11423 = vmatpush1.bf16.msra.mxu0 %v11422_v26 }
 0x765   : > { %5517 = vst.msk [vmem:[#allocation5 + $0x70] sm:$0xff] %vm3170_vm14, %v5501_v17  ;;  %v5691_v40 = vpop.permute.xlu1 %5690  ;;  %5929 = vmatmul.mubr.f32.gmra.mrb[58].mxu0 %v5784_v33  ;;  %v6179_v17 = vld [vmem:[%s15683_s9 + $0x50] sm:$0xff]  ;;  %v6180_v33 = vld [vmem:[%s15683_s9 + $0x58] sm:$0xff]  ;;  %11424 = vmatprep.subr.bf16.mxu0 %v11994_v43 }
 0x766   : > { %5708 = vst.msk [vmem:[#allocation5 + $0x60] sm:$0xff] %vm3942_vm3, %v5691_v40  ;;  %10877 = vmatprep.mubr.msk.f32.mxu0 %vm563_vm0, %v5787_v58  ;;  %v11425_v40 = vpack.c.bf16 %v6180_v33, %v6179_v17 }
 0x768   : > { %v5549_v55 = vpop.permute.xlu0 %5548  ;;  %11426 = vmatpush1.bf16.msra.mxu0 %v11425_v40 }
 0x769   : > { %5565 = vst.msk [vmem:[#allocation5 + $0x70] sm:$0xff] %vm3363_vm15, %v5549_v55  ;;  %v5739_v51 = vpop.permute.xlu1 %5738  ;;  %11427 = vmatprep.subr.bf16.mxu0 %v11994_v43 }
 0x76a   : > { %5756 = vst.msk [vmem:[#allocation5 + $0x60] sm:$0xff] %vm4135_vm4, %v5739_v51 }
 0x76b   : > { %v5960_v56 = vld [vmem:[#allocation6] ss:$2 sm:$0xff]  ;;  %v5964_v63 = vld [vmem:[#allocation6 + $0x1] ss:$2 sm:$0xff] }
 0x76c   : > { %v5968_v31 = vmax.f32 %v5960_v56, %v5964_v63  ;;  %v5597_v19 = vpop.permute.xlu0 %5596 }
 0x76d   : > { %5613 = vst.msk [vmem:[#allocation5 + $0x70] sm:$0xff] %vm3556_vm1, %v5597_v19  ;;  %v5645_v37 = vpop.permute.xlu1 %5644 }
 0x76e   : > { %v5976_v34 = vcombine.high %v5968_v31, %v5968_v31  ;;  %5985 = vst.msk [vmem:[#allocation7] sm:$0xf] %vm5984_vm6, %v5968_v31 }
 0x76f   : > { %5661 = vst.msk [vmem:[#allocation5 + $0x70] sm:$0xff] %vm3749_vm2, %v5645_v37 }
 0x770   : > { %5986 = vst.msk [vmem:[#allocation7 + $0x8] sm:$0xf] %vm5984_vm6, %v5976_v34  ;;  %v5693_v45 = vpop.permute.xlu0 %5692 }
 0x771   : > { %5709 = vst.msk [vmem:[#allocation5 + $0x70] sm:$0xff] %vm3942_vm3, %v5693_v45  ;;  %v5741_v21 = vpop.permute.xlu1 %5740  ;;  %v5786_v1 = vld [vmem:[#allocation5 + $0x60] sm:$0xff] }
 0x772   : > { %5757 = vst.msk [vmem:[#allocation5 + $0x70] sm:$0xff] %vm4135_vm4, %v5741_v21  ;;  %5934 = vmatmul.mubr.f32.gmra.mrb[60].mxu0 %v5786_v1 }
 0x773   : > { %10878 = vmatprep.mubr.msk.f32.mxu0 %vm563_vm0, %v5789_v46 }
 0x775   : > { %v5993_v44 = vld [vmem:[#allocation7] sm:$0xf] }
 0x777   : > { %v5997_v61 = vld [vmem:[#allocation7 + $0x8] sm:$0xf] }
 0x778   : > { %v6001_v12 = vmax.f32 %v5993_v44, %v5997_v61 }
 0x779   : > { %v5788_v54 = vld [vmem:[#allocation5 + $0x70] sm:$0xff] }
 0x77a   : > { %5939 = vmatmul.mubr.f32.gmra.mrb[62].mxu0 %v5788_v54  ;;  %6006 = vst.msk [vmem:[#allocation4 + $0x9] sm:$0xf] %vm5984_vm6, %v6001_v12 }
 0x781   : > { %v11528_v2 = vld [vmem:[#allocation4 + $0x1] ss:$8 sps:$4 sm:$0xff]  }
 0x782   : > { %v11529_v3 = vld [vmem:[#allocation4 + $0x2] ss:$8 sps:$4 sm:$0xff]   ;;  %6034 = vrot.lane.b32.xlu0 %v11528_v2, %s15736_s22 }
 0x783   : > { %v11532_v4 = vld [vmem:[#allocation4] ss:$8 sps:$4 sm:$0xff]   ;;  %6052 = vrot.lane.b32.xlu1 %v11529_v3, %s15730_s27  ;;  %v6181_v3 = vld [vmem:[%s15683_s9 + $0x60] sm:$0xff] }
 0x784   : > { %6022 = vst.msk [vmem:[#allocation5] sm:$0xff] %vm563_vm0, %v11532_v4  ;;  %v6182_v4 = vld [vmem:[%s15683_s9 + $0x68] sm:$0xff] }
 0x79a   : > { %v5915_v38 = vpop.f32.mrb[52].mxu0 }
 0x79b   : > { %v5916_v49 = vadd.f32 %v14953_v52, %v5915_v38  ;;  %v5917_v50 = vpop.f32.mrb[53].mxu0 }
 0x79c   : > { %v6184_v50 = vld [vmem:[%s15683_s9 + $0x78] sm:$0xff] }
 0x79d   : > { %v5946_v60 = vmax.f32 %v5916_v49, 0.0  ;;  %v11428_v49 = vpack.c.bf16 %v6182_v4, %v6181_v3  ;;  %v10879_v3 = vld [vmem:[%s15684_s10] ss:$0 sm:$0xff] }
 0x79f   : > { %5954 = vst.msk [vmem:[#allocation6 + $0x10] sm:$0xff] %vm563_vm0, %v5946_v60  ;;  %11429 = vmatpush1.bf16.msra.mxu0 %v11428_v49  ;;  %v6185_v60 = vld [vmem:[%s15683_s9 + $0x80] sm:$0xff] }
 0x7a0   : > { %11430 = vmatprep.subr.bf16.mxu0 %v11994_v43 }
 0x7d0   : > { %v5920_v20 = vpop.f32.mrb[54].mxu0 }
 0x7d1   : > { %v5921_v30 = vadd.f32 %v14953_v52, %v5920_v20  ;;  %v5922_v24 = vpop.f32.mrb[55].mxu0 }
 0x7d3   : > { %v5947_v53 = vmax.f32 %v5921_v30, 0.0  ;;  %v6186_v30 = vld [vmem:[%s15683_s9 + $0x88] sm:$0xff] }
 0x7d4   : > { %v11434_v24 = vpack.c.bf16 %v6186_v30, %v6185_v60  ;;  %v6462_v30 = vld [vmem:[%s15685_s11 + $0x68] sm:$0xff] }
 0x7d5   : > { %5955 = vst.msk [vmem:[#allocation6 + $0x18] sm:$0xff] %vm563_vm0, %v5947_v53 }
 0x7dc   : > { %v5961_v25 = vld [vmem:[#allocation6 + $0x10] ss:$2 sm:$0xff]  ;;  %v5965_v5 = vld [vmem:[#allocation6 + $0x11] ss:$2 sm:$0xff] }
 0x7dd   : > { %v5969_v62 = vmax.f32 %v5961_v25, %v5965_v5 }
 0x7df   : > { %v5977_v42 = vcombine.high %v5969_v62, %v5969_v62  ;;  %5987 = vst.msk [vmem:[#allocation7 + $0x10] sm:$0xf] %vm5984_vm6, %v5969_v62 }
 0x7e1   : > { %5988 = vst.msk [vmem:[#allocation7 + $0x18] sm:$0xf] %vm5984_vm6, %v5977_v42 }
 0x7e6   : > { %v5994_v7 = vld [vmem:[#allocation7 + $0x10] sm:$0xf] }
 0x7e8   : > { %v5998_v14 = vld [vmem:[#allocation7 + $0x18] sm:$0xf] }
 0x7e9   : > { %v6002_v10 = vmax.f32 %v5994_v7, %v5998_v14 }
 0x7eb   : > { %6007 = vst.msk [vmem:[#allocation4 + $0x11] sm:$0xf] %vm5984_vm6, %v6002_v10 }
 0x7f2   : > { %v11530_v32 = vld [vmem:[#allocation4 + $0x9] ss:$8 sps:$4 sm:$0xff]  }
 0x7f3   : > { %v11531_v9 = vld [vmem:[#allocation4 + $0x8] ss:$8 sps:$4 sm:$0xff]   ;;  %6088 = vrot.lane.b32.xlu1 %v11530_v32, %s15737_s5 }
 0x7f4   : > { %6070 = vrot.lane.b32.xlu0 %v11531_v9, %s15734_s18  ;;  %v6035_v47 = vpop.permute.xlu0 %6034  ;;  %v11533_v0 = vld [vmem:[#allocation4 + $0xa] ss:$8 sps:$4 sm:$0xff]  }
 0x7f5   : > { %6040 = vst.msk [vmem:[#allocation5] sm:$0xff] %vm2977_vm13, %v6035_v47  ;;  %v6053_v39 = vpop.permute.xlu1 %6052 }
 0x7f6   : > { %6058 = vst.msk [vmem:[#allocation5] sm:$0xff] %vm3170_vm14, %v6053_v39 }
 0x7f7   : > { %6106 = vrot.lane.b32.xlu1 %v11533_v0, %s15735_s1 }
 0x80a   : > { %v5925_v29 = vpop.f32.mrb[56].mxu0 }
 0x80b   : > { %v5926_v8 = vadd.f32 %v14953_v52, %v5925_v29  ;;  %v5927_v22 = vpop.f32.mrb[57].mxu0 }
 0x80d   : > { %v5948_v16 = vmax.f32 %v5926_v8, 0.0 }
 0x80f   : > { %5956 = vst.msk [vmem:[#allocation6 + $0x20] sm:$0xff] %vm563_vm0, %v5948_v16 }
 0x838   : > { %v5930_v58 = vpop.f32.mrb[58].mxu0 }
 0x839   : > { %v5931_v55 = vadd.f32 %v14953_v52, %v5930_v58  ;;  %v5932_v51 = vpop.f32.mrb[59].mxu0  ;;  %v6449_v58 = vld [vmem:[%s15685_s11] sm:$0xff] }
 0x83b   : > { %v5949_v56 = vmax.f32 %v5931_v55, 0.0  ;;  %v6450_v55 = vld [vmem:[%s15685_s11 + $0x8] sm:$0xff] }
 0x83c   : > { %v11437_v51 = vpack.c.bf16 %v6450_v55, %v6449_v58 }
 0x83d   : > { %5957 = vst.msk [vmem:[#allocation6 + $0x28] sm:$0xff] %vm563_vm0, %v5949_v56  ;;  %v6451_v56 = vld [vmem:[%s15685_s11 + $0x10] sm:$0xff] }
 0x83e   : > { %11438 = vmatpush1.bf16.msra.mxu1 %v11437_v51 }
 0x83f   : > { %11439 = vmatprep.subr.bf16.mxu1 %v11994_v43 }
 0x844   : > { %v5962_v63 = vld [vmem:[#allocation6 + $0x20] ss:$2 sm:$0xff]  ;;  %v5966_v31 = vld [vmem:[#allocation6 + $0x21] ss:$2 sm:$0xff] }
 0x845   : > { %v5970_v19 = vmax.f32 %v5962_v63, %v5966_v31  ;;  %v5935_v37 = vpop.f32.mrb[60].mxu0  ;;  %v6452_v63 = vld [vmem:[%s15685_s11 + $0x18] sm:$0xff]  ;;  %v6453_v31 = vld [vmem:[%s15685_s11 + $0x20] sm:$0xff] }
 0x846   : > { %v5936_v34 = vadd.f32 %v14953_v52, %v5935_v37  ;;  %v5937_v45 = vpop.f32.mrb[61].mxu0  ;;  %v6454_v37 = vld [vmem:[%s15685_s11 + $0x28] sm:$0xff] }
 0x847   : > { %v5978_v46 = vcombine.high %v5970_v19, %v5970_v19  ;;  %5989 = vst.msk [vmem:[#allocation7 + $0x20] sm:$0xf] %vm5984_vm6, %v5970_v19  ;;  %v11440_v19 = vpack.c.bf16 %v6452_v63, %v6451_v56  ;;  %v6455_v45 = vld [vmem:[%s15685_s11 + $0x30] sm:$0xff] }
 0x848   : > { %v5950_v21 = vmax.f32 %v5936_v34, 0.0  ;;  %v11443_v34 = vpack.c.bf16 %v6454_v37, %v6453_v31 }
 0x849   : > { %5990 = vst.msk [vmem:[#allocation7 + $0x28] sm:$0xf] %vm5984_vm6, %v5978_v46  ;;  %11441 = vmatpush1.bf16.msra.mxu1 %v11440_v19  ;;  %v6456_v46 = vld [vmem:[%s15685_s11 + $0x38] sm:$0xff] }
 0x84a   : > { %5958 = vst.msk [vmem:[#allocation6 + $0x30] sm:$0xff] %vm563_vm0, %v5950_v21  ;;  %11442 = vmatprep.subr.bf16.mxu1 %v11994_v43  ;;  %v11446_v21 = vpack.c.bf16 %v6456_v46, %v6455_v45 }
 0x84d   : > { %v5940_v1 = vpop.f32.mrb[62].mxu0  ;;  %11444 = vmatpush1.bf16.msra.mxu1 %v11443_v34 }
 0x84e   : > { %v5941_v44 = vadd.f32 %v14953_v52, %v5940_v1  ;;  %v5942_v61 = vpop.f32.mrb[63].mxu0  ;;  %v5995_v12 = vld [vmem:[#allocation7 + $0x20] sm:$0xf]  ;;  %v6183_v52 = vld [vmem:[%s15683_s9 + $0x70] sm:$0xff]  ;;  %11445 = vmatprep.subr.bf16.mxu1 %v11994_v43 }
 0x84f   : > { %v11431_v20 = vpack.c.bf16 %v6184_v50, %v6183_v52  ;;  %v6457_v1 = vld [vmem:[%s15685_s11 + $0x40] sm:$0xff] }
 0x850   : > { %v5951_v54 = vmax.f32 %v5941_v44, 0.0  ;;  %v5999_v2 = vld [vmem:[#allocation7 + $0x28] sm:$0xf] }
 0x851   : > { %v6003_v38 = vmax.f32 %v5995_v12, %v5999_v2  ;;  %11432 = vmatpush1.bf16.msra.mxu0 %v11431_v20  ;;  %v6458_v44 = vld [vmem:[%s15685_s11 + $0x48] sm:$0xff]  ;;  %11447 = vmatpush1.bf16.msra.mxu1 %v11446_v21  ;;  %v6459_v12 = vld [vmem:[%s15685_s11 + $0x50] sm:$0xff]  ;;  %v6461_v20 = vld [vmem:[%s15685_s11 + $0x60] sm:$0xff] }
 0x852   : > { %5959 = vst.msk [vmem:[#allocation6 + $0x38] sm:$0xff] %vm563_vm0, %v5951_v54  ;;  %11433 = vmatprep.subr.bf16.mxu0 %v11994_v43  ;;  %v11449_v61 = vpack.c.bf16 %v6458_v44, %v6457_v1  ;;  %11448 = vmatprep.subr.bf16.mxu1 %v11994_v43  ;;  %v6460_v54 = vld [vmem:[%s15685_s11 + $0x58] sm:$0xff]  ;;  %v6569_v1 = vld [vmem:[%s15687_s13] sm:$0xff] }
 0x853   : > { %6008 = vst.msk [vmem:[#allocation4 + $0x19] sm:$0xf] %vm5984_vm6, %v6003_v38  ;;  %v11452_v2 = vpack.c.bf16 %v6460_v54, %v6459_v12  ;;  %v6577_v44 = vld [vmem:[%s15687_s13 + $0x40] sm:$0xff] }
 0x854   : > { %v10885_v12 = vcombine.low %v6569_v1, %v6577_v44  ;;  %v10886_v54 = vcombine.high %v6569_v1, %v6577_v44  ;;  %v7124_v1 = vld [vmem:[%s15687_s13 + $0xd0] sm:$0xff]  ;;  %v7121_v44 = vld [vmem:[%s15687_s13 + $0xb8] sm:$0xff] }
 0x855   : > { %11435 = vmatpush1.bf16.msra.mxu0 %v11434_v24  ;;  %11450 = vmatpush1.bf16.msra.mxu1 %v11449_v61  ;;  %v11455_v24 = vpack.c.bf16 %v6462_v30, %v6461_v20  ;;  %v6572_v61 = vld [vmem:[%s15687_s13 + $0x18] sm:$0xff]  ;;  %v6574_v20 = vld [vmem:[%s15687_s13 + $0x28] sm:$0xff] }
 0x856   : > { %11451 = vmatprep.subr.bf16.mxu1 %v11994_v43  ;;  %6668 = vmatprep.subr.bf16.mxu0 %v10886_v54  ;;  %v6582_v30 = vld [vmem:[%s15687_s13 + $0x68] sm:$0xff] }
 0x859   : > { %v5963_v53 = vld [vmem:[#allocation6 + $0x30] ss:$2 sm:$0xff]  ;;  %v5967_v25 = vld [vmem:[#allocation6 + $0x31] ss:$2 sm:$0xff]  ;;  %11453 = vmatpush1.bf16.msra.mxu1 %v11452_v2 }
 0x85a   : > { %v5971_v5 = vmax.f32 %v5963_v53, %v5967_v25  ;;  %v11534_v62 = vld [vmem:[#allocation4 + $0x10] ss:$8 sps:$4 sm:$0xff]   ;;  %11454 = vmatprep.subr.bf16.mxu1 %v11994_v43  ;;  %v6463_v53 = vld [vmem:[%s15685_s11 + $0x70] sm:$0xff]  ;;  %v6464_v25 = vld [vmem:[%s15685_s11 + $0x78] sm:$0xff] }
 0x85b   : > { %v11535_v42 = vld [vmem:[#allocation4 + $0x11] ss:$8 sps:$4 sm:$0xff]   ;;  %6125 = vrot.lane.b32.xlu1 %v11534_v62, %s15731_s30  ;;  %v6580_v2 = vld [vmem:[%s15687_s13 + $0x58] sm:$0xff] }
 0x85c   : > { %v5979_v7 = vcombine.high %v5971_v5, %v5971_v5  ;;  %5991 = vst.msk [vmem:[#allocation7 + $0x30] sm:$0xf] %vm5984_vm6, %v5971_v5  ;;  %v11536_v14 = vld [vmem:[#allocation4 + $0x11] ss:$8 sps:$4 sm:$0xff]   ;;  %6036 = vrot.lane.b32.xlu0 %v11535_v42, %s15736_s22  ;;  %v11458_v5 = vpack.c.bf16 %v6464_v25, %v6463_v53  ;;  %v10896_v53 = vcombine.high %v6574_v20, %v6582_v30  ;;  %v10882_v25 = vld [vmem:[%s15686_s12] ss:$0 sm:$0xff] }
 0x85d   : > { %v11538_v10 = vld [vmem:[#allocation4 + $0x12] ss:$8 sps:$4 sm:$0xff]   ;;  %11456 = vmatpush1.bf16.msra.mxu1 %v11455_v24  ;;  %v10895_v24 = vcombine.low %v6574_v20, %v6582_v30 }
 0x85e   : > { %5992 = vst.msk [vmem:[#allocation7 + $0x38] sm:$0xf] %vm5984_vm6, %v5979_v7  ;;  %v11544_v32 = vld [vmem:[#allocation4 + $0x10] ss:$8 sps:$4 sm:$0xff]   ;;  %11457 = vmatprep.subr.bf16.mxu1 %v11994_v43 }
 0x85f   : > { %v11537_v9 = vld [vmem:[#allocation4 + $0x12] ss:$8 sps:$4 sm:$0xff]   ;;  %6163 = vst.msk [vmem:[#allocation5 + $0x8] sm:$0xff] %vm563_vm0, %v11538_v10  ;;  %6143 = vrot.lane.b32.xlu1 %v11536_v14, %s15732_s23  ;;  %6023 = vst.msk [vmem:[#allocation5 + $0x10] sm:$0xff] %vm563_vm0, %v11544_v32 }
 0x860   : > { %6054 = vrot.lane.b32.xlu0 %v11537_v9, %s15730_s27 }
 0x861   : > { %11459 = vmatpush1.bf16.msra.mxu1 %v11458_v5 }
 0x862   : > { %11460 = vmatprep.subr.bf16.mxu1 %v11994_v43  ;;  %v6465_v43 = vld [vmem:[%s15685_s11 + $0x80] sm:$0xff] }
 0x863   : > { %v5996_v0 = vld [vmem:[#allocation7 + $0x30] sm:$0xf] }
 0x865   : > { %v6089_v47 = vpop.permute.xlu1 %6088  ;;  %v6000_v39 = vld [vmem:[#allocation7 + $0x38] sm:$0xf] }
 0x866   : > { %v6166_v48 = vld [vmem:[#allocation5 + $0x8] sm:$0xff]  ;;  %v6071_v35 = vpop.permute.xlu0 %6070  ;;  %v6004_v13 = vmax.f32 %v5996_v0, %v6000_v39 }
 0x867   : > { %10880 = vmatprep.mubr.msk.f32.mxu0 %vm563_vm0, %v6166_v48  ;;  %6076 = vst.msk [vmem:[#allocation5] sm:$0xff] %vm3363_vm15, %v6071_v35 }
 0x868   : > { %6094 = vst.msk [vmem:[#allocation5] sm:$0xff] %vm3556_vm1, %v6089_v47 }
 0x869   : > { %6009 = vst.msk [vmem:[#allocation4 + $0x21] sm:$0xf] %vm5984_vm6, %v6004_v13  ;;  %v6107_v36 = vpop.permute.xlu1 %6106  ;;  %v6466_v13 = vld [vmem:[%s15685_s11 + $0x88] sm:$0xff] }
 0x86a   : > { %6112 = vst.msk [vmem:[#allocation5] sm:$0xff] %vm3749_vm2, %v6107_v36  ;;  %v11461_v36 = vpack.c.bf16 %v6466_v13, %v6465_v43  ;;  %v6579_v43 = vld [vmem:[%s15687_s13 + $0x50] sm:$0xff] }
 0x86c   : > { %11462 = vmatpush1.bf16.msra.mxu1 %v11461_v36  ;;  %v6576_v36 = vld [vmem:[%s15687_s13 + $0x38] sm:$0xff] }
 0x870   : > { %v11539_v23 = vld [vmem:[#allocation4 + $0x1a] ss:$8 sps:$4 sm:$0xff]  }
 0x871   : > { %v11540_v11 = vld [vmem:[#allocation4 + $0x18] ss:$8 sps:$4 sm:$0xff]   ;;  %6108 = vrot.lane.b32.xlu1 %v11539_v23, %s15735_s1 }
 0x872   : > { %6072 = vrot.lane.b32.xlu0 %v11540_v11, %s15734_s18  ;;  %v11545_v57 = vld [vmem:[#allocation4 + $0x22] ss:$8 sps:$4 sm:$0xff]  }
 0x873   : > { %v11541_v6 = vld [vmem:[#allocation4 + $0x21] ss:$8 sps:$4 sm:$0xff]   ;;  %6164 = vst.msk [vmem:[#allocation5 + $0x18] sm:$0xff] %vm563_vm0, %v11545_v57 }
 0x874   : > { %v11542_v15 = vld [vmem:[#allocation4 + $0x19] ss:$8 sps:$4 sm:$0xff]  }
 0x875   : > { %6145 = vrot.lane.b32.xlu1 %v11541_v6, %s15732_s23  ;;  %v11543_v18 = vld [vmem:[#allocation4 + $0x20] ss:$8 sps:$4 sm:$0xff]  }
 0x876   : > { %6090 = vrot.lane.b32.xlu0 %v11542_v15, %s15737_s5 }
 0x87a   : > { %6127 = vrot.lane.b32.xlu0 %v11543_v18, %s15731_s30  ;;  %v6168_v8 = vld [vmem:[#allocation5 + $0x18] sm:$0xff] }
 0x8cd   : > { %v6126_v41 = vpop.permute.xlu1 %6125 }
 0x8ce   : > { %6131 = vst.msk [vmem:[#allocation5] sm:$0xff] %vm3942_vm3, %v6126_v41  ;;  %v6037_v27 = vpop.permute.xlu0 %6036 }
 0x8cf   : > { %6041 = vst.msk [vmem:[#allocation5 + $0x10] sm:$0xff] %vm2977_vm13, %v6037_v27 }
 0x8d1   : > { %v6144_v59 = vpop.permute.xlu1 %6143 }
 0x8d2   : > { %6149 = vst.msk [vmem:[#allocation5] sm:$0xff] %vm4135_vm4, %v6144_v59  ;;  %v6055_v28 = vpop.permute.xlu0 %6054 }
 0x8d3   : > { %6059 = vst.msk [vmem:[#allocation5 + $0x10] sm:$0xff] %vm3170_vm14, %v6055_v28 }
 0x8d9   : > { %v6165_v29 = vld [vmem:[#allocation5] sm:$0xff] }
 0x8da   : > { %6265 = vmatmul.mubr.f32.vlgmr.msra.gmra.mrb[64].mxu0 %v6165_v29 }
 0x8db   : > { %10881 = vmatprep.mubr.msk.f32.mxu0 %vm563_vm0, %v6168_v8  ;;  %6669 = vmatpush1.bf16.msra.mxu0 %v10885_v12 }
 0x8e3   : > { %v6109_v26 = vpop.permute.xlu1 %6108 }
 0x8e4   : > { %v6073_v22 = vpop.permute.xlu0 %6072 }
 0x8e5   : > { %6077 = vst.msk [vmem:[#allocation5 + $0x10] sm:$0xff] %vm3363_vm15, %v6073_v22 }
 0x8e7   : > { %v6146_v33 = vpop.permute.xlu1 %6145 }
 0x8e8   : > { %v6091_v16 = vpop.permute.xlu0 %6090 }
 0x8e9   : > { %6095 = vst.msk [vmem:[#allocation5 + $0x10] sm:$0xff] %vm3556_vm1, %v6091_v16 }
 0x8ea   : > { %6113 = vst.msk [vmem:[#allocation5 + $0x10] sm:$0xff] %vm3749_vm2, %v6109_v26 }
 0x8ec   : > { %v6128_v17 = vpop.permute.xlu0 %6127 }
 0x8ed   : > { %6132 = vst.msk [vmem:[#allocation5 + $0x10] sm:$0xff] %vm3942_vm3, %v6128_v17 }
 0x8ee   : > { %6150 = vst.msk [vmem:[#allocation5 + $0x10] sm:$0xff] %vm4135_vm4, %v6146_v33 }
 0x8f5   : > { %v6167_v40 = vld [vmem:[#allocation5 + $0x10] sm:$0xff] }
 0x8f6   : > { %6270 = vmatmul.mubr.f32.gmra.mrb[66].mxu0 %v6167_v40 }
 0x9ad   : > { %v6266_v4 = vpop.f32.mrb[64].mxu0 }
 0x9ae   : > { %v6267_v38 = vadd.f32 %v10879_v3, %v6266_v4  ;;  %v6268_v49 = vpop.f32.mrb[65].mxu0  ;;  %v6570_v4 = vld [vmem:[%s15687_s13 + $0x8] sm:$0xff] }
 0x9af   : > { %v10891_v49 = vcombine.low %v6572_v61, %v6580_v2 }
 0x9b0   : > { %vm6275_vm7 = vcmp.gt.f32.partialorder %v6267_v38, 0.0  ;;  %v6277_v52 = vmul.f32 0.01, %v6267_v38 }
 0x9b2   : > { %v6279_v50 = vsel %vm6275_vm7, %v6267_v38, %v6277_v52  ;;  %v6578_v38 = vld [vmem:[%s15687_s13 + $0x48] sm:$0xff]  ;;  %v10892_v52 = vcombine.high %v6572_v61, %v6580_v2  ;;  %v7129_v61 = vld [vmem:[%s15687_s13 + $0xf8] sm:$0xff] }
 0x9b3   : > { %v6283_v60 = vcombine.high %v6279_v50, %v6279_v50  ;;  %6287 = vst.msk [vmem:[#allocation4 + $0x9] sm:$0xf] %vm5984_vm6, %v6279_v50  ;;  %v10887_v50 = vcombine.low %v6570_v4, %v6578_v38  ;;  %v10923_v20 = vcombine.low %v7121_v44, %v7129_v61 }
 0x9b4   : > { %6791 = vmatprep.subr.bf16.mxu1 %v10892_v52  ;;  %v7662_v52 = vld [vmem:[%s15687_s13 + $0x108] sm:$0xff] }
 0x9b5   : > { %6288 = vst.msk [vmem:[#allocation4 + $0x11] sm:$0xf] %vm5984_vm6, %v6283_v60  ;;  %v10888_v60 = vcombine.high %v6570_v4, %v6578_v38  ;;  %v10924_v4 = vcombine.high %v7121_v44, %v7129_v61  ;;  %v7118_v38 = vld [vmem:[%s15687_s13 + $0xa0] sm:$0xff] }
 0x9b7   : > { %6709 = vmatprep.subr.bf16.mxu0 %v10888_v60 }
 0x9ba   : > { %v11546_v62 = vld [vmem:[#allocation4 + $0x2] ss:$8 sps:$4 sm:$0xff]  }
 0x9bb   : > { %v11547_v42 = vld [vmem:[#allocation4 + $0x1] ss:$8 sps:$4 sm:$0xff]   ;;  %6333 = vrot.lane.b32.xlu1 %v11546_v62, %s15730_s27 }
 0x9bc   : > { %6315 = vrot.lane.b32.xlu0 %v11547_v42, %s15736_s22  ;;  %v11548_v7 = vld [vmem:[#allocation4 + $0x9] ss:$8 sps:$4 sm:$0xff]  }
 0x9bd   : > { %v11549_v14 = vld [vmem:[#allocation4 + $0x8] ss:$8 sps:$4 sm:$0xff]  }
 0x9be   : > { %v11561_v10 = vld [vmem:[#allocation4] ss:$8 sps:$4 sm:$0xff]  }
 0x9bf   : > { %6369 = vrot.lane.b32.xlu1 %v11548_v7, %s15737_s5  ;;  %v11550_v32 = vld [vmem:[#allocation4 + $0xa] ss:$8 sps:$4 sm:$0xff]   ;;  %6303 = vst.msk [vmem:[#allocation5] sm:$0xff] %vm563_vm0, %v11561_v10 }
 0x9c0   : > { %6351 = vrot.lane.b32.xlu0 %v11549_v14, %s15734_s18 }
 0x9c3   : > { %6387 = vrot.lane.b32.xlu1 %v11550_v32, %s15735_s1 }
 0x9c9   : > { %v6271_v9 = vpop.f32.mrb[66].mxu0 }
 0x9ca   : > { %v6272_v47 = vadd.f32 %v10879_v3, %v6271_v9  ;;  %v6273_v0 = vpop.f32.mrb[67].mxu0  ;;  %v12001_v3 = vmov 0  }
 0x9cb   : > { %6700 = vmatprep.mubr.bf16.mxu0 %v12001_v3 }
 0x9cc   : > { %vm6276_vm8 = vcmp.gt.f32.partialorder %v6272_v47, 0.0  ;;  %v6278_v39 = vmul.f32 0.01, %v6272_v47 }
 0x9ce   : > { %v6280_v48 = vsel %vm6276_vm8, %v6272_v47, %v6278_v39 }
 0x9cf   : > { %v6284_v35 = vcombine.high %v6280_v48, %v6280_v48  ;;  %6289 = vst.msk [vmem:[#allocation4 + $0x19] sm:$0xf] %vm5984_vm6, %v6280_v48 }
 0x9d1   : > { %6290 = vst.msk [vmem:[#allocation4 + $0x21] sm:$0xf] %vm5984_vm6, %v6284_v35  ;;  %v6571_v35 = vld [vmem:[%s15687_s13 + $0x10] sm:$0xff] }
 0x9d6   : > { %v11551_v23 = vld [vmem:[#allocation4 + $0x10] ss:$8 sps:$4 sm:$0xff]  }
 0x9d7   : > { %v11552_v11 = vld [vmem:[#allocation4 + $0x11] ss:$8 sps:$4 sm:$0xff]   ;;  %6405 = vrot.lane.b32.xlu1 %v11551_v23, %s15731_s30  ;;  %v6584_v23 = vld [vmem:[%s15687_s13 + $0x78] sm:$0xff] }
 0x9d8   : > { %6317 = vrot.lane.b32.xlu0 %v11552_v11, %s15736_s22  ;;  %v11555_v57 = vld [vmem:[#allocation4 + $0x12] ss:$8 sps:$4 sm:$0xff]   ;;  %v11563_v27 = vld [vmem:[#allocation4 + $0x22] ss:$8 sps:$4 sm:$0xff]  }
 0x9d9   : > { %v11553_v6 = vld [vmem:[#allocation4 + $0x11] ss:$8 sps:$4 sm:$0xff]   ;;  %6443 = vst.msk [vmem:[#allocation5 + $0x8] sm:$0xff] %vm563_vm0, %v11555_v57  ;;  %6444 = vst.msk [vmem:[#allocation5 + $0x18] sm:$0xff] %vm563_vm0, %v11563_v27  ;;  %v11558_v29 = vld [vmem:[#allocation4 + $0x21] ss:$8 sps:$4 sm:$0xff]   ;;  %v10890_v57 = vcombine.high %v6571_v35, %v6579_v43 }
 0x9da   : > { %v11554_v15 = vld [vmem:[#allocation4 + $0x12] ss:$8 sps:$4 sm:$0xff]   ;;  %v11560_v22 = vld [vmem:[#allocation4 + $0x20] ss:$8 sps:$4 sm:$0xff]  }
 0x9db   : > { %6423 = vrot.lane.b32.xlu1 %v11553_v6, %s15732_s23  ;;  %v11556_v18 = vld [vmem:[#allocation4 + $0x1a] ss:$8 sps:$4 sm:$0xff]   ;;  %v10900_v6 = vcombine.high %v6576_v36, %v6584_v23 }
 0x9dc   : > { %6335 = vrot.lane.b32.xlu0 %v11554_v15, %s15730_s27  ;;  %v11562_v41 = vld [vmem:[#allocation4 + $0x10] ss:$8 sps:$4 sm:$0xff]   ;;  %s10793_s27 = sshll.u32 %s15739_s25, 1 }
 0x9dd   : > { %v11557_v59 = vld [vmem:[#allocation4 + $0x18] ss:$8 sps:$4 sm:$0xff]   ;;  %6304 = vst.msk [vmem:[#allocation5 + $0x10] sm:$0xff] %vm563_vm0, %v11562_v41  ;;  %v6573_v15 = vld [vmem:[%s15687_s13 + $0x20] sm:$0xff] }
 0x9de   : > { %v11559_v8 = vld [vmem:[#allocation4 + $0x19] ss:$8 sps:$4 sm:$0xff]  }
 0x9df   : > { %6389 = vrot.lane.b32.xlu1 %v11556_v18, %s15735_s1  ;;  %v6581_v18 = vld [vmem:[%s15687_s13 + $0x60] sm:$0xff]  ;;  %v7115_v41 = vld [vmem:[%s15687_s13 + $0x88] sm:$0xff] }
 0x9e0   : > { %6353 = vrot.lane.b32.xlu0 %v11557_v59, %s15734_s18  ;;  %v6446_v28 = vld [vmem:[#allocation5 + $0x8] sm:$0xff]  ;;  %v6448_v34 = vld [vmem:[#allocation5 + $0x18] sm:$0xff]  ;;  %v10889_v59 = vcombine.low %v6571_v35, %v6579_v43  ;;  %s561_s18 = scalar_lea.vmem %s15691_s17, %s10793_s27 }
 0x9e1   : > { %10883 = vmatprep.mubr.msk.f32.mxu1 %vm563_vm0, %v6446_v28  ;;  %v7123_v27 = vld [vmem:[%s15687_s13 + $0xc8] sm:$0xff]  ;;  %v10899_v28 = vcombine.low %v6576_v36, %v6584_v23  ;;  %v7663_v36 = vld [vmem:[%s15687_s13 + $0x110] sm:$0xff] }
 0x9e2   : > { %v7671_v23 = vld [vmem:[%s15687_s13 + $0x150] sm:$0xff] }
 0x9e3   : > { %6425 = vrot.lane.b32.xlu1 %v11558_v29, %s15732_s23  ;;  %v10894_v29 = vcombine.high %v6573_v15, %v6581_v18 }
 0x9e4   : > { %6371 = vrot.lane.b32.xlu0 %v11559_v8, %s15737_s5  ;;  %v10912_v8 = vcombine.high %v7115_v41, %v7123_v27 }
 0x9e8   : > { %6407 = vrot.lane.b32.xlu0 %v11560_v22, %s15731_s30  ;;  %v6575_v22 = vld [vmem:[%s15687_s13 + $0x30] sm:$0xff] }
 0xa2d   : > { %v6334_v26 = vpop.permute.xlu1 %6333 }
 0xa2e   : > { %v6316_v16 = vpop.permute.xlu0 %6315 }
 0xa2f   : > { %6321 = vst.msk [vmem:[#allocation5] sm:$0xff] %vm2977_vm13, %v6316_v16  ;;  %v7117_v16 = vld [vmem:[%s15687_s13 + $0x98] sm:$0xff] }
 0xa30   : > { %6339 = vst.msk [vmem:[#allocation5] sm:$0xff] %vm3170_vm14, %v6334_v26  ;;  %v6583_v26 = vld [vmem:[%s15687_s13 + $0x70] sm:$0xff] }
 0xa31   : > { %v6370_v17 = vpop.permute.xlu1 %6369 }
 0xa32   : > { %v6352_v33 = vpop.permute.xlu0 %6351 }
 0xa33   : > { %6357 = vst.msk [vmem:[#allocation5] sm:$0xff] %vm3363_vm15, %v6352_v33  ;;  %v10893_v33 = vcombine.low %v6573_v15, %v6581_v18  ;;  %v10938_v18 = vcombine.high %v7663_v36, %v7671_v23 }
 0xa34   : > { %6375 = vst.msk [vmem:[#allocation5] sm:$0xff] %vm3556_vm1, %v6370_v17  ;;  %v7125_v17 = vld [vmem:[%s15687_s13 + $0xd8] sm:$0xff] }
 0xa35   : > { %v6388_v40 = vpop.permute.xlu1 %6387 }
 0xa36   : > { %6393 = vst.msk [vmem:[#allocation5] sm:$0xff] %vm3749_vm2, %v6388_v40  ;;  %v10911_v40 = vcombine.low %v7115_v41, %v7123_v27  ;;  %v7665_v27 = vld [vmem:[%s15687_s13 + $0x120] sm:$0xff] }
 0xa49   : > { %v6406_v58 = vpop.permute.xlu1 %6405 }
 0xa4a   : > { %6411 = vst.msk [vmem:[#allocation5] sm:$0xff] %vm3942_vm3, %v6406_v58  ;;  %v6318_v55 = vpop.permute.xlu0 %6317  ;;  %v10898_v58 = vcombine.high %v6575_v22, %v6583_v26 }
 0xa4b   : > { %6322 = vst.msk [vmem:[#allocation5 + $0x10] sm:$0xff] %vm2977_vm13, %v6318_v55  ;;  %v10916_v55 = vcombine.high %v7117_v16, %v7125_v17 }
 0xa4d   : > { %v6424_v51 = vpop.permute.xlu1 %6423 }
 0xa4e   : > { %6429 = vst.msk [vmem:[#allocation5] sm:$0xff] %vm4135_vm4, %v6424_v51  ;;  %v6336_v56 = vpop.permute.xlu0 %6335  ;;  %v7114_v51 = vld [vmem:[%s15687_s13 + $0x80] sm:$0xff] }
 0xa4f   : > { %6340 = vst.msk [vmem:[#allocation5 + $0x10] sm:$0xff] %vm3170_vm14, %v6336_v56  ;;  %v7122_v56 = vld [vmem:[%s15687_s13 + $0xc0] sm:$0xff] }
 0xa50   : > { %v10909_v12 = vcombine.low %v7114_v51, %v7122_v56 }
 0xa51   : > { %v6390_v31 = vpop.permute.xlu1 %6389 }
 0xa52   : > { %v6354_v63 = vpop.permute.xlu0 %6353 }
 0xa53   : > { %6358 = vst.msk [vmem:[#allocation5 + $0x10] sm:$0xff] %vm3363_vm15, %v6354_v63  ;;  %v7119_v63 = vld [vmem:[%s15687_s13 + $0xa8] sm:$0xff] }
 0xa55   : > { %v6445_v19 = vld [vmem:[#allocation5] sm:$0xff]  ;;  %v6426_v46 = vpop.permute.xlu1 %6425 }
 0xa56   : > { %v6372_v37 = vpop.permute.xlu0 %6371  ;;  %6545 = vmatmul.mubr.f32.vlgmr.msra.gmra.mrb[64].mxu1 %v6445_v19  ;;  %v10897_v19 = vcombine.low %v6575_v22, %v6583_v26 }
 0xa57   : > { %6376 = vst.msk [vmem:[#allocation5 + $0x10] sm:$0xff] %vm3556_vm1, %v6372_v37  ;;  %10884 = vmatprep.mubr.msk.f32.mxu1 %vm563_vm0, %v6448_v34  ;;  %6792 = vmatpush1.bf16.msra.mxu1 %v10891_v49  ;;  %v10915_v37 = vcombine.low %v7117_v16, %v7125_v17  ;;  %v7126_v49 = vld [vmem:[%s15687_s13 + $0xe0] sm:$0xff]  ;;  %v7667_v17 = vld [vmem:[%s15687_s13 + $0x130] sm:$0xff] }
 0xa58   : > { %6394 = vst.msk [vmem:[#allocation5 + $0x10] sm:$0xff] %vm3749_vm2, %v6390_v31  ;;  %6873 = vmatprep.subr.bf16.mxu1 %v10896_v53  ;;  %v7127_v31 = vld [vmem:[%s15687_s13 + $0xe8] sm:$0xff]  ;;  %v10918_v30 = vcombine.high %v7118_v38, %v7126_v49  ;;  %v7120_v53 = vld [vmem:[%s15687_s13 + $0xb0] sm:$0xff] }
 0xa59   : > { %v10919_v54 = vcombine.low %v7119_v63, %v7127_v31 }
 0xa5a   : > { %v6408_v45 = vpop.permute.xlu0 %6407 }
 0xa5b   : > { %6412 = vst.msk [vmem:[#allocation5 + $0x10] sm:$0xff] %vm3942_vm3, %v6408_v45  ;;  %v10910_v45 = vcombine.high %v7114_v51, %v7122_v56 }
 0xa5c   : > { %6430 = vst.msk [vmem:[#allocation5 + $0x10] sm:$0xff] %vm4135_vm4, %v6426_v46  ;;  %v10920_v46 = vcombine.high %v7119_v63, %v7127_v31  ;;  %v8208_v31 = vld [vmem:[%s15687_s13 + $0x180] sm:$0xff] }
 0xa63   : > { %v6447_v21 = vld [vmem:[#allocation5 + $0x10] sm:$0xff] }
 0xa64   : > { %6550 = vmatmul.mubr.f32.gmra.mrb[66].mxu1 %v6447_v21  ;;  %v7116_v21 = vld [vmem:[%s15687_s13 + $0x90] sm:$0xff] }
 0xa65   : > { %6823 = vmatprep.mubr.bf16.mxu1 %v12001_v3  ;;  %v10914_v2 = vcombine.high %v7116_v21, %v7124_v1  ;;  %v10913_v60 = vcombine.low %v7116_v21, %v7124_v1 }
 0xb29   : > { %v6546_v5 = vpop.f32.mrb[64].mxu1 }
 0xb2a   : > { %v6547_v62 = vadd.f32 %v10882_v25, %v6546_v5  ;;  %v6548_v42 = vpop.f32.mrb[65].mxu1  ;;  %v7664_v5 = vld [vmem:[%s15687_s13 + $0x118] sm:$0xff] }
 0xb2b   : > { %v10917_v42 = vcombine.low %v7118_v38, %v7126_v49 }
 0xb2c   : > { %v6555_v7 = vmax.f32 %v6547_v62, 0.0  ;;  %v7672_v62 = vld [vmem:[%s15687_s13 + $0x158] sm:$0xff] }
 0xb2e   : > { %6557 = vst.msk [vmem:[#allocation6] sm:$0xff] %vm563_vm0, %v6555_v7 }
 0xb37   : > { %v6551_v14 = vpop.f32.mrb[66].mxu1 }
 0xb38   : > { %v6552_v10 = vadd.f32 %v10882_v25, %v6551_v14  ;;  %v6553_v32 = vpop.f32.mrb[67].mxu1  ;;  %v7128_v25 = vld [vmem:[%s15687_s13 + $0xf0] sm:$0xff] }
 0xb39   : > { %v10922_v14 = vcombine.high %v7120_v53, %v7128_v25  ;;  %v7661_v32 = vld [vmem:[%s15687_s13 + $0x100] sm:$0xff] }
 0xb3a   : > { %v6556_v9 = vmax.f32 %v6552_v10, 0.0  ;;  %v10940_v10 = vcombine.high %v7664_v5, %v7672_v62 }
 0xb3c   : > { %6558 = vst.msk [vmem:[#allocation6 + $0x8] sm:$0xff] %vm563_vm0, %v6556_v9  ;;  %v7669_v9 = vld [vmem:[%s15687_s13 + $0x140] sm:$0xff] }
 0xb3d   : > { %v10934_v43 = vcombine.high %v7661_v32, %v7669_v9 }
 0xb43   : > { %v6559_v47 = vld [vmem:[#allocation6] ss:$2 sm:$0xff]  ;;  %v6560_v0 = vld [vmem:[#allocation6 + $0x1] ss:$2 sm:$0xff] }
 0xb44   : > { %v6561_v39 = vmax.f32 %v6559_v47, %v6560_v0  ;;  %v7666_v47 = vld [vmem:[%s15687_s13 + $0x128] sm:$0xff] }
 0xb45   : > { %v7674_v0 = vld [vmem:[%s15687_s13 + $0x168] sm:$0xff] }
 0xb46   : > { %v6565_v48 = vrot.slane %v6561_v39, 2  ;;  %v10943_v15 = vcombine.low %v7666_v47, %v7674_v0 }
 0xb48   : > { %v6567_v13 = vmax.f32 %v6561_v39, %v6565_v48  ;;  %v10921_v39 = vcombine.low %v7120_v53, %v7128_v25  ;;  %v10939_v48 = vcombine.low %v7664_v5, %v7672_v62  ;;  %v8214_v53 = vld [vmem:[%s15687_s13 + $0x1b0] sm:$0xff] }
 0xb49   : > { %v8222_v25 = vld [vmem:[%s15687_s13 + $0x1f0] sm:$0xff] }
 0xb4a   : > { %v15249_v11 = vpack.c.bf16 %v6567_v13, %v6567_v13  ;;  %v10944_v13 = vcombine.high %v7666_v47, %v7674_v0  ;;  %v10970_v62 = vcombine.high %v8214_v53, %v8222_v25  ;;  %v11575_v47 = vld [vmem:[#allocation8 + $0x314] ss:$8 sps:$4 sm:$0xff]   ;;  %v11570_v0 = vld [vmem:[#allocation8 + $0x10] ss:$8 sps:$4 sm:$0xff]  }
 0xb4c   : > { %10901 = vmatmul.mubr.msk.bf16.vlgmr.msra.gmra.mrb[68].mxu0 %vm563_vm0, %v15249_v11  ;;  %10904 = vmatmul.mubr.msk.bf16.vlgmr.msra.gmra.mrb[68].mxu1 %vm563_vm0, %v15249_v11  ;;  %v15306_v34 = vshrl.u32 %v15249_v11, 16  ;;  %v15381_v35 = vrot.slane %v15249_v11, 2 }
 0xb4d   : > { %6710 = vmatpush1.bf16.msra.mxu0 %v10887_v50  ;;  %6874 = vmatpush1.bf16.msra.mxu1 %v10895_v24  ;;  %v7670_v50 = vld [vmem:[%s15687_s13 + $0x148] sm:$0xff] }
 0xb4e   : > { %6741 = vmatprep.mubr.bf16.mxu0 %v12001_v3  ;;  %6750 = vmatprep.subr.bf16.mxu0 %v10890_v57  ;;  %v10936_v24 = vcombine.high %v7662_v52, %v7670_v50  ;;  %v10935_v7 = vcombine.low %v7662_v52, %v7670_v50  ;;  %v7676_v57 = vld [vmem:[%s15687_s13 + $0x178] sm:$0xff]  ;;  %v8224_v1 = vrot.slane %v15306_v34, 2  ;;  %v8212_v50 = vld [vmem:[%s15687_s13 + $0x1a0] sm:$0xff] }
 0xb4f   : > { %6905 = vmatprep.mubr.bf16.mxu1 %v12001_v3  ;;  %6955 = vmatprep.subr.bf16.mxu1 %v10900_v6  ;;  %v10933_v6 = vcombine.low %v7661_v32, %v7669_v9  ;;  %v11567_v32 = vld [vmem:[#allocation8 + $0x300] ss:$8 sps:$4 sm:$0xff]   ;;  %v11572_v9 = vld [vmem:[#allocation8 + $0x14] ss:$8 sps:$4 sm:$0xff]  }
 0xb54   : > { %10902 = vmatmul.mubr.msk.bf16.vlgmr.msra.gmra.mrb[72].mxu0 %vm563_vm0, %v15249_v11  ;;  %10906 = vmatmul.mubr.msk.bf16.vlgmr.msra.gmra.mrb[72].mxu1 %vm563_vm0, %v15249_v11 }
 0xb55   : > { %6751 = vmatpush1.bf16.msra.mxu0 %v10889_v59  ;;  %6956 = vmatpush1.bf16.msra.mxu1 %v10899_v28  ;;  %v7673_v59 = vld [vmem:[%s15687_s13 + $0x160] sm:$0xff]  ;;  %v8209_v28 = vld [vmem:[%s15687_s13 + $0x188] sm:$0xff] }
 0xb56   : > { %6782 = vmatprep.mubr.bf16.mxu0 %v12001_v3  ;;  %6832 = vmatprep.subr.bf16.mxu0 %v10894_v29  ;;  %v8217_v29 = vld [vmem:[%s15687_s13 + $0x1c8] sm:$0xff]  ;;  %v10942_v26 = vcombine.high %v7665_v27, %v7673_v59 }
 0xb57   : > { %6987 = vmatprep.mubr.bf16.mxu1 %v12001_v3  ;;  %7256 = vmatprep.subr.bf16.mxu1 %v10912_v8  ;;  %v10937_v8 = vcombine.low %v7663_v36, %v7671_v23  ;;  %v10960_v16 = vcombine.high %v8209_v28, %v8217_v29  ;;  %v10959_v51 = vcombine.low %v8209_v28, %v8217_v29  ;;  %v11587_v36 = vld [vmem:[#allocation8 + $0x334] ss:$8 sps:$4 sm:$0xff]   ;;  %v11582_v23 = vld [vmem:[#allocation8 + $0x30] ss:$8 sps:$4 sm:$0xff]   ;;  %v11602_v29 = vld [vmem:[#allocation8 + $0x64] ss:$8 sps:$4 sm:$0xff]  }
 0xb58   : > { %v11597_v28 = vld [vmem:[#allocation8 + $0x350] ss:$8 sps:$4 sm:$0xff]  }
 0xb5c   : > { %10903 = vmatmul.mubr.msk.bf16.vlgmr.msra.gmra.mrb[76].mxu0 %vm563_vm0, %v15249_v11  ;;  %10908 = vmatmul.mubr.msk.bf16.vlgmr.msra.gmra.mrb[76].mxu1 %vm563_vm0, %v15249_v11 }
 0xb5d   : > { %6833 = vmatpush1.bf16.msra.mxu0 %v10893_v33  ;;  %7257 = vmatpush1.bf16.msra.mxu1 %v10911_v40  ;;  %v7675_v33 = vld [vmem:[%s15687_s13 + $0x170] sm:$0xff]  ;;  %v8211_v40 = vld [vmem:[%s15687_s13 + $0x198] sm:$0xff] }
 0xb5e   : > { %6864 = vmatprep.mubr.bf16.mxu0 %v12001_v3  ;;  %6914 = vmatprep.subr.bf16.mxu0 %v10898_v58  ;;  %v8219_v58 = vld [vmem:[%s15687_s13 + $0x1d8] sm:$0xff]  ;;  %v10946_v56 = vcombine.high %v7667_v17, %v7675_v33 }
 0xb5f   : > { %7288 = vmatprep.mubr.bf16.mxu1 %v12001_v3  ;;  %7338 = vmatprep.subr.bf16.mxu1 %v10916_v55  ;;  %v10941_v55 = vcombine.low %v7665_v27, %v7673_v59  ;;  %v10964_v63 = vcombine.high %v8211_v40, %v8219_v58  ;;  %v10963_v21 = vcombine.low %v8211_v40, %v8219_v58  ;;  %v11599_v27 = vld [vmem:[#allocation8 + $0x354] ss:$8 sps:$4 sm:$0xff]   ;;  %v11594_v59 = vld [vmem:[#allocation8 + $0x50] ss:$8 sps:$4 sm:$0xff]   ;;  %v11614_v58 = vld [vmem:[#allocation8 + $0x84] ss:$8 sps:$4 sm:$0xff]  }
 0xb60   : > { %v11609_v40 = vld [vmem:[#allocation8 + $0x370] ss:$8 sps:$4 sm:$0xff]  }
 0xb64   : > { %10905 = vmatmul.mubr.msk.bf16.vlgmr.msra.gmra.mrb[80].mxu0 %vm563_vm0, %v15249_v11  ;;  %10926 = vmatmul.mubr.msk.bf16.vlgmr.msra.gmra.mrb[80].mxu1 %vm563_vm0, %v15306_v34 }
 0xb65   : > { %6915 = vmatpush1.bf16.msra.mxu0 %v10897_v19  ;;  %7339 = vmatpush1.bf16.msra.mxu1 %v10915_v37  ;;  %v8216_v19 = vld [vmem:[%s15687_s13 + $0x1c0] sm:$0xff]  ;;  %v8213_v37 = vld [vmem:[%s15687_s13 + $0x1a8] sm:$0xff] }
 0xb66   : > { %6946 = vmatprep.mubr.bf16.mxu0 %v12001_v3  ;;  %7215 = vmatprep.subr.bf16.mxu0 %v10910_v45  ;;  %v8221_v45 = vld [vmem:[%s15687_s13 + $0x1e8] sm:$0xff]  ;;  %v10958_v44 = vcombine.high %v8208_v31, %v8216_v19 }
 0xb67   : > { %7370 = vmatprep.mubr.bf16.mxu1 %v12001_v3  ;;  %7420 = vmatprep.subr.bf16.mxu1 %v10920_v46  ;;  %v10945_v46 = vcombine.low %v7667_v17, %v7675_v33  ;;  %v10968_v61 = vcombine.high %v8213_v37, %v8221_v45  ;;  %v10967_v38 = vcombine.low %v8213_v37, %v8221_v45  ;;  %v11611_v17 = vld [vmem:[#allocation8 + $0x374] ss:$8 sps:$4 sm:$0xff]   ;;  %v11606_v33 = vld [vmem:[#allocation8 + $0x70] ss:$8 sps:$4 sm:$0xff]   ;;  %v11626_v45 = vld [vmem:[#allocation8 + $0xa4] ss:$8 sps:$4 sm:$0xff]  }
 0xb68   : > { %v11621_v37 = vld [vmem:[#allocation8 + $0x390] ss:$8 sps:$4 sm:$0xff]  }
 0xb6c   : > { %10907 = vmatmul.mubr.msk.bf16.vlgmr.msra.gmra.mrb[84].mxu0 %vm563_vm0, %v15249_v11  ;;  %10928 = vmatmul.mubr.msk.bf16.vlgmr.msra.gmra.mrb[84].mxu1 %vm563_vm0, %v15306_v34  ;;  %v7668_v11 = vld [vmem:[%s15687_s13 + $0x138] sm:$0xff] }
 0xb6d   : > { %7216 = vmatpush1.bf16.msra.mxu0 %v10909_v12  ;;  %7421 = vmatpush1.bf16.msra.mxu1 %v10919_v54  ;;  %v10948_v41 = vcombine.high %v7668_v11, %v7676_v57  ;;  %v10947_v22 = vcombine.low %v7668_v11, %v7676_v57  ;;  %v8210_v12 = vld [vmem:[%s15687_s13 + $0x190] sm:$0xff]  ;;  %v8215_v54 = vld [vmem:[%s15687_s13 + $0x1b8] sm:$0xff]  ;;  %v11590_v57 = vld [vmem:[#allocation8 + $0x44] ss:$8 sps:$4 sm:$0xff]  }
 0xb6e   : > { %7247 = vmatprep.mubr.bf16.mxu0 %v12001_v3  ;;  %7297 = vmatprep.subr.bf16.mxu0 %v10914_v2  ;;  %v8223_v2 = vld [vmem:[%s15687_s13 + $0x1f8] sm:$0xff] }
 0xb6f   : > { %7452 = vmatprep.mubr.bf16.mxu1 %v12001_v3  ;;  %7502 = vmatprep.subr.bf16.mxu1 %v10924_v4  ;;  %v10957_v4 = vcombine.low %v8208_v31, %v8216_v19  ;;  %v10972_v52 = vcombine.high %v8215_v54, %v8223_v2  ;;  %v11585_v11 = vld [vmem:[#allocation8 + $0x330] ss:$8 sps:$4 sm:$0xff]   ;;  %v11623_v31 = vld [vmem:[#allocation8 + $0x394] ss:$8 sps:$4 sm:$0xff]  }
 0xb70   : > { %v11618_v19 = vld [vmem:[#allocation8 + $0x90] ss:$8 sps:$4 sm:$0xff]  }
 0xb74   : > { %10925 = vmatmul.mubr.msk.bf16.vlgmr.msra.gmra.mrb[88].mxu0 %vm563_vm0, %v15306_v34  ;;  %10930 = vmatmul.mubr.msk.bf16.vlgmr.msra.gmra.mrb[88].mxu1 %vm563_vm0, %v15306_v34 }
 0xb75   : > { %7298 = vmatpush1.bf16.msra.mxu0 %v10913_v60  ;;  %7503 = vmatpush1.bf16.msra.mxu1 %v10923_v20  ;;  %v8220_v60 = vld [vmem:[%s15687_s13 + $0x1e0] sm:$0xff] }
 0xb76   : > { %7329 = vmatprep.mubr.bf16.mxu0 %v12001_v3  ;;  %7379 = vmatprep.subr.bf16.mxu0 %v10918_v30  ;;  %v10971_v30 = vcombine.low %v8215_v54, %v8223_v2  ;;  %v10965_v5 = vcombine.low %v8212_v50, %v8220_v60  ;;  %v11638_v54 = vld [vmem:[#allocation8 + $0xc4] ss:$8 sps:$4 sm:$0xff]  }
 0xb77   : > { %7534 = vmatprep.mubr.bf16.mxu1 %v12001_v3  ;;  %7803 = vmatprep.subr.bf16.mxu1 %v10936_v24  ;;  %v10966_v24 = vcombine.high %v8212_v50, %v8220_v60  ;;  %v11641_v2 = vld [vmem:[#allocation8 + $0x3c4] ss:$8 sps:$4 sm:$0xff]   ;;  %v11642_v50 = vld [vmem:[#allocation8 + $0xd0] ss:$8 sps:$4 sm:$0xff]  }
 0xb78   : > { %v11645_v60 = vld [vmem:[#allocation8 + $0x3d0] ss:$8 sps:$4 sm:$0xff]  }
 0xb7c   : > { %10927 = vmatmul.mubr.msk.bf16.vlgmr.msra.gmra.mrb[92].mxu0 %vm563_vm0, %v15306_v34  ;;  %10932 = vmatmul.mubr.msk.bf16.vlgmr.msra.gmra.mrb[92].mxu1 %vm563_vm0, %v15306_v34 }
 0xb7d   : > { %7380 = vmatpush1.bf16.msra.mxu0 %v10917_v42  ;;  %7804 = vmatpush1.bf16.msra.mxu1 %v10935_v7  ;;  %v10969_v42 = vcombine.low %v8214_v53, %v8222_v25  ;;  %v11566_v7 = vld [vmem:[#allocation8 + $0x4] ss:$8 sps:$4 sm:$0xff]   ;;  %v12002_v25 = vmov 1966171168  }
 0xb7e   : > { %7411 = vmatprep.mubr.bf16.mxu0 %v12001_v3  ;;  %7461 = vmatprep.subr.bf16.mxu0 %v10922_v14  ;;  %v11569_v14 = vld [vmem:[#allocation8 + $0x304] ss:$8 sps:$4 sm:$0xff]  }
 0xb7f   : > { %7835 = vmatprep.mubr.bf16.mxu1 %v12001_v3  ;;  %7885 = vmatprep.subr.bf16.mxu1 %v10940_v10  ;;  %v11564_v10 = vld [vmem:[#allocation8] ss:$8 sps:$4 sm:$0xff]  }
 0xb84   : > { %10929 = vmatmul.mubr.msk.bf16.vlgmr.msra.gmra.mrb[96].mxu0 %vm563_vm0, %v15306_v34  ;;  %10950 = vmatmul.mubr.msk.bf16.vlgmr.msra.gmra.mrb[96].mxu1 %vm563_vm0, %v15381_v35 }
 0xb85   : > { %7462 = vmatpush1.bf16.msra.mxu0 %v10921_v39  ;;  %7886 = vmatpush1.bf16.msra.mxu1 %v10939_v48  ;;  %v11573_v39 = vld [vmem:[#allocation8 + $0x310] ss:$8 sps:$4 sm:$0xff]   ;;  %v11578_v48 = vld [vmem:[#allocation8 + $0x24] ss:$8 sps:$4 sm:$0xff]  }
 0xb86   : > { %7493 = vmatprep.mubr.bf16.mxu0 %v12001_v3  ;;  %7762 = vmatprep.subr.bf16.mxu0 %v10934_v43  ;;  %v11579_v43 = vld [vmem:[#allocation8 + $0x320] ss:$8 sps:$4 sm:$0xff]  }
 0xb87   : > { %7917 = vmatprep.mubr.bf16.mxu1 %v12001_v3  ;;  %7967 = vmatprep.subr.bf16.mxu1 %v10944_v13  ;;  %v11584_v13 = vld [vmem:[#allocation8 + $0x34] ss:$8 sps:$4 sm:$0xff]  }
 0xb8c   : > { %10931 = vmatmul.mubr.msk.bf16.vlgmr.msra.gmra.mrb[100].mxu0 %vm563_vm0, %v15306_v34  ;;  %10952 = vmatmul.mubr.msk.bf16.vlgmr.msra.gmra.mrb[100].mxu1 %vm563_vm0, %v15381_v35  ;;  %v8218_v34 = vld [vmem:[%s15687_s13 + $0x1d0] sm:$0xff] }
 0xb8d   : > { %7763 = vmatpush1.bf16.msra.mxu0 %v10933_v6  ;;  %7968 = vmatpush1.bf16.msra.mxu1 %v10943_v15  ;;  %v10962_v49 = vcombine.high %v8210_v12, %v8218_v34  ;;  %v10961_v20 = vcombine.low %v8210_v12, %v8218_v34  ;;  %v11593_v6 = vld [vmem:[#allocation8 + $0x344] ss:$8 sps:$4 sm:$0xff]   ;;  %v11588_v15 = vld [vmem:[#allocation8 + $0x40] ss:$8 sps:$4 sm:$0xff]   ;;  %v11630_v12 = vld [vmem:[#allocation8 + $0xb0] ss:$8 sps:$4 sm:$0xff]  }
 0xb8e   : > { %7794 = vmatprep.mubr.bf16.mxu0 %v12001_v3  ;;  %7844 = vmatprep.subr.bf16.mxu0 %v10938_v18  ;;  %v11591_v18 = vld [vmem:[#allocation8 + $0x340] ss:$8 sps:$4 sm:$0xff]   ;;  %v11633_v34 = vld [vmem:[#allocation8 + $0x3b0] ss:$8 sps:$4 sm:$0xff]  }
 0xb8f   : > { %7999 = vmatprep.mubr.bf16.mxu1 %v12001_v3  ;;  %8049 = vmatprep.subr.bf16.mxu1 %v10948_v41  ;;  %v11596_v41 = vld [vmem:[#allocation8 + $0x54] ss:$8 sps:$4 sm:$0xff]  }
 0xb94   : > { %10949 = vmatmul.mubr.msk.bf16.vlgmr.msra.gmra.mrb[104].mxu0 %vm563_vm0, %v15381_v35  ;;  %10954 = vmatmul.mubr.msk.bf16.vlgmr.msra.gmra.mrb[104].mxu1 %vm563_vm0, %v15381_v35 }
 0xb95   : > { %7845 = vmatpush1.bf16.msra.mxu0 %v10937_v8  ;;  %8050 = vmatpush1.bf16.msra.mxu1 %v10947_v22  ;;  %v11605_v8 = vld [vmem:[#allocation8 + $0x364] ss:$8 sps:$4 sm:$0xff]   ;;  %v11600_v22 = vld [vmem:[#allocation8 + $0x60] ss:$8 sps:$4 sm:$0xff]  }
 0xb96   : > { %7876 = vmatprep.mubr.bf16.mxu0 %v12001_v3  ;;  %7926 = vmatprep.subr.bf16.mxu0 %v10942_v26  ;;  %v11603_v26 = vld [vmem:[#allocation8 + $0x360] ss:$8 sps:$4 sm:$0xff]  }
 0xb97   : > { %8081 = vmatprep.mubr.bf16.mxu1 %v12001_v3  ;;  %8349 = vmatprep.subr.bf16.mxu1 %v10960_v16  ;;  %v11608_v16 = vld [vmem:[#allocation8 + $0x74] ss:$8 sps:$4 sm:$0xff]  }
 0xb9c   : > { %10951 = vmatmul.mubr.msk.bf16.vlgmr.msra.gmra.mrb[108].mxu0 %vm563_vm0, %v15381_v35  ;;  %10956 = vmatmul.mubr.msk.bf16.vlgmr.msra.gmra.mrb[108].mxu1 %vm563_vm0, %v15381_v35 }
 0xb9d   : > { %7927 = vmatpush1.bf16.msra.mxu0 %v10941_v55  ;;  %8350 = vmatpush1.bf16.msra.mxu1 %v10959_v51  ;;  %v11617_v55 = vld [vmem:[#allocation8 + $0x384] ss:$8 sps:$4 sm:$0xff]   ;;  %v11612_v51 = vld [vmem:[#allocation8 + $0x80] ss:$8 sps:$4 sm:$0xff]  }
 0xb9e   : > { %7958 = vmatprep.mubr.bf16.mxu0 %v12001_v3  ;;  %8008 = vmatprep.subr.bf16.mxu0 %v10946_v56  ;;  %v11615_v56 = vld [vmem:[#allocation8 + $0x380] ss:$8 sps:$4 sm:$0xff]  }
 0xb9f   : > { %8381 = vmatprep.mubr.bf16.mxu1 %v12001_v3  ;;  %8431 = vmatprep.subr.bf16.mxu1 %v10964_v63  ;;  %v11620_v63 = vld [vmem:[#allocation8 + $0x94] ss:$8 sps:$4 sm:$0xff]  }
 0xba4   : > { %10953 = vmatmul.mubr.msk.bf16.vlgmr.msra.gmra.mrb[112].mxu0 %vm563_vm0, %v15381_v35  ;;  %10974 = vmatmul.mubr.msk.bf16.vlgmr.msra.gmra.mrb[112].mxu1 %vm563_vm0, %v8224_v1 }
 0xba5   : > { %8009 = vmatpush1.bf16.msra.mxu0 %v10945_v46  ;;  %8432 = vmatpush1.bf16.msra.mxu1 %v10963_v21  ;;  %v11629_v46 = vld [vmem:[#allocation8 + $0x3a4] ss:$8 sps:$4 sm:$0xff]   ;;  %v11624_v21 = vld [vmem:[#allocation8 + $0xa0] ss:$8 sps:$4 sm:$0xff]  }
 0xba6   : > { %8040 = vmatprep.mubr.bf16.mxu0 %v12001_v3  ;;  %8308 = vmatprep.subr.bf16.mxu0 %v10958_v44  ;;  %v11632_v44 = vld [vmem:[#allocation8 + $0xb4] ss:$8 sps:$4 sm:$0xff]  }
 0xba7   : > { %8463 = vmatprep.mubr.bf16.mxu1 %v12001_v3  ;;  %8513 = vmatprep.subr.bf16.mxu1 %v10968_v61  ;;  %v11635_v61 = vld [vmem:[#allocation8 + $0x3b4] ss:$8 sps:$4 sm:$0xff]  }
 0xbac   : > { %10955 = vmatmul.mubr.msk.bf16.vlgmr.msra.gmra.mrb[116].mxu0 %vm563_vm0, %v15381_v35  ;;  %10976 = vmatmul.mubr.msk.bf16.vlgmr.msra.gmra.mrb[116].mxu1 %vm563_vm0, %v8224_v1  ;;  %v11576_v35 = vld [vmem:[#allocation8 + $0x20] ss:$8 sps:$4 sm:$0xff]  }
 0xbad   : > { %8309 = vmatpush1.bf16.msra.mxu0 %v10957_v4  ;;  %8514 = vmatpush1.bf16.msra.mxu1 %v10967_v38  ;;  %v11636_v4 = vld [vmem:[#allocation8 + $0xc0] ss:$8 sps:$4 sm:$0xff]  }
 0xbae   : > { %8340 = vmatprep.mubr.bf16.mxu0 %v12001_v3  ;;  %8390 = vmatprep.subr.bf16.mxu0 %v10962_v49  ;;  %v11639_v38 = vld [vmem:[#allocation8 + $0x3c0] ss:$8 sps:$4 sm:$0xff]   ;;  %v11644_v49 = vld [vmem:[#allocation8 + $0xd4] ss:$8 sps:$4 sm:$0xff]  }
 0xbaf   : > { %8545 = vmatprep.mubr.bf16.mxu1 %v12001_v3  ;;  %8595 = vmatprep.subr.bf16.mxu1 %v10972_v52  ;;  %v11647_v52 = vld [vmem:[#allocation8 + $0x3d4] ss:$8 sps:$4 sm:$0xff]  }
 0xbb4   : > { %10973 = vmatmul.mubr.msk.bf16.vlgmr.msra.gmra.mrb[120].mxu0 %vm563_vm0, %v8224_v1  ;;  %10978 = vmatmul.mubr.msk.bf16.vlgmr.msra.gmra.mrb[120].mxu1 %vm563_vm0, %v8224_v1 }
 0xbb5   : > { %8391 = vmatpush1.bf16.msra.mxu0 %v10961_v20  ;;  %8596 = vmatpush1.bf16.msra.mxu1 %v10971_v30  ;;  %v11650_v20 = vld [vmem:[#allocation8 + $0xe4] ss:$8 sps:$4 sm:$0xff]  }
 0xbb6   : > { %8422 = vmatprep.mubr.bf16.mxu0 %v12001_v3  ;;  %8627 = vmatprep.mubr.bf16.mxu1 %v12001_v3  ;;  %v11653_v30 = vld [vmem:[#allocation8 + $0x3e4] ss:$8 sps:$4 sm:$0xff]  }
 0xbb7   : > { %8472 = vmatprep.subr.bf16.mxu0 %v10966_v24  ;;  %10368 = vmatprep.subr.bf16.mxu1 %v11566_v7  ;;  %v11651_v7 = vld [vmem:[#allocation8 + $0x3e0] ss:$8 sps:$4 sm:$0xff]  }
 0xbbc   : > { %10975 = vmatmul.mubr.msk.bf16.vlgmr.msra.gmra.mrb[124].mxu0 %vm563_vm0, %v8224_v1  ;;  %10980 = vmatmul.mubr.msk.bf16.vlgmr.msra.gmra.mrb[124].mxu1 %vm563_vm0, %v8224_v1 }
 0xbbd   : > { %8473 = vmatpush1.bf16.msra.mxu0 %v10965_v5  ;;  %8504 = vmatprep.mubr.bf16.mxu0 %v12001_v3  ;;  %v7017_v5 = vunpack.c.l.s4 %v12002_v25 }
 0xbbe   : > { %8554 = vmatprep.subr.bf16.mxu0 %v10970_v62  ;;  %10369 = vmatpush1.bf16.msra.mxu1 %v11564_v10  ;;  %v7019_v62 = vlaneseq }
 0xbbf   : > { %10370 = vmatprep.subr.bf16.mxu1 %v11572_v9  ;;  %v11656_v9 = vld [vmem:[#allocation8 + $0xf4] ss:$8 sps:$4 sm:$0xff]  }
 0xbc0   : > { %vm10716_vm13 = vcmp.lt.s32.totalorder %v7019_v62, 256 }
 0xbc2   : > { %10371 = vmatpush1.bf16.msra.mxu1 %v11570_v0 }
 0xbc3   : > { %10372 = vmatprep.subr.bf16.mxu1 %v11578_v48 }
 0xbc4   : > { %10977 = vmatmul.mubr.msk.bf16.vlgmr.msra.gmra.mrb[128].mxu0 %vm563_vm0, %v8224_v1 }
 0xbc5   : > { %8555 = vmatpush1.bf16.msra.mxu0 %v10969_v42  ;;  %8586 = vmatprep.mubr.bf16.mxu0 %v12001_v3  ;;  %v11581_v3 = vld [vmem:[#allocation8 + $0x324] ss:$8 sps:$4 sm:$0xff]   ;;  %v11648_v42 = vld [vmem:[#allocation8 + $0xe0] ss:$8 sps:$4 sm:$0xff]  }
 0xbc6   : > { %10491 = vmatprep.subr.bf16.mxu0 %v11569_v14  ;;  %10373 = vmatpush1.bf16.msra.mxu1 %v11576_v35  ;;  %v11659_v35 = vld [vmem:[#allocation8 + $0x3f4] ss:$8 sps:$4 sm:$0xff]  }
 0xbc7   : > { %10374 = vmatprep.subr.bf16.mxu1 %v11584_v13 }
 0xbca   : > { %10375 = vmatpush1.bf16.msra.mxu1 %v11582_v23  ;;  %v15501_v23 = vshrl.u32 %v7019_v62, 7 }
 0xbcb   : > { %10376 = vmatprep.subr.bf16.mxu1 %v11590_v57  ;;  %v11665_v57 = vld [vmem:[#allocation8 + $0x404] ss:$8 sps:$4 sm:$0xff]  }
 0xbcc   : > { %10979 = vmatmul.mubr.msk.bf16.vlgmr.msra.gmra.mrb[132].mxu0 %vm563_vm0, %v8224_v1  ;;  %v11627_v1 = vld [vmem:[#allocation8 + $0x3a0] ss:$8 sps:$4 sm:$0xff]   ;;  %vm10364_vm0 = vcmask 654336  }
 0xbcd   : > { %10492 = vmatpush1.bf16.msra.mxu0 %v11567_v32  ;;  %v11654_v32 = vld [vmem:[#allocation8 + $0xf0] ss:$8 sps:$4 sm:$0xff]  }
 0xbce   : > { %10493 = vmatprep.subr.bf16.mxu0 %v11575_v47  ;;  %10377 = vmatpush1.bf16.msra.mxu1 %v11588_v15 }
 0xbcf   : > { %10378 = vmatprep.subr.bf16.mxu1 %v11596_v41 }
 0xbd1   : > { %10494 = vmatpush1.bf16.msra.mxu0 %v11573_v39 }
 0xbd2   : > { %10495 = vmatprep.subr.bf16.mxu0 %v11581_v3  ;;  %10379 = vmatpush1.bf16.msra.mxu1 %v11594_v59  ;;  %v11657_v3 = vld [vmem:[#allocation8 + $0x3f0] ss:$8 sps:$4 sm:$0xff]  }
 0xbd3   : > { %10380 = vmatprep.subr.bf16.mxu1 %v11602_v29 }
 0xbd5   : > { %10496 = vmatpush1.bf16.msra.mxu0 %v11579_v43 }
 0xbd6   : > { %10497 = vmatprep.subr.bf16.mxu0 %v11587_v36  ;;  %10381 = vmatpush1.bf16.msra.mxu1 %v11600_v22  ;;  %v7018_v36 = vunpack.c.0.s8 %v7017_v5 }
 0xbd7   : > { %10382 = vmatprep.subr.bf16.mxu1 %v11608_v16 }
 0xbd9   : > { %10498 = vmatpush1.bf16.msra.mxu0 %v11585_v11  ;;  %v11662_v11 = vld [vmem:[#allocation8 + $0x104] ss:$8 sps:$4 sm:$0xff]  }
 0xbda   : > { %10499 = vmatprep.subr.bf16.mxu0 %v11593_v6  ;;  %10383 = vmatpush1.bf16.msra.mxu1 %v11606_v33  ;;  %v15504_v6 = vsub.s32 %v7018_v36, %v15501_v23 }
 0xbdb   : > { %10384 = vmatprep.subr.bf16.mxu1 %v11614_v58 }
 0xbdd   : > { %10500 = vmatpush1.bf16.msra.mxu0 %v11591_v18 }
 0xbde   : > { %10501 = vmatprep.subr.bf16.mxu0 %v11599_v27  ;;  %10385 = vmatpush1.bf16.msra.mxu1 %v11612_v51 }
 0xbdf   : > { %10386 = vmatprep.subr.bf16.mxu1 %v11620_v63 }
 0xbe1   : > { %10502 = vmatpush1.bf16.msra.mxu0 %v11597_v28 }
 0xbe2   : > { %10503 = vmatprep.subr.bf16.mxu0 %v11605_v8  ;;  %10387 = vmatpush1.bf16.msra.mxu1 %v11618_v19 }
 0xbe3   : > { %10388 = vmatprep.subr.bf16.mxu1 %v11626_v45 }
 0xbe5   : > { %10504 = vmatpush1.bf16.msra.mxu0 %v11603_v26 }
 0xbe6   : > { %10505 = vmatprep.subr.bf16.mxu0 %v11611_v17  ;;  %10389 = vmatpush1.bf16.msra.mxu1 %v11624_v21 }
 0xbe7   : > { %10390 = vmatprep.subr.bf16.mxu1 %v11632_v44 }
 0xbe9   : > { %10506 = vmatpush1.bf16.msra.mxu0 %v11609_v40 }
 0xbea   : > { %10507 = vmatprep.subr.bf16.mxu0 %v11617_v55  ;;  %10391 = vmatpush1.bf16.msra.mxu1 %v11630_v12 }
 0xbeb   : > { %10392 = vmatprep.subr.bf16.mxu1 %v11638_v54 }
 0xbed   : > { %10508 = vmatpush1.bf16.msra.mxu0 %v11615_v56 }
 0xbee   : > { %10509 = vmatprep.subr.bf16.mxu0 %v11623_v31  ;;  %10393 = vmatpush1.bf16.msra.mxu1 %v11636_v4 }
 0xbef   : > { %10394 = vmatprep.subr.bf16.mxu1 %v11644_v49 }
 0xbf1   : > { %10510 = vmatpush1.bf16.msra.mxu0 %v11621_v37 }
 0xbf2   : > { %10511 = vmatprep.subr.bf16.mxu0 %v11629_v46  ;;  %10395 = vmatpush1.bf16.msra.mxu1 %v11642_v50 }
 0xbf3   : > { %10396 = vmatprep.subr.bf16.mxu1 %v11650_v20 }
 0xbf5   : > { %10512 = vmatpush1.bf16.msra.mxu0 %v11627_v1 }
 0xbf6   : > { %10513 = vmatprep.subr.bf16.mxu0 %v11635_v61  ;;  %10397 = vmatpush1.bf16.msra.mxu1 %v11648_v42 }
 0xbf7   : > { %10398 = vmatprep.subr.bf16.mxu1 %v11656_v9 }
 0xbf9   : > { %10514 = vmatpush1.bf16.msra.mxu0 %v11633_v34 }
 0xbfa   : > { %10515 = vmatprep.subr.bf16.mxu0 %v11641_v2  ;;  %10399 = vmatpush1.bf16.msra.mxu1 %v11654_v32 }
 0xbfb   : > { %10409 = vmatprep.subr.bf16.mxu1 %v11662_v11 }
 0xbfd   : > { %10516 = vmatpush1.bf16.msra.mxu0 %v11639_v38 }
 0xbfe   : > { %10517 = vmatprep.subr.bf16.mxu0 %v11647_v52 }
 0xc01   : > { %10518 = vmatpush1.bf16.msra.mxu0 %v11645_v60 }
 0xc02   : > { %10519 = vmatprep.subr.bf16.mxu0 %v11653_v30 }
 0xc05   : > { %10520 = vmatpush1.bf16.msra.mxu0 %v11651_v7 }
 0xc06   : > { %10521 = vmatprep.subr.bf16.mxu0 %v11659_v35 }
 0xc09   : > { %10522 = vmatpush1.bf16.msra.mxu0 %v11657_v3 }
 0xc0a   : > { %10532 = vmatprep.subr.bf16.mxu0 %v11665_v57 }
 0xc1f   : > { %v6702_v24 = vpop.f32.mrb[68].mxu0  ;;  %v6825_v53 = vpop.f32.mrb[68].mxu1 }
 0xc20   : > { %v6704_v14 = vpop.f32.mrb[69].mxu0  ;;  %v6827_v10 = vpop.f32.mrb[69].mxu1 }
 0xc21   : > { %v7012_v47 = vcombine.low %v6702_v24, %v6704_v14  ;;  %v7015_v0 = vcombine.low %v6825_v53, %v6827_v10  ;;  %v6706_v39 = vpop.f32.mrb[70].mxu0  ;;  %v6829_v48 = vpop.f32.mrb[70].mxu1 }
 0xc22   : > { %v6707_v43 = vpop.f32.mrb[71].mxu0  ;;  %v6830_v13 = vpop.f32.mrb[71].mxu1 }
 0xc23   : > { %v7022_v16 = vrot.slane %v7012_v47, %v15504_v6  ;;  %v7043_v46 = vrot.slane %v7015_v0, %v15504_v6 }
 0xc27   : > { %v6743_v15 = vpop.f32.mrb[72].mxu0  ;;  %v6907_v18 = vpop.f32.mrb[72].mxu1 }
 0xc28   : > { %v6745_v41 = vpop.f32.mrb[73].mxu0  ;;  %v6909_v27 = vpop.f32.mrb[73].mxu1 }
 0xc29   : > { %v7013_v59 = vcombine.low %v6743_v15, %v6745_v41  ;;  %v7062_v28 = vcombine.low %v6907_v18, %v6909_v27  ;;  %v6747_v29 = vpop.f32.mrb[74].mxu0  ;;  %v6911_v8 = vpop.f32.mrb[74].mxu1 }
 0xc2a   : > { %v6748_v22 = vpop.f32.mrb[75].mxu0  ;;  %v6912_v26 = vpop.f32.mrb[75].mxu1 }
 0xc2b   : > { %v7029_v17 = vrot.slane %v7013_v59, %v15504_v6  ;;  %v7078_v30 = vrot.slane %v7062_v28, %v15504_v6 }
 0xc2d   : > { %v7044_v33 = vcombine.low %v7022_v16, %v7029_v17 }
 0xc2f   : > { %v6784_v40 = vpop.f32.mrb[76].mxu0  ;;  %v6989_v58 = vpop.f32.mrb[76].mxu1  ;;  %v15511_v44 = vrot.slane %v7044_v33, %v15504_v6 }
 0xc30   : > { %v6786_v55 = vpop.f32.mrb[77].mxu0  ;;  %v6991_v51 = vpop.f32.mrb[77].mxu1 }
 0xc31   : > { %v7014_v56 = vcombine.low %v6784_v40, %v6786_v55  ;;  %v7064_v63 = vcombine.low %v6989_v58, %v6991_v51  ;;  %v6788_v31 = vpop.f32.mrb[78].mxu0  ;;  %v6993_v19 = vpop.f32.mrb[78].mxu1 }
 0xc32   : > { %v6789_v37 = vpop.f32.mrb[79].mxu0  ;;  %v6994_v45 = vpop.f32.mrb[79].mxu1 }
 0xc33   : > { %v7036_v21 = vrot.slane %v7014_v56, %v15504_v6  ;;  %v7092_v39 = vrot.slane %v7064_v63, %v15504_v6 }
 0xc35   : > { %v7045_v1 = vcombine.low %v7036_v21, %v7043_v46  ;;  %v6562_v46 = vld [vmem:[%s15688_s14] sm:$0xff] }
 0xc37   : > { %v15514_v61 = vrot.slane %v7045_v1, %v15504_v6  ;;  %v6866_v12 = vpop.f32.mrb[80].mxu0  ;;  %v7290_v34 = vpop.f32.mrb[80].mxu1 }
 0xc38   : > { %v6868_v54 = vpop.f32.mrb[81].mxu0  ;;  %v7292_v2 = vpop.f32.mrb[81].mxu1 }
 0xc39   : > { %v7060_v4 = vcombine.low %v15511_v44, %v15514_v61  ;;  %v7061_v38 = vcombine.low %v6866_v12, %v6868_v54  ;;  %v7560_v49 = vcombine.low %v7290_v34, %v7292_v2  ;;  %v6870_v52 = vpop.f32.mrb[82].mxu0  ;;  %v7294_v50 = vpop.f32.mrb[82].mxu1 }
 0xc3a   : > { %v6871_v60 = vpop.f32.mrb[83].mxu0  ;;  %v7295_v20 = vpop.f32.mrb[83].mxu1 }
 0xc3b   : > { %v7071_v24 = vrot.slane %v7061_v38, %v15504_v6  ;;  %v7576_v8 = vrot.slane %v7560_v49, %v15504_v6  ;;  %v7112_v54 = vadd.f32 %v7060_v4, %v6562_v46 }
 0xc3d   : > { %v7093_v53 = vcombine.low %v7071_v24, %v7078_v30 }
 0xc3f   : > { %v6948_v25 = vpop.f32.mrb[84].mxu0  ;;  %v7372_v5 = vpop.f32.mrb[84].mxu1  ;;  %v15523_v35 = vrot.slane %v7093_v53, %v15504_v6 }
 0xc40   : > { %v6950_v42 = vpop.f32.mrb[85].mxu0  ;;  %v7374_v7 = vpop.f32.mrb[85].mxu1 }
 0xc41   : > { %v7063_v14 = vcombine.low %v6948_v25, %v6950_v42  ;;  %v7562_v10 = vcombine.low %v7372_v5, %v7374_v7  ;;  %v6952_v32 = vpop.f32.mrb[86].mxu0  ;;  %v7376_v9 = vpop.f32.mrb[86].mxu1 }
 0xc42   : > { %v6953_v47 = vpop.f32.mrb[87].mxu0  ;;  %v7377_v0 = vpop.f32.mrb[87].mxu1 }
 0xc43   : > { %v7085_v48 = vrot.slane %v7063_v14, %v15504_v6  ;;  %v7590_v19 = vrot.slane %v7562_v10, %v15504_v6 }
 0xc45   : > { %v7094_v3 = vcombine.low %v7085_v48, %v7092_v39 }
 0xc47   : > { %v15526_v43 = vrot.slane %v7094_v3, %v15504_v6  ;;  %v7249_v13 = vpop.f32.mrb[88].mxu0  ;;  %v7454_v36 = vpop.f32.mrb[88].mxu1 }
 0xc48   : > { %v7251_v11 = vpop.f32.mrb[89].mxu0  ;;  %v7456_v57 = vpop.f32.mrb[89].mxu1 }
 0xc49   : > { %v7109_v15 = vcombine.low %v15523_v35, %v15526_v43  ;;  %v7559_v18 = vcombine.low %v7249_v13, %v7251_v11  ;;  %v7609_v41 = vcombine.low %v7454_v36, %v7456_v57  ;;  %v7253_v27 = vpop.f32.mrb[90].mxu0  ;;  %v7458_v59 = vpop.f32.mrb[90].mxu1  ;;  %v6563_v35 = vld [vmem:[%s15688_s14 + $0x8] sm:$0xff] }
 0xc4a   : > { %v7254_v28 = vpop.f32.mrb[91].mxu0  ;;  %v7459_v29 = vpop.f32.mrb[91].mxu1 }
 0xc4b   : > { %v7569_v22 = vrot.slane %v7559_v18, %v15504_v6  ;;  %v7625_v30 = vrot.slane %v7609_v41, %v15504_v6  ;;  %v7113_v41 = vadd.f32 %v7109_v15, %v6563_v35 }
 0xc4d   : > { %v7591_v26 = vcombine.low %v7569_v22, %v7576_v8 }
 0xc4f   : > { %v7331_v16 = vpop.f32.mrb[92].mxu0  ;;  %v7536_v17 = vpop.f32.mrb[92].mxu1  ;;  %v7599_v21 = vrot.slane %v7591_v26, %v15504_v6 }
 0xc50   : > { %v7333_v33 = vpop.f32.mrb[93].mxu0  ;;  %v7538_v40 = vpop.f32.mrb[93].mxu1 }
 0xc51   : > { %v7561_v58 = vcombine.low %v7331_v16, %v7333_v33  ;;  %v7611_v55 = vcombine.low %v7536_v17, %v7538_v40  ;;  %v7335_v51 = vpop.f32.mrb[94].mxu0  ;;  %v7540_v56 = vpop.f32.mrb[94].mxu1 }
 0xc52   : > { %v7336_v63 = vpop.f32.mrb[95].mxu0  ;;  %v7541_v31 = vpop.f32.mrb[95].mxu1 }
 0xc53   : > { %v7583_v37 = vrot.slane %v7561_v58, %v15504_v6  ;;  %v7639_v39 = vrot.slane %v7611_v55, %v15504_v6 }
 0xc55   : > { %v7592_v45 = vcombine.low %v7583_v37, %v7590_v19 }
 0xc57   : > { %v7606_v1 = vrot.slane %v7592_v45, %v15504_v6  ;;  %v7413_v44 = vpop.f32.mrb[96].mxu0  ;;  %v7837_v61 = vpop.f32.mrb[96].mxu1 }
 0xc58   : > { %v7415_v12 = vpop.f32.mrb[97].mxu0  ;;  %v7839_v34 = vpop.f32.mrb[97].mxu1 }
 0xc59   : > { %v7607_v2 = vcombine.low %v7599_v21, %v7606_v1  ;;  %v7608_v38 = vcombine.low %v7413_v44, %v7415_v12  ;;  %v8107_v49 = vcombine.low %v7837_v61, %v7839_v34  ;;  %v7417_v52 = vpop.f32.mrb[98].mxu0  ;;  %v7841_v50 = vpop.f32.mrb[98].mxu1 }
 0xc5a   : > { %v7418_v60 = vpop.f32.mrb[99].mxu0  ;;  %v7842_v20 = vpop.f32.mrb[99].mxu1 }
 0xc5b   : > { %v7659_v24 = vadd.f32 %v7607_v2, %v7112_v54  ;;  %v7618_v53 = vrot.slane %v7608_v38, %v15504_v6  ;;  %v8123_v16 = vrot.slane %v8107_v49, %v15504_v6 }
 0xc5d   : > { %v7640_v25 = vcombine.low %v7618_v53, %v7625_v30 }
 0xc5f   : > { %v7495_v5 = vpop.f32.mrb[100].mxu0  ;;  %v7919_v42 = vpop.f32.mrb[100].mxu1  ;;  %v7648_v43 = vrot.slane %v7640_v25, %v15504_v6 }
 0xc60   : > { %v7497_v7 = vpop.f32.mrb[101].mxu0  ;;  %v7921_v14 = vpop.f32.mrb[101].mxu1 }
 0xc61   : > { %v7610_v10 = vcombine.low %v7495_v5, %v7497_v7  ;;  %v8109_v32 = vcombine.low %v7919_v42, %v7921_v14  ;;  %v7499_v4 = vpop.f32.mrb[102].mxu0  ;;  %v7923_v9 = vpop.f32.mrb[102].mxu1 }
 0xc62   : > { %v7500_v47 = vpop.f32.mrb[103].mxu0  ;;  %v7924_v0 = vpop.f32.mrb[103].mxu1 }
 0xc63   : > { %v7632_v48 = vrot.slane %v7610_v10, %v15504_v6  ;;  %v8137_v46 = vrot.slane %v8109_v32, %v15504_v6 }
 0xc65   : > { %v7641_v3 = vcombine.low %v7632_v48, %v7639_v39 }
 0xc67   : > { %v7655_v13 = vrot.slane %v7641_v3, %v15504_v6  ;;  %v7796_v36 = vpop.f32.mrb[104].mxu0  ;;  %v8001_v11 = vpop.f32.mrb[104].mxu1 }
 0xc68   : > { %v7798_v57 = vpop.f32.mrb[105].mxu0  ;;  %v8003_v18 = vpop.f32.mrb[105].mxu1 }
 0xc69   : > { %v7656_v27 = vcombine.low %v7648_v43, %v7655_v13  ;;  %v8106_v59 = vcombine.low %v7796_v36, %v7798_v57  ;;  %v8156_v28 = vcombine.low %v8001_v11, %v8003_v18  ;;  %v7800_v29 = vpop.f32.mrb[106].mxu0  ;;  %v8005_v8 = vpop.f32.mrb[106].mxu1 }
 0xc6a   : > { %v7801_v22 = vpop.f32.mrb[107].mxu0  ;;  %v8006_v26 = vpop.f32.mrb[107].mxu1 }
 0xc6b   : > { %v7660_v17 = vadd.f32 %v7656_v27, %v7113_v41  ;;  %v8116_v33 = vrot.slane %v8106_v59, %v15504_v6  ;;  %v8172_v53 = vrot.slane %v8156_v28, %v15504_v6 }
 0xc6d   : > { %v8138_v40 = vcombine.low %v8116_v33, %v8123_v16 }
 0xc6f   : > { %v7878_v58 = vpop.f32.mrb[108].mxu0  ;;  %v8083_v55 = vpop.f32.mrb[108].mxu1  ;;  %v8146_v44 = vrot.slane %v8138_v40, %v15504_v6 }
 0xc70   : > { %v7880_v51 = vpop.f32.mrb[109].mxu0  ;;  %v8085_v56 = vpop.f32.mrb[109].mxu1 }
 0xc71   : > { %v8108_v63 = vcombine.low %v7878_v58, %v7880_v51  ;;  %v8158_v31 = vcombine.low %v8083_v55, %v8085_v56  ;;  %v7882_v15 = vpop.f32.mrb[110].mxu0  ;;  %v8087_v19 = vpop.f32.mrb[110].mxu1 }
 0xc72   : > { %v7883_v37 = vpop.f32.mrb[111].mxu0  ;;  %v8088_v45 = vpop.f32.mrb[111].mxu1 }
 0xc73   : > { %v8130_v21 = vrot.slane %v8108_v63, %v15504_v6  ;;  %v8186_v3 = vrot.slane %v8158_v31, %v15504_v6 }
 0xc75   : > { %v8139_v1 = vcombine.low %v8130_v21, %v8137_v46 }
 0xc77   : > { %v8153_v61 = vrot.slane %v8139_v1, %v15504_v6  ;;  %v7960_v12 = vpop.f32.mrb[112].mxu0  ;;  %v8383_v34 = vpop.f32.mrb[112].mxu1 }
 0xc78   : > { %v7962_v54 = vpop.f32.mrb[113].mxu0  ;;  %v8385_v2 = vpop.f32.mrb[113].mxu1 }
 0xc79   : > { %v8154_v38 = vcombine.low %v8146_v44, %v8153_v61  ;;  %v8155_v49 = vcombine.low %v7960_v12, %v7962_v54  ;;  %v8653_v52 = vcombine.low %v8383_v34, %v8385_v2  ;;  %v7964_v50 = vpop.f32.mrb[114].mxu0  ;;  %v8387_v60 = vpop.f32.mrb[114].mxu1  ;;  %v15569_v34 = vsub.s32 1, %v15501_v23 }
 0xc7a   : > { %v7965_v20 = vpop.f32.mrb[115].mxu0  ;;  %v8388_v30 = vpop.f32.mrb[115].mxu1  ;;  %v8782_v60 = vsub.s32 6, %v15501_v23 }
 0xc7b   : > { %v8206_v25 = vadd.f32 %v8154_v38, %v7659_v24  ;;  %v8165_v5 = vrot.slane %v8155_v49, %v15504_v6  ;;  %v8669_v26 = vrot.slane %v8653_v52, %v15504_v6  ;;  %v8786_v49 = vsub.s32 7, %v15501_v23 }
 0xc7c   : > { %v15573_v52 = vsub.s32 0, %v15501_v23  ;;  %v8770_v20 = vsub.s32 3, %v15501_v23 }
 0xc7d   : > { %v8187_v42 = vcombine.low %v8165_v5, %v8172_v53 }
 0xc7f   : > { %v8042_v7 = vpop.f32.mrb[116].mxu0  ;;  %v8465_v14 = vpop.f32.mrb[116].mxu1  ;;  %v8195_v24 = vrot.slane %v8187_v42, %v15504_v6 }
 0xc80   : > { %v8044_v10 = vpop.f32.mrb[117].mxu0  ;;  %v8467_v32 = vpop.f32.mrb[117].mxu1 }
 0xc81   : > { %v8157_v4 = vcombine.low %v8042_v7, %v8044_v10  ;;  %v8655_v9 = vcombine.low %v8465_v14, %v8467_v32  ;;  %v8046_v47 = vpop.f32.mrb[118].mxu0  ;;  %v8469_v0 = vpop.f32.mrb[118].mxu1 }
 0xc82   : > { %v8047_v39 = vpop.f32.mrb[119].mxu0  ;;  %v8470_v48 = vpop.f32.mrb[119].mxu1  ;;  %v11660_v47 = vld [vmem:[#allocation8 + $0x100] ss:$8 sps:$4 sm:$0xff]  }
 0xc83   : > { %v8179_v35 = vrot.slane %v8157_v4, %v15504_v6  ;;  %v8683_v46 = vrot.slane %v8655_v9, %v15504_v6  ;;  %v11663_v39 = vld [vmem:[#allocation8 + $0x400] ss:$8 sps:$4 sm:$0xff]  }
 0xc85   : > { %v8188_v43 = vcombine.low %v8179_v35, %v8186_v3 }
 0xc87   : > { %v8202_v13 = vrot.slane %v8188_v43, %v15504_v6  ;;  %v8342_v36 = vpop.f32.mrb[120].mxu0  ;;  %v8547_v11 = vpop.f32.mrb[120].mxu1  ;;  %v11668_v43 = vld [vmem:[#allocation8 + $0x114] ss:$8 sps:$4 sm:$0xff]  }
 0xc88   : > { %v8344_v57 = vpop.f32.mrb[121].mxu0  ;;  %v8549_v18 = vpop.f32.mrb[121].mxu1 }
 0xc89   : > { %v8203_v41 = vcombine.low %v8195_v24, %v8202_v13  ;;  %v8652_v27 = vcombine.low %v8342_v36, %v8344_v57  ;;  %v8702_v59 = vcombine.low %v8547_v11, %v8549_v18  ;;  %v8346_v28 = vpop.f32.mrb[122].mxu0  ;;  %v8551_v29 = vpop.f32.mrb[122].mxu1  ;;  %v11671_v36 = vld [vmem:[#allocation8 + $0x414] ss:$8 sps:$4 sm:$0xff]  }
 0xc8a   : > { %v8347_v8 = vpop.f32.mrb[123].mxu0  ;;  %v8552_v22 = vpop.f32.mrb[123].mxu1  ;;  %v11674_v28 = vld [vmem:[#allocation8 + $0x124] ss:$8 sps:$4 sm:$0xff]  }
 0xc8b   : > { %v15561_v16 = vadd.f32 %v8203_v41, %v7660_v17  ;;  %v8662_v33 = vrot.slane %v8652_v27, %v15504_v6  ;;  %v8718_v30 = vrot.slane %v8702_v59, %v15504_v6  ;;  %v11666_v27 = vld [vmem:[#allocation8 + $0x110] ss:$8 sps:$4 sm:$0xff]   ;;  %v11677_v29 = vld [vmem:[#allocation8 + $0x424] ss:$8 sps:$4 sm:$0xff]  }
 0xc8c   : > { %v11669_v59 = vld [vmem:[#allocation8 + $0x410] ss:$8 sps:$4 sm:$0xff]  }
 0xc8d   : > { %v8684_v40 = vcombine.low %v8662_v33, %v8669_v26  ;;  %v11672_v33 = vld [vmem:[#allocation8 + $0x120] ss:$8 sps:$4 sm:$0xff]  }
 0xc8f   : > { %v8424_v58 = vpop.f32.mrb[124].mxu0  ;;  %v8629_v55 = vpop.f32.mrb[124].mxu1  ;;  %v8692_v17 = vrot.slane %v8684_v40, %v15504_v6  ;;  %v11675_v40 = vld [vmem:[#allocation8 + $0x420] ss:$8 sps:$4 sm:$0xff]  }
 0xc90   : > { %v8426_v51 = vpop.f32.mrb[125].mxu0  ;;  %v8631_v56 = vpop.f32.mrb[125].mxu1 }
 0xc91   : > { %v8654_v63 = vcombine.low %v8424_v58, %v8426_v51  ;;  %v8704_v31 = vcombine.low %v8629_v55, %v8631_v56  ;;  %v8428_v15 = vpop.f32.mrb[126].mxu0  ;;  %v8633_v19 = vpop.f32.mrb[126].mxu1  ;;  %v11680_v58 = vld [vmem:[#allocation8 + $0x134] ss:$8 sps:$4 sm:$0xff]  }
 0xc92   : > { %v8429_v37 = vpop.f32.mrb[127].mxu0  ;;  %v8634_v45 = vpop.f32.mrb[127].mxu1  ;;  %v11683_v55 = vld [vmem:[#allocation8 + $0x434] ss:$8 sps:$4 sm:$0xff]   ;;  %v8766_v15 = vsub.s32 2, %v15501_v23 }
 0xc93   : > { %v8676_v21 = vrot.slane %v8654_v63, %v15504_v6  ;;  %v8732_v18 = vrot.slane %v8704_v31, %v15504_v6  ;;  %v11678_v63 = vld [vmem:[#allocation8 + $0x130] ss:$8 sps:$4 sm:$0xff]   ;;  %v11686_v19 = vld [vmem:[#allocation8 + $0x144] ss:$8 sps:$4 sm:$0xff]   ;;  %v8778_v45 = vsub.s32 5, %v15501_v23 }
 0xc94   : > { %v11681_v31 = vld [vmem:[#allocation8 + $0x430] ss:$8 sps:$4 sm:$0xff]   ;;  %v11689_v37 = vld [vmem:[#allocation8 + $0x444] ss:$8 sps:$4 sm:$0xff]  }
 0xc95   : > { %v8685_v1 = vcombine.low %v8676_v21, %v8683_v46  ;;  %v8774_v46 = vsub.s32 4, %v15501_v23 }
 0xc97   : > { %v8699_v44 = vrot.slane %v8685_v1, %v15504_v6  ;;  %v8506_v61 = vpop.f32.mrb[128].mxu0 }
 0xc98   : > { %v8508_v12 = vpop.f32.mrb[129].mxu0 }
 0xc99   : > { %v8700_v54 = vcombine.low %v8692_v17, %v8699_v44  ;;  %v8701_v2 = vcombine.low %v8506_v61, %v8508_v12  ;;  %v8510_v38 = vpop.f32.mrb[130].mxu0 }
 0xc9a   : > { %v8511_v50 = vpop.f32.mrb[131].mxu0 }
 0xc9b   : > { %v15578_v53 = vadd.f32 %v8700_v54, %v8206_v25  ;;  %v8711_v5 = vrot.slane %v8701_v2, %v15504_v6  ;;  %v11684_v54 = vld [vmem:[#allocation8 + $0x140] ss:$8 sps:$4 sm:$0xff]   ;;  %v11692_v50 = vld [vmem:[#allocation8 + $0x154] ss:$8 sps:$4 sm:$0xff]  }
 0xc9c   : > { %v11687_v2 = vld [vmem:[#allocation8 + $0x440] ss:$8 sps:$4 sm:$0xff]  }
 0xc9d   : > { %v8733_v42 = vcombine.low %v8711_v5, %v8718_v30  ;;  %v8763_v7 = vrot.slane %v15578_v53, %v15569_v34  ;;  %v8787_v14 = vrot.slane %v15578_v53, %v8786_v49  ;;  %v8759_v10 = vrot.slane %v15578_v53, %v15573_v52  ;;  %v11698_v30 = vld [vmem:[#allocation8 + $0x164] ss:$8 sps:$4 sm:$0xff]  }
 0xc9e   : > { %v8783_v32 = vrot.slane %v15578_v53, %v8782_v60  ;;  %v8771_v25 = vrot.slane %v15578_v53, %v8770_v20  ;;  %v11701_v5 = vld [vmem:[#allocation8 + $0x464] ss:$8 sps:$4 sm:$0xff]  }
 0xc9f   : > { %v8588_v4 = vpop.f32.mrb[132].mxu0  ;;  %v8837_v9 = vpack.c.bf16 %v8763_v7, %v8763_v7  ;;  %v8843_v0 = vpack.c.bf16 %v8787_v14, %v8787_v14  ;;  %v8836_v48 = vpack.c.bf16 %v8759_v10, %v8759_v10  ;;  %v8741_v22 = vrot.slane %v8733_v42, %v15504_v6  ;;  %v11696_v42 = vld [vmem:[#allocation8 + $0x160] ss:$8 sps:$4 sm:$0xff]   ;;  %v11704_v14 = vld [vmem:[#allocation8 + $0x174] ss:$8 sps:$4 sm:$0xff]  }
 0xca0   : > { %v8590_v3 = vpop.f32.mrb[133].mxu0  ;;  %v8842_v35 = vpack.c.bf16 %v8783_v32, %v8783_v32  ;;  %v8839_v57 = vpack.c.bf16 %v8771_v25, %v8771_v25  ;;  %v11699_v7 = vld [vmem:[#allocation8 + $0x460] ss:$8 sps:$4 sm:$0xff]   ;;  %v11707_v10 = vld [vmem:[#allocation8 + $0x474] ss:$8 sps:$4 sm:$0xff]  }
 0xca1   : > { %v8703_v24 = vcombine.low %v8588_v4, %v8590_v3  ;;  %v8592_v13 = vpop.f32.mrb[134].mxu0  ;;  %10400 = vmatprep.mubr.bf16.mxu1 %v8837_v9  ;;  %10523 = vmatprep.mubr.bf16.mxu0 %v8843_v0  ;;  %v11702_v32 = vld [vmem:[#allocation8 + $0x170] ss:$8 sps:$4 sm:$0xff]   ;;  %v11710_v4 = vld [vmem:[#allocation8 + $0x184] ss:$8 sps:$4 sm:$0xff]  }
 0xca2   : > { %v8593_v11 = vpop.f32.mrb[135].mxu0  ;;  %10401 = vmatmul.mubr.bf16.vlgmr.msra.gmra.mrb[128].mxu1 %v8836_v48  ;;  %10524 = vmatmul.mubr.bf16.vlgmr.msra.gmra.mrb[136].mxu0 %v8842_v35  ;;  %v11705_v25 = vld [vmem:[#allocation8 + $0x470] ss:$8 sps:$4 sm:$0xff]   ;;  %v11713_v9 = vld [vmem:[#allocation8 + $0x484] ss:$8 sps:$4 sm:$0xff]  }
 0xca3   : > { %v8725_v41 = vrot.slane %v8703_v24, %v15504_v6  ;;  %10410 = vmatpush1.bf16.msra.mxu1 %v11660_v47  ;;  %10533 = vmatpush1.bf16.msra.mxu0 %v11663_v39  ;;  %v11708_v47 = vld [vmem:[#allocation8 + $0x180] ss:$8 sps:$4 sm:$0xff]   ;;  %v11716_v39 = vld [vmem:[#allocation8 + $0x194] ss:$8 sps:$4 sm:$0xff]   ;;  %v11714_v3 = vld [vmem:[#allocation8 + $0x190] ss:$8 sps:$4 sm:$0xff]  }
 0xca4   : > { %10441 = vmatprep.mubr.bf16.mxu1 %v8839_v57  ;;  %10411 = vmatprep.subr.bf16.mxu1 %v11668_v43  ;;  %v11711_v0 = vld [vmem:[#allocation8 + $0x480] ss:$8 sps:$4 sm:$0xff]   ;;  %v11719_v48 = vld [vmem:[#allocation8 + $0x494] ss:$8 sps:$4 sm:$0xff]   ;;  %v11717_v35 = vld [vmem:[#allocation8 + $0x490] ss:$8 sps:$4 sm:$0xff]  }
 0xca5   : > { %v8734_v8 = vcombine.low %v8725_v41, %v8732_v18  ;;  %10534 = vmatprep.subr.bf16.mxu0 %v11671_v36  ;;  %v11722_v43 = vld [vmem:[#allocation8 + $0x1a4] ss:$8 sps:$4 sm:$0xff]   ;;  %v11720_v13 = vld [vmem:[#allocation8 + $0x1a0] ss:$8 sps:$4 sm:$0xff]   ;;  %v11728_v11 = vld [vmem:[#allocation8 + $0x1b4] ss:$8 sps:$4 sm:$0xff]  }
 0xca6   : > { %v11725_v24 = vld [vmem:[#allocation8 + $0x4a4] ss:$8 sps:$4 sm:$0xff]   ;;  %v11723_v36 = vld [vmem:[#allocation8 + $0x4a0] ss:$8 sps:$4 sm:$0xff]   ;;  %v11731_v57 = vld [vmem:[#allocation8 + $0x4b4] ss:$8 sps:$4 sm:$0xff]  }
 0xca7   : > { %v8748_v26 = vrot.slane %v8734_v8, %v15504_v6  ;;  %10412 = vmatpush1.bf16.msra.mxu1 %v11666_v27  ;;  %10535 = vmatpush1.bf16.msra.mxu0 %v11669_v59  ;;  %v11726_v18 = vld [vmem:[#allocation8 + $0x1b0] ss:$8 sps:$4 sm:$0xff]   ;;  %v11734_v27 = vld [vmem:[#allocation8 + $0x1c4] ss:$8 sps:$4 sm:$0xff]   ;;  %v11740_v8 = vld [vmem:[#allocation8 + $0x1d4] ss:$8 sps:$4 sm:$0xff]  }
 0xca8   : > { %10413 = vmatprep.subr.bf16.mxu1 %v11674_v28  ;;  %10536 = vmatprep.subr.bf16.mxu0 %v11677_v29  ;;  %v11729_v41 = vld [vmem:[#allocation8 + $0x4b0] ss:$8 sps:$4 sm:$0xff]   ;;  %v11737_v59 = vld [vmem:[#allocation8 + $0x4c4] ss:$8 sps:$4 sm:$0xff]   ;;  %v11732_v28 = vld [vmem:[#allocation8 + $0x1c0] ss:$8 sps:$4 sm:$0xff]  }
 0xca9   : > { %v8749_v51 = vcombine.low %v8741_v22, %v8748_v26  ;;  %v11735_v29 = vld [vmem:[#allocation8 + $0x4c0] ss:$8 sps:$4 sm:$0xff]   ;;  %v11743_v22 = vld [vmem:[#allocation8 + $0x4d4] ss:$8 sps:$4 sm:$0xff]   ;;  %v11738_v26 = vld [vmem:[#allocation8 + $0x1d0] ss:$8 sps:$4 sm:$0xff]  }
 0xcab   : > { %v15599_v56 = vadd.f32 %v8749_v51, %v15561_v16  ;;  %10414 = vmatpush1.bf16.msra.mxu1 %v11672_v33  ;;  %10537 = vmatpush1.bf16.msra.mxu0 %v11675_v40  ;;  %v11741_v33 = vld [vmem:[#allocation8 + $0x4d0] ss:$8 sps:$4 sm:$0xff]   ;;  %v11746_v40 = vld [vmem:[#allocation8 + $0x1e4] ss:$8 sps:$4 sm:$0xff]   ;;  %v11747_v51 = vld [vmem:[#allocation8 + $0x4e0] ss:$8 sps:$4 sm:$0xff]  }
 0xcac   : > { %10415 = vmatprep.subr.bf16.mxu1 %v11680_v58  ;;  %10538 = vmatprep.subr.bf16.mxu0 %v11683_v55  ;;  %v11749_v58 = vld [vmem:[#allocation8 + $0x4e4] ss:$8 sps:$4 sm:$0xff]   ;;  %v11744_v55 = vld [vmem:[#allocation8 + $0x1e0] ss:$8 sps:$4 sm:$0xff]  }
 0xcad   : > { %v8795_v21 = vrot.slane %v15599_v56, %v15569_v34  ;;  %v15609_v16 = vrot.slane %v15599_v56, %v8770_v20  ;;  %v15614_v1 = vrot.slane %v15599_v56, %v8766_v15  ;;  %v15619_v17 = vrot.slane %v15599_v56, %v8778_v45  ;;  %v11690_v20 = vld [vmem:[#allocation8 + $0x150] ss:$8 sps:$4 sm:$0xff]  }
 0xcae   : > { %v15624_v44 = vrot.slane %v15599_v56, %v8786_v49  ;;  %v15629_v61 = vrot.slane %v15599_v56, %v8782_v60  ;;  %v15634_v12 = vrot.slane %v15599_v56, %v8774_v46  ;;  %v11695_v49 = vld [vmem:[#allocation8 + $0x454] ss:$8 sps:$4 sm:$0xff]   ;;  %v11693_v60 = vld [vmem:[#allocation8 + $0x450] ss:$8 sps:$4 sm:$0xff]  }
 0xcaf   : > { %10416 = vmatpush1.bf16.msra.mxu1 %v11678_v63  ;;  %10539 = vmatpush1.bf16.msra.mxu0 %v11681_v31  ;;  %v8845_v38 = vpack.c.bf16 %v8795_v21, %v8795_v21  ;;  %v11752_v63 = vld [vmem:[#allocation8 + $0x1f4] ss:$8 sps:$4 sm:$0xff]   ;;  %v8767_v21 = vrot.slane %v15578_v53, %v8766_v15  ;;  %v8849_v23 = vpack.c.bf16 %v15619_v17, %v15619_v17  ;;  %v11864_v17 = vld [vmem:[#allocation8 + $0x620] ss:$8 sps:$4 sm:$0xff]  }
 0xcb0   : > { %10417 = vmatprep.subr.bf16.mxu1 %v11686_v19  ;;  %10540 = vmatprep.subr.bf16.mxu0 %v11689_v37  ;;  %v11755_v31 = vld [vmem:[#allocation8 + $0x4f4] ss:$8 sps:$4 sm:$0xff]   ;;  %v11750_v19 = vld [vmem:[#allocation8 + $0x1f0] ss:$8 sps:$4 sm:$0xff]  }
 0xcb1   : > { %10564 = vmatprep.mubr.bf16.mxu0 %v8845_v38  ;;  %v11753_v37 = vld [vmem:[#allocation8 + $0x4f0] ss:$8 sps:$4 sm:$0xff]   ;;  %v11761_v38 = vld [vmem:[#allocation8 + $0x504] ss:$8 sps:$4 sm:$0xff]   ;;  %v11767_v15 = vld [vmem:[#allocation8 + $0x514] ss:$8 sps:$4 sm:$0xff]  }
 0xcb3   : > { %10418 = vmatpush1.bf16.msra.mxu1 %v11684_v54  ;;  %10541 = vmatpush1.bf16.msra.mxu0 %v11687_v2  ;;  %v11758_v54 = vld [vmem:[#allocation8 + $0x204] ss:$8 sps:$4 sm:$0xff]   ;;  %v8791_v2 = vrot.slane %v15599_v56, %v15573_v52  ;;  %v8847_v56 = vpack.c.bf16 %v15609_v16, %v15609_v16  ;;  %v11774_v16 = vld [vmem:[#allocation8 + $0x230] ss:$8 sps:$4 sm:$0xff]  }
 0xcb4   : > { %10419 = vmatprep.subr.bf16.mxu1 %v11692_v50  ;;  %10542 = vmatprep.subr.bf16.mxu0 %v11695_v49  ;;  %v8779_v50 = vrot.slane %v15578_v53, %v8778_v45  ;;  %v11756_v49 = vld [vmem:[#allocation8 + $0x200] ss:$8 sps:$4 sm:$0xff]   ;;  %v11765_v45 = vld [vmem:[#allocation8 + $0x510] ss:$8 sps:$4 sm:$0xff]  }
 0xcb7   : > { %10420 = vmatpush1.bf16.msra.mxu1 %v11690_v20  ;;  %10543 = vmatpush1.bf16.msra.mxu0 %v11693_v60  ;;  %v8838_v20 = vpack.c.bf16 %v8767_v21, %v8767_v21  ;;  %v8844_v60 = vpack.c.bf16 %v8791_v2, %v8791_v2  ;;  %v11827_v21 = vld [vmem:[#allocation8 + $0x5b4] ss:$8 sps:$4 sm:$0xff]   ;;  %v11825_v2 = vld [vmem:[#allocation8 + $0x5b0] ss:$8 sps:$4 sm:$0xff]  }
 0xcb8   : > { %10421 = vmatprep.subr.bf16.mxu1 %v11698_v30  ;;  %10544 = vmatprep.subr.bf16.mxu0 %v11701_v5  ;;  %v11759_v30 = vld [vmem:[#allocation8 + $0x500] ss:$8 sps:$4 sm:$0xff]   ;;  %v8841_v5 = vpack.c.bf16 %v8779_v50, %v8779_v50  ;;  %v11833_v50 = vld [vmem:[#allocation8 + $0x5c4] ss:$8 sps:$4 sm:$0xff]  }
 0xcbb   : > { %10422 = vmatpush1.bf16.msra.mxu1 %v11696_v42  ;;  %10545 = vmatpush1.bf16.msra.mxu0 %v11699_v7  ;;  %v11764_v42 = vld [vmem:[#allocation8 + $0x214] ss:$8 sps:$4 sm:$0xff]   ;;  %v11762_v7 = vld [vmem:[#allocation8 + $0x210] ss:$8 sps:$4 sm:$0xff]  }
 0xcbc   : > { %10423 = vmatprep.subr.bf16.mxu1 %v11704_v14  ;;  %10546 = vmatprep.subr.bf16.mxu0 %v11707_v10  ;;  %v11770_v14 = vld [vmem:[#allocation8 + $0x224] ss:$8 sps:$4 sm:$0xff]  }
 0xcbd   : > { %v11773_v10 = vld [vmem:[#allocation8 + $0x524] ss:$8 sps:$4 sm:$0xff]  }
 0xcbf   : > { %10424 = vmatpush1.bf16.msra.mxu1 %v11702_v32  ;;  %10547 = vmatpush1.bf16.msra.mxu0 %v11705_v25  ;;  %v11768_v32 = vld [vmem:[#allocation8 + $0x220] ss:$8 sps:$4 sm:$0xff]  }
 0xcc0   : > { %10425 = vmatprep.subr.bf16.mxu1 %v11710_v4  ;;  %10548 = vmatprep.subr.bf16.mxu0 %v11713_v9  ;;  %v11771_v25 = vld [vmem:[#allocation8 + $0x520] ss:$8 sps:$4 sm:$0xff]   ;;  %v11776_v4 = vld [vmem:[#allocation8 + $0x234] ss:$8 sps:$4 sm:$0xff]  }
 0xcc1   : > { %v11779_v9 = vld [vmem:[#allocation8 + $0x534] ss:$8 sps:$4 sm:$0xff]  }
 0xcc3   : > { %10426 = vmatpush1.bf16.msra.mxu1 %v11708_v47  ;;  %10549 = vmatpush1.bf16.msra.mxu0 %v11711_v0  ;;  %v11777_v47 = vld [vmem:[#allocation8 + $0x530] ss:$8 sps:$4 sm:$0xff]   ;;  %v11782_v0 = vld [vmem:[#allocation8 + $0x244] ss:$8 sps:$4 sm:$0xff]  }
 0xcc4   : > { %10427 = vmatprep.subr.bf16.mxu1 %v11716_v39  ;;  %10550 = vmatprep.subr.bf16.mxu0 %v11719_v48  ;;  %v11785_v39 = vld [vmem:[#allocation8 + $0x544] ss:$8 sps:$4 sm:$0xff]   ;;  %v11780_v48 = vld [vmem:[#allocation8 + $0x240] ss:$8 sps:$4 sm:$0xff]  }
 0xcc7   : > { %10428 = vmatpush1.bf16.msra.mxu1 %v11714_v3  ;;  %10551 = vmatpush1.bf16.msra.mxu0 %v11717_v35  ;;  %v11783_v3 = vld [vmem:[#allocation8 + $0x540] ss:$8 sps:$4 sm:$0xff]   ;;  %v11788_v35 = vld [vmem:[#allocation8 + $0x254] ss:$8 sps:$4 sm:$0xff]  }
 0xcc8   : > { %10429 = vmatprep.subr.bf16.mxu1 %v11722_v43  ;;  %10552 = vmatprep.subr.bf16.mxu0 %v11725_v24  ;;  %v11791_v43 = vld [vmem:[#allocation8 + $0x554] ss:$8 sps:$4 sm:$0xff]   ;;  %v11786_v24 = vld [vmem:[#allocation8 + $0x250] ss:$8 sps:$4 sm:$0xff]  }
 0xccb   : > { %10430 = vmatpush1.bf16.msra.mxu1 %v11720_v13  ;;  %10553 = vmatpush1.bf16.msra.mxu0 %v11723_v36  ;;  %v11789_v13 = vld [vmem:[#allocation8 + $0x550] ss:$8 sps:$4 sm:$0xff]   ;;  %v11794_v36 = vld [vmem:[#allocation8 + $0x264] ss:$8 sps:$4 sm:$0xff]  }
 0xccc   : > { %10431 = vmatprep.subr.bf16.mxu1 %v11728_v11  ;;  %10554 = vmatprep.subr.bf16.mxu0 %v11731_v57  ;;  %v11797_v11 = vld [vmem:[#allocation8 + $0x564] ss:$8 sps:$4 sm:$0xff]   ;;  %v11792_v57 = vld [vmem:[#allocation8 + $0x260] ss:$8 sps:$4 sm:$0xff]  }
 0xccf   : > { %10432 = vmatpush1.bf16.msra.mxu1 %v11726_v18  ;;  %10555 = vmatpush1.bf16.msra.mxu0 %v11729_v41  ;;  %v11795_v18 = vld [vmem:[#allocation8 + $0x560] ss:$8 sps:$4 sm:$0xff]   ;;  %v11800_v41 = vld [vmem:[#allocation8 + $0x274] ss:$8 sps:$4 sm:$0xff]  }
 0xcd0   : > { %10433 = vmatprep.subr.bf16.mxu1 %v11734_v27  ;;  %10556 = vmatprep.subr.bf16.mxu0 %v11737_v59  ;;  %v11803_v27 = vld [vmem:[#allocation8 + $0x574] ss:$8 sps:$4 sm:$0xff]   ;;  %v11798_v59 = vld [vmem:[#allocation8 + $0x270] ss:$8 sps:$4 sm:$0xff]  }
 0xcd3   : > { %10434 = vmatpush1.bf16.msra.mxu1 %v11732_v28  ;;  %10557 = vmatpush1.bf16.msra.mxu0 %v11735_v29  ;;  %v11801_v28 = vld [vmem:[#allocation8 + $0x570] ss:$8 sps:$4 sm:$0xff]   ;;  %v11806_v29 = vld [vmem:[#allocation8 + $0x284] ss:$8 sps:$4 sm:$0xff]  }
 0xcd4   : > { %10435 = vmatprep.subr.bf16.mxu1 %v11740_v8  ;;  %10558 = vmatprep.subr.bf16.mxu0 %v11743_v22  ;;  %v11809_v8 = vld [vmem:[#allocation8 + $0x584] ss:$8 sps:$4 sm:$0xff]   ;;  %v11804_v22 = vld [vmem:[#allocation8 + $0x280] ss:$8 sps:$4 sm:$0xff]  }
 0xcd7   : > { %10436 = vmatpush1.bf16.msra.mxu1 %v11738_v26  ;;  %10559 = vmatpush1.bf16.msra.mxu0 %v11741_v33  ;;  %v11807_v26 = vld [vmem:[#allocation8 + $0x580] ss:$8 sps:$4 sm:$0xff]   ;;  %v11812_v33 = vld [vmem:[#allocation8 + $0x294] ss:$8 sps:$4 sm:$0xff]  }
 0xcd8   : > { %10437 = vmatprep.subr.bf16.mxu1 %v11746_v40  ;;  %10560 = vmatprep.subr.bf16.mxu0 %v11749_v58  ;;  %v11815_v40 = vld [vmem:[#allocation8 + $0x594] ss:$8 sps:$4 sm:$0xff]   ;;  %v11810_v58 = vld [vmem:[#allocation8 + $0x290] ss:$8 sps:$4 sm:$0xff]  }
 0xcdb   : > { %10438 = vmatpush1.bf16.msra.mxu1 %v11744_v55  ;;  %10561 = vmatpush1.bf16.msra.mxu0 %v11747_v51  ;;  %v11813_v55 = vld [vmem:[#allocation8 + $0x590] ss:$8 sps:$4 sm:$0xff]   ;;  %v11818_v51 = vld [vmem:[#allocation8 + $0x2a4] ss:$8 sps:$4 sm:$0xff]  }
 0xcdc   : > { %10439 = vmatprep.subr.bf16.mxu1 %v11752_v63  ;;  %10562 = vmatprep.subr.bf16.mxu0 %v11755_v31  ;;  %v11821_v63 = vld [vmem:[#allocation8 + $0x5a4] ss:$8 sps:$4 sm:$0xff]   ;;  %v11816_v31 = vld [vmem:[#allocation8 + $0x2a0] ss:$8 sps:$4 sm:$0xff]  }
 0xcdf   : > { %10440 = vmatpush1.bf16.msra.mxu1 %v11750_v19  ;;  %10563 = vmatpush1.bf16.msra.mxu0 %v11753_v37  ;;  %v11819_v19 = vld [vmem:[#allocation8 + $0x5a0] ss:$8 sps:$4 sm:$0xff]   ;;  %v11824_v37 = vld [vmem:[#allocation8 + $0x2b4] ss:$8 sps:$4 sm:$0xff]  }
 0xce0   : > { %10450 = vmatprep.subr.bf16.mxu1 %v11758_v54  ;;  %10573 = vmatprep.subr.bf16.mxu0 %v11761_v38  ;;  %v11822_v54 = vld [vmem:[#allocation8 + $0x2b0] ss:$8 sps:$4 sm:$0xff]   ;;  %v11830_v38 = vld [vmem:[#allocation8 + $0x2c4] ss:$8 sps:$4 sm:$0xff]  }
 0xce2   : > { %10442 = vmatmul.mubr.bf16.vlgmr.msra.gmra.mrb[128].mxu1 %v8838_v20  ;;  %10565 = vmatmul.mubr.bf16.vlgmr.msra.gmra.mrb[136].mxu0 %v8844_v60  ;;  %v11831_v20 = vld [vmem:[#allocation8 + $0x5c0] ss:$8 sps:$4 sm:$0xff]   ;;  %v11836_v60 = vld [vmem:[#allocation8 + $0x2d4] ss:$8 sps:$4 sm:$0xff]  }
 0xce3   : > { %10451 = vmatpush1.bf16.msra.mxu1 %v11756_v49  ;;  %10482 = vmatprep.mubr.bf16.mxu1 %v8841_v5  ;;  %v11828_v49 = vld [vmem:[#allocation8 + $0x2c0] ss:$8 sps:$4 sm:$0xff]   ;;  %v11834_v5 = vld [vmem:[#allocation8 + $0x2d0] ss:$8 sps:$4 sm:$0xff]  }
 0xce4   : > { %10574 = vmatpush1.bf16.msra.mxu0 %v11759_v30  ;;  %10605 = vmatprep.mubr.bf16.mxu0 %v8847_v56  ;;  %v11839_v30 = vld [vmem:[#allocation8 + $0x5d4] ss:$8 sps:$4 sm:$0xff]   ;;  %v11845_v56 = vld [vmem:[#allocation8 + $0x5e4] ss:$8 sps:$4 sm:$0xff]  }
 0xce5   : > { %10452 = vmatprep.subr.bf16.mxu1 %v11764_v42  ;;  %10575 = vmatprep.subr.bf16.mxu0 %v11767_v15  ;;  %v11837_v42 = vld [vmem:[#allocation8 + $0x5d0] ss:$8 sps:$4 sm:$0xff]   ;;  %v11842_v15 = vld [vmem:[#allocation8 + $0x2e4] ss:$8 sps:$4 sm:$0xff]  }
 0xce7   : > { %10453 = vmatpush1.bf16.msra.mxu1 %v11762_v7  ;;  %v11840_v7 = vld [vmem:[#allocation8 + $0x2e0] ss:$8 sps:$4 sm:$0xff]  }
 0xce8   : > { %10576 = vmatpush1.bf16.msra.mxu0 %v11765_v45  ;;  %10454 = vmatprep.subr.bf16.mxu1 %v11770_v14  ;;  %v11843_v45 = vld [vmem:[#allocation8 + $0x5e0] ss:$8 sps:$4 sm:$0xff]   ;;  %v11848_v14 = vld [vmem:[#allocation8 + $0x2f4] ss:$8 sps:$4 sm:$0xff]  }
 0xce9   : > { %10577 = vmatprep.subr.bf16.mxu0 %v11773_v10  ;;  %v11851_v10 = vld [vmem:[#allocation8 + $0x5f4] ss:$8 sps:$4 sm:$0xff]  }
 0xceb   : > { %10455 = vmatpush1.bf16.msra.mxu1 %v11768_v32  ;;  %v11846_v32 = vld [vmem:[#allocation8 + $0x2f0] ss:$8 sps:$4 sm:$0xff]  }
 0xcec   : > { %10578 = vmatpush1.bf16.msra.mxu0 %v11771_v25  ;;  %10456 = vmatprep.subr.bf16.mxu1 %v11776_v4  ;;  %v11849_v25 = vld [vmem:[#allocation8 + $0x5f0] ss:$8 sps:$4 sm:$0xff]   ;;  %v8775_v4 = vrot.slane %v15578_v53, %v8774_v46  ;;  %v11863_v53 = vld [vmem:[#allocation8 + $0x714] ss:$8 sps:$4 sm:$0xff]   ;;  %v8851_v46 = vpack.c.bf16 %v15624_v44, %v15624_v44 }
 0xced   : > { %10579 = vmatprep.subr.bf16.mxu0 %v11779_v9  ;;  %v11857_v9 = vld [vmem:[#allocation8 + $0x704] ss:$8 sps:$4 sm:$0xff]   ;;  %v11870_v44 = vld [vmem:[#allocation8 + $0x630] ss:$8 sps:$4 sm:$0xff]  }
 0xcef   : > { %10457 = vmatpush1.bf16.msra.mxu1 %v11774_v16  ;;  %v11854_v16 = vld [vmem:[#allocation8 + $0x604] ss:$8 sps:$4 sm:$0xff]  }
 0xcf0   : > { %10580 = vmatpush1.bf16.msra.mxu0 %v11777_v47  ;;  %10458 = vmatprep.subr.bf16.mxu1 %v11782_v0  ;;  %v11855_v47 = vld [vmem:[#allocation8 + $0x700] ss:$8 sps:$4 sm:$0xff]   ;;  %v8840_v0 = vpack.c.bf16 %v8775_v4, %v8775_v4  ;;  %v11930_v4 = vld [vmem:[#allocation8 + $0x6d0] ss:$8 sps:$4 sm:$0xff]  }
 0xcf1   : > { %10581 = vmatprep.subr.bf16.mxu0 %v11785_v39  ;;  %v11852_v39 = vld [vmem:[#allocation8 + $0x600] ss:$8 sps:$4 sm:$0xff]  }
 0xcf3   : > { %10459 = vmatpush1.bf16.msra.mxu1 %v11780_v48  ;;  %v8846_v48 = vpack.c.bf16 %v15614_v1, %v15614_v1  ;;  %v11866_v1 = vld [vmem:[#allocation8 + $0x624] ss:$8 sps:$4 sm:$0xff]  }
 0xcf4   : > { %10582 = vmatpush1.bf16.msra.mxu0 %v11783_v3  ;;  %10460 = vmatprep.subr.bf16.mxu1 %v11788_v35  ;;  %v11860_v3 = vld [vmem:[#allocation8 + $0x614] ss:$8 sps:$4 sm:$0xff]   ;;  %v11861_v35 = vld [vmem:[#allocation8 + $0x710] ss:$8 sps:$4 sm:$0xff]  }
 0xcf5   : > { %10583 = vmatprep.subr.bf16.mxu0 %v11791_v43  ;;  %v11858_v43 = vld [vmem:[#allocation8 + $0x610] ss:$8 sps:$4 sm:$0xff]  }
 0xcf7   : > { %10461 = vmatpush1.bf16.msra.mxu1 %v11786_v24  ;;  %v11869_v24 = vld [vmem:[#allocation8 + $0x724] ss:$8 sps:$4 sm:$0xff]  }
 0xcf8   : > { %10584 = vmatpush1.bf16.msra.mxu0 %v11789_v13  ;;  %10462 = vmatprep.subr.bf16.mxu1 %v11794_v36  ;;  %v11867_v13 = vld [vmem:[#allocation8 + $0x720] ss:$8 sps:$4 sm:$0xff]   ;;  %v11875_v36 = vld [vmem:[#allocation8 + $0x734] ss:$8 sps:$4 sm:$0xff]  }
 0xcf9   : > { %10585 = vmatprep.subr.bf16.mxu0 %v11797_v11  ;;  %v11872_v11 = vld [vmem:[#allocation8 + $0x634] ss:$8 sps:$4 sm:$0xff]  }
 0xcfb   : > { %10463 = vmatpush1.bf16.msra.mxu1 %v11792_v57  ;;  %v11873_v57 = vld [vmem:[#allocation8 + $0x730] ss:$8 sps:$4 sm:$0xff]  }
 0xcfc   : > { %10586 = vmatpush1.bf16.msra.mxu0 %v11795_v18  ;;  %10464 = vmatprep.subr.bf16.mxu1 %v11800_v41  ;;  %v11881_v18 = vld [vmem:[#allocation8 + $0x744] ss:$8 sps:$4 sm:$0xff]  }
 0xcfd   : > { %10587 = vmatprep.subr.bf16.mxu0 %v11803_v27  ;;  %v11878_v41 = vld [vmem:[#allocation8 + $0x644] ss:$8 sps:$4 sm:$0xff]   ;;  %v11879_v27 = vld [vmem:[#allocation8 + $0x740] ss:$8 sps:$4 sm:$0xff]  }
 0xcff   : > { %10465 = vmatpush1.bf16.msra.mxu1 %v11798_v59  ;;  %v11876_v59 = vld [vmem:[#allocation8 + $0x640] ss:$8 sps:$4 sm:$0xff]  }
 0xd00   : > { %10588 = vmatpush1.bf16.msra.mxu0 %v11801_v28  ;;  %10466 = vmatprep.subr.bf16.mxu1 %v11806_v29  ;;  %v11887_v28 = vld [vmem:[#allocation8 + $0x754] ss:$8 sps:$4 sm:$0xff]  }
 0xd01   : > { %10589 = vmatprep.subr.bf16.mxu0 %v11809_v8  ;;  %v11884_v29 = vld [vmem:[#allocation8 + $0x654] ss:$8 sps:$4 sm:$0xff]   ;;  %v11885_v8 = vld [vmem:[#allocation8 + $0x750] ss:$8 sps:$4 sm:$0xff]  }
 0xd03   : > { %10467 = vmatpush1.bf16.msra.mxu1 %v11804_v22  ;;  %v11882_v22 = vld [vmem:[#allocation8 + $0x650] ss:$8 sps:$4 sm:$0xff]  }
 0xd04   : > { %10590 = vmatpush1.bf16.msra.mxu0 %v11807_v26  ;;  %10468 = vmatprep.subr.bf16.mxu1 %v11812_v33  ;;  %v11893_v26 = vld [vmem:[#allocation8 + $0x764] ss:$8 sps:$4 sm:$0xff]  }
 0xd05   : > { %10591 = vmatprep.subr.bf16.mxu0 %v11815_v40  ;;  %v11890_v33 = vld [vmem:[#allocation8 + $0x664] ss:$8 sps:$4 sm:$0xff]   ;;  %v11891_v40 = vld [vmem:[#allocation8 + $0x760] ss:$8 sps:$4 sm:$0xff]  }
 0xd07   : > { %10469 = vmatpush1.bf16.msra.mxu1 %v11810_v58  ;;  %v11888_v58 = vld [vmem:[#allocation8 + $0x660] ss:$8 sps:$4 sm:$0xff]  }
 0xd08   : > { %10592 = vmatpush1.bf16.msra.mxu0 %v11813_v55  ;;  %10470 = vmatprep.subr.bf16.mxu1 %v11818_v51  ;;  %v11899_v55 = vld [vmem:[#allocation8 + $0x774] ss:$8 sps:$4 sm:$0xff]  }
 0xd09   : > { %10593 = vmatprep.subr.bf16.mxu0 %v11821_v63  ;;  %v11896_v51 = vld [vmem:[#allocation8 + $0x674] ss:$8 sps:$4 sm:$0xff]   ;;  %v11897_v63 = vld [vmem:[#allocation8 + $0x770] ss:$8 sps:$4 sm:$0xff]  }
 0xd0b   : > { %10471 = vmatpush1.bf16.msra.mxu1 %v11816_v31  ;;  %v11894_v31 = vld [vmem:[#allocation8 + $0x670] ss:$8 sps:$4 sm:$0xff]  }
 0xd0c   : > { %10594 = vmatpush1.bf16.msra.mxu0 %v11819_v19  ;;  %10472 = vmatprep.subr.bf16.mxu1 %v11824_v37  ;;  %v11905_v19 = vld [vmem:[#allocation8 + $0x784] ss:$8 sps:$4 sm:$0xff]  }
 0xd0d   : > { %10595 = vmatprep.subr.bf16.mxu0 %v11827_v21  ;;  %v11902_v37 = vld [vmem:[#allocation8 + $0x684] ss:$8 sps:$4 sm:$0xff]   ;;  %v11903_v21 = vld [vmem:[#allocation8 + $0x780] ss:$8 sps:$4 sm:$0xff]  }
 0xd0f   : > { %10473 = vmatpush1.bf16.msra.mxu1 %v11822_v54  ;;  %v11900_v54 = vld [vmem:[#allocation8 + $0x680] ss:$8 sps:$4 sm:$0xff]  }
 0xd10   : > { %10596 = vmatpush1.bf16.msra.mxu0 %v11825_v2  ;;  %10474 = vmatprep.subr.bf16.mxu1 %v11830_v38  ;;  %v11911_v2 = vld [vmem:[#allocation8 + $0x794] ss:$8 sps:$4 sm:$0xff]  }
 0xd11   : > { %10597 = vmatprep.subr.bf16.mxu0 %v11833_v50  ;;  %v11908_v38 = vld [vmem:[#allocation8 + $0x694] ss:$8 sps:$4 sm:$0xff]   ;;  %v11909_v50 = vld [vmem:[#allocation8 + $0x790] ss:$8 sps:$4 sm:$0xff]  }
 0xd13   : > { %10475 = vmatpush1.bf16.msra.mxu1 %v11828_v49  ;;  %v11906_v49 = vld [vmem:[#allocation8 + $0x690] ss:$8 sps:$4 sm:$0xff]  }
 0xd14   : > { %10598 = vmatpush1.bf16.msra.mxu0 %v11831_v20  ;;  %10476 = vmatprep.subr.bf16.mxu1 %v11836_v60  ;;  %v11917_v20 = vld [vmem:[#allocation8 + $0x7a4] ss:$8 sps:$4 sm:$0xff]  }
 0xd15   : > { %10599 = vmatprep.subr.bf16.mxu0 %v11839_v30  ;;  %v11914_v60 = vld [vmem:[#allocation8 + $0x6a4] ss:$8 sps:$4 sm:$0xff]   ;;  %v11915_v30 = vld [vmem:[#allocation8 + $0x7a0] ss:$8 sps:$4 sm:$0xff]  }
 0xd17   : > { %10477 = vmatpush1.bf16.msra.mxu1 %v11834_v5  ;;  %v11912_v5 = vld [vmem:[#allocation8 + $0x6a0] ss:$8 sps:$4 sm:$0xff]  }
 0xd18   : > { %10600 = vmatpush1.bf16.msra.mxu0 %v11837_v42  ;;  %10478 = vmatprep.subr.bf16.mxu1 %v11842_v15  ;;  %v11923_v42 = vld [vmem:[#allocation8 + $0x7b4] ss:$8 sps:$4 sm:$0xff]  }
 0xd19   : > { %10601 = vmatprep.subr.bf16.mxu0 %v11845_v56  ;;  %v11920_v15 = vld [vmem:[#allocation8 + $0x6b4] ss:$8 sps:$4 sm:$0xff]   ;;  %v11921_v56 = vld [vmem:[#allocation8 + $0x7b0] ss:$8 sps:$4 sm:$0xff]  }
 0xd1b   : > { %10479 = vmatpush1.bf16.msra.mxu1 %v11840_v7  ;;  %v11918_v7 = vld [vmem:[#allocation8 + $0x6b0] ss:$8 sps:$4 sm:$0xff]  }
 0xd1c   : > { %10602 = vmatpush1.bf16.msra.mxu0 %v11843_v45  ;;  %10480 = vmatprep.subr.bf16.mxu1 %v11848_v14  ;;  %v11929_v45 = vld [vmem:[#allocation8 + $0x7c4] ss:$8 sps:$4 sm:$0xff]  }
 0xd1d   : > { %10603 = vmatprep.subr.bf16.mxu0 %v11851_v10  ;;  %v11926_v14 = vld [vmem:[#allocation8 + $0x6c4] ss:$8 sps:$4 sm:$0xff]   ;;  %v11927_v10 = vld [vmem:[#allocation8 + $0x7c0] ss:$8 sps:$4 sm:$0xff]  }
 0xd1f   : > { %10481 = vmatpush1.bf16.msra.mxu1 %v11846_v32  ;;  %v11924_v32 = vld [vmem:[#allocation8 + $0x6c0] ss:$8 sps:$4 sm:$0xff]  }
 0xd20   : > { %10604 = vmatpush1.bf16.msra.mxu0 %v11849_v25  ;;  %10655 = vmatprep.subr.bf16.mxu1 %v11857_v9  ;;  %v11932_v25 = vld [vmem:[#allocation8 + $0x6d4] ss:$8 sps:$4 sm:$0xff]   ;;  %v8850_v9 = vpack.c.bf16 %v15629_v61, %v15629_v61 }
 0xd21   : > { %10614 = vmatprep.subr.bf16.mxu0 %v11854_v16  ;;  %v11935_v16 = vld [vmem:[#allocation8 + $0x6e4] ss:$8 sps:$4 sm:$0xff]  }
 0xd22   : > { %10483 = vmatmul.mubr.bf16.vlgmr.msra.gmra.mrb[128].mxu1 %v8840_v0  ;;  %v11938_v0 = vld [vmem:[#allocation8 + $0x6f4] ss:$8 sps:$4 sm:$0xff]  }
 0xd23   : > { %10606 = vmatmul.mubr.bf16.vlgmr.msra.gmra.mrb[136].mxu0 %v8846_v48  ;;  %10656 = vmatpush1.bf16.msra.mxu1 %v11855_v47  ;;  %v11933_v47 = vld [vmem:[#allocation8 + $0x6e0] ss:$8 sps:$4 sm:$0xff]   ;;  %v8848_v48 = vpack.c.bf16 %v15634_v12, %v15634_v12 }
 0xd24   : > { %10615 = vmatpush1.bf16.msra.mxu0 %v11852_v39  ;;  %10646 = vmatprep.mubr.bf16.mxu0 %v8849_v23  ;;  %v11936_v39 = vld [vmem:[#allocation8 + $0x6f0] ss:$8 sps:$4 sm:$0xff]  }
 0xd25   : > { %11231 = vmatprep.mubr.msk.bf16.mxu1 %vm10364_vm0, %v8851_v46  ;;  %10616 = vmatprep.subr.bf16.mxu0 %v11860_v3 }
 0xd26   : > { %10657 = vmatprep.subr.bf16.mxu1 %v11863_v53 }
 0xd27   : > { %10658 = vmatpush1.bf16.msra.mxu1 %v11861_v35 }
 0xd28   : > { %10617 = vmatpush1.bf16.msra.mxu0 %v11858_v43  ;;  %10659 = vmatprep.subr.bf16.mxu1 %v11869_v24 }
 0xd29   : > { %10618 = vmatprep.subr.bf16.mxu0 %v11866_v1  ;;  %v9102_v1 = vld [vmem:[%s15690_s16] sm:$0x3] }
 0xd2b   : > { %10660 = vmatpush1.bf16.msra.mxu1 %v11867_v13  ;;  %v10357_v13 = vrot.slane %v9102_v1, %v15573_v52 }
 0xd2c   : > { %10619 = vmatpush1.bf16.msra.mxu0 %v11864_v17  ;;  %10661 = vmatprep.subr.bf16.mxu1 %v11875_v36  ;;  %v10361_v17 = vrot.slane %v9102_v1, %v15569_v34 }
 0xd2d   : > { %10620 = vmatprep.subr.bf16.mxu0 %v11872_v11 }
 0xd2f   : > { %10662 = vmatpush1.bf16.msra.mxu1 %v11873_v57 }
 0xd30   : > { %10621 = vmatpush1.bf16.msra.mxu0 %v11870_v44  ;;  %10663 = vmatprep.subr.bf16.mxu1 %v11881_v18 }
 0xd31   : > { %10622 = vmatprep.subr.bf16.mxu0 %v11878_v41 }
 0xd33   : > { %10664 = vmatpush1.bf16.msra.mxu1 %v11879_v27 }
 0xd34   : > { %10623 = vmatpush1.bf16.msra.mxu0 %v11876_v59  ;;  %10665 = vmatprep.subr.bf16.mxu1 %v11887_v28 }
 0xd35   : > { %10624 = vmatprep.subr.bf16.mxu0 %v11884_v29 }
 0xd37   : > { %10666 = vmatpush1.bf16.msra.mxu1 %v11885_v8 }
 0xd38   : > { %10625 = vmatpush1.bf16.msra.mxu0 %v11882_v22  ;;  %10667 = vmatprep.subr.bf16.mxu1 %v11893_v26 }
 0xd39   : > { %10626 = vmatprep.subr.bf16.mxu0 %v11890_v33 }
 0xd3b   : > { %10668 = vmatpush1.bf16.msra.mxu1 %v11891_v40 }
 0xd3c   : > { %10627 = vmatpush1.bf16.msra.mxu0 %v11888_v58  ;;  %10669 = vmatprep.subr.bf16.mxu1 %v11899_v55 }
 0xd3d   : > { %10628 = vmatprep.subr.bf16.mxu0 %v11896_v51 }
 0xd3f   : > { %10670 = vmatpush1.bf16.msra.mxu1 %v11897_v63 }
 0xd40   : > { %10629 = vmatpush1.bf16.msra.mxu0 %v11894_v31  ;;  %10671 = vmatprep.subr.bf16.mxu1 %v11905_v19 }
 0xd41   : > { %10630 = vmatprep.subr.bf16.mxu0 %v11902_v37 }
 0xd43   : > { %10672 = vmatpush1.bf16.msra.mxu1 %v11903_v21 }
 0xd44   : > { %10631 = vmatpush1.bf16.msra.mxu0 %v11900_v54  ;;  %10673 = vmatprep.subr.bf16.mxu1 %v11911_v2 }
 0xd45   : > { %10632 = vmatprep.subr.bf16.mxu0 %v11908_v38 }
 0xd47   : > { %10674 = vmatpush1.bf16.msra.mxu1 %v11909_v50 }
 0xd48   : > { %10633 = vmatpush1.bf16.msra.mxu0 %v11906_v49  ;;  %10675 = vmatprep.subr.bf16.mxu1 %v11917_v20 }
 0xd49   : > { %10634 = vmatprep.subr.bf16.mxu0 %v11914_v60 }
 0xd4b   : > { %10676 = vmatpush1.bf16.msra.mxu1 %v11915_v30 }
 0xd4c   : > { %10635 = vmatpush1.bf16.msra.mxu0 %v11912_v5  ;;  %10677 = vmatprep.subr.bf16.mxu1 %v11923_v42 }
 0xd4d   : > { %10636 = vmatprep.subr.bf16.mxu0 %v11920_v15 }
 0xd4f   : > { %10678 = vmatpush1.bf16.msra.mxu1 %v11921_v56 }
 0xd50   : > { %10637 = vmatpush1.bf16.msra.mxu0 %v11918_v7  ;;  %10679 = vmatprep.subr.bf16.mxu1 %v11929_v45 }
 0xd51   : > { %10638 = vmatprep.subr.bf16.mxu0 %v11926_v14 }
 0xd53   : > { %10680 = vmatpush1.bf16.msra.mxu1 %v11927_v10 }
 0xd54   : > { %10639 = vmatpush1.bf16.msra.mxu0 %v11924_v32 }
 0xd55   : > { %10640 = vmatprep.subr.bf16.mxu0 %v11932_v25 }
 0xd56   : > { %10688 = vmatmul.mubr.bf16.vlgmr.msra.gmra.mrb[132].mxu1 %v8850_v9 }
 0xd58   : > { %10641 = vmatpush1.bf16.msra.mxu0 %v11930_v4 }
 0xd59   : > { %10642 = vmatprep.subr.bf16.mxu0 %v11935_v16 }
 0xd5c   : > { %10643 = vmatpush1.bf16.msra.mxu0 %v11933_v47 }
 0xd5d   : > { %10644 = vmatprep.subr.bf16.mxu0 %v11938_v0 }
 0xd60   : > { %10645 = vmatpush1.bf16.msra.mxu0 %v11936_v39 }
 0xd63   : > { %10647 = vmatmul.mubr.bf16.vlgmr.msra.gmra.mrb[136].mxu0 %v8848_v48 }
 0xdf5   : > { %v10484_v3 = vpop.f32.mrb[128].mxu1 }
 0xdf6   : > { %v10486_v23 = vpop.f32.mrb[129].mxu1  ;;  %v11463_v36 = vadd.f32 %v10484_v3, %v10357_v13 }
 0xdf7   : > { %v10488_v53 = vpop.f32.mrb[130].mxu1  ;;  %v11466_v12 = vadd.f32 %v10486_v23, %v10361_v17 }
 0xdf8   : > { %v10489_v46 = vpop.f32.mrb[131].mxu1 }
 0xe29   : > { %v10689_v61 = vpop.f32.mrb[132].mxu1 }
 0xe2a   : > { %v10691_v35 = vpop.f32.mrb[133].mxu1 }
 0xe2b   : > { %v10693_v43 = vpop.f32.mrb[134].mxu1 }
 0xe2c   : > { %v10694_v24 = vpop.f32.mrb[135].mxu1 }
 0xe36   : > { %v10648_v11 = vpop.f32.mrb[136].mxu0 }
 0xe37   : > { %v11464_v57 = vadd.f32 %v11463_v36, %v10648_v11  ;;  %v10650_v44 = vpop.f32.mrb[137].mxu0 }
 0xe38   : > { %v11467_v18 = vadd.f32 %v11466_v12, %v10650_v44  ;;  %v10652_v41 = vpop.f32.mrb[138].mxu0 }
 0xe39   : > { %v11465_v27 = vadd.f32 %v11464_v57, %v10689_v61  ;;  %v10653_v59 = vpop.f32.mrb[139].mxu0 }
 0xe3a   : > { %v11468_v28 = vadd.f32 %v11467_v18, %v10691_v35 }
 0xe3c   : > { %v10698_v29 = vcombine.low %v11465_v27, %v11468_v28 }
 0xe3e   : > { %v10705_v8 = vrot.slane %v10698_v29, %v15504_v6 }
 0xe40   : > { %v10712_v34 = vrot.slane %v10705_v8, %v15504_v6 }
 0xe42   : > { %10718 = vst.msk [vmem:[%s561_s18] sm:$0x3] %vm10716_vm13, %v10712_v34 }
 0xe43 PF: > { %s28_s24 = sadd.s32 1, %s11980_s24  }
 0xe44   : > { %p25_p3 = scmp.ge.s32.totalorder %s28_s24, 4  }
 0xe46   :  { %27 = sbr.rel (!%p25_p3) target bundleno = 9 (0x9), region = 161 }
 0xe4d   :  { %10738 = vsyncpa [#allocation9], 1 }
 0xe4e   :  { %10740 = vsyncpa [#allocation9 + $0x1], 1 }

</bundles_post_ra>
